<compile_context>
chip_gen: v7x
topology: tpu7x:2x2x1
jax: 0.10.0
libtpu: 0.0.40
codegen_flags: <defaults>
</compile_context>

<pallas_src>
import jax
import jax.numpy as jnp
from jax.experimental import pallas as pl
from jax.experimental.pallas import tpu as pltpu


def _round_up(x, m):
    return ((x + m - 1) // m) * m


# --------------------------- tiled matmul + bias ----------------------------

def _matmul_bias_kernel(x_ref, w_ref, b_ref, o_ref, acc_ref):
    """o = x @ w + b, accumulated over the K grid axis in an f32 VMEM scratch."""
    @pl.when(pl.program_id(2) == 0)
    def _init():
        acc_ref[...] = jnp.zeros_like(acc_ref)

    # Cast the LHS tile to the weight dtype (bf16) in-kernel: the f32 hidden
    # states never need a separate cast pass in HBM.
    acc_ref[...] += jnp.dot(x_ref[...].astype(w_ref.dtype), w_ref[...],
                            preferred_element_type=jnp.float32)

    @pl.when(pl.program_id(2) == pl.num_programs(2) - 1)
    def _finish():
        o_ref[...] = (acc_ref[...] + b_ref[...].astype(jnp.float32)
                      ).astype(o_ref.dtype)


def matmul_bias_pallas(x, w, b, *, out_dtype=jnp.float32,
                       tm=256, tn=256, tk=256):
    """Tiled (M,K)@(K,N)+b.  Pads to tile multiples, slices the result back.

    tm defaults to 256 to fill the 256-wide MXU on v6e/v7x; the min() clamp
    keeps v5e-native 128-row tiles automatic for small M.
    """
    M, K = x.shape
    K2, N = w.shape
    assert K == K2
    tm = min(tm, _round_up(M, 16))
    tn = min(tn, _round_up(N, 128))
    tk = min(tk, _round_up(K, 128))
    Mp, Kp, Np = _round_up(M, tm), _round_up(K, tk), _round_up(N, tn)

    if (Mp, Kp) != (M, K):
        x = jnp.pad(x, ((0, Mp - M), (0, Kp - K)))
    if (Kp, Np) != (K, N):
        w = jnp.pad(w, ((0, Kp - K), (0, Np - N)))
    b2 = b.reshape(1, -1)
    if Np != N:
        b2 = jnp.pad(b2, ((0, 0), (0, Np - N)))

    out = pl.pallas_call(
        _matmul_bias_kernel,
        out_shape=jax.ShapeDtypeStruct((Mp, Np), out_dtype),
        grid_spec=pltpu.PrefetchScalarGridSpec(
            num_scalar_prefetch=0,
            grid=(Mp // tm, Np // tn, Kp // tk),
            in_specs=[
                pl.BlockSpec((tm, tk), lambda i, j, k: (i, k)),
                pl.BlockSpec((tk, tn), lambda i, j, k: (k, j)),
                pl.BlockSpec((1, tn), lambda i, j, k: (0, j)),
            ],
            out_specs=pl.BlockSpec((tm, tn), lambda i, j, k: (i, j)),
            scratch_shapes=[pltpu.VMEM((tm, tn), jnp.float32)],
        ),
        compiler_params=pltpu.CompilerParams(
            dimension_semantics=("parallel", "parallel", "arbitrary"),
            # 32 MiB is plenty for 256^2 tiles and stays inside the v7x
            # (64 MiB physical) budget without re-derivation.
            vmem_limit_bytes=32 * 1024 * 1024),
    )(x, w, b2)
    if (Mp, Np) != (M, N):
        out = out[:M, :N]
    return out


# -------------------- fused LSTM recurrence (x-proj fused) ------------------

def lstm_forward_pallas(x_tbe, w_ih, w_hh, bias_row, h0, c0, *,
                        max_time_chunk=16, batch_block=None,
                        vmem_limit_bytes=32 * 1024 * 1024):
    """Fused LSTM over a whole sequence.

    x_tbe   : (T, B, E) bf16   time-major embeddings (only HBM activation in)
    w_ih    : (E, 4H)   bf16   gate order (i, f, o, g)
    w_hh    : (H, 4H)   bf16   gate order (i, f, o, g)
    bias_row: (1, 4H)   f32    gate order (i, f, o, g)
    h0, c0  : (B, H)    f32

    Returns hidden_seq (B, T, H) f32 (batch-major: reshape to (B*T, H) is
    free) and the final (h_T, c_T) in f32.
    """
    T, B, E = x_tbe.shape
    H = w_hh.shape[0]
    assert w_ih.shape == (E, 4 * H) and w_hh.shape == (H, 4 * H)
    assert bias_row.shape == (1, 4 * H)

    # Time chunk: multiple of 8 (seq block (TC, H) layout rule), padded T.
    TC = max(8, (max_time_chunk // 8) * 8)
    TC = min(TC, _round_up(T, 8))
    Tp = _round_up(T, TC)
    rem = T % TC                 # 0 -> no masked tail in the last chunk
    num_chunks = Tp // TC

    # Batch block: >= 2 blocks for B >= 16 so the "parallel" batch axis can
    # shard across v7x's 2 TensorCores; otherwise one full-batch block (max
    # MXU row fill on 1-TC chips).
    if (batch_block is not None and B % batch_block == 0
            and (batch_block % 8 == 0 or batch_block == B)):
        BB = batch_block
    elif B >= 16 and B % 16 == 0:
        BB = B // 2
    elif B >= 16 and B % 8 == 0:
        BB = 8
    else:
        BB = B

    if Tp != T:
        x_tbe = jnp.pad(x_tbe, ((0, Tp - T), (0, 0), (0, 0)))

    def kernel(x_ref, wih_ref, whh_ref, b_ref, h0_ref, c0_ref,
               seq_ref, hT_ref, cT_ref, h_scr, c_scr):
        # x_ref : (TC, BB, E) bf16      seq_ref: (BB, TC, H) f32 (batch-major)
        # w*_ref: full weights, VMEM-resident across the grid
        # h/c scratch carry the recurrent state across time chunks.
        t_chunk = pl.program_id(1)

        @pl.when(t_chunk == 0)
        def _init_state():
            h_scr[...] = h0_ref[...]
            c_scr[...] = c0_ref[...]

        w_ih_v = wih_ref[...]
        w_hh_v = whh_ref[...]
        bias_b = jnp.broadcast_to(b_ref[...], (BB, 4 * H))   # hoisted once
        h = h_scr[...]
        c = c_scr[...]
        # Only the last chunk may contain padded (masked) steps.
        keep = t_chunk < (num_chunks - 1)

        # Fully unrolled chunk: h/c live in vregs, static slice/store indices.
        # NOTE: if BB/TC are raised a lot, re-check vreg pressure (spills).
        for tt in range(TC):
            x_t = x_ref[tt]                                  # (BB, E) bf16
            # Input projection fused here (no gates_x HBM round trip); the
            # x-side dot does not depend on h, so it sits off the serial
            # critical path and overlaps the h @ W_hh chain.
            gates = (jnp.dot(x_t, w_ih_v, preferred_element_type=jnp.float32)
                     + jnp.dot(h.astype(w_hh_v.dtype), w_hh_v,
                               preferred_element_type=jnp.float32)
                     + bias_b)
            sig = jax.nn.sigmoid(gates[:, :3 * H])           # i, f, o in one pass
            i_t = sig[:, 0:H]
            f_t = sig[:, H:2 * H]
            o_t = sig[:, 2 * H:3 * H]
            g_t = jnp.tanh(gates[:, 3 * H:])
            c_new = f_t * c + i_t * g_t
            h_new = o_t * jnp.tanh(c_new)
            if rem and tt >= rem:
                # Static tail position: only real padding in the last chunk;
                # freeze h/c there so h_T/c_T are the step-(T-1) state.
                h = jnp.where(keep, h_new, h)
                c = jnp.where(keep, c_new, c)
            else:
                h, c = h_new, c_new
            # Batch-major hidden output: kills the HBM transpose pass.
            seq_ref[:, tt, :] = h

        h_scr[...] = h
        c_scr[...] = c
        hT_ref[...] = h
        cT_ref[...] = c

    out_shapes = (
        jax.ShapeDtypeStruct((B, Tp, H), jnp.float32),   # hidden_seq, batch-major
        jax.ShapeDtypeStruct((B, H), jnp.float32),       # h_T
        jax.ShapeDtypeStruct((B, H), jnp.float32),       # c_T
    )
    seq, h_T, c_T = pl.pallas_call(
        kernel,
        out_shape=out_shapes,
        grid_spec=pltpu.PrefetchScalarGridSpec(
            num_scalar_prefetch=0,
            grid=(B // BB, num_chunks),        # (batch blocks, time chunks)
            in_specs=[
                pl.BlockSpec((TC, BB, E), lambda b, t: (t, b, 0)),
                pl.BlockSpec((E, 4 * H), lambda b, t: (0, 0)),
                pl.BlockSpec((H, 4 * H), lambda b, t: (0, 0)),
                pl.BlockSpec((1, 4 * H), lambda b, t: (0, 0)),
                pl.BlockSpec((BB, H), lambda b, t: (b, 0)),
                pl.BlockSpec((BB, H), lambda b, t: (b, 0)),
            ],
            out_specs=[
                pl.BlockSpec((BB, TC, H), lambda b, t: (b, t, 0)),
                pl.BlockSpec((BB, H), lambda b, t: (b, 0)),
                pl.BlockSpec((BB, H), lambda b, t: (b, 0)),
            ],
            scratch_shapes=[pltpu.VMEM((BB, H), jnp.float32),
                            pltpu.VMEM((BB, H), jnp.float32)],
        ),
        compiler_params=pltpu.CompilerParams(
            # Batch blocks are independent (v7x megacore); the time axis
            # carries the recurrent state and must stay sequential.
            dimension_semantics=("parallel", "arbitrary"),
            vmem_limit_bytes=vmem_limit_bytes),
    )(x_tbe, w_ih, w_hh, bias_row, h0, c0)

    if Tp != T:
        seq = seq[:, :T, :]
    return seq, h_T, c_T


# ------------------------------- model glue ---------------------------------

def init_params(key, vocab_size, embedding_dim, hidden_dim):
    """f32 master parameters (PyTorch-equivalent layout, W1 pre-transposed).

    Gate order of w_ih / w_hh / bias columns is the PyTorch order i, f, g, o.
    """
    k_emb, k_ih, k_hh, k_w1, k_b1 = jax.random.split(key, 5)

    def xavier_uniform(k, shape):
        fan_in, fan_out = shape
        limit = (6.0 / (fan_in + fan_out)) ** 0.5
        return jax.random.uniform(k, shape, jnp.float32, -limit, limit)

    bound = 1.0 / (hidden_dim ** 0.5)
    return {
        'embedding': jax.random.normal(k_emb, (vocab_size, embedding_dim),
                                       jnp.float32),
        'w_ih': xavier_uniform(k_ih, (embedding_dim, 4 * hidden_dim)),
        'w_hh': xavier_uniform(k_hh, (hidden_dim, 4 * hidden_dim)),
        'bias': jnp.zeros((4 * hidden_dim,), jnp.float32),
        # nn.Linear(hidden_dim, vocab_size): stored pre-transposed as (H, V).
        'w1_t': xavier_uniform(k_w1, (hidden_dim, vocab_size)),
        'b1': jax.random.uniform(k_b1, (vocab_size,), jnp.float32,
                                 -bound, bound),
    }


def prepare_fast_params(params):
    """One-time host-side prep for the kernels:

      * MXU-feeding weights cast to bf16 (f32 accumulation in-kernel).
      * LSTM gate columns permuted (i, f, g, o) -> (i, f, o, g) consistently
        across w_ih, w_hh and bias, so the kernel applies one wide sigmoid
        over the first 3H gate columns and one tanh over the last H.
      * bias reshaped to a (1, 4H) row for a lane-dense VMEM block.
    """
    def permute_gates(w):
        i, f, g, o = jnp.split(w, 4, axis=-1)
        return jnp.concatenate([i, f, o, g], axis=-1)

    return {
        'embedding': params['embedding'].astype(jnp.bfloat16),
        'w_ih': permute_gates(params['w_ih']).astype(jnp.bfloat16),
        'w_hh': permute_gates(params['w_hh']).astype(jnp.bfloat16),
        'bias': permute_gates(params['bias']).astype(jnp.float32).reshape(1, -1),
        'w1_t': params['w1_t'].astype(jnp.bfloat16),
        'b1': params['b1'].astype(jnp.float32),
    }


def poetry_model_forward(fast_params, input_data, hidden=None):
    """input_data: (batch, seq) int32 token ids.

    Returns {'output': (seq*batch, vocab) f32 logits, 'hidden': (h_T, c_T)},
    matching PoetryModel.forward (logit rows ordered b-major, i.e. b*T + t).
    """
    B, T = input_data.shape
    H = fast_params['w_hh'].shape[0]
    if hidden is None:
        h0 = jnp.zeros((B, H), jnp.float32)
        c0 = jnp.zeros((B, H), jnp.float32)
    else:
        h0 = jnp.asarray(hidden[0], jnp.float32)
        c0 = jnp.asarray(hidden[1], jnp.float32)

    # TODO(synk): the embedding lookup (gather) stays in plain JAX glue; a
    # scalar-prefetch pl.Element gather kernel is possible but not worth it.
    # Gather straight from the bf16 table into time-major layout.
    x_tbe = jnp.take(fast_params['embedding'], input_data.T, axis=0)  # (T,B,E)

    # Fused recurrence: input projection inside the kernel, batch-major
    # hidden_seq out (no gates_x round trip, no transpose pass).
    seq_bth, h_T, c_T = lstm_forward_pallas(
        x_tbe, fast_params['w_ih'], fast_params['w_hh'], fast_params['bias'],
        h0, c0)

    flat = seq_bth.reshape(B * T, H)                 # free reshape (b-major)
    logits = matmul_bias_pallas(flat, fast_params['w1_t'], fast_params['b1'],
                                out_dtype=jnp.float32)   # (B*T, V)
    return {'output': logits, 'hidden': (h_T, c_T)}


# Pure-JAX reference (mirrors the PyTorch code; original i,f,g,o gate order).
# matmul_dtype lets us build both a faithful f32 reference and a bf16-matmul
# reference (same quantization as the kernels) for a tight structural check —
# which also cross-checks the gate-column permutation in prepare_fast_params.
def reference_forward(params, input_data, matmul_dtype=jnp.float32):
    B, T = input_data.shape
    H = params['w_hh'].shape[0]

    def mm(a, b):
        return jnp.dot(a.astype(matmul_dtype), b.astype(matmul_dtype),
                       preferred_element_type=jnp.float32)

    h = jnp.zeros((B, H), jnp.float32)
    c = jnp.zeros((B, H), jnp.float32)
    embeds = jnp.take(params['embedding'], input_data, axis=0)   # (B, T, E)
    hs = []
    for t in range(T):
        x_t = embeds[:, t, :]
        gates = mm(x_t, params['w_ih']) + mm(h, params['w_hh']) + params['bias']
        i_t = jax.nn.sigmoid(gates[:, :H])
        f_t = jax.nn.sigmoid(gates[:, H:2 * H])
        g_t = jnp.tanh(gates[:, 2 * H:3 * H])
        o_t = jax.nn.sigmoid(gates[:, 3 * H:])
        c = f_t * c + i_t * g_t
        h = o_t * jnp.tanh(c)
        hs.append(h)
    hidden_seq = jnp.stack(hs, axis=1)                           # (B, T, H)
    flat = hidden_seq.reshape(B * T, H)
    logits = mm(flat, params['w1_t']) + params['b1']
    return {'output': logits, 'hidden': (h, c)}


if __name__ == "__main__":
    # Hardware-aligned small demo: B multiple of 8, E/H multiples of 128.
    # seq=24 deliberately does NOT divide the 16-step time chunk, so the
    # padded/masked tail path and the multi-chunk state carry are exercised.
    vocab_size, embedding_dim, hidden_dim = 256, 128, 128
    batch, seq = 8, 24

    key = jax.random.PRNGKey(0)
    k_params, k_tokens = jax.random.split(key)
    params = init_params(k_params, vocab_size, embedding_dim, hidden_dim)
    fast_params = prepare_fast_params(params)
    input_data = jax.random.randint(k_tokens, (batch, seq), 0, vocab_size,
                                    dtype=jnp.int32)

    fwd = jax.jit(poetry_model_forward)
    out = fwd(fast_params, input_data)
    jax.block_until_ready(out)

    assert out['output'].shape == (seq * batch, vocab_size)
    assert out['hidden'][0].shape == (batch, hidden_dim)
    assert out['hidden'][1].shape == (batch, hidden_dim)

    # Tight check against a reference with the same bf16-matmul quantization
    # (also verifies the gate permutation and the masked time tail).
    ref_bf = reference_forward(params, input_data, matmul_dtype=jnp.bfloat16)
    assert jnp.allclose(out['output'], ref_bf['output'], rtol=1e-2, atol=1e-2)
    assert jnp.allclose(out['hidden'][0], ref_bf['hidden'][0], rtol=1e-2, atol=1e-2)
    assert jnp.allclose(out['hidden'][1], ref_bf['hidden'][1], rtol=1e-2, atol=1e-2)

    # Loose check against the faithful full-f32 reference (bf16 weight quant
    # is the only expected gap).
    ref_f32 = reference_forward(params, input_data, matmul_dtype=jnp.float32)
    assert jnp.allclose(out['output'], ref_f32['output'], rtol=1e-1, atol=1e-1)
    assert jnp.allclose(out['hidden'][0], ref_f32['hidden'][0], rtol=1e-1, atol=1e-1)
    assert jnp.allclose(out['hidden'][1], ref_f32['hidden'][1], rtol=1e-1, atol=1e-1)

    print("KERNEL_OK")
</pallas_src>

<mosaic_0001>
module attributes {stable_mosaic.version = 11 : i64} {
  func.func @_matmul_bias_kernel(%arg0: i32, %arg1: i32, %arg2: i32, %arg3: memref<192x128xf32, #tpu.memory_space<vmem>>, %arg4: memref<128x256xbf16, #tpu.memory_space<vmem>>, %arg5: memref<1x256xf32, #tpu.memory_space<vmem>>, %arg6: memref<192x256xf32, #tpu.memory_space<vmem>>, %arg7: memref<192x256xf32, #tpu.memory_space<vmem>>) attributes {dimension_semantics = [#tpu.dimension_semantics<parallel>, #tpu.dimension_semantics<parallel>, #tpu.dimension_semantics<arbitrary>], iteration_bounds = array<i64: 1, 1, 1>, scalar_prefetch = 0 : i64, scratch_operands = 1 : i64, tpu.core_type = #tpu.core_type<tc>, window_params = [{transform_indices = @transform_0, window_bounds = array<i64: 192, 128>}, {transform_indices = @transform_1, window_bounds = array<i64: 128, 256>}, {transform_indices = @transform_2, window_bounds = array<i64: 1, 256>}, {transform_indices = @transform_3, window_bounds = array<i64: 192, 256>}]} {
    %c0_i32 = arith.constant 0 : i32
    %0 = arith.cmpi eq, %arg2, %c0_i32 : i32
    %1 = arith.extui %0 : i1 to i32
    %c0_i32_0 = arith.constant 0 : i32
    %2 = arith.cmpi ne, %1, %c0_i32_0 : i32
    scf.if %2 {
      %cst_10 = arith.constant 0.000000e+00 : f32
      %13 = vector.broadcast %cst_10 : f32 to vector<192x256xf32>
      %c0_11 = arith.constant 0 : index
      %c0_12 = arith.constant 0 : index
      %14 = vector.load %arg7[%c0_11, %c0_12] : memref<192x256xf32, #tpu.memory_space<vmem>>, vector<192x256xf32>
      tpu.vector_store %arg7[%c0_11, %c0_12], %13 {strides = array<i32>} : memref<192x256xf32, #tpu.memory_space<vmem>>, vector<192x256xf32>,
    } else {
    }
    %c0 = arith.constant 0 : index
    %c0_1 = arith.constant 0 : index
    %3 = vector.load %arg7[%c0, %c0_1] : memref<192x256xf32, #tpu.memory_space<vmem>>, vector<192x256xf32>
    %c0_2 = arith.constant 0 : index
    %c0_3 = arith.constant 0 : index
    %4 = vector.load %arg3[%c0_2, %c0_3] : memref<192x128xf32, #tpu.memory_space<vmem>>, vector<192x128xf32>
    %5 = arith.truncf %4 : vector<192x128xf32> to vector<192x128xbf16>
    %c0_4 = arith.constant 0 : index
    %c0_5 = arith.constant 0 : index
    %6 = vector.load %arg4[%c0_4, %c0_5] : memref<128x256xbf16, #tpu.memory_space<vmem>>, vector<128x256xbf16>
    %cst = arith.constant dense<0.000000e+00> : vector<192x256xf32>
    %7 = tpu.matmul %5, %6, %cst {dimension_numbers = #tpu.dot_dimension_numbers<[1], [0], [0], [1], [0, 0, 1, 1], [], []>} : vector<192x128xbf16>, vector<128x256xbf16>, vector<192x256xf32> -> vector<192x256xf32>
    %8 = arith.addf %3, %7 : vector<192x256xf32>
    %c0_6 = arith.constant 0 : index
    %c0_7 = arith.constant 0 : index
    %9 = vector.load %arg7[%c0_6, %c0_7] : memref<192x256xf32, #tpu.memory_space<vmem>>, vector<192x256xf32>
    tpu.vector_store %arg7[%c0_6, %c0_7], %8 {strides = array<i32>} : memref<192x256xf32, #tpu.memory_space<vmem>>, vector<192x256xf32>,
    %c0_i32_8 = arith.constant 0 : i32
    %10 = arith.cmpi eq, %arg2, %c0_i32_8 : i32
    %11 = arith.extui %10 : i1 to i32
    %c0_i32_9 = arith.constant 0 : i32
    %12 = arith.cmpi ne, %11, %c0_i32_9 : i32
    scf.if %12 {
      %c0_10 = arith.constant 0 : index
      %c0_11 = arith.constant 0 : index
      %13 = vector.load %arg7[%c0_10, %c0_11] : memref<192x256xf32, #tpu.memory_space<vmem>>, vector<192x256xf32>
      %c0_12 = arith.constant 0 : index
      %c0_13 = arith.constant 0 : index
      %14 = vector.load %arg5[%c0_12, %c0_13] : memref<1x256xf32, #tpu.memory_space<vmem>>, vector<1x256xf32>
      %15 = vector.broadcast %14 : vector<1x256xf32> to vector<192x256xf32>
      %16 = arith.addf %13, %15 : vector<192x256xf32>
      %c0_14 = arith.constant 0 : index
      %c0_15 = arith.constant 0 : index
      %17 = vector.load %arg6[%c0_14, %c0_15] : memref<192x256xf32, #tpu.memory_space<vmem>>, vector<192x256xf32>
      tpu.vector_store %arg6[%c0_14, %c0_15], %16 {strides = array<i32>} : memref<192x256xf32, #tpu.memory_space<vmem>>, vector<192x256xf32>,
    } else {
    }
    return
  }
  func.func @transform_0(%arg0: i32, %arg1: i32, %arg2: i32) -> (i32, i32) {
    %c0_i32 = arith.constant 0 : i32
    return %arg0, %arg2 : i32, i32
  }
  func.func @transform_1(%arg0: i32, %arg1: i32, %arg2: i32) -> (i32, i32) {
    %c0_i32 = arith.constant 0 : i32
    return %arg2, %arg1 : i32, i32
  }
  func.func @transform_2(%arg0: i32, %arg1: i32, %arg2: i32) -> (i32, i32) {
    %c0_i32 = arith.constant 0 : i32
    %c0_i32_0 = arith.constant 0 : i32
    return %c0_i32, %arg1 : i32, i32
  }
  func.func @transform_3(%arg0: i32, %arg1: i32, %arg2: i32) -> (i32, i32) {
    %c0_i32 = arith.constant 0 : i32
    return %arg0, %arg1 : i32, i32
  }
}

module attributes {stable_mosaic.version = 11 : i64} {
  func.func @kernel(%arg0: i32, %arg1: i32, %arg2: memref<16x8x128xbf16, #tpu.memory_space<vmem>>, %arg3: memref<128x512xbf16, #tpu.memory_space<vmem>>, %arg4: memref<128x512xbf16, #tpu.memory_space<vmem>>, %arg5: memref<1x512xf32, #tpu.memory_space<vmem>>, %arg6: memref<8x128xf32, #tpu.memory_space<vmem>>, %arg7: memref<8x128xf32, #tpu.memory_space<vmem>>, %arg8: memref<8x16x128xf32, #tpu.memory_space<vmem>>, %arg9: memref<8x128xf32, #tpu.memory_space<vmem>>, %arg10: memref<8x128xf32, #tpu.memory_space<vmem>>, %arg11: memref<8x128xf32, #tpu.memory_space<vmem>>, %arg12: memref<8x128xf32, #tpu.memory_space<vmem>>) attributes {dimension_semantics = [#tpu.dimension_semantics<parallel>, #tpu.dimension_semantics<arbitrary>], iteration_bounds = array<i64: 1, 2>, scalar_prefetch = 0 : i64, scratch_operands = 2 : i64, tpu.core_type = #tpu.core_type<tc>, window_params = [{transform_indices = @transform_0, window_bounds = array<i64: 16, 8, 128>}, {pipeline_mode = #tpu.pipeline_mode<synchronous>, transform_indices = @transform_1, window_bounds = array<i64: 128, 512>}, {pipeline_mode = #tpu.pipeline_mode<synchronous>, transform_indices = @transform_2, window_bounds = array<i64: 128, 512>}, {pipeline_mode = #tpu.pipeline_mode<synchronous>, transform_indices = @transform_3, window_bounds = array<i64: 1, 512>}, {transform_indices = @transform_4, window_bounds = array<i64: 8, 128>}, {transform_indices = @transform_5, window_bounds = array<i64: 8, 128>}, {transform_indices = @transform_6, window_bounds = array<i64: 8, 16, 128>}, {transform_indices = @transform_7, window_bounds = array<i64: 8, 128>}, {transform_indices = @transform_8, window_bounds = array<i64: 8, 128>}]} {
    %c0_i32 = arith.constant 0 : i32
    %0 = arith.cmpi eq, %arg1, %c0_i32 : i32
    %1 = arith.extui %0 : i1 to i32
    %c0_i32_0 = arith.constant 0 : i32
    %2 = arith.cmpi ne, %1, %c0_i32_0 : i32
    scf.if %2 {
      %c0_146 = arith.constant 0 : index
      %c0_147 = arith.constant 0 : index
      %447 = vector.load %arg6[%c0_146, %c0_147] : memref<8x128xf32, #tpu.memory_space<vmem>>, vector<8x128xf32>
      %c0_148 = arith.constant 0 : index
      %c0_149 = arith.constant 0 : index
      %448 = vector.load %arg11[%c0_148, %c0_149] : memref<8x128xf32, #tpu.memory_space<vmem>>, vector<8x128xf32>
      tpu.vector_store %arg11[%c0_148, %c0_149], %447 {strides = array<i32>} : memref<8x128xf32, #tpu.memory_space<vmem>>, vector<8x128xf32>,
      %c0_150 = arith.constant 0 : index
      %c0_151 = arith.constant 0 : index
      %449 = vector.load %arg7[%c0_150, %c0_151] : memref<8x128xf32, #tpu.memory_space<vmem>>, vector<8x128xf32>
      %c0_152 = arith.constant 0 : index
      %c0_153 = arith.constant 0 : index
      %450 = vector.load %arg12[%c0_152, %c0_153] : memref<8x128xf32, #tpu.memory_space<vmem>>, vector<8x128xf32>
      tpu.vector_store %arg12[%c0_152, %c0_153], %449 {strides = array<i32>} : memref<8x128xf32, #tpu.memory_space<vmem>>, vector<8x128xf32>,
    } else {
    }
    %c0 = arith.constant 0 : index
    %c0_1 = arith.constant 0 : index
    %3 = vector.load %arg3[%c0, %c0_1] : memref<128x512xbf16, #tpu.memory_space<vmem>>, vector<128x512xbf16>
    %c0_2 = arith.constant 0 : index
    %c0_3 = arith.constant 0 : index
    %4 = vector.load %arg4[%c0_2, %c0_3] : memref<128x512xbf16, #tpu.memory_space<vmem>>, vector<128x512xbf16>
    %c0_4 = arith.constant 0 : index
    %c0_5 = arith.constant 0 : index
    %5 = vector.load %arg5[%c0_4, %c0_5] : memref<1x512xf32, #tpu.memory_space<vmem>>, vector<1x512xf32>
    %6 = vector.shape_cast %5 : vector<1x512xf32> to vector<1x512xf32>
    %7 = vector.broadcast %6 : vector<1x512xf32> to vector<8x512xf32>
    %c0_6 = arith.constant 0 : index
    %c0_7 = arith.constant 0 : index
    %8 = vector.load %arg11[%c0_6, %c0_7] : memref<8x128xf32, #tpu.memory_space<vmem>>, vector<8x128xf32>
    %c0_8 = arith.constant 0 : index
    %c0_9 = arith.constant 0 : index
    %9 = vector.load %arg12[%c0_8, %c0_9] : memref<8x128xf32, #tpu.memory_space<vmem>>, vector<8x128xf32>
    %c1_i32 = arith.constant 1 : i32
    %10 = arith.cmpi slt, %arg1, %c1_i32 : i32
    %c0_10 = arith.constant 0 : index
    %c0_11 = arith.constant 0 : index
    %c0_12 = arith.constant 0 : index
    %11 = vector.load %arg2[%c0_10, %c0_11, %c0_12] : memref<16x8x128xbf16, #tpu.memory_space<vmem>>, vector<1x8x128xbf16>
    %12 = vector.shape_cast %11 : vector<1x8x128xbf16> to vector<8x128xbf16>
    %cst = arith.constant dense<0.000000e+00> : vector<8x512xf32>
    %13 = tpu.matmul %12, %3, %cst {dimension_numbers = #tpu.dot_dimension_numbers<[1], [0], [0], [1], [0, 0, 1, 1], [], []>} : vector<8x128xbf16>, vector<128x512xbf16>, vector<8x512xf32> -> vector<8x512xf32>
    %14 = arith.truncf %8 : vector<8x128xf32> to vector<8x128xbf16>
    %cst_13 = arith.constant dense<0.000000e+00> : vector<8x512xf32>
    %15 = tpu.matmul %14, %4, %cst_13 {dimension_numbers = #tpu.dot_dimension_numbers<[1], [0], [0], [1], [0, 0, 1, 1], [], []>} : vector<8x128xbf16>, vector<128x512xbf16>, vector<8x512xf32> -> vector<8x512xf32>
    %16 = arith.addf %13, %15 : vector<8x512xf32>
    %17 = arith.addf %16, %7 : vector<8x512xf32>
    %18 = vector.extract_strided_slice %17 {offsets = [0, 0], sizes = [8, 384], strides = [1, 1]} : vector<8x512xf32> to vector<8x384xf32>
    %19 = arith.negf %18 : vector<8x384xf32>
    %20 = math.exp %19 : vector<8x384xf32>
    %cst_14 = arith.constant 1.000000e+00 : f32
    %21 = vector.broadcast %cst_14 : f32 to vector<8x384xf32>
    %22 = arith.addf %21, %20 : vector<8x384xf32>
    %23 = arith.divf %21, %22 : vector<8x384xf32>
    %24 = vector.extract_strided_slice %23 {offsets = [0, 0], sizes = [8, 128], strides = [1, 1]} : vector<8x384xf32> to vector<8x128xf32>
    %25 = vector.extract_strided_slice %23 {offsets = [0, 128], sizes = [8, 128], strides = [1, 1]} : vector<8x384xf32> to vector<8x128xf32>
    %26 = vector.extract_strided_slice %23 {offsets = [0, 256], sizes = [8, 128], strides = [1, 1]} : vector<8x384xf32> to vector<8x128xf32>
    %27 = vector.extract_strided_slice %17 {offsets = [0, 384], sizes = [8, 128], strides = [1, 1]} : vector<8x512xf32> to vector<8x128xf32>
    %28 = math.tanh %27 : vector<8x128xf32>
    %29 = arith.mulf %25, %9 : vector<8x128xf32>
    %30 = arith.mulf %24, %28 : vector<8x128xf32>
    %31 = arith.addf %29, %30 : vector<8x128xf32>
    %32 = math.tanh %31 : vector<8x128xf32>
    %33 = arith.mulf %26, %32 : vector<8x128xf32>
    %c0_15 = arith.constant 0 : index
    %c0_16 = arith.constant 0 : index
    %c0_17 = arith.constant 0 : index
    %34 = vector.load %arg8[%c0_15, %c0_16, %c0_17] : memref<8x16x128xf32, #tpu.memory_space<vmem>>, vector<8x1x128xf32>
    %35 = vector.shape_cast %34 : vector<8x1x128xf32> to vector<8x128xf32>
    %36 = vector.shape_cast %33 : vector<8x128xf32> to vector<8x1x128xf32>
    tpu.vector_store %arg8[%c0_15, %c0_16, %c0_17], %36 {strides = array<i32>} : memref<8x16x128xf32, #tpu.memory_space<vmem>>, vector<8x1x128xf32>,
    %c1 = arith.constant 1 : index
    %c0_18 = arith.constant 0 : index
    %c0_19 = arith.constant 0 : index
    %37 = vector.load %arg2[%c1, %c0_18, %c0_19] : memref<16x8x128xbf16, #tpu.memory_space<vmem>>, vector<1x8x128xbf16>
    %38 = vector.shape_cast %37 : vector<1x8x128xbf16> to vector<8x128xbf16>
    %cst_20 = arith.constant dense<0.000000e+00> : vector<8x512xf32>
    %39 = tpu.matmul %38, %3, %cst_20 {dimension_numbers = #tpu.dot_dimension_numbers<[1], [0], [0], [1], [0, 0, 1, 1], [], []>} : vector<8x128xbf16>, vector<128x512xbf16>, vector<8x512xf32> -> vector<8x512xf32>
    %40 = arith.truncf %33 : vector<8x128xf32> to vector<8x128xbf16>
    %cst_21 = arith.constant dense<0.000000e+00> : vector<8x512xf32>
    %41 = tpu.matmul %40, %4, %cst_21 {dimension_numbers = #tpu.dot_dimension_numbers<[1], [0], [0], [1], [0, 0, 1, 1], [], []>} : vector<8x128xbf16>, vector<128x512xbf16>, vector<8x512xf32> -> vector<8x512xf32>
    %42 = arith.addf %39, %41 : vector<8x512xf32>
    %43 = arith.addf %42, %7 : vector<8x512xf32>
    %44 = vector.extract_strided_slice %43 {offsets = [0, 0], sizes = [8, 384], strides = [1, 1]} : vector<8x512xf32> to vector<8x384xf32>
    %45 = arith.negf %44 : vector<8x384xf32>
    %46 = math.exp %45 : vector<8x384xf32>
    %cst_22 = arith.constant 1.000000e+00 : f32
    %47 = vector.broadcast %cst_22 : f32 to vector<8x384xf32>
    %48 = arith.addf %47, %46 : vector<8x384xf32>
    %49 = arith.divf %47, %48 : vector<8x384xf32>
    %50 = vector.extract_strided_slice %49 {offsets = [0, 0], sizes = [8, 128], strides = [1, 1]} : vector<8x384xf32> to vector<8x128xf32>
    %51 = vector.extract_strided_slice %49 {offsets = [0, 128], sizes = [8, 128], strides = [1, 1]} : vector<8x384xf32> to vector<8x128xf32>
    %52 = vector.extract_strided_slice %49 {offsets = [0, 256], sizes = [8, 128], strides = [1, 1]} : vector<8x384xf32> to vector<8x128xf32>
    %53 = vector.extract_strided_slice %43 {offsets = [0, 384], sizes = [8, 128], strides = [1, 1]} : vector<8x512xf32> to vector<8x128xf32>
    %54 = math.tanh %53 : vector<8x128xf32>
    %55 = arith.mulf %51, %31 : vector<8x128xf32>
    %56 = arith.mulf %50, %54 : vector<8x128xf32>
    %57 = arith.addf %55, %56 : vector<8x128xf32>
    %58 = math.tanh %57 : vector<8x128xf32>
    %59 = arith.mulf %52, %58 : vector<8x128xf32>
    %c0_23 = arith.constant 0 : index
    %c1_24 = arith.constant 1 : index
    %c0_25 = arith.constant 0 : index
    %60 = vector.load %arg8[%c0_23, %c1_24, %c0_25] : memref<8x16x128xf32, #tpu.memory_space<vmem>>, vector<8x1x128xf32>
    %61 = vector.shape_cast %60 : vector<8x1x128xf32> to vector<8x128xf32>
    %62 = vector.shape_cast %59 : vector<8x128xf32> to vector<8x1x128xf32>
    tpu.vector_store %arg8[%c0_23, %c1_24, %c0_25], %62 {strides = array<i32>} : memref<8x16x128xf32, #tpu.memory_space<vmem>>, vector<8x1x128xf32>,
    %c2 = arith.constant 2 : index
    %c0_26 = arith.constant 0 : index
    %c0_27 = arith.constant 0 : index
    %63 = vector.load %arg2[%c2, %c0_26, %c0_27] : memref<16x8x128xbf16, #tpu.memory_space<vmem>>, vector<1x8x128xbf16>
    %64 = vector.shape_cast %63 : vector<1x8x128xbf16> to vector<8x128xbf16>
    %cst_28 = arith.constant dense<0.000000e+00> : vector<8x512xf32>
    %65 = tpu.matmul %64, %3, %cst_28 {dimension_numbers = #tpu.dot_dimension_numbers<[1], [0], [0], [1], [0, 0, 1, 1], [], []>} : vector<8x128xbf16>, vector<128x512xbf16>, vector<8x512xf32> -> vector<8x512xf32>
    %66 = arith.truncf %59 : vector<8x128xf32> to vector<8x128xbf16>
    %cst_29 = arith.constant dense<0.000000e+00> : vector<8x512xf32>
    %67 = tpu.matmul %66, %4, %cst_29 {dimension_numbers = #tpu.dot_dimension_numbers<[1], [0], [0], [1], [0, 0, 1, 1], [], []>} : vector<8x128xbf16>, vector<128x512xbf16>, vector<8x512xf32> -> vector<8x512xf32>
    %68 = arith.addf %65, %67 : vector<8x512xf32>
    %69 = arith.addf %68, %7 : vector<8x512xf32>
    %70 = vector.extract_strided_slice %69 {offsets = [0, 0], sizes = [8, 384], strides = [1, 1]} : vector<8x512xf32> to vector<8x384xf32>
    %71 = arith.negf %70 : vector<8x384xf32>
    %72 = math.exp %71 : vector<8x384xf32>
    %cst_30 = arith.constant 1.000000e+00 : f32
    %73 = vector.broadcast %cst_30 : f32 to vector<8x384xf32>
    %74 = arith.addf %73, %72 : vector<8x384xf32>
    %75 = arith.divf %73, %74 : vector<8x384xf32>
    %76 = vector.extract_strided_slice %75 {offsets = [0, 0], sizes = [8, 128], strides = [1, 1]} : vector<8x384xf32> to vector<8x128xf32>
    %77 = vector.extract_strided_slice %75 {offsets = [0, 128], sizes = [8, 128], strides = [1, 1]} : vector<8x384xf32> to vector<8x128xf32>
    %78 = vector.extract_strided_slice %75 {offsets = [0, 256], sizes = [8, 128], strides = [1, 1]} : vector<8x384xf32> to vector<8x128xf32>
    %79 = vector.extract_strided_slice %69 {offsets = [0, 384], sizes = [8, 128], strides = [1, 1]} : vector<8x512xf32> to vector<8x128xf32>
    %80 = math.tanh %79 : vector<8x128xf32>
    %81 = arith.mulf %77, %57 : vector<8x128xf32>
    %82 = arith.mulf %76, %80 : vector<8x128xf32>
    %83 = arith.addf %81, %82 : vector<8x128xf32>
    %84 = math.tanh %83 : vector<8x128xf32>
    %85 = arith.mulf %78, %84 : vector<8x128xf32>
    %c0_31 = arith.constant 0 : index
    %c2_32 = arith.constant 2 : index
    %c0_33 = arith.constant 0 : index
    %86 = vector.load %arg8[%c0_31, %c2_32, %c0_33] : memref<8x16x128xf32, #tpu.memory_space<vmem>>, vector<8x1x128xf32>
    %87 = vector.shape_cast %86 : vector<8x1x128xf32> to vector<8x128xf32>
    %88 = vector.shape_cast %85 : vector<8x128xf32> to vector<8x1x128xf32>
    tpu.vector_store %arg8[%c0_31, %c2_32, %c0_33], %88 {strides = array<i32>} : memref<8x16x128xf32, #tpu.memory_space<vmem>>, vector<8x1x128xf32>,
    %c3 = arith.constant 3 : index
    %c0_34 = arith.constant 0 : index
    %c0_35 = arith.constant 0 : index
    %89 = vector.load %arg2[%c3, %c0_34, %c0_35] : memref<16x8x128xbf16, #tpu.memory_space<vmem>>, vector<1x8x128xbf16>
    %90 = vector.shape_cast %89 : vector<1x8x128xbf16> to vector<8x128xbf16>
    %cst_36 = arith.constant dense<0.000000e+00> : vector<8x512xf32>
    %91 = tpu.matmul %90, %3, %cst_36 {dimension_numbers = #tpu.dot_dimension_numbers<[1], [0], [0], [1], [0, 0, 1, 1], [], []>} : vector<8x128xbf16>, vector<128x512xbf16>, vector<8x512xf32> -> vector<8x512xf32>
    %92 = arith.truncf %85 : vector<8x128xf32> to vector<8x128xbf16>
    %cst_37 = arith.constant dense<0.000000e+00> : vector<8x512xf32>
    %93 = tpu.matmul %92, %4, %cst_37 {dimension_numbers = #tpu.dot_dimension_numbers<[1], [0], [0], [1], [0, 0, 1, 1], [], []>} : vector<8x128xbf16>, vector<128x512xbf16>, vector<8x512xf32> -> vector<8x512xf32>
    %94 = arith.addf %91, %93 : vector<8x512xf32>
    %95 = arith.addf %94, %7 : vector<8x512xf32>
    %96 = vector.extract_strided_slice %95 {offsets = [0, 0], sizes = [8, 384], strides = [1, 1]} : vector<8x512xf32> to vector<8x384xf32>
    %97 = arith.negf %96 : vector<8x384xf32>
    %98 = math.exp %97 : vector<8x384xf32>
    %cst_38 = arith.constant 1.000000e+00 : f32
    %99 = vector.broadcast %cst_38 : f32 to vector<8x384xf32>
    %100 = arith.addf %99, %98 : vector<8x384xf32>
    %101 = arith.divf %99, %100 : vector<8x384xf32>
    %102 = vector.extract_strided_slice %101 {offsets = [0, 0], sizes = [8, 128], strides = [1, 1]} : vector<8x384xf32> to vector<8x128xf32>
    %103 = vector.extract_strided_slice %101 {offsets = [0, 128], sizes = [8, 128], strides = [1, 1]} : vector<8x384xf32> to vector<8x128xf32>
    %104 = vector.extract_strided_slice %101 {offsets = [0, 256], sizes = [8, 128], strides = [1, 1]} : vector<8x384xf32> to vector<8x128xf32>
    %105 = vector.extract_strided_slice %95 {offsets = [0, 384], sizes = [8, 128], strides = [1, 1]} : vector<8x512xf32> to vector<8x128xf32>
    %106 = math.tanh %105 : vector<8x128xf32>
    %107 = arith.mulf %103, %83 : vector<8x128xf32>
    %108 = arith.mulf %102, %106 : vector<8x128xf32>
    %109 = arith.addf %107, %108 : vector<8x128xf32>
    %110 = math.tanh %109 : vector<8x128xf32>
    %111 = arith.mulf %104, %110 : vector<8x128xf32>
    %c0_39 = arith.constant 0 : index
    %c3_40 = arith.constant 3 : index
    %c0_41 = arith.constant 0 : index
    %112 = vector.load %arg8[%c0_39, %c3_40, %c0_41] : memref<8x16x128xf32, #tpu.memory_space<vmem>>, vector<8x1x128xf32>
    %113 = vector.shape_cast %112 : vector<8x1x128xf32> to vector<8x128xf32>
    %114 = vector.shape_cast %111 : vector<8x128xf32> to vector<8x1x128xf32>
    tpu.vector_store %arg8[%c0_39, %c3_40, %c0_41], %114 {strides = array<i32>} : memref<8x16x128xf32, #tpu.memory_space<vmem>>, vector<8x1x128xf32>,
    %c4 = arith.constant 4 : index
    %c0_42 = arith.constant 0 : index
    %c0_43 = arith.constant 0 : index
    %115 = vector.load %arg2[%c4, %c0_42, %c0_43] : memref<16x8x128xbf16, #tpu.memory_space<vmem>>, vector<1x8x128xbf16>
    %116 = vector.shape_cast %115 : vector<1x8x128xbf16> to vector<8x128xbf16>
    %cst_44 = arith.constant dense<0.000000e+00> : vector<8x512xf32>
    %117 = tpu.matmul %116, %3, %cst_44 {dimension_numbers = #tpu.dot_dimension_numbers<[1], [0], [0], [1], [0, 0, 1, 1], [], []>} : vector<8x128xbf16>, vector<128x512xbf16>, vector<8x512xf32> -> vector<8x512xf32>
    %118 = arith.truncf %111 : vector<8x128xf32> to vector<8x128xbf16>
    %cst_45 = arith.constant dense<0.000000e+00> : vector<8x512xf32>
    %119 = tpu.matmul %118, %4, %cst_45 {dimension_numbers = #tpu.dot_dimension_numbers<[1], [0], [0], [1], [0, 0, 1, 1], [], []>} : vector<8x128xbf16>, vector<128x512xbf16>, vector<8x512xf32> -> vector<8x512xf32>
    %120 = arith.addf %117, %119 : vector<8x512xf32>
    %121 = arith.addf %120, %7 : vector<8x512xf32>
    %122 = vector.extract_strided_slice %121 {offsets = [0, 0], sizes = [8, 384], strides = [1, 1]} : vector<8x512xf32> to vector<8x384xf32>
    %123 = arith.negf %122 : vector<8x384xf32>
    %124 = math.exp %123 : vector<8x384xf32>
    %cst_46 = arith.constant 1.000000e+00 : f32
    %125 = vector.broadcast %cst_46 : f32 to vector<8x384xf32>
    %126 = arith.addf %125, %124 : vector<8x384xf32>
    %127 = arith.divf %125, %126 : vector<8x384xf32>
    %128 = vector.extract_strided_slice %127 {offsets = [0, 0], sizes = [8, 128], strides = [1, 1]} : vector<8x384xf32> to vector<8x128xf32>
    %129 = vector.extract_strided_slice %127 {offsets = [0, 128], sizes = [8, 128], strides = [1, 1]} : vector<8x384xf32> to vector<8x128xf32>
    %130 = vector.extract_strided_slice %127 {offsets = [0, 256], sizes = [8, 128], strides = [1, 1]} : vector<8x384xf32> to vector<8x128xf32>
    %131 = vector.extract_strided_slice %121 {offsets = [0, 384], sizes = [8, 128], strides = [1, 1]} : vector<8x512xf32> to vector<8x128xf32>
    %132 = math.tanh %131 : vector<8x128xf32>
    %133 = arith.mulf %129, %109 : vector<8x128xf32>
    %134 = arith.mulf %128, %132 : vector<8x128xf32>
    %135 = arith.addf %133, %134 : vector<8x128xf32>
    %136 = math.tanh %135 : vector<8x128xf32>
    %137 = arith.mulf %130, %136 : vector<8x128xf32>
    %c0_47 = arith.constant 0 : index
    %c4_48 = arith.constant 4 : index
    %c0_49 = arith.constant 0 : index
    %138 = vector.load %arg8[%c0_47, %c4_48, %c0_49] : memref<8x16x128xf32, #tpu.memory_space<vmem>>, vector<8x1x128xf32>
    %139 = vector.shape_cast %138 : vector<8x1x128xf32> to vector<8x128xf32>
    %140 = vector.shape_cast %137 : vector<8x128xf32> to vector<8x1x128xf32>
    tpu.vector_store %arg8[%c0_47, %c4_48, %c0_49], %140 {strides = array<i32>} : memref<8x16x128xf32, #tpu.memory_space<vmem>>, vector<8x1x128xf32>,
    %c5 = arith.constant 5 : index
    %c0_50 = arith.constant 0 : index
    %c0_51 = arith.constant 0 : index
    %141 = vector.load %arg2[%c5, %c0_50, %c0_51] : memref<16x8x128xbf16, #tpu.memory_space<vmem>>, vector<1x8x128xbf16>
    %142 = vector.shape_cast %141 : vector<1x8x128xbf16> to vector<8x128xbf16>
    %cst_52 = arith.constant dense<0.000000e+00> : vector<8x512xf32>
    %143 = tpu.matmul %142, %3, %cst_52 {dimension_numbers = #tpu.dot_dimension_numbers<[1], [0], [0], [1], [0, 0, 1, 1], [], []>} : vector<8x128xbf16>, vector<128x512xbf16>, vector<8x512xf32> -> vector<8x512xf32>
    %144 = arith.truncf %137 : vector<8x128xf32> to vector<8x128xbf16>
    %cst_53 = arith.constant dense<0.000000e+00> : vector<8x512xf32>
    %145 = tpu.matmul %144, %4, %cst_53 {dimension_numbers = #tpu.dot_dimension_numbers<[1], [0], [0], [1], [0, 0, 1, 1], [], []>} : vector<8x128xbf16>, vector<128x512xbf16>, vector<8x512xf32> -> vector<8x512xf32>
    %146 = arith.addf %143, %145 : vector<8x512xf32>
    %147 = arith.addf %146, %7 : vector<8x512xf32>
    %148 = vector.extract_strided_slice %147 {offsets = [0, 0], sizes = [8, 384], strides = [1, 1]} : vector<8x512xf32> to vector<8x384xf32>
    %149 = arith.negf %148 : vector<8x384xf32>
    %150 = math.exp %149 : vector<8x384xf32>
    %cst_54 = arith.constant 1.000000e+00 : f32
    %151 = vector.broadcast %cst_54 : f32 to vector<8x384xf32>
    %152 = arith.addf %151, %150 : vector<8x384xf32>
    %153 = arith.divf %151, %152 : vector<8x384xf32>
    %154 = vector.extract_strided_slice %153 {offsets = [0, 0], sizes = [8, 128], strides = [1, 1]} : vector<8x384xf32> to vector<8x128xf32>
    %155 = vector.extract_strided_slice %153 {offsets = [0, 128], sizes = [8, 128], strides = [1, 1]} : vector<8x384xf32> to vector<8x128xf32>
    %156 = vector.extract_strided_slice %153 {offsets = [0, 256], sizes = [8, 128], strides = [1, 1]} : vector<8x384xf32> to vector<8x128xf32>
    %157 = vector.extract_strided_slice %147 {offsets = [0, 384], sizes = [8, 128], strides = [1, 1]} : vector<8x512xf32> to vector<8x128xf32>
    %158 = math.tanh %157 : vector<8x128xf32>
    %159 = arith.mulf %155, %135 : vector<8x128xf32>
    %160 = arith.mulf %154, %158 : vector<8x128xf32>
    %161 = arith.addf %159, %160 : vector<8x128xf32>
    %162 = math.tanh %161 : vector<8x128xf32>
    %163 = arith.mulf %156, %162 : vector<8x128xf32>
    %c0_55 = arith.constant 0 : index
    %c5_56 = arith.constant 5 : index
    %c0_57 = arith.constant 0 : index
    %164 = vector.load %arg8[%c0_55, %c5_56, %c0_57] : memref<8x16x128xf32, #tpu.memory_space<vmem>>, vector<8x1x128xf32>
    %165 = vector.shape_cast %164 : vector<8x1x128xf32> to vector<8x128xf32>
    %166 = vector.shape_cast %163 : vector<8x128xf32> to vector<8x1x128xf32>
    tpu.vector_store %arg8[%c0_55, %c5_56, %c0_57], %166 {strides = array<i32>} : memref<8x16x128xf32, #tpu.memory_space<vmem>>, vector<8x1x128xf32>,
    %c6 = arith.constant 6 : index
    %c0_58 = arith.constant 0 : index
    %c0_59 = arith.constant 0 : index
    %167 = vector.load %arg2[%c6, %c0_58, %c0_59] : memref<16x8x128xbf16, #tpu.memory_space<vmem>>, vector<1x8x128xbf16>
    %168 = vector.shape_cast %167 : vector<1x8x128xbf16> to vector<8x128xbf16>
    %cst_60 = arith.constant dense<0.000000e+00> : vector<8x512xf32>
    %169 = tpu.matmul %168, %3, %cst_60 {dimension_numbers = #tpu.dot_dimension_numbers<[1], [0], [0], [1], [0, 0, 1, 1], [], []>} : vector<8x128xbf16>, vector<128x512xbf16>, vector<8x512xf32> -> vector<8x512xf32>
    %170 = arith.truncf %163 : vector<8x128xf32> to vector<8x128xbf16>
    %cst_61 = arith.constant dense<0.000000e+00> : vector<8x512xf32>
    %171 = tpu.matmul %170, %4, %cst_61 {dimension_numbers = #tpu.dot_dimension_numbers<[1], [0], [0], [1], [0, 0, 1, 1], [], []>} : vector<8x128xbf16>, vector<128x512xbf16>, vector<8x512xf32> -> vector<8x512xf32>
    %172 = arith.addf %169, %171 : vector<8x512xf32>
    %173 = arith.addf %172, %7 : vector<8x512xf32>
    %174 = vector.extract_strided_slice %173 {offsets = [0, 0], sizes = [8, 384], strides = [1, 1]} : vector<8x512xf32> to vector<8x384xf32>
    %175 = arith.negf %174 : vector<8x384xf32>
    %176 = math.exp %175 : vector<8x384xf32>
    %cst_62 = arith.constant 1.000000e+00 : f32
    %177 = vector.broadcast %cst_62 : f32 to vector<8x384xf32>
    %178 = arith.addf %177, %176 : vector<8x384xf32>
    %179 = arith.divf %177, %178 : vector<8x384xf32>
    %180 = vector.extract_strided_slice %179 {offsets = [0, 0], sizes = [8, 128], strides = [1, 1]} : vector<8x384xf32> to vector<8x128xf32>
    %181 = vector.extract_strided_slice %179 {offsets = [0, 128], sizes = [8, 128], strides = [1, 1]} : vector<8x384xf32> to vector<8x128xf32>
    %182 = vector.extract_strided_slice %179 {offsets = [0, 256], sizes = [8, 128], strides = [1, 1]} : vector<8x384xf32> to vector<8x128xf32>
    %183 = vector.extract_strided_slice %173 {offsets = [0, 384], sizes = [8, 128], strides = [1, 1]} : vector<8x512xf32> to vector<8x128xf32>
    %184 = math.tanh %183 : vector<8x128xf32>
    %185 = arith.mulf %181, %161 : vector<8x128xf32>
    %186 = arith.mulf %180, %184 : vector<8x128xf32>
    %187 = arith.addf %185, %186 : vector<8x128xf32>
    %188 = math.tanh %187 : vector<8x128xf32>
    %189 = arith.mulf %182, %188 : vector<8x128xf32>
    %c0_63 = arith.constant 0 : index
    %c6_64 = arith.constant 6 : index
    %c0_65 = arith.constant 0 : index
    %190 = vector.load %arg8[%c0_63, %c6_64, %c0_65] : memref<8x16x128xf32, #tpu.memory_space<vmem>>, vector<8x1x128xf32>
    %191 = vector.shape_cast %190 : vector<8x1x128xf32> to vector<8x128xf32>
    %192 = vector.shape_cast %189 : vector<8x128xf32> to vector<8x1x128xf32>
    tpu.vector_store %arg8[%c0_63, %c6_64, %c0_65], %192 {strides = array<i32>} : memref<8x16x128xf32, #tpu.memory_space<vmem>>, vector<8x1x128xf32>,
    %c7 = arith.constant 7 : index
    %c0_66 = arith.constant 0 : index
    %c0_67 = arith.constant 0 : index
    %193 = vector.load %arg2[%c7, %c0_66, %c0_67] : memref<16x8x128xbf16, #tpu.memory_space<vmem>>, vector<1x8x128xbf16>
    %194 = vector.shape_cast %193 : vector<1x8x128xbf16> to vector<8x128xbf16>
    %cst_68 = arith.constant dense<0.000000e+00> : vector<8x512xf32>
    %195 = tpu.matmul %194, %3, %cst_68 {dimension_numbers = #tpu.dot_dimension_numbers<[1], [0], [0], [1], [0, 0, 1, 1], [], []>} : vector<8x128xbf16>, vector<128x512xbf16>, vector<8x512xf32> -> vector<8x512xf32>
    %196 = arith.truncf %189 : vector<8x128xf32> to vector<8x128xbf16>
    %cst_69 = arith.constant dense<0.000000e+00> : vector<8x512xf32>
    %197 = tpu.matmul %196, %4, %cst_69 {dimension_numbers = #tpu.dot_dimension_numbers<[1], [0], [0], [1], [0, 0, 1, 1], [], []>} : vector<8x128xbf16>, vector<128x512xbf16>, vector<8x512xf32> -> vector<8x512xf32>
    %198 = arith.addf %195, %197 : vector<8x512xf32>
    %199 = arith.addf %198, %7 : vector<8x512xf32>
    %200 = vector.extract_strided_slice %199 {offsets = [0, 0], sizes = [8, 384], strides = [1, 1]} : vector<8x512xf32> to vector<8x384xf32>
    %201 = arith.negf %200 : vector<8x384xf32>
    %202 = math.exp %201 : vector<8x384xf32>
    %cst_70 = arith.constant 1.000000e+00 : f32
    %203 = vector.broadcast %cst_70 : f32 to vector<8x384xf32>
    %204 = arith.addf %203, %202 : vector<8x384xf32>
    %205 = arith.divf %203, %204 : vector<8x384xf32>
    %206 = vector.extract_strided_slice %205 {offsets = [0, 0], sizes = [8, 128], strides = [1, 1]} : vector<8x384xf32> to vector<8x128xf32>
    %207 = vector.extract_strided_slice %205 {offsets = [0, 128], sizes = [8, 128], strides = [1, 1]} : vector<8x384xf32> to vector<8x128xf32>
    %208 = vector.extract_strided_slice %205 {offsets = [0, 256], sizes = [8, 128], strides = [1, 1]} : vector<8x384xf32> to vector<8x128xf32>
    %209 = vector.extract_strided_slice %199 {offsets = [0, 384], sizes = [8, 128], strides = [1, 1]} : vector<8x512xf32> to vector<8x128xf32>
    %210 = math.tanh %209 : vector<8x128xf32>
    %211 = arith.mulf %207, %187 : vector<8x128xf32>
    %212 = arith.mulf %206, %210 : vector<8x128xf32>
    %213 = arith.addf %211, %212 : vector<8x128xf32>
    %214 = math.tanh %213 : vector<8x128xf32>
    %215 = arith.mulf %208, %214 : vector<8x128xf32>
    %c0_71 = arith.constant 0 : index
    %c7_72 = arith.constant 7 : index
    %c0_73 = arith.constant 0 : index
    %216 = vector.load %arg8[%c0_71, %c7_72, %c0_73] : memref<8x16x128xf32, #tpu.memory_space<vmem>>, vector<8x1x128xf32>
    %217 = vector.shape_cast %216 : vector<8x1x128xf32> to vector<8x128xf32>
    %218 = vector.shape_cast %215 : vector<8x128xf32> to vector<8x1x128xf32>
    tpu.vector_store %arg8[%c0_71, %c7_72, %c0_73], %218 {strides = array<i32>} : memref<8x16x128xf32, #tpu.memory_space<vmem>>, vector<8x1x128xf32>,
    %c8 = arith.constant 8 : index
    %c0_74 = arith.constant 0 : index
    %c0_75 = arith.constant 0 : index
    %219 = vector.load %arg2[%c8, %c0_74, %c0_75] : memref<16x8x128xbf16, #tpu.memory_space<vmem>>, vector<1x8x128xbf16>
    %220 = vector.shape_cast %219 : vector<1x8x128xbf16> to vector<8x128xbf16>
    %cst_76 = arith.constant dense<0.000000e+00> : vector<8x512xf32>
    %221 = tpu.matmul %220, %3, %cst_76 {dimension_numbers = #tpu.dot_dimension_numbers<[1], [0], [0], [1], [0, 0, 1, 1], [], []>} : vector<8x128xbf16>, vector<128x512xbf16>, vector<8x512xf32> -> vector<8x512xf32>
    %222 = arith.truncf %215 : vector<8x128xf32> to vector<8x128xbf16>
    %cst_77 = arith.constant dense<0.000000e+00> : vector<8x512xf32>
    %223 = tpu.matmul %222, %4, %cst_77 {dimension_numbers = #tpu.dot_dimension_numbers<[1], [0], [0], [1], [0, 0, 1, 1], [], []>} : vector<8x128xbf16>, vector<128x512xbf16>, vector<8x512xf32> -> vector<8x512xf32>
    %224 = arith.addf %221, %223 : vector<8x512xf32>
    %225 = arith.addf %224, %7 : vector<8x512xf32>
    %226 = vector.extract_strided_slice %225 {offsets = [0, 0], sizes = [8, 384], strides = [1, 1]} : vector<8x512xf32> to vector<8x384xf32>
    %227 = arith.negf %226 : vector<8x384xf32>
    %228 = math.exp %227 : vector<8x384xf32>
    %cst_78 = arith.constant 1.000000e+00 : f32
    %229 = vector.broadcast %cst_78 : f32 to vector<8x384xf32>
    %230 = arith.addf %229, %228 : vector<8x384xf32>
    %231 = arith.divf %229, %230 : vector<8x384xf32>
    %232 = vector.extract_strided_slice %231 {offsets = [0, 0], sizes = [8, 128], strides = [1, 1]} : vector<8x384xf32> to vector<8x128xf32>
    %233 = vector.extract_strided_slice %231 {offsets = [0, 128], sizes = [8, 128], strides = [1, 1]} : vector<8x384xf32> to vector<8x128xf32>
    %234 = vector.extract_strided_slice %231 {offsets = [0, 256], sizes = [8, 128], strides = [1, 1]} : vector<8x384xf32> to vector<8x128xf32>
    %235 = vector.extract_strided_slice %225 {offsets = [0, 384], sizes = [8, 128], strides = [1, 1]} : vector<8x512xf32> to vector<8x128xf32>
    %236 = math.tanh %235 : vector<8x128xf32>
    %237 = arith.mulf %233, %213 : vector<8x128xf32>
    %238 = arith.mulf %232, %236 : vector<8x128xf32>
    %239 = arith.addf %237, %238 : vector<8x128xf32>
    %240 = math.tanh %239 : vector<8x128xf32>
    %241 = arith.mulf %234, %240 : vector<8x128xf32>
    %242 = arith.select %10, %241, %215 : vector<8x128xf32>
    %243 = arith.select %10, %239, %213 : vector<8x128xf32>
    %c0_79 = arith.constant 0 : index
    %c8_80 = arith.constant 8 : index
    %c0_81 = arith.constant 0 : index
    %244 = vector.load %arg8[%c0_79, %c8_80, %c0_81] : memref<8x16x128xf32, #tpu.memory_space<vmem>>, vector<8x1x128xf32>
    %245 = vector.shape_cast %244 : vector<8x1x128xf32> to vector<8x128xf32>
    %246 = vector.shape_cast %242 : vector<8x128xf32> to vector<8x1x128xf32>
    tpu.vector_store %arg8[%c0_79, %c8_80, %c0_81], %246 {strides = array<i32>} : memref<8x16x128xf32, #tpu.memory_space<vmem>>, vector<8x1x128xf32>,
    %c9 = arith.constant 9 : index
    %c0_82 = arith.constant 0 : index
    %c0_83 = arith.constant 0 : index
    %247 = vector.load %arg2[%c9, %c0_82, %c0_83] : memref<16x8x128xbf16, #tpu.memory_space<vmem>>, vector<1x8x128xbf16>
    %248 = vector.shape_cast %247 : vector<1x8x128xbf16> to vector<8x128xbf16>
    %cst_84 = arith.constant dense<0.000000e+00> : vector<8x512xf32>
    %249 = tpu.matmul %248, %3, %cst_84 {dimension_numbers = #tpu.dot_dimension_numbers<[1], [0], [0], [1], [0, 0, 1, 1], [], []>} : vector<8x128xbf16>, vector<128x512xbf16>, vector<8x512xf32> -> vector<8x512xf32>
    %250 = arith.truncf %242 : vector<8x128xf32> to vector<8x128xbf16>
    %cst_85 = arith.constant dense<0.000000e+00> : vector<8x512xf32>
    %251 = tpu.matmul %250, %4, %cst_85 {dimension_numbers = #tpu.dot_dimension_numbers<[1], [0], [0], [1], [0, 0, 1, 1], [], []>} : vector<8x128xbf16>, vector<128x512xbf16>, vector<8x512xf32> -> vector<8x512xf32>
    %252 = arith.addf %249, %251 : vector<8x512xf32>
    %253 = arith.addf %252, %7 : vector<8x512xf32>
    %254 = vector.extract_strided_slice %253 {offsets = [0, 0], sizes = [8, 384], strides = [1, 1]} : vector<8x512xf32> to vector<8x384xf32>
    %255 = arith.negf %254 : vector<8x384xf32>
    %256 = math.exp %255 : vector<8x384xf32>
    %cst_86 = arith.constant 1.000000e+00 : f32
    %257 = vector.broadcast %cst_86 : f32 to vector<8x384xf32>
    %258 = arith.addf %257, %256 : vector<8x384xf32>
    %259 = arith.divf %257, %258 : vector<8x384xf32>
    %260 = vector.extract_strided_slice %259 {offsets = [0, 0], sizes = [8, 128], strides = [1, 1]} : vector<8x384xf32> to vector<8x128xf32>
    %261 = vector.extract_strided_slice %259 {offsets = [0, 128], sizes = [8, 128], strides = [1, 1]} : vector<8x384xf32> to vector<8x128xf32>
    %262 = vector.extract_strided_slice %259 {offsets = [0, 256], sizes = [8, 128], strides = [1, 1]} : vector<8x384xf32> to vector<8x128xf32>
    %263 = vector.extract_strided_slice %253 {offsets = [0, 384], sizes = [8, 128], strides = [1, 1]} : vector<8x512xf32> to vector<8x128xf32>
    %264 = math.tanh %263 : vector<8x128xf32>
    %265 = arith.mulf %261, %243 : vector<8x128xf32>
    %266 = arith.mulf %260, %264 : vector<8x128xf32>
    %267 = arith.addf %265, %266 : vector<8x128xf32>
    %268 = math.tanh %267 : vector<8x128xf32>
    %269 = arith.mulf %262, %268 : vector<8x128xf32>
    %270 = arith.select %10, %269, %242 : vector<8x128xf32>
    %271 = arith.select %10, %267, %243 : vector<8x128xf32>
    %c0_87 = arith.constant 0 : index
    %c9_88 = arith.constant 9 : index
    %c0_89 = arith.constant 0 : index
    %272 = vector.load %arg8[%c0_87, %c9_88, %c0_89] : memref<8x16x128xf32, #tpu.memory_space<vmem>>, vector<8x1x128xf32>
    %273 = vector.shape_cast %272 : vector<8x1x128xf32> to vector<8x128xf32>
    %274 = vector.shape_cast %270 : vector<8x128xf32> to vector<8x1x128xf32>
    tpu.vector_store %arg8[%c0_87, %c9_88, %c0_89], %274 {strides = array<i32>} : memref<8x16x128xf32, #tpu.memory_space<vmem>>, vector<8x1x128xf32>,
    %c10 = arith.constant 10 : index
    %c0_90 = arith.constant 0 : index
    %c0_91 = arith.constant 0 : index
    %275 = vector.load %arg2[%c10, %c0_90, %c0_91] : memref<16x8x128xbf16, #tpu.memory_space<vmem>>, vector<1x8x128xbf16>
    %276 = vector.shape_cast %275 : vector<1x8x128xbf16> to vector<8x128xbf16>
    %cst_92 = arith.constant dense<0.000000e+00> : vector<8x512xf32>
    %277 = tpu.matmul %276, %3, %cst_92 {dimension_numbers = #tpu.dot_dimension_numbers<[1], [0], [0], [1], [0, 0, 1, 1], [], []>} : vector<8x128xbf16>, vector<128x512xbf16>, vector<8x512xf32> -> vector<8x512xf32>
    %278 = arith.truncf %270 : vector<8x128xf32> to vector<8x128xbf16>
    %cst_93 = arith.constant dense<0.000000e+00> : vector<8x512xf32>
    %279 = tpu.matmul %278, %4, %cst_93 {dimension_numbers = #tpu.dot_dimension_numbers<[1], [0], [0], [1], [0, 0, 1, 1], [], []>} : vector<8x128xbf16>, vector<128x512xbf16>, vector<8x512xf32> -> vector<8x512xf32>
    %280 = arith.addf %277, %279 : vector<8x512xf32>
    %281 = arith.addf %280, %7 : vector<8x512xf32>
    %282 = vector.extract_strided_slice %281 {offsets = [0, 0], sizes = [8, 384], strides = [1, 1]} : vector<8x512xf32> to vector<8x384xf32>
    %283 = arith.negf %282 : vector<8x384xf32>
    %284 = math.exp %283 : vector<8x384xf32>
    %cst_94 = arith.constant 1.000000e+00 : f32
    %285 = vector.broadcast %cst_94 : f32 to vector<8x384xf32>
    %286 = arith.addf %285, %284 : vector<8x384xf32>
    %287 = arith.divf %285, %286 : vector<8x384xf32>
    %288 = vector.extract_strided_slice %287 {offsets = [0, 0], sizes = [8, 128], strides = [1, 1]} : vector<8x384xf32> to vector<8x128xf32>
    %289 = vector.extract_strided_slice %287 {offsets = [0, 128], sizes = [8, 128], strides = [1, 1]} : vector<8x384xf32> to vector<8x128xf32>
    %290 = vector.extract_strided_slice %287 {offsets = [0, 256], sizes = [8, 128], strides = [1, 1]} : vector<8x384xf32> to vector<8x128xf32>
    %291 = vector.extract_strided_slice %281 {offsets = [0, 384], sizes = [8, 128], strides = [1, 1]} : vector<8x512xf32> to vector<8x128xf32>
    %292 = math.tanh %291 : vector<8x128xf32>
    %293 = arith.mulf %289, %271 : vector<8x128xf32>
    %294 = arith.mulf %288, %292 : vector<8x128xf32>
    %295 = arith.addf %293, %294 : vector<8x128xf32>
    %296 = math.tanh %295 : vector<8x128xf32>
    %297 = arith.mulf %290, %296 : vector<8x128xf32>
    %298 = arith.select %10, %297, %270 : vector<8x128xf32>
    %299 = arith.select %10, %295, %271 : vector<8x128xf32>
    %c0_95 = arith.constant 0 : index
    %c10_96 = arith.constant 10 : index
    %c0_97 = arith.constant 0 : index
    %300 = vector.load %arg8[%c0_95, %c10_96, %c0_97] : memref<8x16x128xf32, #tpu.memory_space<vmem>>, vector<8x1x128xf32>
    %301 = vector.shape_cast %300 : vector<8x1x128xf32> to vector<8x128xf32>
    %302 = vector.shape_cast %298 : vector<8x128xf32> to vector<8x1x128xf32>
    tpu.vector_store %arg8[%c0_95, %c10_96, %c0_97], %302 {strides = array<i32>} : memref<8x16x128xf32, #tpu.memory_space<vmem>>, vector<8x1x128xf32>,
    %c11 = arith.constant 11 : index
    %c0_98 = arith.constant 0 : index
    %c0_99 = arith.constant 0 : index
    %303 = vector.load %arg2[%c11, %c0_98, %c0_99] : memref<16x8x128xbf16, #tpu.memory_space<vmem>>, vector<1x8x128xbf16>
    %304 = vector.shape_cast %303 : vector<1x8x128xbf16> to vector<8x128xbf16>
    %cst_100 = arith.constant dense<0.000000e+00> : vector<8x512xf32>
    %305 = tpu.matmul %304, %3, %cst_100 {dimension_numbers = #tpu.dot_dimension_numbers<[1], [0], [0], [1], [0, 0, 1, 1], [], []>} : vector<8x128xbf16>, vector<128x512xbf16>, vector<8x512xf32> -> vector<8x512xf32>
    %306 = arith.truncf %298 : vector<8x128xf32> to vector<8x128xbf16>
    %cst_101 = arith.constant dense<0.000000e+00> : vector<8x512xf32>
    %307 = tpu.matmul %306, %4, %cst_101 {dimension_numbers = #tpu.dot_dimension_numbers<[1], [0], [0], [1], [0, 0, 1, 1], [], []>} : vector<8x128xbf16>, vector<128x512xbf16>, vector<8x512xf32> -> vector<8x512xf32>
    %308 = arith.addf %305, %307 : vector<8x512xf32>
    %309 = arith.addf %308, %7 : vector<8x512xf32>
    %310 = vector.extract_strided_slice %309 {offsets = [0, 0], sizes = [8, 384], strides = [1, 1]} : vector<8x512xf32> to vector<8x384xf32>
    %311 = arith.negf %310 : vector<8x384xf32>
    %312 = math.exp %311 : vector<8x384xf32>
    %cst_102 = arith.constant 1.000000e+00 : f32
    %313 = vector.broadcast %cst_102 : f32 to vector<8x384xf32>
    %314 = arith.addf %313, %312 : vector<8x384xf32>
    %315 = arith.divf %313, %314 : vector<8x384xf32>
    %316 = vector.extract_strided_slice %315 {offsets = [0, 0], sizes = [8, 128], strides = [1, 1]} : vector<8x384xf32> to vector<8x128xf32>
    %317 = vector.extract_strided_slice %315 {offsets = [0, 128], sizes = [8, 128], strides = [1, 1]} : vector<8x384xf32> to vector<8x128xf32>
    %318 = vector.extract_strided_slice %315 {offsets = [0, 256], sizes = [8, 128], strides = [1, 1]} : vector<8x384xf32> to vector<8x128xf32>
    %319 = vector.extract_strided_slice %309 {offsets = [0, 384], sizes = [8, 128], strides = [1, 1]} : vector<8x512xf32> to vector<8x128xf32>
    %320 = math.tanh %319 : vector<8x128xf32>
    %321 = arith.mulf %317, %299 : vector<8x128xf32>
    %322 = arith.mulf %316, %320 : vector<8x128xf32>
    %323 = arith.addf %321, %322 : vector<8x128xf32>
    %324 = math.tanh %323 : vector<8x128xf32>
    %325 = arith.mulf %318, %324 : vector<8x128xf32>
    %326 = arith.select %10, %325, %298 : vector<8x128xf32>
    %327 = arith.select %10, %323, %299 : vector<8x128xf32>
    %c0_103 = arith.constant 0 : index
    %c11_104 = arith.constant 11 : index
    %c0_105 = arith.constant 0 : index
    %328 = vector.load %arg8[%c0_103, %c11_104, %c0_105] : memref<8x16x128xf32, #tpu.memory_space<vmem>>, vector<8x1x128xf32>
    %329 = vector.shape_cast %328 : vector<8x1x128xf32> to vector<8x128xf32>
    %330 = vector.shape_cast %326 : vector<8x128xf32> to vector<8x1x128xf32>
    tpu.vector_store %arg8[%c0_103, %c11_104, %c0_105], %330 {strides = array<i32>} : memref<8x16x128xf32, #tpu.memory_space<vmem>>, vector<8x1x128xf32>,
    %c12 = arith.constant 12 : index
    %c0_106 = arith.constant 0 : index
    %c0_107 = arith.constant 0 : index
    %331 = vector.load %arg2[%c12, %c0_106, %c0_107] : memref<16x8x128xbf16, #tpu.memory_space<vmem>>, vector<1x8x128xbf16>
    %332 = vector.shape_cast %331 : vector<1x8x128xbf16> to vector<8x128xbf16>
    %cst_108 = arith.constant dense<0.000000e+00> : vector<8x512xf32>
    %333 = tpu.matmul %332, %3, %cst_108 {dimension_numbers = #tpu.dot_dimension_numbers<[1], [0], [0], [1], [0, 0, 1, 1], [], []>} : vector<8x128xbf16>, vector<128x512xbf16>, vector<8x512xf32> -> vector<8x512xf32>
    %334 = arith.truncf %326 : vector<8x128xf32> to vector<8x128xbf16>
    %cst_109 = arith.constant dense<0.000000e+00> : vector<8x512xf32>
    %335 = tpu.matmul %334, %4, %cst_109 {dimension_numbers = #tpu.dot_dimension_numbers<[1], [0], [0], [1], [0, 0, 1, 1], [], []>} : vector<8x128xbf16>, vector<128x512xbf16>, vector<8x512xf32> -> vector<8x512xf32>
    %336 = arith.addf %333, %335 : vector<8x512xf32>
    %337 = arith.addf %336, %7 : vector<8x512xf32>
    %338 = vector.extract_strided_slice %337 {offsets = [0, 0], sizes = [8, 384], strides = [1, 1]} : vector<8x512xf32> to vector<8x384xf32>
    %339 = arith.negf %338 : vector<8x384xf32>
    %340 = math.exp %339 : vector<8x384xf32>
    %cst_110 = arith.constant 1.000000e+00 : f32
    %341 = vector.broadcast %cst_110 : f32 to vector<8x384xf32>
    %342 = arith.addf %341, %340 : vector<8x384xf32>
    %343 = arith.divf %341, %342 : vector<8x384xf32>
    %344 = vector.extract_strided_slice %343 {offsets = [0, 0], sizes = [8, 128], strides = [1, 1]} : vector<8x384xf32> to vector<8x128xf32>
    %345 = vector.extract_strided_slice %343 {offsets = [0, 128], sizes = [8, 128], strides = [1, 1]} : vector<8x384xf32> to vector<8x128xf32>
    %346 = vector.extract_strided_slice %343 {offsets = [0, 256], sizes = [8, 128], strides = [1, 1]} : vector<8x384xf32> to vector<8x128xf32>
    %347 = vector.extract_strided_slice %337 {offsets = [0, 384], sizes = [8, 128], strides = [1, 1]} : vector<8x512xf32> to vector<8x128xf32>
    %348 = math.tanh %347 : vector<8x128xf32>
    %349 = arith.mulf %345, %327 : vector<8x128xf32>
    %350 = arith.mulf %344, %348 : vector<8x128xf32>
    %351 = arith.addf %349, %350 : vector<8x128xf32>
    %352 = math.tanh %351 : vector<8x128xf32>
    %353 = arith.mulf %346, %352 : vector<8x128xf32>
    %354 = arith.select %10, %353, %326 : vector<8x128xf32>
    %355 = arith.select %10, %351, %327 : vector<8x128xf32>
    %c0_111 = arith.constant 0 : index
    %c12_112 = arith.constant 12 : index
    %c0_113 = arith.constant 0 : index
    %356 = vector.load %arg8[%c0_111, %c12_112, %c0_113] : memref<8x16x128xf32, #tpu.memory_space<vmem>>, vector<8x1x128xf32>
    %357 = vector.shape_cast %356 : vector<8x1x128xf32> to vector<8x128xf32>
    %358 = vector.shape_cast %354 : vector<8x128xf32> to vector<8x1x128xf32>
    tpu.vector_store %arg8[%c0_111, %c12_112, %c0_113], %358 {strides = array<i32>} : memref<8x16x128xf32, #tpu.memory_space<vmem>>, vector<8x1x128xf32>,
    %c13 = arith.constant 13 : index
    %c0_114 = arith.constant 0 : index
    %c0_115 = arith.constant 0 : index
    %359 = vector.load %arg2[%c13, %c0_114, %c0_115] : memref<16x8x128xbf16, #tpu.memory_space<vmem>>, vector<1x8x128xbf16>
    %360 = vector.shape_cast %359 : vector<1x8x128xbf16> to vector<8x128xbf16>
    %cst_116 = arith.constant dense<0.000000e+00> : vector<8x512xf32>
    %361 = tpu.matmul %360, %3, %cst_116 {dimension_numbers = #tpu.dot_dimension_numbers<[1], [0], [0], [1], [0, 0, 1, 1], [], []>} : vector<8x128xbf16>, vector<128x512xbf16>, vector<8x512xf32> -> vector<8x512xf32>
    %362 = arith.truncf %354 : vector<8x128xf32> to vector<8x128xbf16>
    %cst_117 = arith.constant dense<0.000000e+00> : vector<8x512xf32>
    %363 = tpu.matmul %362, %4, %cst_117 {dimension_numbers = #tpu.dot_dimension_numbers<[1], [0], [0], [1], [0, 0, 1, 1], [], []>} : vector<8x128xbf16>, vector<128x512xbf16>, vector<8x512xf32> -> vector<8x512xf32>
    %364 = arith.addf %361, %363 : vector<8x512xf32>
    %365 = arith.addf %364, %7 : vector<8x512xf32>
    %366 = vector.extract_strided_slice %365 {offsets = [0, 0], sizes = [8, 384], strides = [1, 1]} : vector<8x512xf32> to vector<8x384xf32>
    %367 = arith.negf %366 : vector<8x384xf32>
    %368 = math.exp %367 : vector<8x384xf32>
    %cst_118 = arith.constant 1.000000e+00 : f32
    %369 = vector.broadcast %cst_118 : f32 to vector<8x384xf32>
    %370 = arith.addf %369, %368 : vector<8x384xf32>
    %371 = arith.divf %369, %370 : vector<8x384xf32>
    %372 = vector.extract_strided_slice %371 {offsets = [0, 0], sizes = [8, 128], strides = [1, 1]} : vector<8x384xf32> to vector<8x128xf32>
    %373 = vector.extract_strided_slice %371 {offsets = [0, 128], sizes = [8, 128], strides = [1, 1]} : vector<8x384xf32> to vector<8x128xf32>
    %374 = vector.extract_strided_slice %371 {offsets = [0, 256], sizes = [8, 128], strides = [1, 1]} : vector<8x384xf32> to vector<8x128xf32>
    %375 = vector.extract_strided_slice %365 {offsets = [0, 384], sizes = [8, 128], strides = [1, 1]} : vector<8x512xf32> to vector<8x128xf32>
    %376 = math.tanh %375 : vector<8x128xf32>
    %377 = arith.mulf %373, %355 : vector<8x128xf32>
    %378 = arith.mulf %372, %376 : vector<8x128xf32>
    %379 = arith.addf %377, %378 : vector<8x128xf32>
    %380 = math.tanh %379 : vector<8x128xf32>
    %381 = arith.mulf %374, %380 : vector<8x128xf32>
    %382 = arith.select %10, %381, %354 : vector<8x128xf32>
    %383 = arith.select %10, %379, %355 : vector<8x128xf32>
    %c0_119 = arith.constant 0 : index
    %c13_120 = arith.constant 13 : index
    %c0_121 = arith.constant 0 : index
    %384 = vector.load %arg8[%c0_119, %c13_120, %c0_121] : memref<8x16x128xf32, #tpu.memory_space<vmem>>, vector<8x1x128xf32>
    %385 = vector.shape_cast %384 : vector<8x1x128xf32> to vector<8x128xf32>
    %386 = vector.shape_cast %382 : vector<8x128xf32> to vector<8x1x128xf32>
    tpu.vector_store %arg8[%c0_119, %c13_120, %c0_121], %386 {strides = array<i32>} : memref<8x16x128xf32, #tpu.memory_space<vmem>>, vector<8x1x128xf32>,
    %c14 = arith.constant 14 : index
    %c0_122 = arith.constant 0 : index
    %c0_123 = arith.constant 0 : index
    %387 = vector.load %arg2[%c14, %c0_122, %c0_123] : memref<16x8x128xbf16, #tpu.memory_space<vmem>>, vector<1x8x128xbf16>
    %388 = vector.shape_cast %387 : vector<1x8x128xbf16> to vector<8x128xbf16>
    %cst_124 = arith.constant dense<0.000000e+00> : vector<8x512xf32>
    %389 = tpu.matmul %388, %3, %cst_124 {dimension_numbers = #tpu.dot_dimension_numbers<[1], [0], [0], [1], [0, 0, 1, 1], [], []>} : vector<8x128xbf16>, vector<128x512xbf16>, vector<8x512xf32> -> vector<8x512xf32>
    %390 = arith.truncf %382 : vector<8x128xf32> to vector<8x128xbf16>
    %cst_125 = arith.constant dense<0.000000e+00> : vector<8x512xf32>
    %391 = tpu.matmul %390, %4, %cst_125 {dimension_numbers = #tpu.dot_dimension_numbers<[1], [0], [0], [1], [0, 0, 1, 1], [], []>} : vector<8x128xbf16>, vector<128x512xbf16>, vector<8x512xf32> -> vector<8x512xf32>
    %392 = arith.addf %389, %391 : vector<8x512xf32>
    %393 = arith.addf %392, %7 : vector<8x512xf32>
    %394 = vector.extract_strided_slice %393 {offsets = [0, 0], sizes = [8, 384], strides = [1, 1]} : vector<8x512xf32> to vector<8x384xf32>
    %395 = arith.negf %394 : vector<8x384xf32>
    %396 = math.exp %395 : vector<8x384xf32>
    %cst_126 = arith.constant 1.000000e+00 : f32
    %397 = vector.broadcast %cst_126 : f32 to vector<8x384xf32>
    %398 = arith.addf %397, %396 : vector<8x384xf32>
    %399 = arith.divf %397, %398 : vector<8x384xf32>
    %400 = vector.extract_strided_slice %399 {offsets = [0, 0], sizes = [8, 128], strides = [1, 1]} : vector<8x384xf32> to vector<8x128xf32>
    %401 = vector.extract_strided_slice %399 {offsets = [0, 128], sizes = [8, 128], strides = [1, 1]} : vector<8x384xf32> to vector<8x128xf32>
    %402 = vector.extract_strided_slice %399 {offsets = [0, 256], sizes = [8, 128], strides = [1, 1]} : vector<8x384xf32> to vector<8x128xf32>
    %403 = vector.extract_strided_slice %393 {offsets = [0, 384], sizes = [8, 128], strides = [1, 1]} : vector<8x512xf32> to vector<8x128xf32>
    %404 = math.tanh %403 : vector<8x128xf32>
    %405 = arith.mulf %401, %383 : vector<8x128xf32>
    %406 = arith.mulf %400, %404 : vector<8x128xf32>
    %407 = arith.addf %405, %406 : vector<8x128xf32>
    %408 = math.tanh %407 : vector<8x128xf32>
    %409 = arith.mulf %402, %408 : vector<8x128xf32>
    %410 = arith.select %10, %409, %382 : vector<8x128xf32>
    %411 = arith.select %10, %407, %383 : vector<8x128xf32>
    %c0_127 = arith.constant 0 : index
    %c14_128 = arith.constant 14 : index
    %c0_129 = arith.constant 0 : index
    %412 = vector.load %arg8[%c0_127, %c14_128, %c0_129] : memref<8x16x128xf32, #tpu.memory_space<vmem>>, vector<8x1x128xf32>
    %413 = vector.shape_cast %412 : vector<8x1x128xf32> to vector<8x128xf32>
    %414 = vector.shape_cast %410 : vector<8x128xf32> to vector<8x1x128xf32>
    tpu.vector_store %arg8[%c0_127, %c14_128, %c0_129], %414 {strides = array<i32>} : memref<8x16x128xf32, #tpu.memory_space<vmem>>, vector<8x1x128xf32>,
    %c15 = arith.constant 15 : index
    %c0_130 = arith.constant 0 : index
    %c0_131 = arith.constant 0 : index
    %415 = vector.load %arg2[%c15, %c0_130, %c0_131] : memref<16x8x128xbf16, #tpu.memory_space<vmem>>, vector<1x8x128xbf16>
    %416 = vector.shape_cast %415 : vector<1x8x128xbf16> to vector<8x128xbf16>
    %cst_132 = arith.constant dense<0.000000e+00> : vector<8x512xf32>
    %417 = tpu.matmul %416, %3, %cst_132 {dimension_numbers = #tpu.dot_dimension_numbers<[1], [0], [0], [1], [0, 0, 1, 1], [], []>} : vector<8x128xbf16>, vector<128x512xbf16>, vector<8x512xf32> -> vector<8x512xf32>
    %418 = arith.truncf %410 : vector<8x128xf32> to vector<8x128xbf16>
    %cst_133 = arith.constant dense<0.000000e+00> : vector<8x512xf32>
    %419 = tpu.matmul %418, %4, %cst_133 {dimension_numbers = #tpu.dot_dimension_numbers<[1], [0], [0], [1], [0, 0, 1, 1], [], []>} : vector<8x128xbf16>, vector<128x512xbf16>, vector<8x512xf32> -> vector<8x512xf32>
    %420 = arith.addf %417, %419 : vector<8x512xf32>
    %421 = arith.addf %420, %7 : vector<8x512xf32>
    %422 = vector.extract_strided_slice %421 {offsets = [0, 0], sizes = [8, 384], strides = [1, 1]} : vector<8x512xf32> to vector<8x384xf32>
    %423 = arith.negf %422 : vector<8x384xf32>
    %424 = math.exp %423 : vector<8x384xf32>
    %cst_134 = arith.constant 1.000000e+00 : f32
    %425 = vector.broadcast %cst_134 : f32 to vector<8x384xf32>
    %426 = arith.addf %425, %424 : vector<8x384xf32>
    %427 = arith.divf %425, %426 : vector<8x384xf32>
    %428 = vector.extract_strided_slice %427 {offsets = [0, 0], sizes = [8, 128], strides = [1, 1]} : vector<8x384xf32> to vector<8x128xf32>
    %429 = vector.extract_strided_slice %427 {offsets = [0, 128], sizes = [8, 128], strides = [1, 1]} : vector<8x384xf32> to vector<8x128xf32>
    %430 = vector.extract_strided_slice %427 {offsets = [0, 256], sizes = [8, 128], strides = [1, 1]} : vector<8x384xf32> to vector<8x128xf32>
    %431 = vector.extract_strided_slice %421 {offsets = [0, 384], sizes = [8, 128], strides = [1, 1]} : vector<8x512xf32> to vector<8x128xf32>
    %432 = math.tanh %431 : vector<8x128xf32>
    %433 = arith.mulf %429, %411 : vector<8x128xf32>
    %434 = arith.mulf %428, %432 : vector<8x128xf32>
    %435 = arith.addf %433, %434 : vector<8x128xf32>
    %436 = math.tanh %435 : vector<8x128xf32>
    %437 = arith.mulf %430, %436 : vector<8x128xf32>
    %438 = arith.select %10, %437, %410 : vector<8x128xf32>
    %439 = arith.select %10, %435, %411 : vector<8x128xf32>
    %c0_135 = arith.constant 0 : index
    %c15_136 = arith.constant 15 : index
    %c0_137 = arith.constant 0 : index
    %440 = vector.load %arg8[%c0_135, %c15_136, %c0_137] : memref<8x16x128xf32, #tpu.memory_space<vmem>>, vector<8x1x128xf32>
    %441 = vector.shape_cast %440 : vector<8x1x128xf32> to vector<8x128xf32>
    %442 = vector.shape_cast %438 : vector<8x128xf32> to vector<8x1x128xf32>
    tpu.vector_store %arg8[%c0_135, %c15_136, %c0_137], %442 {strides = array<i32>} : memref<8x16x128xf32, #tpu.memory_space<vmem>>, vector<8x1x128xf32>,
    %c0_138 = arith.constant 0 : index
    %c0_139 = arith.constant 0 : index
    %443 = vector.load %arg11[%c0_138, %c0_139] : memref<8x128xf32, #tpu.memory_space<vmem>>, vector<8x128xf32>
    tpu.vector_store %arg11[%c0_138, %c0_139], %438 {strides = array<i32>} : memref<8x128xf32, #tpu.memory_space<vmem>>, vector<8x128xf32>,
    %c0_140 = arith.constant 0 : index
    %c0_141 = arith.constant 0 : index
    %444 = vector.load %arg12[%c0_140, %c0_141] : memref<8x128xf32, #tpu.memory_space<vmem>>, vector<8x128xf32>
    tpu.vector_store %arg12[%c0_140, %c0_141], %439 {strides = array<i32>} : memref<8x128xf32, #tpu.memory_space<vmem>>, vector<8x128xf32>,
    %c0_142 = arith.constant 0 : index
    %c0_143 = arith.constant 0 : index
    %445 = vector.load %arg9[%c0_142, %c0_143] : memref<8x128xf32, #tpu.memory_space<vmem>>, vector<8x128xf32>
    tpu.vector_store %arg9[%c0_142, %c0_143], %438 {strides = array<i32>} : memref<8x128xf32, #tpu.memory_space<vmem>>, vector<8x128xf32>,
    %c0_144 = arith.constant 0 : index
    %c0_145 = arith.constant 0 : index
    %446 = vector.load %arg10[%c0_144, %c0_145] : memref<8x128xf32, #tpu.memory_space<vmem>>, vector<8x128xf32>
    tpu.vector_store %arg10[%c0_144, %c0_145], %439 {strides = array<i32>} : memref<8x128xf32, #tpu.memory_space<vmem>>, vector<8x128xf32>,
    return
  }
  func.func @transform_0(%arg0: i32, %arg1: i32) -> (i32, i32, i32) {
    %c0_i32 = arith.constant 0 : i32
    %c0_i32_0 = arith.constant 0 : i32
    return %arg1, %arg0, %c0_i32 : i32, i32, i32
  }
  func.func @transform_1(%arg0: i32, %arg1: i32) -> (i32, i32) {
    %c0_i32 = arith.constant 0 : i32
    %c0_i32_0 = arith.constant 0 : i32
    %c0_i32_1 = arith.constant 0 : i32
    return %c0_i32, %c0_i32_0 : i32, i32
  }
  func.func @transform_2(%arg0: i32, %arg1: i32) -> (i32, i32) {
    %c0_i32 = arith.constant 0 : i32
    %c0_i32_0 = arith.constant 0 : i32
    %c0_i32_1 = arith.constant 0 : i32
    return %c0_i32, %c0_i32_0 : i32, i32
  }
  func.func @transform_3(%arg0: i32, %arg1: i32) -> (i32, i32) {
    %c0_i32 = arith.constant 0 : i32
    %c0_i32_0 = arith.constant 0 : i32
    %c0_i32_1 = arith.constant 0 : i32
    return %c0_i32, %c0_i32_0 : i32, i32
  }
  func.func @transform_4(%arg0: i32, %arg1: i32) -> (i32, i32) {
    %c0_i32 = arith.constant 0 : i32
    %c0_i32_0 = arith.constant 0 : i32
    return %arg0, %c0_i32 : i32, i32
  }
  func.func @transform_5(%arg0: i32, %arg1: i32) -> (i32, i32) {
    %c0_i32 = arith.constant 0 : i32
    %c0_i32_0 = arith.constant 0 : i32
    return %arg0, %c0_i32 : i32, i32
  }
  func.func @transform_6(%arg0: i32, %arg1: i32) -> (i32, i32, i32) {
    %c0_i32 = arith.constant 0 : i32
    %c0_i32_0 = arith.constant 0 : i32
    return %arg0, %arg1, %c0_i32 : i32, i32, i32
  }
  func.func @transform_7(%arg0: i32, %arg1: i32) -> (i32, i32) {
    %c0_i32 = arith.constant 0 : i32
    %c0_i32_0 = arith.constant 0 : i32
    return %arg0, %c0_i32 : i32, i32
  }
  func.func @transform_8(%arg0: i32, %arg1: i32) -> (i32, i32) {
    %c0_i32 = arith.constant 0 : i32
    %c0_i32_0 = arith.constant 0 : i32
    return %arg0, %c0_i32 : i32, i32
  }
}

</mosaic_0001>

<bundles_post_ra>
// kernel: poetry_model_forward.3
= control target key start
LH: loop header
LB: loop body
LE: loop exit
PB: predicated region body
PF: predicated region fallthrough
CT: control target
= control target key end

     0   :  { %v756_v2 = vmov 0   ;;  %s979_s0 = inlined_call_operand.vmem [shape: f32[192,128], index: 0, kind: input, shape index: {}]   ;;  %s980_s1 = inlined_call_operand.vmem [shape: bf16[128,256], index: 1, kind: input, shape index: {}]   ;;  %s981_s2 = inlined_call_operand.vmem [shape: f32[1,256], index: 2, kind: input, shape index: {}]   ;;  %s982_s3 = inlined_call_operand.hbm [shape: f32[192,256], index: 3, kind: output, shape index: {}]  }
   0x1   :  { %v708_v0 = vld [vmem:[%s980_s1 + $0x4] ss:$8 sps:$4 sm:$0xff]   ;;  %v710_v1 = vld [vmem:[%s980_s1] ss:$8 sps:$4 sm:$0xff]   ;;  %280 = vmatprep.mubr.bf16.mxu0 %v756_v2  ;;  %340 = vmatprep.mubr.bf16.mxu1 %v756_v2  ;;  %v711_v3 = vld [vmem:[%s980_s1 + $0x14] ss:$8 sps:$4 sm:$0xff]  }
   0x2   :  { %248 = vmatprep.subr.bf16.mxu0 %v708_v0  ;;  %688 = vmatprep.subr.bf16.mxu1 %v708_v0  ;;  %v713_v4 = vld [vmem:[%s980_s1 + $0x10] ss:$8 sps:$4 sm:$0xff]   ;;  %v714_v5 = vld [vmem:[%s980_s1 + $0x24] ss:$8 sps:$4 sm:$0xff]   ;;  %v716_v6 = vld [vmem:[%s980_s1 + $0x20] ss:$8 sps:$4 sm:$0xff]  }
   0x3   :  { %249 = vmatpush1.bf16.msra.mxu0 %v710_v1  ;;  %696 = vmatpush1.bf16.msra.mxu1 %v710_v1  ;;  %v717_v7 = vld [vmem:[%s980_s1 + $0x34] ss:$8 sps:$4 sm:$0xff]   ;;  %v719_v8 = vld [vmem:[%s980_s1 + $0x30] ss:$8 sps:$4 sm:$0xff]   ;;  %v720_v9 = vld [vmem:[%s980_s1 + $0x44] ss:$8 sps:$4 sm:$0xff]  }
   0x4   :  { %250 = vmatprep.subr.bf16.mxu0 %v711_v3  ;;  %689 = vmatprep.subr.bf16.mxu1 %v711_v3  ;;  %v722_v10 = vld [vmem:[%s980_s1 + $0x40] ss:$8 sps:$4 sm:$0xff]   ;;  %v723_v11 = vld [vmem:[%s980_s1 + $0x54] ss:$8 sps:$4 sm:$0xff]  }
   0x7   :  { %251 = vmatpush1.bf16.msra.mxu0 %v713_v4  ;;  %697 = vmatpush1.bf16.msra.mxu1 %v713_v4 }
   0x8   :  { %252 = vmatprep.subr.bf16.mxu0 %v714_v5  ;;  %690 = vmatprep.subr.bf16.mxu1 %v714_v5 }
   0xb   :  { %253 = vmatpush1.bf16.msra.mxu0 %v716_v6  ;;  %698 = vmatpush1.bf16.msra.mxu1 %v716_v6 }
   0xc   :  { %254 = vmatprep.subr.bf16.mxu0 %v717_v7  ;;  %691 = vmatprep.subr.bf16.mxu1 %v717_v7 }
   0xf   :  { %255 = vmatpush1.bf16.msra.mxu0 %v719_v8  ;;  %699 = vmatpush1.bf16.msra.mxu1 %v719_v8 }
  0x10   :  { %256 = vmatprep.subr.bf16.mxu0 %v720_v9  ;;  %692 = vmatprep.subr.bf16.mxu1 %v720_v9 }
  0x11   :  { %8 = vsyncpa [#allocation4], 0  ;;  %v725_v12 = vld [vmem:[%s980_s1 + $0x50] ss:$8 sps:$4 sm:$0xff]   ;;  %v726_v13 = vld [vmem:[%s980_s1 + $0x64] ss:$8 sps:$4 sm:$0xff]   ;;  %v550_v53 = vlaneseq }
  0x12   :  { %v728_v14 = vld [vmem:[%s980_s1 + $0x60] ss:$8 sps:$4 sm:$0xff]   ;;  %v729_v15 = vld [vmem:[%s980_s1 + $0x74] ss:$8 sps:$4 sm:$0xff]   ;;  %v731_v16 = vld [vmem:[%s980_s1 + $0x70] ss:$8 sps:$4 sm:$0xff]  }
  0x13   :  { %257 = vmatpush1.bf16.msra.mxu0 %v722_v10  ;;  %700 = vmatpush1.bf16.msra.mxu1 %v722_v10  ;;  %v116_v17 = vld [vmem:[%s979_s0] sm:$0xff]  ;;  %v117_v18 = vld [vmem:[%s979_s0 + $0x8] sm:$0xff]  ;;  %v118_v23 = vld [vmem:[%s979_s0 + $0x10] sm:$0xff]  ;;  %v551_v54 = vshrl.u32 %v550_v53, 7 }
  0x14   :  { %258 = vmatprep.subr.bf16.mxu0 %v723_v11  ;;  %693 = vmatprep.subr.bf16.mxu1 %v723_v11  ;;  %v128_v19 = vld [vmem:[%s979_s0 + $0x60] sm:$0xff]  ;;  %v129_v20 = vld [vmem:[%s979_s0 + $0x68] sm:$0xff]  ;;  %v140_v21 = vpack.c.bf16 %v117_v18, %v116_v17  ;;  %v119_v24 = vld [vmem:[%s979_s0 + $0x18] sm:$0xff] }
  0x15   :  { %v146_v22 = vpack.c.bf16 %v129_v20, %v128_v19  ;;  %v130_v25 = vld [vmem:[%s979_s0 + $0x70] sm:$0xff]  ;;  %v131_v26 = vld [vmem:[%s979_s0 + $0x78] sm:$0xff]  ;;  %v141_v27 = vpack.c.bf16 %v119_v24, %v118_v23  ;;  %v120_v29 = vld [vmem:[%s979_s0 + $0x20] sm:$0xff]  ;;  %v552_v55 = vsub.s32 0, %v551_v54  ;;  %v556_v57 = vsub.s32 1, %v551_v54 }
  0x16   :  { %v147_v28 = vpack.c.bf16 %v131_v26, %v130_v25  ;;  %v121_v30 = vld [vmem:[%s979_s0 + $0x28] sm:$0xff]  ;;  %v132_v31 = vld [vmem:[%s979_s0 + $0x80] sm:$0xff]  ;;  %v122_v35 = vld [vmem:[%s979_s0 + $0x30] sm:$0xff] }
  0x17   :  { %259 = vmatpush1.bf16.msra.mxu0 %v725_v12  ;;  %701 = vmatpush1.bf16.msra.mxu1 %v725_v12  ;;  %v133_v32 = vld [vmem:[%s979_s0 + $0x88] sm:$0xff]  ;;  %v142_v33 = vpack.c.bf16 %v121_v30, %v120_v29  ;;  %v123_v36 = vld [vmem:[%s979_s0 + $0x38] sm:$0xff]  ;;  %v134_v37 = vld [vmem:[%s979_s0 + $0x90] sm:$0xff] }
  0x18   :  { %260 = vmatprep.subr.bf16.mxu0 %v726_v13  ;;  %694 = vmatprep.subr.bf16.mxu1 %v726_v13  ;;  %v148_v34 = vpack.c.bf16 %v133_v32, %v132_v31  ;;  %v135_v38 = vld [vmem:[%s979_s0 + $0x98] sm:$0xff]  ;;  %v143_v39 = vpack.c.bf16 %v123_v36, %v122_v35  ;;  %v124_v41 = vld [vmem:[%s979_s0 + $0x40] sm:$0xff]  ;;  %v125_v42 = vld [vmem:[%s979_s0 + $0x48] sm:$0xff] }
  0x19   :  { %v149_v40 = vpack.c.bf16 %v135_v38, %v134_v37  ;;  %v136_v43 = vld [vmem:[%s979_s0 + $0xa0] sm:$0xff]  ;;  %v137_v44 = vld [vmem:[%s979_s0 + $0xa8] sm:$0xff]  ;;  %v144_v45 = vpack.c.bf16 %v125_v42, %v124_v41  ;;  %v126_v47 = vld [vmem:[%s979_s0 + $0x50] sm:$0xff] }
  0x1a   :  { %v150_v46 = vpack.c.bf16 %v137_v44, %v136_v43  ;;  %v127_v48 = vld [vmem:[%s979_s0 + $0x58] sm:$0xff]  ;;  %v138_v49 = vld [vmem:[%s979_s0 + $0xb0] sm:$0xff]  ;;  %v548_v56 = vld [vmem:[%s981_s2] sm:$0x3] }
  0x1b   :  { %261 = vmatpush1.bf16.msra.mxu0 %v728_v14  ;;  %702 = vmatpush1.bf16.msra.mxu1 %v728_v14  ;;  %v139_v50 = vld [vmem:[%s979_s0 + $0xb8] sm:$0xff]  ;;  %v145_v51 = vpack.c.bf16 %v127_v48, %v126_v47  ;;  %v915_v58 = vrot.slane %v548_v56, %v552_v55  ;;  %v917_v59 = vrot.slane %v548_v56, %v556_v57  ;;  %s757_s0 = smov [#allocation3]  }
  0x1c   :  { %262 = vmatprep.subr.bf16.mxu0 %v729_v15  ;;  %695 = vmatprep.subr.bf16.mxu1 %v729_v15  ;;  %v151_v52 = vpack.c.bf16 %v139_v50, %v138_v49  ;;  %s661_s2 = sshll.u32 %s757_s0, 4  ;;  %s662_s2 = int_to_ptr.vmem [resolvable:$true] %s661_s2 }
  0x1d   :  { %s732_s11 = scalar_lea.vmem %s662_s2, 6144  ;;  %p737_p1 = scmp.lt.s32.totalorder %s662_s2, %s662_s2 }
  0x1e   :  { %p733_p0 = scmp.ne.s32.totalorder %s662_s2, %s732_s11  ;;  %p738_p2 = scmp.lt.s32.totalorder %s732_s11, %s732_s11 }
  0x1f   :  { %263 = vmatpush1.bf16.msra.mxu0 %v731_v16  ;;  %703 = vmatpush1.bf16.msra.mxu1 %v731_v16 }
  0x20   :  { %p739_p3 = por %p738_p2, %p737_p1 }
  0x22   :  { %281 = vmatmul.mubr.bf16.vlgmr.msra.gmra.mrb[0].mxu0 %v140_v21  ;;  %341 = vmatmul.mubr.bf16.vlgmr.msra.gmra.mrb[0].mxu1 %v146_v22  ;;  %p740_p4 = pnand %p739_p3, %p733_p0 }
  0x23   :  { %290 = vmatprep.mubr.bf16.mxu0 %v756_v2  ;;  %350 = vmatprep.mubr.bf16.mxu1 %v756_v2 }
  0x2a   :  { %291 = vmatmul.mubr.bf16.gmra.mrb[4].mxu0 %v141_v27  ;;  %351 = vmatmul.mubr.bf16.gmra.mrb[4].mxu1 %v147_v28 }
  0x2b   :  { %300 = vmatprep.mubr.bf16.mxu0 %v756_v2  ;;  %360 = vmatprep.mubr.bf16.mxu1 %v756_v2 }
  0x32   :  { %301 = vmatmul.mubr.bf16.gmra.mrb[8].mxu0 %v142_v33  ;;  %361 = vmatmul.mubr.bf16.gmra.mrb[8].mxu1 %v148_v34 }
  0x33   :  { %310 = vmatprep.mubr.bf16.mxu0 %v756_v2  ;;  %370 = vmatprep.mubr.bf16.mxu1 %v756_v2 }
  0x3a   :  { %311 = vmatmul.mubr.bf16.gmra.mrb[12].mxu0 %v143_v39  ;;  %371 = vmatmul.mubr.bf16.gmra.mrb[12].mxu1 %v149_v40 }
  0x3b   :  { %320 = vmatprep.mubr.bf16.mxu0 %v756_v2  ;;  %380 = vmatprep.mubr.bf16.mxu1 %v756_v2 }
  0x42   :  { %321 = vmatmul.mubr.bf16.gmra.mrb[16].mxu0 %v144_v45  ;;  %381 = vmatmul.mubr.bf16.gmra.mrb[16].mxu1 %v150_v46 }
  0x43   :  { %330 = vmatprep.mubr.bf16.mxu0 %v756_v2  ;;  %390 = vmatprep.mubr.bf16.mxu1 %v756_v2 }
  0x4a   :  { %331 = vmatmul.mubr.bf16.gmra.mrb[20].mxu0 %v145_v51  ;;  %391 = vmatmul.mubr.bf16.gmra.mrb[20].mxu1 %v151_v52 }
  0xf5   :  { %v282_v60 = vpop.f32.mrb[0].mxu0  ;;  %v342_v61 = vpop.f32.mrb[0].mxu1 }
  0xf6   :  { %v560_v62 = vadd.f32 %v915_v58, %v282_v60  ;;  %v584_v63 = vadd.f32 %v915_v58, %v342_v61  ;;  %v284_v0 = vpop.f32.mrb[1].mxu0  ;;  %v344_v1 = vpop.f32.mrb[1].mxu1 }
  0xf7   :  { %v561_v2 = vadd.f32 %v917_v59, %v284_v0  ;;  %v585_v3 = vadd.f32 %v917_v59, %v344_v1  ;;  %v286_v4 = vpop.f32.mrb[2].mxu0  ;;  %v346_v5 = vpop.f32.mrb[2].mxu1 }
  0xf8   :  { %608 = vst [vmem:[#allocation3] sm:$0xff] %v560_v62  ;;  %632 = vst [vmem:[#allocation3 + $0xc0] sm:$0xff] %v584_v63  ;;  %v562_v6 = vadd.f32 %v915_v58, %v286_v4  ;;  %v586_v7 = vadd.f32 %v915_v58, %v346_v5  ;;  %v288_v8 = vpop.f32.mrb[3].mxu0  ;;  %v348_v9 = vpop.f32.mrb[3].mxu1 }
  0xf9   :  { %609 = vst [vmem:[#allocation3 + $0x8] sm:$0xff] %v561_v2  ;;  %633 = vst [vmem:[#allocation3 + $0xc8] sm:$0xff] %v585_v3  ;;  %v563_v10 = vadd.f32 %v917_v59, %v288_v8  ;;  %v587_v11 = vadd.f32 %v917_v59, %v348_v9 }
  0xfa   :  { %610 = vst [vmem:[#allocation3 + $0x10] sm:$0xff] %v562_v6  ;;  %634 = vst [vmem:[#allocation3 + $0xd0] sm:$0xff] %v586_v7 }
  0xfb   :  { %611 = vst [vmem:[#allocation3 + $0x18] sm:$0xff] %v563_v10  ;;  %635 = vst [vmem:[#allocation3 + $0xd8] sm:$0xff] %v587_v11 }
  0xfd   :  { %v292_v12 = vpop.f32.mrb[4].mxu0  ;;  %v352_v13 = vpop.f32.mrb[4].mxu1 }
  0xfe   :  { %v564_v14 = vadd.f32 %v915_v58, %v292_v12  ;;  %v588_v15 = vadd.f32 %v915_v58, %v352_v13  ;;  %v294_v16 = vpop.f32.mrb[5].mxu0  ;;  %v354_v17 = vpop.f32.mrb[5].mxu1 }
  0xff   :  { %v565_v18 = vadd.f32 %v917_v59, %v294_v16  ;;  %v589_v19 = vadd.f32 %v917_v59, %v354_v17  ;;  %v296_v20 = vpop.f32.mrb[6].mxu0  ;;  %v356_v21 = vpop.f32.mrb[6].mxu1 }
 0x100   :  { %612 = vst [vmem:[#allocation3 + $0x20] sm:$0xff] %v564_v14  ;;  %636 = vst [vmem:[#allocation3 + $0xe0] sm:$0xff] %v588_v15  ;;  %v566_v22 = vadd.f32 %v915_v58, %v296_v20  ;;  %v590_v23 = vadd.f32 %v915_v58, %v356_v21  ;;  %v298_v24 = vpop.f32.mrb[7].mxu0  ;;  %v358_v25 = vpop.f32.mrb[7].mxu1 }
 0x101   :  { %613 = vst [vmem:[#allocation3 + $0x28] sm:$0xff] %v565_v18  ;;  %637 = vst [vmem:[#allocation3 + $0xe8] sm:$0xff] %v589_v19  ;;  %v567_v26 = vadd.f32 %v917_v59, %v298_v24  ;;  %v591_v27 = vadd.f32 %v917_v59, %v358_v25 }
 0x102   :  { %614 = vst [vmem:[#allocation3 + $0x30] sm:$0xff] %v566_v22  ;;  %638 = vst [vmem:[#allocation3 + $0xf0] sm:$0xff] %v590_v23 }
 0x103   :  { %615 = vst [vmem:[#allocation3 + $0x38] sm:$0xff] %v567_v26  ;;  %639 = vst [vmem:[#allocation3 + $0xf8] sm:$0xff] %v591_v27 }
 0x105   :  { %v302_v28 = vpop.f32.mrb[8].mxu0  ;;  %v362_v29 = vpop.f32.mrb[8].mxu1 }
 0x106   :  { %v568_v30 = vadd.f32 %v915_v58, %v302_v28  ;;  %v592_v31 = vadd.f32 %v915_v58, %v362_v29  ;;  %v304_v32 = vpop.f32.mrb[9].mxu0  ;;  %v364_v33 = vpop.f32.mrb[9].mxu1 }
 0x107   :  { %v569_v34 = vadd.f32 %v917_v59, %v304_v32  ;;  %v593_v35 = vadd.f32 %v917_v59, %v364_v33  ;;  %v306_v36 = vpop.f32.mrb[10].mxu0  ;;  %v366_v37 = vpop.f32.mrb[10].mxu1 }
 0x108   :  { %616 = vst [vmem:[#allocation3 + $0x40] sm:$0xff] %v568_v30  ;;  %640 = vst [vmem:[#allocation3 + $0x100] sm:$0xff] %v592_v31  ;;  %v570_v38 = vadd.f32 %v915_v58, %v306_v36  ;;  %v594_v39 = vadd.f32 %v915_v58, %v366_v37  ;;  %v308_v40 = vpop.f32.mrb[11].mxu0  ;;  %v368_v41 = vpop.f32.mrb[11].mxu1 }
 0x109   :  { %617 = vst [vmem:[#allocation3 + $0x48] sm:$0xff] %v569_v34  ;;  %641 = vst [vmem:[#allocation3 + $0x108] sm:$0xff] %v593_v35  ;;  %v571_v42 = vadd.f32 %v917_v59, %v308_v40  ;;  %v595_v43 = vadd.f32 %v917_v59, %v368_v41 }
 0x10a   :  { %618 = vst [vmem:[#allocation3 + $0x50] sm:$0xff] %v570_v38  ;;  %642 = vst [vmem:[#allocation3 + $0x110] sm:$0xff] %v594_v39 }
 0x10b   :  { %619 = vst [vmem:[#allocation3 + $0x58] sm:$0xff] %v571_v42  ;;  %643 = vst [vmem:[#allocation3 + $0x118] sm:$0xff] %v595_v43 }
 0x10d   :  { %v312_v44 = vpop.f32.mrb[12].mxu0  ;;  %v372_v45 = vpop.f32.mrb[12].mxu1 }
 0x10e   :  { %v572_v46 = vadd.f32 %v915_v58, %v312_v44  ;;  %v596_v47 = vadd.f32 %v915_v58, %v372_v45  ;;  %v314_v48 = vpop.f32.mrb[13].mxu0  ;;  %v374_v49 = vpop.f32.mrb[13].mxu1 }
 0x10f   :  { %v573_v50 = vadd.f32 %v917_v59, %v314_v48  ;;  %v597_v51 = vadd.f32 %v917_v59, %v374_v49  ;;  %v316_v52 = vpop.f32.mrb[14].mxu0  ;;  %v376_v53 = vpop.f32.mrb[14].mxu1 }
 0x110   :  { %620 = vst [vmem:[#allocation3 + $0x60] sm:$0xff] %v572_v46  ;;  %644 = vst [vmem:[#allocation3 + $0x120] sm:$0xff] %v596_v47  ;;  %v574_v54 = vadd.f32 %v915_v58, %v316_v52  ;;  %v598_v55 = vadd.f32 %v915_v58, %v376_v53  ;;  %v318_v56 = vpop.f32.mrb[15].mxu0  ;;  %v378_v57 = vpop.f32.mrb[15].mxu1 }
 0x111   :  { %621 = vst [vmem:[#allocation3 + $0x68] sm:$0xff] %v573_v50  ;;  %645 = vst [vmem:[#allocation3 + $0x128] sm:$0xff] %v597_v51  ;;  %v575_v60 = vadd.f32 %v917_v59, %v318_v56  ;;  %v599_v61 = vadd.f32 %v917_v59, %v378_v57 }
 0x112   :  { %622 = vst [vmem:[#allocation3 + $0x70] sm:$0xff] %v574_v54  ;;  %646 = vst [vmem:[#allocation3 + $0x130] sm:$0xff] %v598_v55 }
 0x113   :  { %623 = vst [vmem:[#allocation3 + $0x78] sm:$0xff] %v575_v60  ;;  %647 = vst [vmem:[#allocation3 + $0x138] sm:$0xff] %v599_v61 }
 0x115   :  { %v322_v62 = vpop.f32.mrb[16].mxu0  ;;  %v382_v63 = vpop.f32.mrb[16].mxu1 }
 0x116   :  { %v576_v0 = vadd.f32 %v915_v58, %v322_v62  ;;  %v600_v1 = vadd.f32 %v915_v58, %v382_v63  ;;  %v324_v2 = vpop.f32.mrb[17].mxu0  ;;  %v384_v3 = vpop.f32.mrb[17].mxu1 }
 0x117   :  { %v577_v4 = vadd.f32 %v917_v59, %v324_v2  ;;  %v601_v5 = vadd.f32 %v917_v59, %v384_v3  ;;  %v326_v6 = vpop.f32.mrb[18].mxu0  ;;  %v386_v7 = vpop.f32.mrb[18].mxu1 }
 0x118   :  { %624 = vst [vmem:[#allocation3 + $0x80] sm:$0xff] %v576_v0  ;;  %648 = vst [vmem:[#allocation3 + $0x140] sm:$0xff] %v600_v1  ;;  %v578_v8 = vadd.f32 %v915_v58, %v326_v6  ;;  %v602_v9 = vadd.f32 %v915_v58, %v386_v7  ;;  %v328_v10 = vpop.f32.mrb[19].mxu0  ;;  %v388_v11 = vpop.f32.mrb[19].mxu1 }
 0x119   :  { %625 = vst [vmem:[#allocation3 + $0x88] sm:$0xff] %v577_v4  ;;  %649 = vst [vmem:[#allocation3 + $0x148] sm:$0xff] %v601_v5  ;;  %v579_v12 = vadd.f32 %v917_v59, %v328_v10  ;;  %v603_v13 = vadd.f32 %v917_v59, %v388_v11 }
 0x11a   :  { %626 = vst [vmem:[#allocation3 + $0x90] sm:$0xff] %v578_v8  ;;  %650 = vst [vmem:[#allocation3 + $0x150] sm:$0xff] %v602_v9 }
 0x11b   :  { %627 = vst [vmem:[#allocation3 + $0x98] sm:$0xff] %v579_v12  ;;  %651 = vst [vmem:[#allocation3 + $0x158] sm:$0xff] %v603_v13 }
 0x11d   :  { %v332_v14 = vpop.f32.mrb[20].mxu0  ;;  %v392_v15 = vpop.f32.mrb[20].mxu1 }
 0x11e   :  { %v580_v16 = vadd.f32 %v915_v58, %v332_v14  ;;  %v604_v17 = vadd.f32 %v915_v58, %v392_v15  ;;  %v334_v18 = vpop.f32.mrb[21].mxu0  ;;  %v394_v19 = vpop.f32.mrb[21].mxu1 }
 0x11f   :  { %v581_v20 = vadd.f32 %v917_v59, %v334_v18  ;;  %v605_v21 = vadd.f32 %v917_v59, %v394_v19  ;;  %v336_v22 = vpop.f32.mrb[22].mxu0  ;;  %v396_v23 = vpop.f32.mrb[22].mxu1 }
 0x120   :  { %628 = vst [vmem:[#allocation3 + $0xa0] sm:$0xff] %v580_v16  ;;  %652 = vst [vmem:[#allocation3 + $0x160] sm:$0xff] %v604_v17  ;;  %v582_v24 = vadd.f32 %v915_v58, %v336_v22  ;;  %v606_v25 = vadd.f32 %v915_v58, %v396_v23  ;;  %v338_v26 = vpop.f32.mrb[23].mxu0  ;;  %v398_v27 = vpop.f32.mrb[23].mxu1 }
 0x121   :  { %629 = vst [vmem:[#allocation3 + $0xa8] sm:$0xff] %v581_v20  ;;  %653 = vst [vmem:[#allocation3 + $0x168] sm:$0xff] %v605_v21  ;;  %v583_v28 = vadd.f32 %v917_v59, %v338_v26  ;;  %v607_v29 = vadd.f32 %v917_v59, %v398_v27 }
 0x122   :  { %630 = vst [vmem:[#allocation3 + $0xb0] sm:$0xff] %v582_v24  ;;  %654 = vst [vmem:[#allocation3 + $0x170] sm:$0xff] %v606_v25 }
 0x123   :  { %631 = vst [vmem:[#allocation3 + $0xb8] sm:$0xff] %v583_v28  ;;  %655 = vst [vmem:[#allocation3 + $0x178] sm:$0xff] %v607_v29 }
 0x124   :  { %743 = shalt.err (!%p740_p4)
}
 0x125   :  { %s744_s14 = scalar_lea.hbm %s982_s3, 6144 }
 0x126   :  { %p745_p5 = scmp.ne.s32.totalorder %s982_s3, %s744_s14  ;;  %p748_p6 = scmp.lt.u32.totalorder %s744_s14, %s982_s3 }
 0x128   :  { %p750_p7 = pnand %p748_p6, %p745_p5 }
 0x12a   :  { %753 = shalt.err (!%p750_p7)
}
 0x12b   :  { %s758_s19 = smov 256   ;;  %s759_s20 = smov 16  }
 0x12c   :  { %667 = dma.vmem_to_hbm [thread:$0]  %s662_s2, 6144, %s982_s3, [#allocation4], %s758_s19, %s758_s19, %s759_s20  }
 0x12d   :  { %754 = dma.done.wait [#allocation4], 6144  }
 0x12e   :  { %755 = vsyncadd [#allocation4], 4294961152 }
 0x12f   :  { %671 = vsyncpa [#allocation4], 1 }

// kernel: poetry_model_forward.2
= control target key start
LH: loop header
LB: loop body
LE: loop exit
PB: predicated region body
PF: predicated region fallthrough
CT: control target
= control target key end

     0   :  { %14 = vsyncpa [#allocation6], 0  ;;  %s9170_s0 = inlined_call_operand.vmem [shape: bf16[32,8,128], index: 0, kind: input, shape index: {}]   ;;  %s9171_s1 = inlined_call_operand.vmem [shape: bf16[128,512], index: 1, kind: input, shape index: {}]   ;;  %s9172_s2 = inlined_call_operand.vmem [shape: bf16[128,512], index: 2, kind: input, shape index: {}]   ;;  %s9173_s3 = inlined_call_operand.vmem [shape: f32[1,512], index: 3, kind: input, shape index: {}]   ;;  %s9174_s4 = inlined_call_operand.vmem [shape: f32[8,128], index: 4, kind: input, shape index: {}, may-alias: {4,5}]   ;;  %s9175_s5 = inlined_call_operand.vmem [shape: f32[8,128], index: 5, kind: input, shape index: {}, may-alias: {4,5}]   ;;  %s9176_s6 = inlined_call_operand.vmem [shape: f32[8,32,128], index: 6, kind: output, shape index: {0}]   ;;  %s9177_s7 = inlined_call_operand.hbm [shape: f32[8,128], index: 7, kind: output, shape index: {1}]   ;;  %s9178_s8 = inlined_call_operand.hbm [shape: f32[8,128], index: 8, kind: output, shape index: {2}]  }
   0x1   :  { %15 = vsyncpa [#allocation8], 0  ;;  %s6201_s27 = smov 0   ;;  %s6203_s28 = smov 0  }
   0x2   :  { %s6205_s29 = smov 0   ;;  %s6207_s30 = smov 0  }
   0x3   :  { %s6209_s9 = smov 0  }
   0x4 LB: > { %s5240_s10 = sadd.s32 4294967295, %s6150_s9   ;;  %s30_s11 = sadd.s32 1, %s6146_s30  ;;  %s6150_s9 = sphi %s6209_s9, %s21_s9   ;;  %s6146_s30 = sphi %s6207_s30, %s9851_s30   ;;  %s6142_s29 = sphi %s6205_s29, %s9850_s29   ;;  %s6138_s28 = sphi %s6203_s28, %s9849_s28   ;;  %s6134_s27 = sphi %s6201_s27, %s9848_s27  }
   0x5   : > { %p31_p0 = scmp.ge.s32.totalorder %s30_s11, 2  ;;  %s185_s12 = sadd.s32 1, %s6138_s28 }
   0x6   : > { %p195_p1 = scmp.ne.s32.totalorder %s6138_s28, %s6134_s27  ;;  %p6228_p2 = scmp.eq.s32.totalorder %s5240_s10, 1 }
   0x7   : > { %s9853_s11 = smov (%p31_p0, %s30_s11), 0  ;;  %p5246_p4 = scmp.ge.s32.totalorder %s6150_s9, 1 }
   0x8   : > { %p6236_p3 = por %p6228_p2, %p195_p1  ;;  %s181_s15 = ssub.s32 %s6146_s30, %s9853_s11 }
   0x9   : > { %p307_p5 = scmp.lt.s32.totalorder %s6150_s9, 3  ;;  %p183_p6 = scmp.eq.s32.totalorder %s181_s15, 0 }
   0xb   : > { %p308_p7 = pnand %p5246_p4, %p307_p5 }
   0xc   : > { %s6245_s16 = scalar_select %p183_p6, %s6138_s28, %s185_s12  }
   0xd   : > { %311 = sbr.rel (%p308_p7) target bundleno = 4842 (0x12ea), region = 44 }
  0x14   : > { %s344_s17 = sand.u32 1, %s6134_s27   ;;  %s6248_s18 = sshll.u32 %s6142_s29, 4 }
  0x15   : > { %s5247_s19 = sshll.u32 %s344_s17, 7  ;;  %p352_p8 = scmp.lt.s32.totalorder %s6248_s18, 31 }
  0x16   : > { %s6257_s25 = scalar_lea.vmem [#allocation4], %s5247_s19  ;;  %p5250_p9 = scmp.ne.s32.totalorder %s6142_s29, 0 }
  0x17   : > { %s353_s20 = scalar_select %p352_p8, %s6248_s18, 31 }
  0x18   : > { %374 = sbr.rel (%p5250_p9) target bundleno = 31 (0x1f), region = 48  ;;  %v375_v0 = vld [vmem:[%s9174_s4] sm:$0xff] (!%p5250_p9) }
  0x19   : > { %s5249_s21 = sshll.u32 %s353_s20, 2  ;;  %v377_v1 = vld [vmem:[%s9175_s5] sm:$0xff] (!%p5250_p9)  ;;  %376 = vst [vmem:[#allocation2] sm:$0xff] (!%p5250_p9), %v375_v0 }
  0x1a   : > { %s6255_s24 = scalar_lea.vmem %s9170_s0, %s5249_s21  ;;  %378 = vst [vmem:[#allocation3] sm:$0xff] (!%p5250_p9), %v377_v1 }
  0x1f PF: > { %v6269_v2 = vld [vmem:[%s9172_s2 + $0x4] ss:$16 sps:$4 sm:$0xff]   ;;  %v6274_v3 = vld [vmem:[%s9172_s2 + $0xc] ss:$16 sps:$4 sm:$0xff]   ;;  %v9179_v4 = vmov 0   ;;  %p467_p10 = scmp.lt.s32.totalorder %s6142_s29, 1  ;;  %s9077_s12 = scalar_lea.vmem (%p6236_p3), %s9176_s6, %s6248_s18 }
  0x20   : > { %662 = vmatprep.mubr.bf16.mxu0 %v9179_v4  ;;  %703 = vmatprep.mubr.bf16.mxu1 %v9179_v4  ;;  %v6282_v5 = vld [vmem:[%s9172_s2] ss:$16 sps:$4 sm:$0xff]   ;;  %v6287_v6 = vld [vmem:[%s9172_s2 + $0x8] ss:$16 sps:$4 sm:$0xff]   ;;  %v6293_v7 = vld [vmem:[%s9172_s2 + $0x24] ss:$16 sps:$4 sm:$0xff]  }
  0x21   : > { %630 = vmatprep.subr.bf16.mxu0 %v6269_v2  ;;  %671 = vmatprep.subr.bf16.mxu1 %v6274_v3  ;;  %v6300_v8 = vld [vmem:[%s9172_s2 + $0x2c] ss:$16 sps:$4 sm:$0xff]   ;;  %v6305_v9 = vld [vmem:[%s9172_s2 + $0x20] ss:$16 sps:$4 sm:$0xff]   ;;  %v6311_v10 = vld [vmem:[%s9172_s2 + $0x28] ss:$16 sps:$4 sm:$0xff]  }
  0x22   : > { %631 = vmatpush1.bf16.msra.mxu0 %v6282_v5  ;;  %672 = vmatpush1.bf16.msra.mxu1 %v6287_v6  ;;  %9452 = vst [vmem:[#allocation11_spill] sm:$0xff] %v6300_v8  ;;  %9453 = vst [vmem:[#allocation12_spill] sm:$0xff] %v6305_v9  ;;  %v6317_v11 = vld [vmem:[%s9172_s2 + $0x44] ss:$16 sps:$4 sm:$0xff]   ;;  %v6322_v12 = vld [vmem:[%s9172_s2 + $0x4c] ss:$16 sps:$4 sm:$0xff]  }
  0x23   : > { %632 = vmatprep.subr.bf16.mxu0 %v6293_v7  ;;  %9454 = vst [vmem:[#allocation13_spill] sm:$0xff] %v6311_v10  ;;  %673 = vmatprep.subr.bf16.mxu1 %v6300_v8  ;;  %9455 = vst [vmem:[#allocation14_spill] sm:$0xff] %v6317_v11  ;;  %v6327_v13 = vld [vmem:[%s9172_s2 + $0x40] ss:$16 sps:$4 sm:$0xff]   ;;  %v6332_v14 = vld [vmem:[%s9172_s2 + $0x48] ss:$16 sps:$4 sm:$0xff]  }
  0x24   : > { %9456 = vst [vmem:[#allocation15_spill] sm:$0xff] %v6322_v12  ;;  %9457 = vst [vmem:[#allocation16_spill] sm:$0xff] %v6327_v13  ;;  %v6339_v15 = vld [vmem:[%s9172_s2 + $0x64] ss:$16 sps:$4 sm:$0xff]   ;;  %v6346_v16 = vld [vmem:[%s9172_s2 + $0x6c] ss:$16 sps:$4 sm:$0xff]  }
  0x25   : > { %9458 = vst [vmem:[#allocation17_spill] sm:$0xff] %v6332_v14  ;;  %9459 = vst [vmem:[#allocation18_spill] sm:$0xff] %v6339_v15  ;;  %v6351_v17 = vld [vmem:[%s9172_s2 + $0x60] ss:$16 sps:$4 sm:$0xff]   ;;  %v6358_v18 = vld [vmem:[%s9172_s2 + $0x68] ss:$16 sps:$4 sm:$0xff]  }
  0x26   : > { %633 = vmatpush1.bf16.msra.mxu0 %v6305_v9  ;;  %674 = vmatpush1.bf16.msra.mxu1 %v6311_v10  ;;  %9460 = vst [vmem:[#allocation19_spill] sm:$0xff] %v6346_v16  ;;  %9461 = vst [vmem:[#allocation20_spill] sm:$0xff] %v6351_v17  ;;  %v6363_v19 = vld [vmem:[%s9172_s2 + $0x84] ss:$16 sps:$4 sm:$0xff]   ;;  %v6370_v20 = vld [vmem:[%s9172_s2 + $0x8c] ss:$16 sps:$4 sm:$0xff]  }
  0x27   : > { %634 = vmatprep.subr.bf16.mxu0 %v6317_v11  ;;  %675 = vmatprep.subr.bf16.mxu1 %v6322_v12  ;;  %9462 = vst [vmem:[#allocation21_spill] sm:$0xff] %v6358_v18  ;;  %9463 = vst [vmem:[#allocation22_spill] sm:$0xff] %v6363_v19  ;;  %v6375_v21 = vld [vmem:[%s9172_s2 + $0x80] ss:$16 sps:$4 sm:$0xff]   ;;  %v6380_v22 = vld [vmem:[%s9172_s2 + $0x88] ss:$16 sps:$4 sm:$0xff]  }
  0x28   : > { %9464 = vst [vmem:[#allocation23_spill] sm:$0xff] %v6370_v20  ;;  %9465 = vst [vmem:[#allocation24_spill] sm:$0xff] %v6375_v21  ;;  %v6387_v23 = vld [vmem:[%s9172_s2 + $0xa4] ss:$16 sps:$4 sm:$0xff]   ;;  %v6394_v24 = vld [vmem:[%s9172_s2 + $0xac] ss:$16 sps:$4 sm:$0xff]  }
  0x29   : > { %9466 = vst [vmem:[#allocation25_spill] sm:$0xff] %v6380_v22  ;;  %9467 = vst [vmem:[#allocation26_spill] sm:$0xff] %v6387_v23  ;;  %v6401_v25 = vld [vmem:[%s9172_s2 + $0xa0] ss:$16 sps:$4 sm:$0xff]   ;;  %v6406_v26 = vld [vmem:[%s9172_s2 + $0xa8] ss:$16 sps:$4 sm:$0xff]  }
  0x2a   : > { %635 = vmatpush1.bf16.msra.mxu0 %v6327_v13  ;;  %676 = vmatpush1.bf16.msra.mxu1 %v6332_v14  ;;  %9468 = vst [vmem:[#allocation27_spill] sm:$0xff] %v6394_v24  ;;  %9469 = vst [vmem:[#allocation28_spill] sm:$0xff] %v6401_v25  ;;  %v6413_v27 = vld [vmem:[%s9172_s2 + $0xc4] ss:$16 sps:$4 sm:$0xff]   ;;  %v6418_v28 = vld [vmem:[%s9172_s2 + $0xcc] ss:$16 sps:$4 sm:$0xff]  }
  0x2b   : > { %636 = vmatprep.subr.bf16.mxu0 %v6339_v15  ;;  %677 = vmatprep.subr.bf16.mxu1 %v6346_v16  ;;  %9470 = vst [vmem:[#allocation29_spill] sm:$0xff] %v6406_v26  ;;  %9471 = vst [vmem:[#allocation30_spill] sm:$0xff] %v6413_v27  ;;  %v6423_v29 = vld [vmem:[%s9172_s2 + $0xc0] ss:$16 sps:$4 sm:$0xff]   ;;  %v6428_v30 = vld [vmem:[%s9172_s2 + $0xc8] ss:$16 sps:$4 sm:$0xff]  }
  0x2c   : > { %9472 = vst [vmem:[#allocation31_spill] sm:$0xff] %v6418_v28  ;;  %9473 = vst [vmem:[#allocation32_spill] sm:$0xff] %v6423_v29  ;;  %v6435_v31 = vld [vmem:[%s9172_s2 + $0xe4] ss:$16 sps:$4 sm:$0xff]   ;;  %v6442_v32 = vld [vmem:[%s9172_s2 + $0xec] ss:$16 sps:$4 sm:$0xff]  }
  0x2d   : > { %9474 = vst [vmem:[#allocation33_spill] sm:$0xff] %v6428_v30  ;;  %9475 = vst [vmem:[#allocation34_spill] sm:$0xff] %v6435_v31  ;;  %v6447_v33 = vld [vmem:[%s9172_s2 + $0xe0] ss:$16 sps:$4 sm:$0xff]   ;;  %v6452_v34 = vld [vmem:[%s9172_s2 + $0xe8] ss:$16 sps:$4 sm:$0xff]  }
  0x2e   : > { %637 = vmatpush1.bf16.msra.mxu0 %v6351_v17  ;;  %678 = vmatpush1.bf16.msra.mxu1 %v6358_v18  ;;  %9476 = vst [vmem:[#allocation35_spill] sm:$0xff] %v6442_v32  ;;  %9477 = vst [vmem:[#allocation36_spill] sm:$0xff] %v6447_v33  ;;  %v465_v35 = vld [vmem:[#allocation2] sm:$0xff]  ;;  %v6466_v37 = vld [vmem:[%s9171_s1 + $0xc] ss:$16 sps:$4 sm:$0xff]  }
  0x2f   : > { %638 = vmatprep.subr.bf16.mxu0 %v6363_v19  ;;  %679 = vmatprep.subr.bf16.mxu1 %v6370_v20  ;;  %9478 = vst [vmem:[#allocation37_spill] sm:$0xff] %v6452_v34  ;;  %v6461_v36 = vld [vmem:[%s9171_s1 + $0x4] ss:$16 sps:$4 sm:$0xff]   ;;  %9480 = vst [vmem:[#allocation39_spill] sm:$0xff] %v6466_v37  ;;  %v469_v38 = vpack.c.bf16 %v465_v35, %v465_v35  ;;  %v6471_v39 = vld [vmem:[%s9171_s1] ss:$16 sps:$4 sm:$0xff]  }
  0x30   : > { %9479 = vst [vmem:[#allocation38_spill] sm:$0xff] %v6461_v36  ;;  %v6476_v40 = vld [vmem:[%s9171_s1 + $0x8] ss:$16 sps:$4 sm:$0xff]   ;;  %v6483_v41 = vld [vmem:[%s9171_s1 + $0x24] ss:$16 sps:$4 sm:$0xff]  }
  0x31   : > { %v6490_v42 = vld [vmem:[%s9171_s1 + $0x2c] ss:$16 sps:$4 sm:$0xff]   ;;  %v6495_v43 = vld [vmem:[%s9171_s1 + $0x20] ss:$16 sps:$4 sm:$0xff]   ;;  %v6502_v44 = vld [vmem:[%s9171_s1 + $0x28] ss:$16 sps:$4 sm:$0xff]  }
  0x32   : > { %639 = vmatpush1.bf16.msra.mxu0 %v6375_v21  ;;  %680 = vmatpush1.bf16.msra.mxu1 %v6380_v22  ;;  %v6509_v45 = vld [vmem:[%s9171_s1 + $0x44] ss:$16 sps:$4 sm:$0xff]   ;;  %v6514_v46 = vld [vmem:[%s9171_s1 + $0x4c] ss:$16 sps:$4 sm:$0xff]   ;;  %v6521_v47 = vld [vmem:[%s9171_s1 + $0x40] ss:$16 sps:$4 sm:$0xff]  }
  0x33   : > { %640 = vmatprep.subr.bf16.mxu0 %v6387_v23  ;;  %681 = vmatprep.subr.bf16.mxu1 %v6394_v24  ;;  %v6526_v48 = vld [vmem:[%s9171_s1 + $0x48] ss:$16 sps:$4 sm:$0xff]   ;;  %v6533_v49 = vld [vmem:[%s9171_s1 + $0x64] ss:$16 sps:$4 sm:$0xff]   ;;  %v6540_v50 = vld [vmem:[%s9171_s1 + $0x6c] ss:$16 sps:$4 sm:$0xff]  }
  0x34   : > { %v6547_v51 = vld [vmem:[%s9171_s1 + $0x60] ss:$16 sps:$4 sm:$0xff]   ;;  %v6552_v52 = vld [vmem:[%s9171_s1 + $0x68] ss:$16 sps:$4 sm:$0xff]   ;;  %v6559_v53 = vld [vmem:[%s9171_s1 + $0x84] ss:$16 sps:$4 sm:$0xff]  }
  0x35   : > { %v6564_v54 = vld [vmem:[%s9171_s1 + $0x8c] ss:$16 sps:$4 sm:$0xff]   ;;  %v6571_v55 = vld [vmem:[%s9171_s1 + $0x80] ss:$16 sps:$4 sm:$0xff]   ;;  %v6576_v56 = vld [vmem:[%s9171_s1 + $0x88] ss:$16 sps:$4 sm:$0xff]  }
  0x36   : > { %641 = vmatpush1.bf16.msra.mxu0 %v6401_v25  ;;  %682 = vmatpush1.bf16.msra.mxu1 %v6406_v26  ;;  %v6583_v57 = vld [vmem:[%s9171_s1 + $0xa4] ss:$16 sps:$4 sm:$0xff]   ;;  %v6588_v58 = vld [vmem:[%s9171_s1 + $0xac] ss:$16 sps:$4 sm:$0xff]   ;;  %v6595_v59 = vld [vmem:[%s9171_s1 + $0xa0] ss:$16 sps:$4 sm:$0xff]  }
  0x37   : > { %642 = vmatprep.subr.bf16.mxu0 %v6413_v27  ;;  %683 = vmatprep.subr.bf16.mxu1 %v6418_v28  ;;  %v6600_v60 = vld [vmem:[%s9171_s1 + $0xa8] ss:$16 sps:$4 sm:$0xff]   ;;  %v6607_v61 = vld [vmem:[%s9171_s1 + $0xc4] ss:$16 sps:$4 sm:$0xff]   ;;  %v6612_v62 = vld [vmem:[%s9171_s1 + $0xcc] ss:$16 sps:$4 sm:$0xff]  }
  0x38   : > { %v6619_v63 = vld [vmem:[%s9171_s1 + $0xc0] ss:$16 sps:$4 sm:$0xff]   ;;  %v6624_v0 = vld [vmem:[%s9171_s1 + $0xc8] ss:$16 sps:$4 sm:$0xff]   ;;  %v6631_v1 = vld [vmem:[%s9171_s1 + $0xe4] ss:$16 sps:$4 sm:$0xff]  }
  0x39   : > { %9481 = vst [vmem:[#allocation40_spill] sm:$0xff] %v6619_v63  ;;  %v6636_v35 = vld [vmem:[%s9171_s1 + $0xec] ss:$16 sps:$4 sm:$0xff]   ;;  %s3070_s17 = scalar_select %p467_p10, 1, 0 }
  0x3a   : > { %643 = vmatpush1.bf16.msra.mxu0 %v6423_v29  ;;  %684 = vmatpush1.bf16.msra.mxu1 %v6428_v30  ;;  %9482 = vst [vmem:[#allocation41_spill] sm:$0xff] %v6636_v35 }
  0x3b   : > { %644 = vmatprep.subr.bf16.mxu0 %v6435_v31  ;;  %685 = vmatprep.subr.bf16.mxu1 %v6442_v32 }
  0x3e   : > { %645 = vmatpush1.bf16.msra.mxu0 %v6447_v33  ;;  %686 = vmatpush1.bf16.msra.mxu1 %v6452_v34 }
  0x3f   : > { %872 = vmatprep.subr.bf16.mxu0 %v6461_v36  ;;  %913 = vmatprep.subr.bf16.mxu1 %v6466_v37 }
  0x41   : > { %663 = vmatmul.mubr.bf16.vlgmr.msra.gmra.mrb[0].mxu0 %v469_v38  ;;  %704 = vmatmul.mubr.bf16.vlgmr.msra.gmra.mrb[0].mxu1 %v469_v38  ;;  %v6643_v38 = vld [vmem:[%s9171_s1 + $0xe0] ss:$16 sps:$4 sm:$0xff]  }
  0x42   : > { %873 = vmatpush1.bf16.msra.mxu0 %v6471_v39  ;;  %914 = vmatpush1.bf16.msra.mxu1 %v6476_v40 }
  0x43   : > { %874 = vmatprep.subr.bf16.mxu0 %v6483_v41  ;;  %915 = vmatprep.subr.bf16.mxu1 %v6490_v42 }
  0x44   : > { %904 = vmatprep.mubr.bf16.mxu0 %v9179_v4  ;;  %945 = vmatprep.mubr.bf16.mxu1 %v9179_v4  ;;  %v6648_v4 = vld [vmem:[%s9171_s1 + $0xe8] ss:$16 sps:$4 sm:$0xff]  }
  0x46   : > { %875 = vmatpush1.bf16.msra.mxu0 %v6495_v43  ;;  %916 = vmatpush1.bf16.msra.mxu1 %v6502_v44 }
  0x47   : > { %876 = vmatprep.subr.bf16.mxu0 %v6509_v45  ;;  %917 = vmatprep.subr.bf16.mxu1 %v6514_v46 }
  0x4a   : > { %877 = vmatpush1.bf16.msra.mxu0 %v6521_v47  ;;  %918 = vmatpush1.bf16.msra.mxu1 %v6526_v48 }
  0x4b   : > { %878 = vmatprep.subr.bf16.mxu0 %v6533_v49  ;;  %919 = vmatprep.subr.bf16.mxu1 %v6540_v50 }
  0x4e   : > { %879 = vmatpush1.bf16.msra.mxu0 %v6547_v51  ;;  %920 = vmatpush1.bf16.msra.mxu1 %v6552_v52 }
  0x4f   : > { %880 = vmatprep.subr.bf16.mxu0 %v6559_v53  ;;  %921 = vmatprep.subr.bf16.mxu1 %v6564_v54 }
  0x52   : > { %881 = vmatpush1.bf16.msra.mxu0 %v6571_v55  ;;  %922 = vmatpush1.bf16.msra.mxu1 %v6576_v56 }
  0x53   : > { %882 = vmatprep.subr.bf16.mxu0 %v6583_v57  ;;  %923 = vmatprep.subr.bf16.mxu1 %v6588_v58 }
  0x56   : > { %883 = vmatpush1.bf16.msra.mxu0 %v6595_v59  ;;  %924 = vmatpush1.bf16.msra.mxu1 %v6600_v60 }
  0x57   : > { %884 = vmatprep.subr.bf16.mxu0 %v6607_v61  ;;  %925 = vmatprep.subr.bf16.mxu1 %v6612_v62 }
  0x5a   : > { %885 = vmatpush1.bf16.msra.mxu0 %v6619_v63  ;;  %926 = vmatpush1.bf16.msra.mxu1 %v6624_v0  ;;  %v468_v63 = vld [vmem:[%s6255_s24] sm:$0xf] }
  0x5b   : > { %886 = vmatprep.subr.bf16.mxu0 %v6631_v1  ;;  %927 = vmatprep.subr.bf16.mxu1 %v6636_v35  ;;  %v9483_v35 = vmov 0  }
  0x5e   : > { %887 = vmatpush1.bf16.msra.mxu0 %v6643_v38  ;;  %928 = vmatpush1.bf16.msra.mxu1 %v6648_v4 }
  0x5f   : > { %1051 = vmatprep.subr.bf16.mxu0 %v6269_v2  ;;  %1092 = vmatprep.subr.bf16.mxu1 %v6274_v3 }
  0x61   : > { %905 = vmatmul.mubr.bf16.vlgmr.msra.gmra.mrb[4].mxu0 %v468_v63  ;;  %946 = vmatmul.mubr.bf16.vlgmr.msra.gmra.mrb[4].mxu1 %v468_v63 }
  0x62   : > { %1052 = vmatpush1.bf16.msra.mxu0 %v6282_v5  ;;  %1093 = vmatpush1.bf16.msra.mxu1 %v6287_v6 }
  0x63   : > { %1053 = vmatprep.subr.bf16.mxu0 %v6293_v7  ;;  %1094 = vmatprep.subr.bf16.mxu1 %v6300_v8 }
  0x64   : > { %1083 = vmatprep.mubr.bf16.mxu0 %v9483_v35  ;;  %1124 = vmatprep.mubr.bf16.mxu1 %v9483_v35 }
  0x66   : > { %1054 = vmatpush1.bf16.msra.mxu0 %v6305_v9  ;;  %1095 = vmatpush1.bf16.msra.mxu1 %v6311_v10 }
  0x67   : > { %1055 = vmatprep.subr.bf16.mxu0 %v6317_v11  ;;  %1096 = vmatprep.subr.bf16.mxu1 %v6322_v12 }
  0x6a   : > { %1056 = vmatpush1.bf16.msra.mxu0 %v6327_v13  ;;  %1097 = vmatpush1.bf16.msra.mxu1 %v6332_v14 }
  0x6b   : > { %1057 = vmatprep.subr.bf16.mxu0 %v6339_v15  ;;  %1098 = vmatprep.subr.bf16.mxu1 %v6346_v16 }
  0x6e   : > { %1058 = vmatpush1.bf16.msra.mxu0 %v6351_v17  ;;  %1099 = vmatpush1.bf16.msra.mxu1 %v6358_v18 }
  0x6f   : > { %1059 = vmatprep.subr.bf16.mxu0 %v6363_v19  ;;  %1100 = vmatprep.subr.bf16.mxu1 %v6370_v20 }
  0x72   : > { %1060 = vmatpush1.bf16.msra.mxu0 %v6375_v21  ;;  %1101 = vmatpush1.bf16.msra.mxu1 %v6380_v22 }
  0x73   : > { %1061 = vmatprep.subr.bf16.mxu0 %v6387_v23  ;;  %1102 = vmatprep.subr.bf16.mxu1 %v6394_v24  ;;  %v445_v23 = vlaneseq }
  0x76   : > { %1062 = vmatpush1.bf16.msra.mxu0 %v6401_v25  ;;  %1103 = vmatpush1.bf16.msra.mxu1 %v6406_v26 }
  0x77   : > { %1063 = vmatprep.subr.bf16.mxu0 %v6413_v27  ;;  %1104 = vmatprep.subr.bf16.mxu1 %v6418_v28 }
  0x7a   : > { %1064 = vmatpush1.bf16.msra.mxu0 %v6423_v29  ;;  %1105 = vmatpush1.bf16.msra.mxu1 %v6428_v30 }
  0x7b   : > { %1065 = vmatprep.subr.bf16.mxu0 %v6435_v31  ;;  %1106 = vmatprep.subr.bf16.mxu1 %v6442_v32  ;;  %v446_v31 = vshrl.u32 %v445_v23, 7 }
  0x7d   : > { %v447_v22 = vsub.s32 0, %v446_v31  ;;  %v455_v16 = vsub.s32 2, %v446_v31  ;;  %v459_v11 = vsub.s32 3, %v446_v31 }
  0x7e   : > { %1066 = vmatpush1.bf16.msra.mxu0 %v6447_v33  ;;  %1107 = vmatpush1.bf16.msra.mxu1 %v6452_v34  ;;  %v443_v33 = vld [vmem:[%s9173_s3] sm:$0xf]  ;;  %v451_v34 = vsub.s32 1, %v446_v31 }
  0x7f   : > { %1133 = vmatprep.subr.bf16.mxu0 %v6461_v36  ;;  %1174 = vmatprep.subr.bf16.mxu1 %v6466_v37  ;;  %v6694_v32 = vrot.slane %v443_v33, %v447_v22 }
  0x80   : > { %v6696_v21 = vrot.slane %v443_v33, %v451_v34  ;;  %v6700_v34 = vrot.slane %v443_v33, %v455_v16 }
 0x114   : > { %v664_v63 = vpop.f32.mrb[0].mxu0  ;;  %v705_v27 = vpop.f32.mrb[0].mxu1 }
 0x115   : > { %v666_v26 = vpop.f32.mrb[1].mxu0  ;;  %v707_v28 = vpop.f32.mrb[1].mxu1 }
 0x116   : > { %v668_v25 = vpop.f32.mrb[2].mxu0  ;;  %v709_v29 = vpop.f32.mrb[2].mxu1 }
 0x117   : > { %v669_v24 = vpop.f32.mrb[3].mxu0  ;;  %v710_v30 = vpop.f32.mrb[3].mxu1 }
 0x134   : > { %v906_v36 = vpop.f32.mrb[4].mxu0  ;;  %v947_v37 = vpop.f32.mrb[4].mxu1 }
 0x135   : > { %v907_v20 = vadd.f32 %v906_v36, %v664_v63  ;;  %v948_v19 = vadd.f32 %v947_v37, %v705_v27  ;;  %v908_v25 = vpop.f32.mrb[5].mxu0  ;;  %v949_v29 = vpop.f32.mrb[5].mxu1  ;;  %v6702_v27 = vrot.slane %v443_v33, %v459_v11  ;;  %v466_v37 = vld [vmem:[#allocation3] sm:$0xff] }
 0x136   : > { %v909_v24 = vadd.f32 %v908_v25, %v666_v26  ;;  %v950_v30 = vadd.f32 %v949_v29, %v707_v28  ;;  %v910_v18 = vpop.f32.mrb[6].mxu0  ;;  %v951_v23 = vpop.f32.mrb[6].mxu1  ;;  %v6153_v25 = vmov 1966171168  }
 0x137   : > { %v954_v17 = vadd.f32 %v907_v20, %v6694_v32  ;;  %v911_v15 = vpop.f32.mrb[7].mxu0  ;;  %v952_v14 = vpop.f32.mrb[7].mxu1  ;;  %v956_v26 = vadd.f32 %v948_v19, %v6700_v34  ;;  %v985_v29 = vunpack.c.l.s4 %v6153_v25  ;;  %v9485_v25 = vld [vmem:[#allocation41_spill] sm:$0xff] }
 0x138   : > { %v955_v22 = vadd.f32 %v909_v24, %v6696_v21  ;;  %v957_v18 = vadd.f32 %v950_v30, %v6702_v27 }
 0x139   : > { %v5315_v13 = vmul.f32 -1.442695, %v954_v17  ;;  %v5317_v28 = vmul.f32 -1.442695, %v956_v26  ;;  %v986_v24 = vunpack.c.0.s8 %v985_v29  ;;  %v5322_v29 = vld [vmem:[%s6255_s24 + $0x4] sm:$0xf] }
 0x13a   : > { %v5316_v12 = vmul.f32 -1.442695, %v955_v22 }
 0x13b   : > { %5604 = vpow2.f32 %v5315_v13  ;;  %v6709_v23 = vsub.s32 %v986_v24, %v446_v31  ;;  %v9486_v24 = vld [vmem:[#allocation14_spill] sm:$0xff] }
 0x13c   : > { %5606 = vpow2.f32 %v5316_v12 }
 0x13d   : > { %5608 = vtanh.f32 %v957_v18 }
 0x13e   : > { %5610 = vpow2.f32 %v5317_v28 }
 0x145   : > { %v5605_v20 = vpop.eup %5604 }
 0x146   : > { %v967_v36 = vadd.f32 1.0, %v5605_v20  ;;  %v5607_v14 = vpop.eup %5606 }
 0x147   : > { %v968_v15 = vadd.f32 1.0, %v5607_v14  ;;  %v5609_v17 = vpop.eup %5608 }
 0x148   : > { %5612 = vrcp.f32 %v967_v36  ;;  %v5611_v13 = vpop.eup %5610 }
 0x149   : > { %5614 = vrcp.f32 %v968_v15  ;;  %v969_v33 = vadd.f32 1.0, %v5611_v13 }
 0x14b   : > { %5616 = vrcp.f32 %v969_v33 }
 0x152   : > { %v5613_v16 = vpop.eup %5612 }
 0x153   : > { %v978_v12 = vmul.f32 %v5613_v16, %v5609_v17  ;;  %v5615_v11 = vpop.eup %5614 }
 0x154   : > { %v977_v63 = vmul.f32 %v5615_v11, %v466_v37 }
 0x155   : > { %v5617_v30 = vpop.eup %5616 }
 0x156   : > { %v6706_v19 = vadd.f32 %v978_v12, %v977_v63  ;;  %v9484_v63 = vld [vmem:[#allocation40_spill] sm:$0xff] }
 0x158   : > { %5618 = vtanh.f32 %v6706_v19 }
 0x162   : > { %v5619_v22 = vpop.eup %5618 }
 0x163   : > { %v981_v26 = vmul.f32 %v5619_v22, %v5617_v30  ;;  %v9487_v30 = vld [vmem:[#allocation15_spill] sm:$0xff]  ;;  %v9488_v22 = vld [vmem:[#allocation16_spill] sm:$0xff] }
 0x165   : > { %v983_v18 = vcombine.high %v981_v26, %v981_v26  ;;  %v990_v28 = vrot.slane %v981_v26, %v6709_v23  ;;  %v1050_v20 = vpack.c.bf16 %v981_v26, %v981_v26  ;;  %v9489_v26 = vld [vmem:[#allocation17_spill] sm:$0xff] }
 0x167   : > { %v997_v36 = vrot.slane %v983_v18, %v6709_v23  ;;  %v998_v14 = vcombine.high %v990_v28, %v990_v28  ;;  %v1006_v15 = vrot.slane %v990_v28, %v6709_v23  ;;  %5318 = vst.sshfl [vmem:[%s6257_s25] sm:$0x1 pattern:$0x73625140] %v990_v28  ;;  %1084 = vmatmul.mubr.bf16.vlgmr.msra.gmra.mrb[8].mxu0 %v1050_v20  ;;  %v9490_v18 = vld [vmem:[#allocation18_spill] sm:$0xff]  ;;  %v9491_v28 = vld [vmem:[#allocation19_spill] sm:$0xff] }
 0x168   : > { %1125 = vmatmul.mubr.bf16.vlgmr.msra.gmra.mrb[8].mxu1 %v1050_v20  ;;  %1134 = vmatpush1.bf16.msra.mxu0 %v6471_v39  ;;  %v9492_v20 = vld [vmem:[#allocation20_spill] sm:$0xff] }
 0x169   : > { %1175 = vmatpush1.bf16.msra.mxu1 %v6476_v40  ;;  %v999_v31 = vcombine.high %v997_v36, %v997_v36  ;;  %v1013_v17 = vrot.slane %v997_v36, %v6709_v23  ;;  %v1020_v13 = vrot.slane %v998_v14, %v6709_v23  ;;  %v1028_v16 = vcombine.high %v1006_v15, %v1006_v15  ;;  %v9495_v15 = vld [vmem:[#allocation23_spill] sm:$0xff] }
 0x16a   : > { %5319 = vst.sshfl [vmem:[%s6257_s25 + $0x10] sm:$0x1 pattern:$0x73625140] %v998_v14  ;;  %1135 = vmatprep.subr.bf16.mxu0 %v6483_v41  ;;  %1176 = vmatprep.subr.bf16.mxu1 %v6490_v42  ;;  %v9494_v14 = vld [vmem:[#allocation22_spill] sm:$0xff] }
 0x16b   : > { %5320 = vst.sshfl [vmem:[%s6257_s25 + $0x40] sm:$0x1 pattern:$0x73625140] %v997_v36  ;;  %1165 = vmatprep.mubr.bf16.mxu0 %v9483_v35  ;;  %v1027_v37 = vrot.slane %v999_v31, %v6709_v23  ;;  %v1029_v12 = vcombine.high %v1013_v17, %v1013_v17  ;;  %v1030_v11 = vcombine.high %v1020_v13, %v1020_v13  ;;  %1042 = vst [vmem:[%s6257_s25 + $0x20] sm:$0x1] %v1028_v16 }
 0x16c   : > { %5321 = vst.sshfl [vmem:[%s6257_s25 + $0x50] sm:$0x1 pattern:$0x73625140] %v999_v31  ;;  %1206 = vmatprep.mubr.bf16.mxu1 %v9483_v35  ;;  %1136 = vmatpush1.bf16.msra.mxu0 %v6495_v43  ;;  %v9493_v36 = vld [vmem:[#allocation21_spill] sm:$0xff]  ;;  %v9496_v31 = vld [vmem:[#allocation24_spill] sm:$0xff] }
 0x16d   : > { %1177 = vmatpush1.bf16.msra.mxu1 %v6502_v44  ;;  %v1031_v33 = vcombine.high %v1027_v37, %v1027_v37  ;;  %1043 = vst [vmem:[%s6257_s25 + $0x30] sm:$0x1] %v1030_v11  ;;  %1046 = vst [vmem:[%s6257_s25 + $0x60] sm:$0x1] %v1029_v12  ;;  %1137 = vmatprep.subr.bf16.mxu0 %v6509_v45  ;;  %v9497_v17 = vld [vmem:[#allocation25_spill] sm:$0xff]  ;;  %v9498_v13 = vld [vmem:[#allocation26_spill] sm:$0xff] }
 0x16e   : > { %1178 = vmatprep.subr.bf16.mxu1 %v6514_v46  ;;  %v9499_v16 = vld [vmem:[#allocation27_spill] sm:$0xff]  ;;  %v9500_v37 = vld [vmem:[#allocation28_spill] sm:$0xff]  ;;  %v9501_v12 = vld [vmem:[#allocation29_spill] sm:$0xff] }
 0x16f   : > { %1047 = vst [vmem:[%s6257_s25 + $0x70] sm:$0x1] %v1031_v33  ;;  %v9502_v11 = vld [vmem:[#allocation30_spill] sm:$0xff]  ;;  %v9503_v33 = vld [vmem:[#allocation31_spill] sm:$0xff] }
 0x170   : > { %1138 = vmatpush1.bf16.msra.mxu0 %v6521_v47 }
 0x171   : > { %1179 = vmatpush1.bf16.msra.mxu1 %v6526_v48  ;;  %1139 = vmatprep.subr.bf16.mxu0 %v6533_v49 }
 0x172   : > { %1180 = vmatprep.subr.bf16.mxu1 %v6540_v50 }
 0x174   : > { %1140 = vmatpush1.bf16.msra.mxu0 %v6547_v51 }
 0x175   : > { %1181 = vmatpush1.bf16.msra.mxu1 %v6552_v52  ;;  %1141 = vmatprep.subr.bf16.mxu0 %v6559_v53 }
 0x176   : > { %1182 = vmatprep.subr.bf16.mxu1 %v6564_v54 }
 0x178   : > { %1142 = vmatpush1.bf16.msra.mxu0 %v6571_v55 }
 0x179   : > { %1183 = vmatpush1.bf16.msra.mxu1 %v6576_v56  ;;  %1143 = vmatprep.subr.bf16.mxu0 %v6583_v57 }
 0x17a   : > { %1184 = vmatprep.subr.bf16.mxu1 %v6588_v58 }
 0x17c   : > { %1144 = vmatpush1.bf16.msra.mxu0 %v6595_v59 }
 0x17d   : > { %1185 = vmatpush1.bf16.msra.mxu1 %v6600_v60  ;;  %1145 = vmatprep.subr.bf16.mxu0 %v6607_v61 }
 0x17e   : > { %1186 = vmatprep.subr.bf16.mxu1 %v6612_v62 }
 0x180   : > { %1146 = vmatpush1.bf16.msra.mxu0 %v9484_v63 }
 0x181   : > { %1187 = vmatpush1.bf16.msra.mxu1 %v6624_v0  ;;  %1147 = vmatprep.subr.bf16.mxu0 %v6631_v1 }
 0x182   : > { %1188 = vmatprep.subr.bf16.mxu1 %v9485_v25 }
 0x184   : > { %1148 = vmatpush1.bf16.msra.mxu0 %v6643_v38 }
 0x185   : > { %1189 = vmatpush1.bf16.msra.mxu1 %v6648_v4  ;;  %1312 = vmatprep.subr.bf16.mxu0 %v6269_v2 }
 0x186   : > { %1353 = vmatprep.subr.bf16.mxu1 %v6274_v3 }
 0x187   : > { %1166 = vmatmul.mubr.bf16.vlgmr.msra.gmra.mrb[12].mxu0 %v5322_v29 }
 0x188   : > { %1207 = vmatmul.mubr.bf16.vlgmr.msra.gmra.mrb[12].mxu1 %v5322_v29  ;;  %1313 = vmatpush1.bf16.msra.mxu0 %v6282_v5  ;;  %v9504_v29 = vld [vmem:[#allocation32_spill] sm:$0xff] }
 0x189   : > { %1354 = vmatpush1.bf16.msra.mxu1 %v6287_v6  ;;  %1314 = vmatprep.subr.bf16.mxu0 %v6293_v7 }
 0x18a   : > { %1355 = vmatprep.subr.bf16.mxu1 %v6300_v8  ;;  %1344 = vmatprep.mubr.bf16.mxu0 %v9483_v35 }
 0x18b   : > { %1385 = vmatprep.mubr.bf16.mxu1 %v9483_v35 }
 0x18c   : > { %1315 = vmatpush1.bf16.msra.mxu0 %v6305_v9 }
 0x18d   : > { %1356 = vmatpush1.bf16.msra.mxu1 %v6311_v10  ;;  %1316 = vmatprep.subr.bf16.mxu0 %v9486_v24 }
 0x18e   : > { %1357 = vmatprep.subr.bf16.mxu1 %v9487_v30 }
 0x190   : > { %1317 = vmatpush1.bf16.msra.mxu0 %v9488_v22 }
 0x191   : > { %1358 = vmatpush1.bf16.msra.mxu1 %v9489_v26  ;;  %1318 = vmatprep.subr.bf16.mxu0 %v9490_v18 }
 0x192   : > { %1359 = vmatprep.subr.bf16.mxu1 %v9491_v28 }
 0x194   : > { %1319 = vmatpush1.bf16.msra.mxu0 %v9492_v20 }
 0x195   : > { %1360 = vmatpush1.bf16.msra.mxu1 %v9493_v36  ;;  %1320 = vmatprep.subr.bf16.mxu0 %v9494_v14  ;;  %v9505_v14 = vld [vmem:[#allocation33_spill] sm:$0xff] }
 0x196   : > { %1361 = vmatprep.subr.bf16.mxu1 %v9495_v15  ;;  %v9506_v15 = vld [vmem:[#allocation34_spill] sm:$0xff] }
 0x198   : > { %1321 = vmatpush1.bf16.msra.mxu0 %v9496_v31  ;;  %v9507_v31 = vld [vmem:[#allocation35_spill] sm:$0xff] }
 0x199   : > { %1362 = vmatpush1.bf16.msra.mxu1 %v9497_v17  ;;  %1322 = vmatprep.subr.bf16.mxu0 %v9498_v13  ;;  %v9508_v17 = vld [vmem:[#allocation36_spill] sm:$0xff]  ;;  %v9509_v13 = vld [vmem:[#allocation37_spill] sm:$0xff] }
 0x19a   : > { %1363 = vmatprep.subr.bf16.mxu1 %v9499_v16  ;;  %v9510_v16 = vld [vmem:[#allocation38_spill] sm:$0xff] }
 0x19c   : > { %1323 = vmatpush1.bf16.msra.mxu0 %v9500_v37  ;;  %v9511_v37 = vld [vmem:[#allocation39_spill] sm:$0xff] }
 0x19d   : > { %1364 = vmatpush1.bf16.msra.mxu1 %v9501_v12  ;;  %1324 = vmatprep.subr.bf16.mxu0 %v9502_v11 }
 0x19e   : > { %1365 = vmatprep.subr.bf16.mxu1 %v9503_v33 }
 0x1a0   : > { %1325 = vmatpush1.bf16.msra.mxu0 %v9504_v29 }
 0x1a1   : > { %1366 = vmatpush1.bf16.msra.mxu1 %v9505_v14  ;;  %1326 = vmatprep.subr.bf16.mxu0 %v9506_v15 }
 0x1a2   : > { %1367 = vmatprep.subr.bf16.mxu1 %v9507_v31 }
 0x1a4   : > { %1327 = vmatpush1.bf16.msra.mxu0 %v9508_v17 }
 0x1a5   : > { %1368 = vmatpush1.bf16.msra.mxu1 %v9509_v13  ;;  %1394 = vmatprep.subr.bf16.mxu0 %v9510_v16 }
 0x1a6   : > { %1435 = vmatprep.subr.bf16.mxu1 %v9511_v37 }
 0x23a   : > { %v1085_v12 = vpop.f32.mrb[8].mxu0 }
 0x23b   : > { %v1126_v11 = vpop.f32.mrb[8].mxu1  ;;  %v1087_v36 = vpop.f32.mrb[9].mxu0 }
 0x23c   : > { %v1128_v33 = vpop.f32.mrb[9].mxu1  ;;  %v1089_v20 = vpop.f32.mrb[10].mxu0 }
 0x23d   : > { %v1130_v29 = vpop.f32.mrb[10].mxu1  ;;  %v1090_v28 = vpop.f32.mrb[11].mxu0 }
 0x23e   : > { %v1131_v14 = vpop.f32.mrb[11].mxu1 }
 0x25a   : > { %v1167_v18 = vpop.f32.mrb[12].mxu0 }
 0x25b   : > { %v1208_v15 = vpop.f32.mrb[12].mxu1  ;;  %v1168_v26 = vadd.f32 %v1167_v18, %v1085_v12  ;;  %v1169_v22 = vpop.f32.mrb[13].mxu0 }
 0x25c   : > { %v1209_v31 = vadd.f32 %v1208_v15, %v1126_v11  ;;  %v1210_v17 = vpop.f32.mrb[13].mxu1  ;;  %v1170_v30 = vadd.f32 %v1169_v22, %v1087_v36  ;;  %v1171_v24 = vpop.f32.mrb[14].mxu0 }
 0x25d   : > { %v1211_v13 = vadd.f32 %v1210_v17, %v1128_v33  ;;  %v1212_v16 = vpop.f32.mrb[14].mxu1  ;;  %v1215_v37 = vadd.f32 %v1168_v26, %v6694_v32  ;;  %v1172_v10 = vpop.f32.mrb[15].mxu0 }
 0x25e   : > { %v1213_v9 = vpop.f32.mrb[15].mxu1  ;;  %v1216_v8 = vadd.f32 %v1170_v30, %v6696_v21  ;;  %v1217_v28 = vadd.f32 %v1209_v31, %v6700_v34 }
 0x25f   : > { %v5323_v20 = vmul.f32 -1.442695, %v1215_v37  ;;  %v1218_v18 = vadd.f32 %v1211_v13, %v6702_v27 }
 0x260   : > { %v5324_v29 = vmul.f32 -1.442695, %v1216_v8  ;;  %v5325_v14 = vmul.f32 -1.442695, %v1217_v28 }
 0x261   : > { %5620 = vpow2.f32 %v5323_v20 }
 0x262   : > { %5622 = vpow2.f32 %v5324_v29 }
 0x263   : > { %5624 = vtanh.f32 %v1218_v18 }
 0x264   : > { %5626 = vpow2.f32 %v5325_v14 }
 0x26b   : > { %v5621_v15 = vpop.eup %5620 }
 0x26c   : > { %v1228_v22 = vadd.f32 1.0, %v5621_v15  ;;  %v5623_v24 = vpop.eup %5622 }
 0x26d   : > { %v1229_v26 = vadd.f32 1.0, %v5623_v24  ;;  %v5625_v9 = vpop.eup %5624 }
 0x26e   : > { %5628 = vrcp.f32 %v1228_v22  ;;  %v5627_v10 = vpop.eup %5626 }
 0x26f   : > { %5630 = vrcp.f32 %v1229_v26  ;;  %v1230_v17 = vadd.f32 1.0, %v5627_v10 }
 0x271   : > { %5632 = vrcp.f32 %v1230_v17  ;;  %v9514_v17 = vld [vmem:[#allocation13_spill] sm:$0xff] }
 0x278   : > { %v5629_v30 = vpop.eup %5628 }
 0x279   : > { %v1239_v36 = vmul.f32 %v5629_v30, %v5625_v9  ;;  %v5631_v8 = vpop.eup %5630  ;;  %v5330_v30 = vld [vmem:[%s6255_s24 + $0x8] sm:$0xf] }
 0x27a   : > { %v1238_v31 = vmul.f32 %v5631_v8, %v6706_v19  ;;  %v9513_v8 = vld [vmem:[#allocation12_spill] sm:$0xff] }
 0x27b   : > { %v5633_v13 = vpop.eup %5632 }
 0x27c   : > { %v6799_v16 = vadd.f32 %v1239_v36, %v1238_v31  ;;  %v9512_v36 = vld [vmem:[#allocation11_spill] sm:$0xff]  ;;  %v9517_v31 = vld [vmem:[#allocation16_spill] sm:$0xff] }
 0x27e   : > { %5634 = vtanh.f32 %v6799_v16 }
 0x288   : > { %v5635_v37 = vpop.eup %5634 }
 0x289   : > { %v1242_v12 = vmul.f32 %v5635_v37, %v5633_v13  ;;  %v9521_v13 = vld [vmem:[#allocation20_spill] sm:$0xff]  ;;  %v9522_v37 = vld [vmem:[#allocation21_spill] sm:$0xff] }
 0x28b   : > { %v1244_v11 = vcombine.high %v1242_v12, %v1242_v12  ;;  %v1251_v33 = vrot.slane %v1242_v12, %v6709_v23  ;;  %v1311_v20 = vpack.c.bf16 %v1242_v12, %v1242_v12  ;;  %v9523_v12 = vld [vmem:[#allocation22_spill] sm:$0xff] }
 0x28d   : > { %v1258_v29 = vrot.slane %v1244_v11, %v6709_v23  ;;  %v1259_v28 = vcombine.high %v1251_v33, %v1251_v33  ;;  %v1267_v18 = vrot.slane %v1251_v33, %v6709_v23  ;;  %5326 = vst.sshfl [vmem:[%s6257_s25 + $0x1] sm:$0x1 pattern:$0x73625140] %v1251_v33  ;;  %1345 = vmatmul.mubr.bf16.vlgmr.msra.gmra.mrb[16].mxu0 %v1311_v20  ;;  %v9524_v11 = vld [vmem:[#allocation23_spill] sm:$0xff]  ;;  %v9525_v33 = vld [vmem:[#allocation24_spill] sm:$0xff] }
 0x28e   : > { %1386 = vmatmul.mubr.bf16.vlgmr.msra.gmra.mrb[16].mxu1 %v1311_v20  ;;  %1395 = vmatpush1.bf16.msra.mxu0 %v6471_v39  ;;  %v9526_v20 = vld [vmem:[#allocation25_spill] sm:$0xff] }
 0x28f   : > { %1436 = vmatpush1.bf16.msra.mxu1 %v6476_v40  ;;  %v1260_v19 = vcombine.high %v1258_v29, %v1258_v29  ;;  %v1274_v14 = vrot.slane %v1258_v29, %v6709_v23  ;;  %v1281_v15 = vrot.slane %v1259_v28, %v6709_v23  ;;  %v1289_v22 = vcombine.high %v1267_v18, %v1267_v18  ;;  %v9529_v18 = vld [vmem:[#allocation28_spill] sm:$0xff] }
 0x290   : > { %5327 = vst.sshfl [vmem:[%s6257_s25 + $0x11] sm:$0x1 pattern:$0x73625140] %v1259_v28  ;;  %1396 = vmatprep.subr.bf16.mxu0 %v6483_v41  ;;  %1437 = vmatprep.subr.bf16.mxu1 %v6490_v42  ;;  %v9528_v28 = vld [vmem:[#allocation27_spill] sm:$0xff] }
 0x291   : > { %5328 = vst.sshfl [vmem:[%s6257_s25 + $0x41] sm:$0x1 pattern:$0x73625140] %v1258_v29  ;;  %1426 = vmatprep.mubr.bf16.mxu0 %v9483_v35  ;;  %v1288_v24 = vrot.slane %v1260_v19, %v6709_v23  ;;  %v1290_v26 = vcombine.high %v1274_v14, %v1274_v14  ;;  %v1291_v9 = vcombine.high %v1281_v15, %v1281_v15  ;;  %1303 = vst [vmem:[%s6257_s25 + $0x21] sm:$0x1] %v1289_v22 }
 0x292   : > { %5329 = vst.sshfl [vmem:[%s6257_s25 + $0x51] sm:$0x1 pattern:$0x73625140] %v1260_v19  ;;  %1467 = vmatprep.mubr.bf16.mxu1 %v9483_v35  ;;  %1397 = vmatpush1.bf16.msra.mxu0 %v6495_v43  ;;  %v9527_v29 = vld [vmem:[#allocation26_spill] sm:$0xff]  ;;  %v9530_v19 = vld [vmem:[#allocation29_spill] sm:$0xff] }
 0x293   : > { %1438 = vmatpush1.bf16.msra.mxu1 %v6502_v44  ;;  %v1292_v10 = vcombine.high %v1288_v24, %v1288_v24  ;;  %1304 = vst [vmem:[%s6257_s25 + $0x31] sm:$0x1] %v1291_v9  ;;  %1307 = vst [vmem:[%s6257_s25 + $0x61] sm:$0x1] %v1290_v26  ;;  %1398 = vmatprep.subr.bf16.mxu0 %v6509_v45  ;;  %v9531_v14 = vld [vmem:[#allocation30_spill] sm:$0xff]  ;;  %v9532_v15 = vld [vmem:[#allocation31_spill] sm:$0xff] }
 0x294   : > { %1439 = vmatprep.subr.bf16.mxu1 %v6514_v46  ;;  %v9533_v22 = vld [vmem:[#allocation32_spill] sm:$0xff]  ;;  %v9534_v24 = vld [vmem:[#allocation33_spill] sm:$0xff]  ;;  %v9535_v26 = vld [vmem:[#allocation34_spill] sm:$0xff] }
 0x295   : > { %1308 = vst [vmem:[%s6257_s25 + $0x71] sm:$0x1] %v1292_v10  ;;  %v9536_v9 = vld [vmem:[#allocation35_spill] sm:$0xff]  ;;  %v9537_v10 = vld [vmem:[#allocation36_spill] sm:$0xff] }
 0x296   : > { %1399 = vmatpush1.bf16.msra.mxu0 %v6521_v47 }
 0x297   : > { %1440 = vmatpush1.bf16.msra.mxu1 %v6526_v48  ;;  %1400 = vmatprep.subr.bf16.mxu0 %v6533_v49 }
 0x298   : > { %1441 = vmatprep.subr.bf16.mxu1 %v6540_v50 }
 0x29a   : > { %1401 = vmatpush1.bf16.msra.mxu0 %v6547_v51 }
 0x29b   : > { %1442 = vmatpush1.bf16.msra.mxu1 %v6552_v52  ;;  %1402 = vmatprep.subr.bf16.mxu0 %v6559_v53 }
 0x29c   : > { %1443 = vmatprep.subr.bf16.mxu1 %v6564_v54 }
 0x29e   : > { %1403 = vmatpush1.bf16.msra.mxu0 %v6571_v55 }
 0x29f   : > { %1444 = vmatpush1.bf16.msra.mxu1 %v6576_v56  ;;  %1404 = vmatprep.subr.bf16.mxu0 %v6583_v57 }
 0x2a0   : > { %1445 = vmatprep.subr.bf16.mxu1 %v6588_v58 }
 0x2a2   : > { %1405 = vmatpush1.bf16.msra.mxu0 %v6595_v59 }
 0x2a3   : > { %1446 = vmatpush1.bf16.msra.mxu1 %v6600_v60  ;;  %1406 = vmatprep.subr.bf16.mxu0 %v6607_v61 }
 0x2a4   : > { %1447 = vmatprep.subr.bf16.mxu1 %v6612_v62 }
 0x2a6   : > { %1407 = vmatpush1.bf16.msra.mxu0 %v9484_v63 }
 0x2a7   : > { %1448 = vmatpush1.bf16.msra.mxu1 %v6624_v0  ;;  %1408 = vmatprep.subr.bf16.mxu0 %v6631_v1 }
 0x2a8   : > { %1449 = vmatprep.subr.bf16.mxu1 %v9485_v25 }
 0x2aa   : > { %1409 = vmatpush1.bf16.msra.mxu0 %v6643_v38 }
 0x2ab   : > { %1450 = vmatpush1.bf16.msra.mxu1 %v6648_v4  ;;  %1573 = vmatprep.subr.bf16.mxu0 %v6269_v2  ;;  %v9515_v2 = vld [vmem:[#allocation14_spill] sm:$0xff] }
 0x2ac   : > { %1614 = vmatprep.subr.bf16.mxu1 %v6274_v3  ;;  %v9516_v3 = vld [vmem:[#allocation15_spill] sm:$0xff] }
 0x2ad   : > { %1427 = vmatmul.mubr.bf16.vlgmr.msra.gmra.mrb[20].mxu0 %v5330_v30 }
 0x2ae   : > { %1468 = vmatmul.mubr.bf16.vlgmr.msra.gmra.mrb[20].mxu1 %v5330_v30  ;;  %1574 = vmatpush1.bf16.msra.mxu0 %v6282_v5  ;;  %v9518_v5 = vld [vmem:[#allocation17_spill] sm:$0xff] }
 0x2af   : > { %1615 = vmatpush1.bf16.msra.mxu1 %v6287_v6  ;;  %1575 = vmatprep.subr.bf16.mxu0 %v6293_v7  ;;  %v9519_v6 = vld [vmem:[#allocation18_spill] sm:$0xff]  ;;  %v9520_v7 = vld [vmem:[#allocation19_spill] sm:$0xff]  ;;  %v9538_v30 = vld [vmem:[#allocation37_spill] sm:$0xff] }
 0x2b0   : > { %1616 = vmatprep.subr.bf16.mxu1 %v9512_v36  ;;  %1605 = vmatprep.mubr.bf16.mxu0 %v9483_v35  ;;  %v9539_v36 = vld [vmem:[#allocation38_spill] sm:$0xff] }
 0x2b1   : > { %1646 = vmatprep.mubr.bf16.mxu1 %v9483_v35 }
 0x2b2   : > { %1576 = vmatpush1.bf16.msra.mxu0 %v9513_v8  ;;  %v9540_v8 = vld [vmem:[#allocation39_spill] sm:$0xff] }
 0x2b3   : > { %1617 = vmatpush1.bf16.msra.mxu1 %v9514_v17  ;;  %1577 = vmatprep.subr.bf16.mxu0 %v9515_v2 }
 0x2b4   : > { %1618 = vmatprep.subr.bf16.mxu1 %v9516_v3 }
 0x2b6   : > { %1578 = vmatpush1.bf16.msra.mxu0 %v9517_v31 }
 0x2b7   : > { %1619 = vmatpush1.bf16.msra.mxu1 %v9518_v5  ;;  %1579 = vmatprep.subr.bf16.mxu0 %v9519_v6 }
 0x2b8   : > { %1620 = vmatprep.subr.bf16.mxu1 %v9520_v7 }
 0x2ba   : > { %1580 = vmatpush1.bf16.msra.mxu0 %v9521_v13 }
 0x2bb   : > { %1621 = vmatpush1.bf16.msra.mxu1 %v9522_v37  ;;  %1581 = vmatprep.subr.bf16.mxu0 %v9523_v12 }
 0x2bc   : > { %1622 = vmatprep.subr.bf16.mxu1 %v9524_v11 }
 0x2be   : > { %1582 = vmatpush1.bf16.msra.mxu0 %v9525_v33 }
 0x2bf   : > { %1623 = vmatpush1.bf16.msra.mxu1 %v9526_v20  ;;  %1583 = vmatprep.subr.bf16.mxu0 %v9527_v29 }
 0x2c0   : > { %1624 = vmatprep.subr.bf16.mxu1 %v9528_v28 }
 0x2c2   : > { %1584 = vmatpush1.bf16.msra.mxu0 %v9529_v18 }
 0x2c3   : > { %1625 = vmatpush1.bf16.msra.mxu1 %v9530_v19  ;;  %1585 = vmatprep.subr.bf16.mxu0 %v9531_v14 }
 0x2c4   : > { %1626 = vmatprep.subr.bf16.mxu1 %v9532_v15 }
 0x2c6   : > { %1586 = vmatpush1.bf16.msra.mxu0 %v9533_v22 }
 0x2c7   : > { %1627 = vmatpush1.bf16.msra.mxu1 %v9534_v24  ;;  %1587 = vmatprep.subr.bf16.mxu0 %v9535_v26 }
 0x2c8   : > { %1628 = vmatprep.subr.bf16.mxu1 %v9536_v9 }
 0x2ca   : > { %1588 = vmatpush1.bf16.msra.mxu0 %v9537_v10 }
 0x2cb   : > { %1629 = vmatpush1.bf16.msra.mxu1 %v9538_v30  ;;  %1655 = vmatprep.subr.bf16.mxu0 %v9539_v36 }
 0x2cc   : > { %1696 = vmatprep.subr.bf16.mxu1 %v9540_v8 }
 0x360   : > { %v1346_v17 = vpop.f32.mrb[16].mxu0 }
 0x361   : > { %v1387_v2 = vpop.f32.mrb[16].mxu1  ;;  %v1348_v3 = vpop.f32.mrb[17].mxu0 }
 0x362   : > { %v1389_v31 = vpop.f32.mrb[17].mxu1  ;;  %v1350_v5 = vpop.f32.mrb[18].mxu0 }
 0x363   : > { %v1391_v6 = vpop.f32.mrb[18].mxu1  ;;  %v1351_v7 = vpop.f32.mrb[19].mxu0 }
 0x364   : > { %v1392_v13 = vpop.f32.mrb[19].mxu1 }
 0x380   : > { %v1428_v37 = vpop.f32.mrb[20].mxu0 }
 0x381   : > { %v1469_v12 = vpop.f32.mrb[20].mxu1  ;;  %v1429_v11 = vadd.f32 %v1428_v37, %v1346_v17  ;;  %v1430_v20 = vpop.f32.mrb[21].mxu0 }
 0x382   : > { %v1470_v33 = vadd.f32 %v1469_v12, %v1387_v2  ;;  %v1471_v29 = vpop.f32.mrb[21].mxu1  ;;  %v1431_v28 = vadd.f32 %v1430_v20, %v1348_v3  ;;  %v1432_v19 = vpop.f32.mrb[22].mxu0 }
 0x383   : > { %v1472_v18 = vadd.f32 %v1471_v29, %v1389_v31  ;;  %v1473_v14 = vpop.f32.mrb[22].mxu1  ;;  %v1476_v15 = vadd.f32 %v1429_v11, %v6694_v32  ;;  %v1433_v22 = vpop.f32.mrb[23].mxu0 }
 0x384   : > { %v1474_v24 = vpop.f32.mrb[23].mxu1  ;;  %v1477_v26 = vadd.f32 %v1431_v28, %v6696_v21  ;;  %v1478_v30 = vadd.f32 %v1470_v33, %v6700_v34 }
 0x385   : > { %v5331_v9 = vmul.f32 -1.442695, %v1476_v15  ;;  %v1479_v36 = vadd.f32 %v1472_v18, %v6702_v27 }
 0x386   : > { %v5332_v10 = vmul.f32 -1.442695, %v1477_v26  ;;  %v5333_v8 = vmul.f32 -1.442695, %v1478_v30 }
 0x387   : > { %5636 = vpow2.f32 %v5331_v9 }
 0x388   : > { %5638 = vpow2.f32 %v5332_v10 }
 0x389   : > { %5640 = vtanh.f32 %v1479_v36 }
 0x38a   : > { %5642 = vpow2.f32 %v5333_v8  ;;  %v7107_v8 = vld [vmem:[%s9172_s2 + $0xc8] ss:$16 sps:$4 sm:$0xff]  }
 0x38b   : > { %9563 = vst [vmem:[#allocation31_spill] sm:$0xff] %v7107_v8 }
 0x391   : > { %v5637_v17 = vpop.eup %5636 }
 0x392   : > { %v1489_v2 = vadd.f32 1.0, %v5637_v17  ;;  %v5639_v3 = vpop.eup %5638  ;;  %v7113_v17 = vld [vmem:[%s9172_s2 + $0xe4] ss:$16 sps:$4 sm:$0xff]  }
 0x393   : > { %v1490_v31 = vadd.f32 1.0, %v5639_v3  ;;  %v5641_v5 = vpop.eup %5640  ;;  %9564 = vst [vmem:[#allocation32_spill] sm:$0xff] %v7113_v17  ;;  %v7125_v3 = vld [vmem:[%s9172_s2 + $0xe0] ss:$16 sps:$4 sm:$0xff]  }
 0x394   : > { %5644 = vrcp.f32 %v1489_v2  ;;  %v5643_v6 = vpop.eup %5642  ;;  %v7119_v2 = vld [vmem:[%s9172_s2 + $0xec] ss:$16 sps:$4 sm:$0xff]   ;;  %9566 = vst [vmem:[#allocation34_spill] sm:$0xff] %v7125_v3 }
 0x395   : > { %5646 = vrcp.f32 %v1490_v31  ;;  %v1491_v12 = vadd.f32 1.0, %v5643_v6  ;;  %9565 = vst [vmem:[#allocation33_spill] sm:$0xff] %v7119_v2  ;;  %v7131_v31 = vld [vmem:[%s9172_s2 + $0xe8] ss:$16 sps:$4 sm:$0xff]   ;;  %v7143_v6 = vld [vmem:[%s9171_s1 + $0xc] ss:$16 sps:$4 sm:$0xff]  }
 0x396   : > { %9567 = vst [vmem:[#allocation35_spill] sm:$0xff] %v7131_v31  ;;  %9569 = vst [vmem:[#allocation37_spill] sm:$0xff] %v7143_v6 }
 0x397   : > { %5648 = vrcp.f32 %v1491_v12 }
 0x39e   : > { %v5645_v7 = vpop.eup %5644 }
 0x39f   : > { %v1500_v13 = vmul.f32 %v5645_v7, %v5641_v5  ;;  %v5647_v37 = vpop.eup %5646  ;;  %v7137_v5 = vld [vmem:[%s9171_s1 + $0x4] ss:$16 sps:$4 sm:$0xff]  }
 0x3a0   : > { %v1499_v11 = vmul.f32 %v5647_v37, %v6799_v16  ;;  %9568 = vst [vmem:[#allocation36_spill] sm:$0xff] %v7137_v5 }
 0x3a1   : > { %v5649_v20 = vpop.eup %5648 }
 0x3a2   : > { %v6890_v33 = vadd.f32 %v1500_v13, %v1499_v11 }
 0x3a4   : > { %5650 = vtanh.f32 %v6890_v33 }
 0x3ae   : > { %v5651_v29 = vpop.eup %5650 }
 0x3af   : > { %v1503_v28 = vmul.f32 %v5651_v29, %v5649_v20 }
 0x3b1   : > { %v1505_v18 = vcombine.high %v1503_v28, %v1503_v28  ;;  %v1512_v19 = vrot.slane %v1503_v28, %v6709_v23  ;;  %v1572_v14 = vpack.c.bf16 %v1503_v28, %v1503_v28 }
 0x3b3   : > { %v1519_v15 = vrot.slane %v1505_v18, %v6709_v23  ;;  %v1520_v22 = vcombine.high %v1512_v19, %v1512_v19  ;;  %v1528_v24 = vrot.slane %v1512_v19, %v6709_v23  ;;  %5334 = vst.sshfl [vmem:[%s6257_s25 + $0x2] sm:$0x1 pattern:$0x73625140] %v1512_v19  ;;  %1606 = vmatmul.mubr.bf16.vlgmr.msra.gmra.mrb[24].mxu0 %v1572_v14 }
 0x3b4   : > { %1647 = vmatmul.mubr.bf16.vlgmr.msra.gmra.mrb[24].mxu1 %v1572_v14  ;;  %1656 = vmatpush1.bf16.msra.mxu0 %v6471_v39 }
 0x3b5   : > { %1697 = vmatpush1.bf16.msra.mxu1 %v6476_v40  ;;  %v1521_v16 = vcombine.high %v1519_v15, %v1519_v15  ;;  %v1535_v26 = vrot.slane %v1519_v15, %v6709_v23  ;;  %v1542_v9 = vrot.slane %v1520_v22, %v6709_v23  ;;  %v1550_v10 = vcombine.high %v1528_v24, %v1528_v24 }
 0x3b6   : > { %5335 = vst.sshfl [vmem:[%s6257_s25 + $0x12] sm:$0x1 pattern:$0x73625140] %v1520_v22  ;;  %1657 = vmatprep.subr.bf16.mxu0 %v6483_v41  ;;  %1698 = vmatprep.subr.bf16.mxu1 %v6490_v42  ;;  %v5338_v41 = vld [vmem:[%s6255_s24 + $0xc] sm:$0xf] }
 0x3b7   : > { %5336 = vst.sshfl [vmem:[%s6257_s25 + $0x42] sm:$0x1 pattern:$0x73625140] %v1519_v15  ;;  %1687 = vmatprep.mubr.bf16.mxu0 %v9483_v35  ;;  %v1549_v39 = vrot.slane %v1521_v16, %v6709_v23  ;;  %v1551_v40 = vcombine.high %v1535_v26, %v1535_v26  ;;  %v1552_v30 = vcombine.high %v1542_v9, %v1542_v9  ;;  %1564 = vst [vmem:[%s6257_s25 + $0x22] sm:$0x1] %v1550_v10 }
 0x3b8   : > { %5337 = vst.sshfl [vmem:[%s6257_s25 + $0x52] sm:$0x1 pattern:$0x73625140] %v1521_v16  ;;  %1728 = vmatprep.mubr.bf16.mxu1 %v9483_v35  ;;  %1658 = vmatpush1.bf16.msra.mxu0 %v6495_v43  ;;  %v6943_v42 = vld [vmem:[%s9172_s2 + $0x4] ss:$16 sps:$4 sm:$0xff]  }
 0x3b9   : > { %1699 = vmatpush1.bf16.msra.mxu1 %v6502_v44  ;;  %v1553_v36 = vcombine.high %v1549_v39, %v1549_v39  ;;  %1565 = vst [vmem:[%s6257_s25 + $0x32] sm:$0x1] %v1552_v30  ;;  %1568 = vst [vmem:[%s6257_s25 + $0x62] sm:$0x1] %v1551_v40  ;;  %1659 = vmatprep.subr.bf16.mxu0 %v6509_v45  ;;  %v6949_v43 = vld [vmem:[%s9172_s2 + $0xc] ss:$16 sps:$4 sm:$0xff]  }
 0x3ba   : > { %1700 = vmatprep.subr.bf16.mxu1 %v6514_v46  ;;  %v6961_v44 = vld [vmem:[%s9172_s2 + $0x8] ss:$16 sps:$4 sm:$0xff]   ;;  %v6967_v45 = vld [vmem:[%s9172_s2 + $0x24] ss:$16 sps:$4 sm:$0xff]   ;;  %v6973_v46 = vld [vmem:[%s9172_s2 + $0x2c] ss:$16 sps:$4 sm:$0xff]  }
 0x3bb   : > { %1569 = vst [vmem:[%s6257_s25 + $0x72] sm:$0x1] %v1553_v36  ;;  %9541 = vst [vmem:[#allocation40_spill] sm:$0xff] %v6973_v46 }
 0x3bc   : > { %1660 = vmatpush1.bf16.msra.mxu0 %v6521_v47  ;;  %v6981_v47 = vld [vmem:[%s9172_s2 + $0x20] ss:$16 sps:$4 sm:$0xff]  }
 0x3bd   : > { %1701 = vmatpush1.bf16.msra.mxu1 %v6526_v48  ;;  %1661 = vmatprep.subr.bf16.mxu0 %v6533_v49  ;;  %9542 = vst [vmem:[#allocation41_spill] sm:$0xff] %v6981_v47  ;;  %v6987_v48 = vld [vmem:[%s9172_s2 + $0x28] ss:$16 sps:$4 sm:$0xff]   ;;  %v6993_v49 = vld [vmem:[%s9172_s2 + $0x44] ss:$16 sps:$4 sm:$0xff]  }
 0x3be   : > { %1702 = vmatprep.subr.bf16.mxu1 %v6540_v50  ;;  %9543 = vst [vmem:[#allocation11_spill] sm:$0xff] %v6987_v48  ;;  %9544 = vst [vmem:[#allocation12_spill] sm:$0xff] %v6993_v49  ;;  %v6999_v50 = vld [vmem:[%s9172_s2 + $0x4c] ss:$16 sps:$4 sm:$0xff]  }
 0x3bf   : > { %9545 = vst [vmem:[#allocation13_spill] sm:$0xff] %v6999_v50 }
 0x3c0   : > { %1662 = vmatpush1.bf16.msra.mxu0 %v6547_v51  ;;  %v7005_v51 = vld [vmem:[%s9172_s2 + $0x40] ss:$16 sps:$4 sm:$0xff]  }
 0x3c1   : > { %1703 = vmatpush1.bf16.msra.mxu1 %v6552_v52  ;;  %1663 = vmatprep.subr.bf16.mxu0 %v6559_v53  ;;  %9546 = vst [vmem:[#allocation14_spill] sm:$0xff] %v7005_v51  ;;  %v7011_v52 = vld [vmem:[%s9172_s2 + $0x48] ss:$16 sps:$4 sm:$0xff]   ;;  %v7017_v53 = vld [vmem:[%s9172_s2 + $0x64] ss:$16 sps:$4 sm:$0xff]  }
 0x3c2   : > { %1704 = vmatprep.subr.bf16.mxu1 %v6564_v54  ;;  %9547 = vst [vmem:[#allocation15_spill] sm:$0xff] %v7011_v52  ;;  %9548 = vst [vmem:[#allocation16_spill] sm:$0xff] %v7017_v53  ;;  %v7023_v54 = vld [vmem:[%s9172_s2 + $0x6c] ss:$16 sps:$4 sm:$0xff]  }
 0x3c3   : > { %9549 = vst [vmem:[#allocation17_spill] sm:$0xff] %v7023_v54 }
 0x3c4   : > { %1664 = vmatpush1.bf16.msra.mxu0 %v6571_v55  ;;  %v7029_v55 = vld [vmem:[%s9172_s2 + $0x60] ss:$16 sps:$4 sm:$0xff]  }
 0x3c5   : > { %1705 = vmatpush1.bf16.msra.mxu1 %v6576_v56  ;;  %1665 = vmatprep.subr.bf16.mxu0 %v6583_v57  ;;  %9550 = vst [vmem:[#allocation18_spill] sm:$0xff] %v7029_v55  ;;  %v7035_v56 = vld [vmem:[%s9172_s2 + $0x68] ss:$16 sps:$4 sm:$0xff]   ;;  %v7041_v57 = vld [vmem:[%s9172_s2 + $0x84] ss:$16 sps:$4 sm:$0xff]  }
 0x3c6   : > { %1706 = vmatprep.subr.bf16.mxu1 %v6588_v58  ;;  %9551 = vst [vmem:[#allocation19_spill] sm:$0xff] %v7035_v56  ;;  %9552 = vst [vmem:[#allocation20_spill] sm:$0xff] %v7041_v57  ;;  %v7047_v58 = vld [vmem:[%s9172_s2 + $0x8c] ss:$16 sps:$4 sm:$0xff]  }
 0x3c7   : > { %9553 = vst [vmem:[#allocation21_spill] sm:$0xff] %v7047_v58 }
 0x3c8   : > { %1666 = vmatpush1.bf16.msra.mxu0 %v6595_v59  ;;  %v7053_v59 = vld [vmem:[%s9172_s2 + $0x80] ss:$16 sps:$4 sm:$0xff]  }
 0x3c9   : > { %1707 = vmatpush1.bf16.msra.mxu1 %v6600_v60  ;;  %1667 = vmatprep.subr.bf16.mxu0 %v6607_v61  ;;  %9554 = vst [vmem:[#allocation22_spill] sm:$0xff] %v7053_v59  ;;  %v7059_v60 = vld [vmem:[%s9172_s2 + $0x88] ss:$16 sps:$4 sm:$0xff]   ;;  %v7065_v61 = vld [vmem:[%s9172_s2 + $0xa4] ss:$16 sps:$4 sm:$0xff]  }
 0x3ca   : > { %1708 = vmatprep.subr.bf16.mxu1 %v6612_v62  ;;  %9555 = vst [vmem:[#allocation23_spill] sm:$0xff] %v7059_v60  ;;  %9556 = vst [vmem:[#allocation24_spill] sm:$0xff] %v7065_v61  ;;  %v7071_v62 = vld [vmem:[%s9172_s2 + $0xac] ss:$16 sps:$4 sm:$0xff]  }
 0x3cb   : > { %9557 = vst [vmem:[#allocation25_spill] sm:$0xff] %v7071_v62 }
 0x3cc   : > { %1668 = vmatpush1.bf16.msra.mxu0 %v9484_v63  ;;  %v7095_v63 = vld [vmem:[%s9172_s2 + $0xcc] ss:$16 sps:$4 sm:$0xff]  }
 0x3cd   : > { %1709 = vmatpush1.bf16.msra.mxu1 %v6624_v0  ;;  %1669 = vmatprep.subr.bf16.mxu0 %v6631_v1  ;;  %v7077_v0 = vld [vmem:[%s9172_s2 + $0xa0] ss:$16 sps:$4 sm:$0xff]   ;;  %v7083_v1 = vld [vmem:[%s9172_s2 + $0xa8] ss:$16 sps:$4 sm:$0xff]   ;;  %9561 = vst [vmem:[#allocation29_spill] sm:$0xff] %v7095_v63 }
 0x3ce   : > { %1710 = vmatprep.subr.bf16.mxu1 %v9485_v25  ;;  %9558 = vst [vmem:[#allocation26_spill] sm:$0xff] %v7077_v0  ;;  %9559 = vst [vmem:[#allocation27_spill] sm:$0xff] %v7083_v1  ;;  %v7101_v25 = vld [vmem:[%s9172_s2 + $0xc0] ss:$16 sps:$4 sm:$0xff]  }
 0x3cf   : > { %9562 = vst [vmem:[#allocation30_spill] sm:$0xff] %v7101_v25 }
 0x3d0   : > { %1670 = vmatpush1.bf16.msra.mxu0 %v6643_v38  ;;  %v7089_v38 = vld [vmem:[%s9172_s2 + $0xc4] ss:$16 sps:$4 sm:$0xff]  }
 0x3d1   : > { %1711 = vmatpush1.bf16.msra.mxu1 %v6648_v4  ;;  %1834 = vmatprep.subr.bf16.mxu0 %v6943_v42  ;;  %v6955_v4 = vld [vmem:[%s9172_s2] ss:$16 sps:$4 sm:$0xff]   ;;  %9560 = vst [vmem:[#allocation28_spill] sm:$0xff] %v7089_v38 }
 0x3d2   : > { %1875 = vmatprep.subr.bf16.mxu1 %v6949_v43 }
 0x3d3   : > { %1688 = vmatmul.mubr.bf16.vlgmr.msra.gmra.mrb[28].mxu0 %v5338_v41 }
 0x3d4   : > { %1729 = vmatmul.mubr.bf16.vlgmr.msra.gmra.mrb[28].mxu1 %v5338_v41  ;;  %1835 = vmatpush1.bf16.msra.mxu0 %v6955_v4 }
 0x3d5   : > { %1876 = vmatpush1.bf16.msra.mxu1 %v6961_v44  ;;  %1836 = vmatprep.subr.bf16.mxu0 %v6967_v45 }
 0x3d6   : > { %1877 = vmatprep.subr.bf16.mxu1 %v6973_v46  ;;  %1866 = vmatprep.mubr.bf16.mxu0 %v9483_v35 }
 0x3d7   : > { %1907 = vmatprep.mubr.bf16.mxu1 %v9483_v35 }
 0x3d8   : > { %1837 = vmatpush1.bf16.msra.mxu0 %v6981_v47 }
 0x3d9   : > { %1878 = vmatpush1.bf16.msra.mxu1 %v6987_v48  ;;  %1838 = vmatprep.subr.bf16.mxu0 %v6993_v49 }
 0x3da   : > { %1879 = vmatprep.subr.bf16.mxu1 %v6999_v50 }
 0x3dc   : > { %1839 = vmatpush1.bf16.msra.mxu0 %v7005_v51 }
 0x3dd   : > { %1880 = vmatpush1.bf16.msra.mxu1 %v7011_v52  ;;  %1840 = vmatprep.subr.bf16.mxu0 %v7017_v53 }
 0x3de   : > { %1881 = vmatprep.subr.bf16.mxu1 %v7023_v54 }
 0x3e0   : > { %1841 = vmatpush1.bf16.msra.mxu0 %v7029_v55 }
 0x3e1   : > { %1882 = vmatpush1.bf16.msra.mxu1 %v7035_v56  ;;  %1842 = vmatprep.subr.bf16.mxu0 %v7041_v57 }
 0x3e2   : > { %1883 = vmatprep.subr.bf16.mxu1 %v7047_v58 }
 0x3e4   : > { %1843 = vmatpush1.bf16.msra.mxu0 %v7053_v59 }
 0x3e5   : > { %1884 = vmatpush1.bf16.msra.mxu1 %v7059_v60  ;;  %1844 = vmatprep.subr.bf16.mxu0 %v7065_v61 }
 0x3e6   : > { %1885 = vmatprep.subr.bf16.mxu1 %v7071_v62 }
 0x3e8   : > { %1845 = vmatpush1.bf16.msra.mxu0 %v7077_v0 }
 0x3e9   : > { %1886 = vmatpush1.bf16.msra.mxu1 %v7083_v1  ;;  %1846 = vmatprep.subr.bf16.mxu0 %v7089_v38 }
 0x3ea   : > { %1887 = vmatprep.subr.bf16.mxu1 %v7095_v63 }
 0x3ec   : > { %1847 = vmatpush1.bf16.msra.mxu0 %v7101_v25 }
 0x3ed   : > { %1888 = vmatpush1.bf16.msra.mxu1 %v7107_v8  ;;  %1848 = vmatprep.subr.bf16.mxu0 %v7113_v17 }
 0x3ee   : > { %1889 = vmatprep.subr.bf16.mxu1 %v7119_v2 }
 0x3f0   : > { %1849 = vmatpush1.bf16.msra.mxu0 %v7125_v3 }
 0x3f1   : > { %1890 = vmatpush1.bf16.msra.mxu1 %v7131_v31  ;;  %1916 = vmatprep.subr.bf16.mxu0 %v7137_v5 }
 0x3f2   : > { %1957 = vmatprep.subr.bf16.mxu1 %v7143_v6 }
 0x486   : > { %v1607_v7 = vpop.f32.mrb[24].mxu0 }
 0x487   : > { %v1648_v13 = vpop.f32.mrb[24].mxu1  ;;  %v1609_v37 = vpop.f32.mrb[25].mxu0 }
 0x488   : > { %v1650_v12 = vpop.f32.mrb[25].mxu1  ;;  %v1611_v11 = vpop.f32.mrb[26].mxu0 }
 0x489   : > { %v1652_v20 = vpop.f32.mrb[26].mxu1  ;;  %v1612_v29 = vpop.f32.mrb[27].mxu0 }
 0x48a   : > { %v1653_v28 = vpop.f32.mrb[27].mxu1 }
 0x4a6   : > { %v1689_v18 = vpop.f32.mrb[28].mxu0 }
 0x4a7   : > { %v1730_v19 = vpop.f32.mrb[28].mxu1  ;;  %v1690_v14 = vadd.f32 %v1689_v18, %v1607_v7  ;;  %v1691_v22 = vpop.f32.mrb[29].mxu0 }
 0x4a8   : > { %v1731_v15 = vadd.f32 %v1730_v19, %v1648_v13  ;;  %v1732_v24 = vpop.f32.mrb[29].mxu1  ;;  %v1692_v16 = vadd.f32 %v1691_v22, %v1609_v37  ;;  %v1693_v9 = vpop.f32.mrb[30].mxu0 }
 0x4a9   : > { %v1733_v26 = vadd.f32 %v1732_v24, %v1650_v12  ;;  %v1734_v10 = vpop.f32.mrb[30].mxu1  ;;  %v1737_v39 = vadd.f32 %v1690_v14, %v6694_v32  ;;  %v1694_v40 = vpop.f32.mrb[31].mxu0 }
 0x4aa   : > { %v1735_v30 = vpop.f32.mrb[31].mxu1  ;;  %v1738_v36 = vadd.f32 %v1692_v16, %v6696_v21  ;;  %v1739_v20 = vadd.f32 %v1731_v15, %v6700_v34 }
 0x4ab   : > { %v5339_v41 = vmul.f32 -1.442695, %v1737_v39  ;;  %v1740_v7 = vadd.f32 %v1733_v26, %v6702_v27 }
 0x4ac   : > { %v5340_v11 = vmul.f32 -1.442695, %v1738_v36  ;;  %v5341_v13 = vmul.f32 -1.442695, %v1739_v20 }
 0x4ad   : > { %5652 = vpow2.f32 %v5339_v41 }
 0x4ae   : > { %5654 = vpow2.f32 %v5340_v11 }
 0x4af   : > { %5656 = vtanh.f32 %v1740_v7  ;;  %v7167_v7 = vld [vmem:[%s9171_s1 + $0x8] ss:$16 sps:$4 sm:$0xff]  }
 0x4b0   : > { %5658 = vpow2.f32 %v5341_v13 }
 0x4b7   : > { %v5653_v29 = vpop.eup %5652 }
 0x4b8   : > { %v1750_v37 = vadd.f32 1.0, %v5653_v29  ;;  %v5655_v12 = vpop.eup %5654 }
 0x4b9   : > { %v1751_v28 = vadd.f32 1.0, %v5655_v12  ;;  %v5657_v18 = vpop.eup %5656 }
 0x4ba   : > { %5660 = vrcp.f32 %v1750_v37  ;;  %v5659_v19 = vpop.eup %5658 }
 0x4bb   : > { %5662 = vrcp.f32 %v1751_v28  ;;  %v1752_v16 = vadd.f32 1.0, %v5659_v19  ;;  %v7177_v28 = vld [vmem:[%s9171_s1 + $0x24] ss:$16 sps:$4 sm:$0xff]  }
 0x4bd   : > { %5664 = vrcp.f32 %v1752_v16  ;;  %v7200_v16 = vld [vmem:[%s9171_s1 + $0x28] ss:$16 sps:$4 sm:$0xff]  }
 0x4c4   : > { %v5661_v14 = vpop.eup %5660 }
 0x4c5   : > { %v1761_v22 = vmul.f32 %v5661_v14, %v5657_v18  ;;  %v5663_v24 = vpop.eup %5662  ;;  %v7183_v18 = vld [vmem:[%s9171_s1 + $0x2c] ss:$16 sps:$4 sm:$0xff]  }
 0x4c6   : > { %v1760_v15 = vmul.f32 %v5663_v24, %v6890_v33  ;;  %v7161_v33 = vld [vmem:[%s9171_s1] ss:$16 sps:$4 sm:$0xff]  }
 0x4c7   : > { %v5665_v26 = vpop.eup %5664  ;;  %v7194_v24 = vld [vmem:[%s9171_s1 + $0x20] ss:$16 sps:$4 sm:$0xff]  }
 0x4c8   : > { %v7151_v9 = vadd.f32 %v1761_v22, %v1760_v15 }
 0x4ca   : > { %5666 = vtanh.f32 %v7151_v9 }
 0x4d4   : > { %v5667_v10 = vpop.eup %5666 }
 0x4d5   : > { %v1764_v39 = vmul.f32 %v5667_v10, %v5665_v26  ;;  %v7208_v26 = vld [vmem:[%s9171_s1 + $0x44] ss:$16 sps:$4 sm:$0xff]   ;;  %v7214_v10 = vld [vmem:[%s9171_s1 + $0x4c] ss:$16 sps:$4 sm:$0xff]  }
 0x4d7   : > { %v1766_v40 = vcombine.high %v1764_v39, %v1764_v39  ;;  %v1773_v30 = vrot.slane %v1764_v39, %v6709_v23  ;;  %v1833_v36 = vpack.c.bf16 %v1764_v39, %v1764_v39  ;;  %v7221_v39 = vld [vmem:[%s9171_s1 + $0x40] ss:$16 sps:$4 sm:$0xff]  }
 0x4d9   : > { %v1780_v41 = vrot.slane %v1766_v40, %v6709_v23  ;;  %v1781_v11 = vcombine.high %v1773_v30, %v1773_v30  ;;  %v1789_v20 = vrot.slane %v1773_v30, %v6709_v23  ;;  %5342 = vst.sshfl [vmem:[%s6257_s25 + $0x3] sm:$0x1 pattern:$0x73625140] %v1773_v30  ;;  %1867 = vmatmul.mubr.bf16.vlgmr.msra.gmra.mrb[32].mxu0 %v1833_v36  ;;  %v7227_v40 = vld [vmem:[%s9171_s1 + $0x48] ss:$16 sps:$4 sm:$0xff]  }
 0x4da   : > { %1908 = vmatmul.mubr.bf16.vlgmr.msra.gmra.mrb[32].mxu1 %v1833_v36  ;;  %1917 = vmatpush1.bf16.msra.mxu0 %v7161_v33  ;;  %v7233_v30 = vld [vmem:[%s9171_s1 + $0x64] ss:$16 sps:$4 sm:$0xff]   ;;  %v7239_v36 = vld [vmem:[%s9171_s1 + $0x6c] ss:$16 sps:$4 sm:$0xff]  }
 0x4db   : > { %1958 = vmatpush1.bf16.msra.mxu1 %v7167_v7  ;;  %v1782_v13 = vcombine.high %v1780_v41, %v1780_v41  ;;  %v1796_v29 = vrot.slane %v1780_v41, %v6709_v23  ;;  %v1803_v37 = vrot.slane %v1781_v11, %v6709_v23  ;;  %v1811_v12 = vcombine.high %v1789_v20, %v1789_v20  ;;  %v7257_v20 = vld [vmem:[%s9171_s1 + $0x84] ss:$16 sps:$4 sm:$0xff]  }
 0x4dc   : > { %5343 = vst.sshfl [vmem:[%s6257_s25 + $0x13] sm:$0x1 pattern:$0x73625140] %v1781_v11  ;;  %1918 = vmatprep.subr.bf16.mxu0 %v7177_v28  ;;  %1959 = vmatprep.subr.bf16.mxu1 %v7183_v18  ;;  %v7251_v11 = vld [vmem:[%s9171_s1 + $0x68] ss:$16 sps:$4 sm:$0xff]  }
 0x4dd   : > { %5344 = vst.sshfl [vmem:[%s6257_s25 + $0x43] sm:$0x1 pattern:$0x73625140] %v1780_v41  ;;  %1948 = vmatprep.mubr.bf16.mxu0 %v9483_v35  ;;  %v1810_v19 = vrot.slane %v1782_v13, %v6709_v23  ;;  %v1812_v14 = vcombine.high %v1796_v29, %v1796_v29  ;;  %v1813_v22 = vcombine.high %v1803_v37, %v1803_v37  ;;  %1825 = vst [vmem:[%s6257_s25 + $0x23] sm:$0x1] %v1811_v12 }
 0x4de   : > { %5345 = vst.sshfl [vmem:[%s6257_s25 + $0x53] sm:$0x1 pattern:$0x73625140] %v1782_v13  ;;  %1989 = vmatprep.mubr.bf16.mxu1 %v9483_v35  ;;  %1919 = vmatpush1.bf16.msra.mxu0 %v7194_v24  ;;  %v7245_v41 = vld [vmem:[%s9171_s1 + $0x60] ss:$16 sps:$4 sm:$0xff]  }
 0x4df   : > { %1960 = vmatpush1.bf16.msra.mxu1 %v7200_v16  ;;  %v1814_v15 = vcombine.high %v1810_v19, %v1810_v19  ;;  %1826 = vst [vmem:[%s6257_s25 + $0x33] sm:$0x1] %v1813_v22  ;;  %1829 = vst [vmem:[%s6257_s25 + $0x63] sm:$0x1] %v1812_v14  ;;  %1920 = vmatprep.subr.bf16.mxu0 %v7208_v26  ;;  %v7263_v13 = vld [vmem:[%s9171_s1 + $0x8c] ss:$16 sps:$4 sm:$0xff]  }
 0x4e0   : > { %1961 = vmatprep.subr.bf16.mxu1 %v7214_v10  ;;  %v7269_v29 = vld [vmem:[%s9171_s1 + $0x80] ss:$16 sps:$4 sm:$0xff]   ;;  %v7275_v37 = vld [vmem:[%s9171_s1 + $0x88] ss:$16 sps:$4 sm:$0xff]   ;;  %v7281_v12 = vld [vmem:[%s9171_s1 + $0xa4] ss:$16 sps:$4 sm:$0xff]  }
 0x4e1   : > { %1830 = vst [vmem:[%s6257_s25 + $0x73] sm:$0x1] %v1814_v15  ;;  %v7287_v19 = vld [vmem:[%s9171_s1 + $0xac] ss:$16 sps:$4 sm:$0xff]   ;;  %v7293_v14 = vld [vmem:[%s9171_s1 + $0xa0] ss:$16 sps:$4 sm:$0xff]  }
 0x4e2   : > { %1921 = vmatpush1.bf16.msra.mxu0 %v7221_v39  ;;  %9570 = vst [vmem:[#allocation38_spill] sm:$0xff] %v7287_v19  ;;  %9571 = vst [vmem:[#allocation39_spill] sm:$0xff] %v7293_v14  ;;  %v7299_v22 = vld [vmem:[%s9171_s1 + $0xa8] ss:$16 sps:$4 sm:$0xff]   ;;  %v7305_v15 = vld [vmem:[%s9171_s1 + $0xc4] ss:$16 sps:$4 sm:$0xff]  }
 0x4e3   : > { %1962 = vmatpush1.bf16.msra.mxu1 %v7227_v40  ;;  %1922 = vmatprep.subr.bf16.mxu0 %v7233_v30  ;;  %9572 = vst [vmem:[#allocation42_spill] sm:$0xff] %v7299_v22  ;;  %9573 = vst [vmem:[#allocation43_spill] sm:$0xff] %v7305_v15 }
 0x4e4   : > { %1963 = vmatprep.subr.bf16.mxu1 %v7239_v36 }
 0x4e6   : > { %1923 = vmatpush1.bf16.msra.mxu0 %v7245_v41 }
 0x4e7   : > { %1964 = vmatpush1.bf16.msra.mxu1 %v7251_v11  ;;  %1924 = vmatprep.subr.bf16.mxu0 %v7257_v20 }
 0x4e8   : > { %1965 = vmatprep.subr.bf16.mxu1 %v7263_v13 }
 0x4ea   : > { %1925 = vmatpush1.bf16.msra.mxu0 %v7269_v29 }
 0x4eb   : > { %1966 = vmatpush1.bf16.msra.mxu1 %v7275_v37  ;;  %1926 = vmatprep.subr.bf16.mxu0 %v7281_v12 }
 0x4ec   : > { %1967 = vmatprep.subr.bf16.mxu1 %v7287_v19  ;;  %v7311_v19 = vld [vmem:[%s9171_s1 + $0xcc] ss:$16 sps:$4 sm:$0xff]  }
 0x4ed   : > { %9574 = vst [vmem:[#allocation44_spill] sm:$0xff] %v7311_v19 }
 0x4ee   : > { %1927 = vmatpush1.bf16.msra.mxu0 %v7293_v14  ;;  %v7317_v14 = vld [vmem:[%s9171_s1 + $0xc0] ss:$16 sps:$4 sm:$0xff]  }
 0x4ef   : > { %1968 = vmatpush1.bf16.msra.mxu1 %v7299_v22  ;;  %1928 = vmatprep.subr.bf16.mxu0 %v7305_v15  ;;  %9575 = vst [vmem:[#allocation45_spill] sm:$0xff] %v7317_v14  ;;  %v7323_v22 = vld [vmem:[%s9171_s1 + $0xc8] ss:$16 sps:$4 sm:$0xff]   ;;  %v7329_v15 = vld [vmem:[%s9171_s1 + $0xe4] ss:$16 sps:$4 sm:$0xff]  }
 0x4f0   : > { %1969 = vmatprep.subr.bf16.mxu1 %v7311_v19  ;;  %9576 = vst [vmem:[#allocation46_spill] sm:$0xff] %v7323_v22  ;;  %9577 = vst [vmem:[#allocation47_spill] sm:$0xff] %v7329_v15  ;;  %v7335_v19 = vld [vmem:[%s9171_s1 + $0xec] ss:$16 sps:$4 sm:$0xff]  }
 0x4f2   : > { %1929 = vmatpush1.bf16.msra.mxu0 %v7317_v14  ;;  %v7341_v14 = vld [vmem:[%s9171_s1 + $0xe0] ss:$16 sps:$4 sm:$0xff]  }
 0x4f3   : > { %1970 = vmatpush1.bf16.msra.mxu1 %v7323_v22  ;;  %1930 = vmatprep.subr.bf16.mxu0 %v7329_v15  ;;  %v7347_v22 = vld [vmem:[%s9171_s1 + $0xe8] ss:$16 sps:$4 sm:$0xff]   ;;  %v5346_v15 = vld [vmem:[%s6255_s24 + $0x10] sm:$0xf] }
 0x4f4   : > { %1971 = vmatprep.subr.bf16.mxu1 %v7335_v19 }
 0x4f6   : > { %1931 = vmatpush1.bf16.msra.mxu0 %v7341_v14 }
 0x4f7   : > { %1972 = vmatpush1.bf16.msra.mxu1 %v7347_v22  ;;  %2095 = vmatprep.subr.bf16.mxu0 %v6943_v42 }
 0x4f8   : > { %2136 = vmatprep.subr.bf16.mxu1 %v6949_v43 }
 0x4f9   : > { %1949 = vmatmul.mubr.bf16.vlgmr.msra.gmra.mrb[36].mxu0 %v5346_v15 }
 0x4fa   : > { %1990 = vmatmul.mubr.bf16.vlgmr.msra.gmra.mrb[36].mxu1 %v5346_v15  ;;  %2096 = vmatpush1.bf16.msra.mxu0 %v6955_v4 }
 0x4fb   : > { %2137 = vmatpush1.bf16.msra.mxu1 %v6961_v44  ;;  %2097 = vmatprep.subr.bf16.mxu0 %v6967_v45 }
 0x4fc   : > { %2138 = vmatprep.subr.bf16.mxu1 %v6973_v46  ;;  %2127 = vmatprep.mubr.bf16.mxu0 %v9483_v35 }
 0x4fd   : > { %2168 = vmatprep.mubr.bf16.mxu1 %v9483_v35 }
 0x4fe   : > { %2098 = vmatpush1.bf16.msra.mxu0 %v6981_v47 }
 0x4ff   : > { %2139 = vmatpush1.bf16.msra.mxu1 %v6987_v48  ;;  %2099 = vmatprep.subr.bf16.mxu0 %v6993_v49 }
 0x500   : > { %2140 = vmatprep.subr.bf16.mxu1 %v6999_v50 }
 0x502   : > { %2100 = vmatpush1.bf16.msra.mxu0 %v7005_v51 }
 0x503   : > { %2141 = vmatpush1.bf16.msra.mxu1 %v7011_v52  ;;  %2101 = vmatprep.subr.bf16.mxu0 %v7017_v53 }
 0x504   : > { %2142 = vmatprep.subr.bf16.mxu1 %v7023_v54 }
 0x506   : > { %2102 = vmatpush1.bf16.msra.mxu0 %v7029_v55 }
 0x507   : > { %2143 = vmatpush1.bf16.msra.mxu1 %v7035_v56  ;;  %2103 = vmatprep.subr.bf16.mxu0 %v7041_v57 }
 0x508   : > { %2144 = vmatprep.subr.bf16.mxu1 %v7047_v58 }
 0x50a   : > { %2104 = vmatpush1.bf16.msra.mxu0 %v7053_v59 }
 0x50b   : > { %2145 = vmatpush1.bf16.msra.mxu1 %v7059_v60  ;;  %2105 = vmatprep.subr.bf16.mxu0 %v7065_v61 }
 0x50c   : > { %2146 = vmatprep.subr.bf16.mxu1 %v7071_v62 }
 0x50e   : > { %2106 = vmatpush1.bf16.msra.mxu0 %v7077_v0 }
 0x50f   : > { %2147 = vmatpush1.bf16.msra.mxu1 %v7083_v1  ;;  %2107 = vmatprep.subr.bf16.mxu0 %v7089_v38 }
 0x510   : > { %2148 = vmatprep.subr.bf16.mxu1 %v7095_v63 }
 0x512   : > { %2108 = vmatpush1.bf16.msra.mxu0 %v7101_v25 }
 0x513   : > { %2149 = vmatpush1.bf16.msra.mxu1 %v7107_v8  ;;  %2109 = vmatprep.subr.bf16.mxu0 %v7113_v17 }
 0x514   : > { %2150 = vmatprep.subr.bf16.mxu1 %v7119_v2 }
 0x516   : > { %2110 = vmatpush1.bf16.msra.mxu0 %v7125_v3 }
 0x517   : > { %2151 = vmatpush1.bf16.msra.mxu1 %v7131_v31  ;;  %2177 = vmatprep.subr.bf16.mxu0 %v7137_v5 }
 0x518   : > { %2218 = vmatprep.subr.bf16.mxu1 %v7143_v6 }
 0x5ac   : > { %v1868_v15 = vpop.f32.mrb[32].mxu0 }
 0x5ad   : > { %v1909_v38 = vpop.f32.mrb[32].mxu1  ;;  %v1870_v1 = vpop.f32.mrb[33].mxu0 }
 0x5ae   : > { %v1911_v63 = vpop.f32.mrb[33].mxu1  ;;  %v1872_v0 = vpop.f32.mrb[34].mxu0 }
 0x5af   : > { %v1913_v25 = vpop.f32.mrb[34].mxu1  ;;  %v1873_v62 = vpop.f32.mrb[35].mxu0 }
 0x5b0   : > { %v1914_v8 = vpop.f32.mrb[35].mxu1 }
 0x5cc   : > { %v1950_v61 = vpop.f32.mrb[36].mxu0 }
 0x5cd   : > { %v1991_v17 = vpop.f32.mrb[36].mxu1  ;;  %v1951_v60 = vadd.f32 %v1950_v61, %v1868_v15  ;;  %v1952_v59 = vpop.f32.mrb[37].mxu0 }
 0x5ce   : > { %v1992_v2 = vadd.f32 %v1991_v17, %v1909_v38  ;;  %v1993_v3 = vpop.f32.mrb[37].mxu1  ;;  %v1953_v58 = vadd.f32 %v1952_v59, %v1870_v1  ;;  %v1954_v57 = vpop.f32.mrb[38].mxu0 }
 0x5cf   : > { %v1994_v31 = vadd.f32 %v1993_v3, %v1911_v63  ;;  %v1995_v5 = vpop.f32.mrb[38].mxu1  ;;  %v1998_v6 = vadd.f32 %v1951_v60, %v6694_v32  ;;  %v1955_v56 = vpop.f32.mrb[39].mxu0 }
 0x5d0   : > { %v1996_v55 = vpop.f32.mrb[39].mxu1  ;;  %v1999_v54 = vadd.f32 %v1953_v58, %v6696_v21  ;;  %v2000_v62 = vadd.f32 %v1992_v2, %v6700_v34 }
 0x5d1   : > { %v5347_v0 = vmul.f32 -1.442695, %v1998_v6  ;;  %v2001_v61 = vadd.f32 %v1994_v31, %v6702_v27 }
 0x5d2   : > { %v5348_v25 = vmul.f32 -1.442695, %v1999_v54  ;;  %v5349_v38 = vmul.f32 -1.442695, %v2000_v62 }
 0x5d3   : > { %5668 = vpow2.f32 %v5347_v0 }
 0x5d4   : > { %5670 = vpow2.f32 %v5348_v25 }
 0x5d5   : > { %5672 = vtanh.f32 %v2001_v61 }
 0x5d6   : > { %5674 = vpow2.f32 %v5349_v38 }
 0x5dd   : > { %v5669_v8 = vpop.eup %5668 }
 0x5de   : > { %v2011_v59 = vadd.f32 1.0, %v5669_v8  ;;  %v5671_v57 = vpop.eup %5670 }
 0x5df   : > { %v2012_v60 = vadd.f32 1.0, %v5671_v57  ;;  %v5673_v55 = vpop.eup %5672 }
 0x5e0   : > { %5676 = vrcp.f32 %v2011_v59  ;;  %v5675_v56 = vpop.eup %5674 }
 0x5e1   : > { %5678 = vrcp.f32 %v2012_v60  ;;  %v2013_v63 = vadd.f32 1.0, %v5675_v56 }
 0x5e3   : > { %5680 = vrcp.f32 %v2013_v63  ;;  %v9581_v63 = vld [vmem:[#allocation43_spill] sm:$0xff] }
 0x5ea   : > { %v5677_v58 = vpop.eup %5676 }
 0x5eb   : > { %v2022_v1 = vmul.f32 %v5677_v58, %v5673_v55  ;;  %v5679_v54 = vpop.eup %5678  ;;  %v9578_v58 = vld [vmem:[#allocation38_spill] sm:$0xff] }
 0x5ec   : > { %v2021_v17 = vmul.f32 %v5679_v54, %v7151_v9  ;;  %v9580_v54 = vld [vmem:[#allocation42_spill] sm:$0xff] }
 0x5ed   : > { %v5681_v3 = vpop.eup %5680 }
 0x5ee   : > { %v7392_v2 = vadd.f32 %v2022_v1, %v2021_v17  ;;  %v9579_v1 = vld [vmem:[#allocation39_spill] sm:$0xff]  ;;  %v9582_v17 = vld [vmem:[#allocation44_spill] sm:$0xff] }
 0x5f0   : > { %5682 = vtanh.f32 %v7392_v2 }
 0x5fa   : > { %v5683_v31 = vpop.eup %5682 }
 0x5fb   : > { %v2025_v5 = vmul.f32 %v5683_v31, %v5681_v3  ;;  %v9583_v3 = vld [vmem:[#allocation45_spill] sm:$0xff]  ;;  %v9584_v31 = vld [vmem:[#allocation46_spill] sm:$0xff] }
 0x5fd   : > { %v2027_v6 = vcombine.high %v2025_v5, %v2025_v5  ;;  %v2034_v15 = vrot.slane %v2025_v5, %v6709_v23  ;;  %v2094_v0 = vpack.c.bf16 %v2025_v5, %v2025_v5  ;;  %v9585_v5 = vld [vmem:[#allocation47_spill] sm:$0xff] }
 0x5ff   : > { %v2041_v25 = vrot.slane %v2027_v6, %v6709_v23  ;;  %v2042_v62 = vcombine.high %v2034_v15, %v2034_v15  ;;  %v2050_v61 = vrot.slane %v2034_v15, %v6709_v23  ;;  %5350 = vst.sshfl [vmem:[%s6257_s25 + $0x4] sm:$0x1 pattern:$0x73625140] %v2034_v15  ;;  %2128 = vmatmul.mubr.bf16.vlgmr.msra.gmra.mrb[40].mxu0 %v2094_v0  ;;  %v5354_v6 = vld [vmem:[%s6255_s24 + $0x14] sm:$0xf] }
 0x600   : > { %2169 = vmatmul.mubr.bf16.vlgmr.msra.gmra.mrb[40].mxu1 %v2094_v0  ;;  %2178 = vmatpush1.bf16.msra.mxu0 %v7161_v33  ;;  %v9586_v15 = vld [vmem:[#allocation17_spill] sm:$0xff]  ;;  %v9587_v0 = vld [vmem:[#allocation18_spill] sm:$0xff] }
 0x601   : > { %2219 = vmatpush1.bf16.msra.mxu1 %v7167_v7  ;;  %v2043_v9 = vcombine.high %v2041_v25, %v2041_v25  ;;  %v2057_v38 = vrot.slane %v2041_v25, %v6709_v23  ;;  %v2064_v8 = vrot.slane %v2042_v62, %v6709_v23  ;;  %v2072_v59 = vcombine.high %v2050_v61, %v2050_v61  ;;  %v9590_v61 = vld [vmem:[#allocation21_spill] sm:$0xff] }
 0x602   : > { %5351 = vst.sshfl [vmem:[%s6257_s25 + $0x14] sm:$0x1 pattern:$0x73625140] %v2042_v62  ;;  %2179 = vmatprep.subr.bf16.mxu0 %v7177_v28  ;;  %2220 = vmatprep.subr.bf16.mxu1 %v7183_v18  ;;  %v9589_v62 = vld [vmem:[#allocation20_spill] sm:$0xff] }
 0x603   : > { %5352 = vst.sshfl [vmem:[%s6257_s25 + $0x44] sm:$0x1 pattern:$0x73625140] %v2041_v25  ;;  %2209 = vmatprep.mubr.bf16.mxu0 %v9483_v35  ;;  %v2071_v57 = vrot.slane %v2043_v9, %v6709_v23  ;;  %v2073_v60 = vcombine.high %v2057_v38, %v2057_v38  ;;  %v2074_v55 = vcombine.high %v2064_v8, %v2064_v8  ;;  %2086 = vst [vmem:[%s6257_s25 + $0x24] sm:$0x1] %v2072_v59 }
 0x604   : > { %5353 = vst.sshfl [vmem:[%s6257_s25 + $0x54] sm:$0x1 pattern:$0x73625140] %v2043_v9  ;;  %2250 = vmatprep.mubr.bf16.mxu1 %v9483_v35  ;;  %2180 = vmatpush1.bf16.msra.mxu0 %v7194_v24  ;;  %v9588_v25 = vld [vmem:[#allocation19_spill] sm:$0xff]  ;;  %v9591_v9 = vld [vmem:[#allocation22_spill] sm:$0xff] }
 0x605   : > { %2221 = vmatpush1.bf16.msra.mxu1 %v7200_v16  ;;  %v2075_v56 = vcombine.high %v2071_v57, %v2071_v57  ;;  %2087 = vst [vmem:[%s6257_s25 + $0x34] sm:$0x1] %v2074_v55  ;;  %2090 = vst [vmem:[%s6257_s25 + $0x64] sm:$0x1] %v2073_v60  ;;  %2181 = vmatprep.subr.bf16.mxu0 %v7208_v26  ;;  %v9592_v38 = vld [vmem:[#allocation23_spill] sm:$0xff]  ;;  %v9593_v8 = vld [vmem:[#allocation24_spill] sm:$0xff] }
 0x606   : > { %2222 = vmatprep.subr.bf16.mxu1 %v7214_v10  ;;  %v9594_v59 = vld [vmem:[#allocation25_spill] sm:$0xff]  ;;  %v9595_v57 = vld [vmem:[#allocation26_spill] sm:$0xff]  ;;  %v9596_v60 = vld [vmem:[#allocation27_spill] sm:$0xff] }
 0x607   : > { %2091 = vst [vmem:[%s6257_s25 + $0x74] sm:$0x1] %v2075_v56  ;;  %v9597_v55 = vld [vmem:[#allocation28_spill] sm:$0xff]  ;;  %v9598_v56 = vld [vmem:[#allocation29_spill] sm:$0xff] }
 0x608   : > { %2182 = vmatpush1.bf16.msra.mxu0 %v7221_v39 }
 0x609   : > { %2223 = vmatpush1.bf16.msra.mxu1 %v7227_v40  ;;  %2183 = vmatprep.subr.bf16.mxu0 %v7233_v30 }
 0x60a   : > { %2224 = vmatprep.subr.bf16.mxu1 %v7239_v36 }
 0x60c   : > { %2184 = vmatpush1.bf16.msra.mxu0 %v7245_v41 }
 0x60d   : > { %2225 = vmatpush1.bf16.msra.mxu1 %v7251_v11  ;;  %2185 = vmatprep.subr.bf16.mxu0 %v7257_v20 }
 0x60e   : > { %2226 = vmatprep.subr.bf16.mxu1 %v7263_v13 }
 0x610   : > { %2186 = vmatpush1.bf16.msra.mxu0 %v7269_v29 }
 0x611   : > { %2227 = vmatpush1.bf16.msra.mxu1 %v7275_v37  ;;  %2187 = vmatprep.subr.bf16.mxu0 %v7281_v12 }
 0x612   : > { %2228 = vmatprep.subr.bf16.mxu1 %v9578_v58 }
 0x614   : > { %2188 = vmatpush1.bf16.msra.mxu0 %v9579_v1 }
 0x615   : > { %2229 = vmatpush1.bf16.msra.mxu1 %v9580_v54  ;;  %2189 = vmatprep.subr.bf16.mxu0 %v9581_v63 }
 0x616   : > { %2230 = vmatprep.subr.bf16.mxu1 %v9582_v17 }
 0x618   : > { %2190 = vmatpush1.bf16.msra.mxu0 %v9583_v3 }
 0x619   : > { %2231 = vmatpush1.bf16.msra.mxu1 %v9584_v31  ;;  %2191 = vmatprep.subr.bf16.mxu0 %v9585_v5 }
 0x61a   : > { %2232 = vmatprep.subr.bf16.mxu1 %v7335_v19 }
 0x61c   : > { %2192 = vmatpush1.bf16.msra.mxu0 %v7341_v14 }
 0x61d   : > { %2233 = vmatpush1.bf16.msra.mxu1 %v7347_v22  ;;  %2356 = vmatprep.subr.bf16.mxu0 %v6943_v42 }
 0x61e   : > { %2397 = vmatprep.subr.bf16.mxu1 %v6949_v43 }
 0x61f   : > { %2210 = vmatmul.mubr.bf16.vlgmr.msra.gmra.mrb[44].mxu0 %v5354_v6 }
 0x620   : > { %2251 = vmatmul.mubr.bf16.vlgmr.msra.gmra.mrb[44].mxu1 %v5354_v6  ;;  %2357 = vmatpush1.bf16.msra.mxu0 %v6955_v4  ;;  %v9599_v6 = vld [vmem:[#allocation30_spill] sm:$0xff] }
 0x621   : > { %2398 = vmatpush1.bf16.msra.mxu1 %v6961_v44  ;;  %2358 = vmatprep.subr.bf16.mxu0 %v6967_v45 }
 0x622   : > { %2399 = vmatprep.subr.bf16.mxu1 %v6973_v46  ;;  %2388 = vmatprep.mubr.bf16.mxu0 %v9483_v35 }
 0x623   : > { %2429 = vmatprep.mubr.bf16.mxu1 %v9483_v35 }
 0x624   : > { %2359 = vmatpush1.bf16.msra.mxu0 %v6981_v47 }
 0x625   : > { %2400 = vmatpush1.bf16.msra.mxu1 %v6987_v48  ;;  %2360 = vmatprep.subr.bf16.mxu0 %v6993_v49 }
 0x626   : > { %2401 = vmatprep.subr.bf16.mxu1 %v6999_v50 }
 0x628   : > { %2361 = vmatpush1.bf16.msra.mxu0 %v7005_v51 }
 0x629   : > { %2402 = vmatpush1.bf16.msra.mxu1 %v7011_v52  ;;  %2362 = vmatprep.subr.bf16.mxu0 %v7017_v53 }
 0x62a   : > { %2403 = vmatprep.subr.bf16.mxu1 %v9586_v15 }
 0x62c   : > { %2363 = vmatpush1.bf16.msra.mxu0 %v9587_v0 }
 0x62d   : > { %2404 = vmatpush1.bf16.msra.mxu1 %v9588_v25  ;;  %2364 = vmatprep.subr.bf16.mxu0 %v9589_v62  ;;  %v9600_v62 = vld [vmem:[#allocation31_spill] sm:$0xff] }
 0x62e   : > { %2405 = vmatprep.subr.bf16.mxu1 %v9590_v61  ;;  %v9601_v61 = vld [vmem:[#allocation32_spill] sm:$0xff] }
 0x630   : > { %2365 = vmatpush1.bf16.msra.mxu0 %v9591_v9  ;;  %v9602_v9 = vld [vmem:[#allocation33_spill] sm:$0xff] }
 0x631   : > { %2406 = vmatpush1.bf16.msra.mxu1 %v9592_v38  ;;  %2366 = vmatprep.subr.bf16.mxu0 %v9593_v8  ;;  %v9603_v38 = vld [vmem:[#allocation34_spill] sm:$0xff]  ;;  %v9604_v8 = vld [vmem:[#allocation35_spill] sm:$0xff] }
 0x632   : > { %2407 = vmatprep.subr.bf16.mxu1 %v9594_v59  ;;  %v9605_v59 = vld [vmem:[#allocation36_spill] sm:$0xff] }
 0x634   : > { %2367 = vmatpush1.bf16.msra.mxu0 %v9595_v57  ;;  %v9606_v57 = vld [vmem:[#allocation37_spill] sm:$0xff] }
 0x635   : > { %2408 = vmatpush1.bf16.msra.mxu1 %v9596_v60  ;;  %2368 = vmatprep.subr.bf16.mxu0 %v9597_v55 }
 0x636   : > { %2409 = vmatprep.subr.bf16.mxu1 %v9598_v56 }
 0x638   : > { %2369 = vmatpush1.bf16.msra.mxu0 %v9599_v6 }
 0x639   : > { %2410 = vmatpush1.bf16.msra.mxu1 %v9600_v62  ;;  %2370 = vmatprep.subr.bf16.mxu0 %v9601_v61 }
 0x63a   : > { %2411 = vmatprep.subr.bf16.mxu1 %v9602_v9 }
 0x63c   : > { %2371 = vmatpush1.bf16.msra.mxu0 %v9603_v38 }
 0x63d   : > { %2412 = vmatpush1.bf16.msra.mxu1 %v9604_v8  ;;  %2438 = vmatprep.subr.bf16.mxu0 %v9605_v59 }
 0x63e   : > { %2479 = vmatprep.subr.bf16.mxu1 %v9606_v57 }
 0x6d2   : > { %v2129_v60 = vpop.f32.mrb[40].mxu0 }
 0x6d3   : > { %v2170_v55 = vpop.f32.mrb[40].mxu1  ;;  %v2131_v25 = vpop.f32.mrb[41].mxu0 }
 0x6d4   : > { %v2172_v56 = vpop.f32.mrb[41].mxu1  ;;  %v2133_v0 = vpop.f32.mrb[42].mxu0 }
 0x6d5   : > { %v2174_v6 = vpop.f32.mrb[42].mxu1  ;;  %v2134_v15 = vpop.f32.mrb[43].mxu0 }
 0x6d6   : > { %v2175_v62 = vpop.f32.mrb[43].mxu1 }
 0x6f2   : > { %v2211_v53 = vpop.f32.mrb[44].mxu0 }
 0x6f3   : > { %v2252_v61 = vpop.f32.mrb[44].mxu1  ;;  %v2212_v52 = vadd.f32 %v2211_v53, %v2129_v60  ;;  %v2213_v51 = vpop.f32.mrb[45].mxu0 }
 0x6f4   : > { %v2253_v9 = vadd.f32 %v2252_v61, %v2170_v55  ;;  %v2254_v38 = vpop.f32.mrb[45].mxu1  ;;  %v2214_v50 = vadd.f32 %v2213_v51, %v2131_v25  ;;  %v2215_v49 = vpop.f32.mrb[46].mxu0 }
 0x6f5   : > { %v2255_v8 = vadd.f32 %v2254_v38, %v2172_v56  ;;  %v2256_v59 = vpop.f32.mrb[46].mxu1  ;;  %v2259_v57 = vadd.f32 %v2212_v52, %v6694_v32  ;;  %v2216_v48 = vpop.f32.mrb[47].mxu0 }
 0x6f6   : > { %v2257_v47 = vpop.f32.mrb[47].mxu1  ;;  %v2260_v46 = vadd.f32 %v2214_v50, %v6696_v21  ;;  %v2261_v15 = vadd.f32 %v2253_v9, %v6700_v34 }
 0x6f7   : > { %v5355_v0 = vmul.f32 -1.442695, %v2259_v57  ;;  %v2262_v53 = vadd.f32 %v2255_v8, %v6702_v27 }
 0x6f8   : > { %v5356_v6 = vmul.f32 -1.442695, %v2260_v46  ;;  %v5357_v62 = vmul.f32 -1.442695, %v2261_v15 }
 0x6f9   : > { %5684 = vpow2.f32 %v5355_v0 }
 0x6fa   : > { %5686 = vpow2.f32 %v5356_v6 }
 0x6fb   : > { %5688 = vtanh.f32 %v2262_v53 }
 0x6fc   : > { %5690 = vpow2.f32 %v5357_v62 }
 0x703   : > { %v5685_v61 = vpop.eup %5684 }
 0x704   : > { %v2272_v51 = vadd.f32 1.0, %v5685_v61  ;;  %v5687_v49 = vpop.eup %5686 }
 0x705   : > { %v2273_v52 = vadd.f32 1.0, %v5687_v49  ;;  %v5689_v47 = vpop.eup %5688 }
 0x706   : > { %5692 = vrcp.f32 %v2272_v51  ;;  %v5691_v48 = vpop.eup %5690 }
 0x707   : > { %5694 = vrcp.f32 %v2273_v52  ;;  %v2274_v38 = vadd.f32 1.0, %v5691_v48 }
 0x709   : > { %5696 = vrcp.f32 %v2274_v38  ;;  %v9609_v38 = vld [vmem:[#allocation11_spill] sm:$0xff] }
 0x710   : > { %v5693_v50 = vpop.eup %5692 }
 0x711   : > { %v2283_v25 = vmul.f32 %v5693_v50, %v5689_v47  ;;  %v5695_v46 = vpop.eup %5694  ;;  %v5362_v50 = vld [vmem:[%s6255_s24 + $0x18] sm:$0xf] }
 0x712   : > { %v2282_v9 = vmul.f32 %v5695_v46, %v7392_v2  ;;  %v9608_v46 = vld [vmem:[#allocation41_spill] sm:$0xff] }
 0x713   : > { %v5697_v8 = vpop.eup %5696 }
 0x714   : > { %v7483_v59 = vadd.f32 %v2283_v25, %v2282_v9  ;;  %v9607_v25 = vld [vmem:[#allocation40_spill] sm:$0xff]  ;;  %v9612_v9 = vld [vmem:[#allocation14_spill] sm:$0xff] }
 0x716   : > { %5698 = vtanh.f32 %v7483_v59 }
 0x720   : > { %v5699_v57 = vpop.eup %5698 }
 0x721   : > { %v2286_v60 = vmul.f32 %v5699_v57, %v5697_v8  ;;  %v9616_v8 = vld [vmem:[#allocation18_spill] sm:$0xff]  ;;  %v9617_v57 = vld [vmem:[#allocation19_spill] sm:$0xff] }
 0x723   : > { %v2288_v55 = vcombine.high %v2286_v60, %v2286_v60  ;;  %v2295_v56 = vrot.slane %v2286_v60, %v6709_v23  ;;  %v2355_v0 = vpack.c.bf16 %v2286_v60, %v2286_v60  ;;  %v9618_v60 = vld [vmem:[#allocation20_spill] sm:$0xff] }
 0x725   : > { %v2302_v6 = vrot.slane %v2288_v55, %v6709_v23  ;;  %v2303_v15 = vcombine.high %v2295_v56, %v2295_v56  ;;  %v2311_v53 = vrot.slane %v2295_v56, %v6709_v23  ;;  %5358 = vst.sshfl [vmem:[%s6257_s25 + $0x5] sm:$0x1 pattern:$0x73625140] %v2295_v56  ;;  %2389 = vmatmul.mubr.bf16.vlgmr.msra.gmra.mrb[48].mxu0 %v2355_v0  ;;  %v9619_v55 = vld [vmem:[#allocation21_spill] sm:$0xff]  ;;  %v9620_v56 = vld [vmem:[#allocation22_spill] sm:$0xff] }
 0x726   : > { %2430 = vmatmul.mubr.bf16.vlgmr.msra.gmra.mrb[48].mxu1 %v2355_v0  ;;  %2439 = vmatpush1.bf16.msra.mxu0 %v7161_v33  ;;  %v9621_v0 = vld [vmem:[#allocation23_spill] sm:$0xff] }
 0x727   : > { %2480 = vmatpush1.bf16.msra.mxu1 %v7167_v7  ;;  %v2304_v2 = vcombine.high %v2302_v6, %v2302_v6  ;;  %v2318_v62 = vrot.slane %v2302_v6, %v6709_v23  ;;  %v2325_v61 = vrot.slane %v2303_v15, %v6709_v23  ;;  %v2333_v51 = vcombine.high %v2311_v53, %v2311_v53  ;;  %v9624_v53 = vld [vmem:[#allocation26_spill] sm:$0xff] }
 0x728   : > { %5359 = vst.sshfl [vmem:[%s6257_s25 + $0x15] sm:$0x1 pattern:$0x73625140] %v2303_v15  ;;  %2440 = vmatprep.subr.bf16.mxu0 %v7177_v28  ;;  %2481 = vmatprep.subr.bf16.mxu1 %v7183_v18  ;;  %v9623_v15 = vld [vmem:[#allocation25_spill] sm:$0xff] }
 0x729   : > { %5360 = vst.sshfl [vmem:[%s6257_s25 + $0x45] sm:$0x1 pattern:$0x73625140] %v2302_v6  ;;  %2470 = vmatprep.mubr.bf16.mxu0 %v9483_v35  ;;  %v2332_v49 = vrot.slane %v2304_v2, %v6709_v23  ;;  %v2334_v52 = vcombine.high %v2318_v62, %v2318_v62  ;;  %v2335_v47 = vcombine.high %v2325_v61, %v2325_v61  ;;  %2347 = vst [vmem:[%s6257_s25 + $0x25] sm:$0x1] %v2333_v51 }
 0x72a   : > { %5361 = vst.sshfl [vmem:[%s6257_s25 + $0x55] sm:$0x1 pattern:$0x73625140] %v2304_v2  ;;  %2511 = vmatprep.mubr.bf16.mxu1 %v9483_v35  ;;  %2441 = vmatpush1.bf16.msra.mxu0 %v7194_v24  ;;  %v9622_v6 = vld [vmem:[#allocation24_spill] sm:$0xff]  ;;  %v9625_v2 = vld [vmem:[#allocation27_spill] sm:$0xff] }
 0x72b   : > { %2482 = vmatpush1.bf16.msra.mxu1 %v7200_v16  ;;  %v2336_v48 = vcombine.high %v2332_v49, %v2332_v49  ;;  %2348 = vst [vmem:[%s6257_s25 + $0x35] sm:$0x1] %v2335_v47  ;;  %2351 = vst [vmem:[%s6257_s25 + $0x65] sm:$0x1] %v2334_v52  ;;  %2442 = vmatprep.subr.bf16.mxu0 %v7208_v26  ;;  %v9626_v62 = vld [vmem:[#allocation28_spill] sm:$0xff]  ;;  %v9627_v61 = vld [vmem:[#allocation29_spill] sm:$0xff] }
 0x72c   : > { %2483 = vmatprep.subr.bf16.mxu1 %v7214_v10  ;;  %v9628_v51 = vld [vmem:[#allocation30_spill] sm:$0xff]  ;;  %v9629_v49 = vld [vmem:[#allocation31_spill] sm:$0xff]  ;;  %v9630_v52 = vld [vmem:[#allocation32_spill] sm:$0xff] }
 0x72d   : > { %2352 = vst [vmem:[%s6257_s25 + $0x75] sm:$0x1] %v2336_v48  ;;  %v9631_v47 = vld [vmem:[#allocation33_spill] sm:$0xff]  ;;  %v9632_v48 = vld [vmem:[#allocation34_spill] sm:$0xff] }
 0x72e   : > { %2443 = vmatpush1.bf16.msra.mxu0 %v7221_v39 }
 0x72f   : > { %2484 = vmatpush1.bf16.msra.mxu1 %v7227_v40  ;;  %2444 = vmatprep.subr.bf16.mxu0 %v7233_v30 }
 0x730   : > { %2485 = vmatprep.subr.bf16.mxu1 %v7239_v36 }
 0x732   : > { %2445 = vmatpush1.bf16.msra.mxu0 %v7245_v41 }
 0x733   : > { %2486 = vmatpush1.bf16.msra.mxu1 %v7251_v11  ;;  %2446 = vmatprep.subr.bf16.mxu0 %v7257_v20 }
 0x734   : > { %2487 = vmatprep.subr.bf16.mxu1 %v7263_v13 }
 0x736   : > { %2447 = vmatpush1.bf16.msra.mxu0 %v7269_v29 }
 0x737   : > { %2488 = vmatpush1.bf16.msra.mxu1 %v7275_v37  ;;  %2448 = vmatprep.subr.bf16.mxu0 %v7281_v12 }
 0x738   : > { %2489 = vmatprep.subr.bf16.mxu1 %v9578_v58 }
 0x73a   : > { %2449 = vmatpush1.bf16.msra.mxu0 %v9579_v1 }
 0x73b   : > { %2490 = vmatpush1.bf16.msra.mxu1 %v9580_v54  ;;  %2450 = vmatprep.subr.bf16.mxu0 %v9581_v63 }
 0x73c   : > { %2491 = vmatprep.subr.bf16.mxu1 %v9582_v17 }
 0x73e   : > { %2451 = vmatpush1.bf16.msra.mxu0 %v9583_v3 }
 0x73f   : > { %2492 = vmatpush1.bf16.msra.mxu1 %v9584_v31  ;;  %2452 = vmatprep.subr.bf16.mxu0 %v9585_v5 }
 0x740   : > { %2493 = vmatprep.subr.bf16.mxu1 %v7335_v19 }
 0x742   : > { %2453 = vmatpush1.bf16.msra.mxu0 %v7341_v14 }
 0x743   : > { %2494 = vmatpush1.bf16.msra.mxu1 %v7347_v22  ;;  %2617 = vmatprep.subr.bf16.mxu0 %v6943_v42  ;;  %v9610_v42 = vld [vmem:[#allocation12_spill] sm:$0xff] }
 0x744   : > { %2658 = vmatprep.subr.bf16.mxu1 %v6949_v43  ;;  %v9611_v43 = vld [vmem:[#allocation13_spill] sm:$0xff] }
 0x745   : > { %2471 = vmatmul.mubr.bf16.vlgmr.msra.gmra.mrb[52].mxu0 %v5362_v50 }
 0x746   : > { %2512 = vmatmul.mubr.bf16.vlgmr.msra.gmra.mrb[52].mxu1 %v5362_v50  ;;  %2618 = vmatpush1.bf16.msra.mxu0 %v6955_v4  ;;  %v9613_v4 = vld [vmem:[#allocation15_spill] sm:$0xff] }
 0x747   : > { %2659 = vmatpush1.bf16.msra.mxu1 %v6961_v44  ;;  %2619 = vmatprep.subr.bf16.mxu0 %v6967_v45  ;;  %v9614_v44 = vld [vmem:[#allocation16_spill] sm:$0xff]  ;;  %v9615_v45 = vld [vmem:[#allocation17_spill] sm:$0xff]  ;;  %v9633_v50 = vld [vmem:[#allocation35_spill] sm:$0xff] }
 0x748   : > { %2660 = vmatprep.subr.bf16.mxu1 %v9607_v25  ;;  %2649 = vmatprep.mubr.bf16.mxu0 %v9483_v35  ;;  %v9634_v25 = vld [vmem:[#allocation36_spill] sm:$0xff] }
 0x749   : > { %2690 = vmatprep.mubr.bf16.mxu1 %v9483_v35 }
 0x74a   : > { %2620 = vmatpush1.bf16.msra.mxu0 %v9608_v46  ;;  %v9635_v46 = vld [vmem:[#allocation37_spill] sm:$0xff] }
 0x74b   : > { %2661 = vmatpush1.bf16.msra.mxu1 %v9609_v38  ;;  %2621 = vmatprep.subr.bf16.mxu0 %v9610_v42 }
 0x74c   : > { %2662 = vmatprep.subr.bf16.mxu1 %v9611_v43 }
 0x74e   : > { %2622 = vmatpush1.bf16.msra.mxu0 %v9612_v9 }
 0x74f   : > { %2663 = vmatpush1.bf16.msra.mxu1 %v9613_v4  ;;  %2623 = vmatprep.subr.bf16.mxu0 %v9614_v44 }
 0x750   : > { %2664 = vmatprep.subr.bf16.mxu1 %v9615_v45 }
 0x752   : > { %2624 = vmatpush1.bf16.msra.mxu0 %v9616_v8 }
 0x753   : > { %2665 = vmatpush1.bf16.msra.mxu1 %v9617_v57  ;;  %2625 = vmatprep.subr.bf16.mxu0 %v9618_v60 }
 0x754   : > { %2666 = vmatprep.subr.bf16.mxu1 %v9619_v55 }
 0x756   : > { %2626 = vmatpush1.bf16.msra.mxu0 %v9620_v56 }
 0x757   : > { %2667 = vmatpush1.bf16.msra.mxu1 %v9621_v0  ;;  %2627 = vmatprep.subr.bf16.mxu0 %v9622_v6 }
 0x758   : > { %2668 = vmatprep.subr.bf16.mxu1 %v9623_v15 }
 0x75a   : > { %2628 = vmatpush1.bf16.msra.mxu0 %v9624_v53 }
 0x75b   : > { %2669 = vmatpush1.bf16.msra.mxu1 %v9625_v2  ;;  %2629 = vmatprep.subr.bf16.mxu0 %v9626_v62 }
 0x75c   : > { %2670 = vmatprep.subr.bf16.mxu1 %v9627_v61 }
 0x75e   : > { %2630 = vmatpush1.bf16.msra.mxu0 %v9628_v51 }
 0x75f   : > { %2671 = vmatpush1.bf16.msra.mxu1 %v9629_v49  ;;  %2631 = vmatprep.subr.bf16.mxu0 %v9630_v52 }
 0x760   : > { %2672 = vmatprep.subr.bf16.mxu1 %v9631_v47 }
 0x762   : > { %2632 = vmatpush1.bf16.msra.mxu0 %v9632_v48 }
 0x763   : > { %2673 = vmatpush1.bf16.msra.mxu1 %v9633_v50  ;;  %2699 = vmatprep.subr.bf16.mxu0 %v9634_v25 }
 0x764   : > { %2740 = vmatprep.subr.bf16.mxu1 %v9635_v46 }
 0x7f8   : > { %v2390_v38 = vpop.f32.mrb[48].mxu0 }
 0x7f9   : > { %v2431_v42 = vpop.f32.mrb[48].mxu1  ;;  %v2392_v43 = vpop.f32.mrb[49].mxu0 }
 0x7fa   : > { %v2433_v9 = vpop.f32.mrb[49].mxu1  ;;  %v2394_v4 = vpop.f32.mrb[50].mxu0 }
 0x7fb   : > { %v2435_v44 = vpop.f32.mrb[50].mxu1  ;;  %v2395_v45 = vpop.f32.mrb[51].mxu0 }
 0x7fc   : > { %v2436_v8 = vpop.f32.mrb[51].mxu1 }
 0x818   : > { %v2472_v57 = vpop.f32.mrb[52].mxu0 }
 0x819   : > { %v2513_v60 = vpop.f32.mrb[52].mxu1  ;;  %v2473_v55 = vadd.f32 %v2472_v57, %v2390_v38  ;;  %v2474_v0 = vpop.f32.mrb[53].mxu0 }
 0x81a   : > { %v2514_v56 = vadd.f32 %v2513_v60, %v2431_v42  ;;  %v2515_v6 = vpop.f32.mrb[53].mxu1  ;;  %v2475_v15 = vadd.f32 %v2474_v0, %v2392_v43  ;;  %v2476_v2 = vpop.f32.mrb[54].mxu0 }
 0x81b   : > { %v2516_v53 = vadd.f32 %v2515_v6, %v2433_v9  ;;  %v2517_v62 = vpop.f32.mrb[54].mxu1  ;;  %v2520_v61 = vadd.f32 %v2473_v55, %v6694_v32  ;;  %v2477_v51 = vpop.f32.mrb[55].mxu0 }
 0x81c   : > { %v2518_v49 = vpop.f32.mrb[55].mxu1  ;;  %v2521_v52 = vadd.f32 %v2475_v15, %v6696_v21  ;;  %v2522_v50 = vadd.f32 %v2514_v56, %v6700_v34 }
 0x81d   : > { %v5363_v47 = vmul.f32 -1.442695, %v2520_v61  ;;  %v2523_v25 = vadd.f32 %v2516_v53, %v6702_v27 }
 0x81e   : > { %v5364_v48 = vmul.f32 -1.442695, %v2521_v52  ;;  %v5365_v46 = vmul.f32 -1.442695, %v2522_v50 }
 0x81f   : > { %5700 = vpow2.f32 %v5363_v47 }
 0x820   : > { %5702 = vpow2.f32 %v5364_v48 }
 0x821   : > { %5704 = vtanh.f32 %v2523_v25 }
 0x822   : > { %5706 = vpow2.f32 %v5365_v46  ;;  %v7791_v46 = vld [vmem:[%s9172_s2 + $0xc8] ss:$16 sps:$4 sm:$0xff]  }
 0x823   : > { %9661 = vst [vmem:[#allocation26_spill] sm:$0xff] %v7791_v46 }
 0x829   : > { %v5701_v38 = vpop.eup %5700 }
 0x82a   : > { %v2533_v42 = vadd.f32 1.0, %v5701_v38  ;;  %v5703_v43 = vpop.eup %5702  ;;  %v7797_v38 = vld [vmem:[%s9172_s2 + $0xe4] ss:$16 sps:$4 sm:$0xff]  }
 0x82b   : > { %v2534_v9 = vadd.f32 1.0, %v5703_v43  ;;  %v5705_v4 = vpop.eup %5704  ;;  %9662 = vst [vmem:[#allocation27_spill] sm:$0xff] %v7797_v38  ;;  %v7809_v43 = vld [vmem:[%s9172_s2 + $0xe0] ss:$16 sps:$4 sm:$0xff]  }
 0x82c   : > { %5708 = vrcp.f32 %v2533_v42  ;;  %v5707_v44 = vpop.eup %5706  ;;  %v7803_v42 = vld [vmem:[%s9172_s2 + $0xec] ss:$16 sps:$4 sm:$0xff]   ;;  %9664 = vst [vmem:[#allocation29_spill] sm:$0xff] %v7809_v43 }
 0x82d   : > { %5710 = vrcp.f32 %v2534_v9  ;;  %v2535_v60 = vadd.f32 1.0, %v5707_v44  ;;  %9663 = vst [vmem:[#allocation28_spill] sm:$0xff] %v7803_v42  ;;  %v7815_v9 = vld [vmem:[%s9172_s2 + $0xe8] ss:$16 sps:$4 sm:$0xff]   ;;  %v7827_v44 = vld [vmem:[%s9171_s1 + $0xc] ss:$16 sps:$4 sm:$0xff]  }
 0x82e   : > { %9665 = vst [vmem:[#allocation30_spill] sm:$0xff] %v7815_v9  ;;  %9667 = vst [vmem:[#allocation32_spill] sm:$0xff] %v7827_v44 }
 0x82f   : > { %5712 = vrcp.f32 %v2535_v60 }
 0x836   : > { %v5709_v45 = vpop.eup %5708 }
 0x837   : > { %v2544_v8 = vmul.f32 %v5709_v45, %v5705_v4  ;;  %v5711_v57 = vpop.eup %5710  ;;  %v7821_v4 = vld [vmem:[%s9171_s1 + $0x4] ss:$16 sps:$4 sm:$0xff]  }
 0x838   : > { %v2543_v55 = vmul.f32 %v5711_v57, %v7483_v59  ;;  %9666 = vst [vmem:[#allocation31_spill] sm:$0xff] %v7821_v4 }
 0x839   : > { %v5713_v0 = vpop.eup %5712 }
 0x83a   : > { %v7574_v56 = vadd.f32 %v2544_v8, %v2543_v55 }
 0x83c   : > { %5714 = vtanh.f32 %v7574_v56 }
 0x846   : > { %v5715_v6 = vpop.eup %5714 }
 0x847   : > { %v2547_v15 = vmul.f32 %v5715_v6, %v5713_v0 }
 0x849   : > { %v2549_v53 = vcombine.high %v2547_v15, %v2547_v15  ;;  %v2556_v2 = vrot.slane %v2547_v15, %v6709_v23  ;;  %v2616_v62 = vpack.c.bf16 %v2547_v15, %v2547_v15 }
 0x84b   : > { %v2563_v61 = vrot.slane %v2549_v53, %v6709_v23  ;;  %v2564_v51 = vcombine.high %v2556_v2, %v2556_v2  ;;  %v2572_v49 = vrot.slane %v2556_v2, %v6709_v23  ;;  %5366 = vst.sshfl [vmem:[%s6257_s25 + $0x6] sm:$0x1 pattern:$0x73625140] %v2556_v2  ;;  %2650 = vmatmul.mubr.bf16.vlgmr.msra.gmra.mrb[56].mxu0 %v2616_v62 }
 0x84c   : > { %2691 = vmatmul.mubr.bf16.vlgmr.msra.gmra.mrb[56].mxu1 %v2616_v62  ;;  %2700 = vmatpush1.bf16.msra.mxu0 %v7161_v33 }
 0x84d   : > { %2741 = vmatpush1.bf16.msra.mxu1 %v7167_v7  ;;  %v2565_v59 = vcombine.high %v2563_v61, %v2563_v61  ;;  %v2579_v52 = vrot.slane %v2563_v61, %v6709_v23  ;;  %v2586_v47 = vrot.slane %v2564_v51, %v6709_v23  ;;  %v2594_v48 = vcombine.high %v2572_v49, %v2572_v49 }
 0x84e   : > { %5367 = vst.sshfl [vmem:[%s6257_s25 + $0x16] sm:$0x1 pattern:$0x73625140] %v2564_v51  ;;  %2701 = vmatprep.subr.bf16.mxu0 %v7177_v28  ;;  %2742 = vmatprep.subr.bf16.mxu1 %v7183_v18  ;;  %v5370_v28 = vld [vmem:[%s6255_s24 + $0x1c] sm:$0xf] }
 0x84f   : > { %5368 = vst.sshfl [vmem:[%s6257_s25 + $0x46] sm:$0x1 pattern:$0x73625140] %v2563_v61  ;;  %2731 = vmatprep.mubr.bf16.mxu0 %v9483_v35  ;;  %v2593_v33 = vrot.slane %v2565_v59, %v6709_v23  ;;  %v2595_v7 = vcombine.high %v2579_v52, %v2579_v52  ;;  %v2596_v50 = vcombine.high %v2586_v47, %v2586_v47  ;;  %2608 = vst [vmem:[%s6257_s25 + $0x26] sm:$0x1] %v2594_v48 }
 0x850   : > { %5369 = vst.sshfl [vmem:[%s6257_s25 + $0x56] sm:$0x1 pattern:$0x73625140] %v2565_v59  ;;  %2772 = vmatprep.mubr.bf16.mxu1 %v9483_v35  ;;  %2702 = vmatpush1.bf16.msra.mxu0 %v7194_v24  ;;  %v7627_v18 = vld [vmem:[%s9172_s2 + $0x4] ss:$16 sps:$4 sm:$0xff]  }
 0x851   : > { %2743 = vmatpush1.bf16.msra.mxu1 %v7200_v16  ;;  %v2597_v25 = vcombine.high %v2593_v33, %v2593_v33  ;;  %2609 = vst [vmem:[%s6257_s25 + $0x36] sm:$0x1] %v2596_v50  ;;  %2612 = vst [vmem:[%s6257_s25 + $0x66] sm:$0x1] %v2595_v7  ;;  %2703 = vmatprep.subr.bf16.mxu0 %v7208_v26  ;;  %v7633_v24 = vld [vmem:[%s9172_s2 + $0xc] ss:$16 sps:$4 sm:$0xff]  }
 0x852   : > { %2744 = vmatprep.subr.bf16.mxu1 %v7214_v10  ;;  %v7639_v16 = vld [vmem:[%s9172_s2] ss:$16 sps:$4 sm:$0xff]   ;;  %v7645_v26 = vld [vmem:[%s9172_s2 + $0x8] ss:$16 sps:$4 sm:$0xff]   ;;  %v7651_v10 = vld [vmem:[%s9172_s2 + $0x24] ss:$16 sps:$4 sm:$0xff]  }
 0x853   : > { %2613 = vst [vmem:[%s6257_s25 + $0x76] sm:$0x1] %v2597_v25  ;;  %9636 = vst [vmem:[#allocation38_spill] sm:$0xff] %v7639_v16 }
 0x854   : > { %2704 = vmatpush1.bf16.msra.mxu0 %v7221_v39  ;;  %9637 = vst [vmem:[#allocation39_spill] sm:$0xff] %v7645_v26  ;;  %9638 = vst [vmem:[#allocation42_spill] sm:$0xff] %v7651_v10  ;;  %v7657_v39 = vld [vmem:[%s9172_s2 + $0x2c] ss:$16 sps:$4 sm:$0xff]  }
 0x855   : > { %2745 = vmatpush1.bf16.msra.mxu1 %v7227_v40  ;;  %2705 = vmatprep.subr.bf16.mxu0 %v7233_v30  ;;  %9639 = vst [vmem:[#allocation43_spill] sm:$0xff] %v7657_v39  ;;  %v7665_v40 = vld [vmem:[%s9172_s2 + $0x20] ss:$16 sps:$4 sm:$0xff]   ;;  %v7671_v30 = vld [vmem:[%s9172_s2 + $0x28] ss:$16 sps:$4 sm:$0xff]  }
 0x856   : > { %2746 = vmatprep.subr.bf16.mxu1 %v7239_v36  ;;  %9640 = vst [vmem:[#allocation44_spill] sm:$0xff] %v7665_v40  ;;  %9641 = vst [vmem:[#allocation45_spill] sm:$0xff] %v7671_v30  ;;  %v7677_v36 = vld [vmem:[%s9172_s2 + $0x44] ss:$16 sps:$4 sm:$0xff]  }
 0x857   : > { %9642 = vst [vmem:[#allocation46_spill] sm:$0xff] %v7677_v36 }
 0x858   : > { %2706 = vmatpush1.bf16.msra.mxu0 %v7245_v41  ;;  %v7683_v41 = vld [vmem:[%s9172_s2 + $0x4c] ss:$16 sps:$4 sm:$0xff]  }
 0x859   : > { %2747 = vmatpush1.bf16.msra.mxu1 %v7251_v11  ;;  %2707 = vmatprep.subr.bf16.mxu0 %v7257_v20  ;;  %9643 = vst [vmem:[#allocation47_spill] sm:$0xff] %v7683_v41  ;;  %v7689_v11 = vld [vmem:[%s9172_s2 + $0x40] ss:$16 sps:$4 sm:$0xff]   ;;  %v7695_v20 = vld [vmem:[%s9172_s2 + $0x48] ss:$16 sps:$4 sm:$0xff]  }
 0x85a   : > { %2748 = vmatprep.subr.bf16.mxu1 %v7263_v13  ;;  %9644 = vst [vmem:[#allocation40_spill] sm:$0xff] %v7689_v11  ;;  %9645 = vst [vmem:[#allocation41_spill] sm:$0xff] %v7695_v20  ;;  %v7701_v13 = vld [vmem:[%s9172_s2 + $0x64] ss:$16 sps:$4 sm:$0xff]  }
 0x85b   : > { %9646 = vst [vmem:[#allocation11_spill] sm:$0xff] %v7701_v13 }
 0x85c   : > { %2708 = vmatpush1.bf16.msra.mxu0 %v7269_v29  ;;  %v7707_v29 = vld [vmem:[%s9172_s2 + $0x6c] ss:$16 sps:$4 sm:$0xff]  }
 0x85d   : > { %2749 = vmatpush1.bf16.msra.mxu1 %v7275_v37  ;;  %2709 = vmatprep.subr.bf16.mxu0 %v7281_v12  ;;  %9647 = vst [vmem:[#allocation12_spill] sm:$0xff] %v7707_v29  ;;  %v7713_v37 = vld [vmem:[%s9172_s2 + $0x60] ss:$16 sps:$4 sm:$0xff]   ;;  %v7719_v12 = vld [vmem:[%s9172_s2 + $0x68] ss:$16 sps:$4 sm:$0xff]  }
 0x85e   : > { %2750 = vmatprep.subr.bf16.mxu1 %v9578_v58  ;;  %9648 = vst [vmem:[#allocation13_spill] sm:$0xff] %v7713_v37  ;;  %9649 = vst [vmem:[#allocation14_spill] sm:$0xff] %v7719_v12  ;;  %v7743_v58 = vld [vmem:[%s9172_s2 + $0x88] ss:$16 sps:$4 sm:$0xff]  }
 0x85f   : > { %9653 = vst [vmem:[#allocation18_spill] sm:$0xff] %v7743_v58 }
 0x860   : > { %2710 = vmatpush1.bf16.msra.mxu0 %v9579_v1  ;;  %v7749_v1 = vld [vmem:[%s9172_s2 + $0xa4] ss:$16 sps:$4 sm:$0xff]  }
 0x861   : > { %2751 = vmatpush1.bf16.msra.mxu1 %v9580_v54  ;;  %2711 = vmatprep.subr.bf16.mxu0 %v9581_v63  ;;  %9654 = vst [vmem:[#allocation19_spill] sm:$0xff] %v7749_v1  ;;  %v7755_v54 = vld [vmem:[%s9172_s2 + $0xac] ss:$16 sps:$4 sm:$0xff]   ;;  %v7761_v63 = vld [vmem:[%s9172_s2 + $0xa0] ss:$16 sps:$4 sm:$0xff]  }
 0x862   : > { %2752 = vmatprep.subr.bf16.mxu1 %v9582_v17  ;;  %9655 = vst [vmem:[#allocation20_spill] sm:$0xff] %v7755_v54  ;;  %9656 = vst [vmem:[#allocation21_spill] sm:$0xff] %v7761_v63  ;;  %v7767_v17 = vld [vmem:[%s9172_s2 + $0xa8] ss:$16 sps:$4 sm:$0xff]  }
 0x863   : > { %9657 = vst [vmem:[#allocation22_spill] sm:$0xff] %v7767_v17 }
 0x864   : > { %2712 = vmatpush1.bf16.msra.mxu0 %v9583_v3  ;;  %v7773_v3 = vld [vmem:[%s9172_s2 + $0xc4] ss:$16 sps:$4 sm:$0xff]  }
 0x865   : > { %2753 = vmatpush1.bf16.msra.mxu1 %v9584_v31  ;;  %2713 = vmatprep.subr.bf16.mxu0 %v9585_v5  ;;  %9658 = vst [vmem:[#allocation23_spill] sm:$0xff] %v7773_v3  ;;  %v7779_v31 = vld [vmem:[%s9172_s2 + $0xcc] ss:$16 sps:$4 sm:$0xff]   ;;  %v7785_v5 = vld [vmem:[%s9172_s2 + $0xc0] ss:$16 sps:$4 sm:$0xff]  }
 0x866   : > { %2754 = vmatprep.subr.bf16.mxu1 %v7335_v19  ;;  %v7725_v19 = vld [vmem:[%s9172_s2 + $0x84] ss:$16 sps:$4 sm:$0xff]   ;;  %9659 = vst [vmem:[#allocation24_spill] sm:$0xff] %v7779_v31  ;;  %9660 = vst [vmem:[#allocation25_spill] sm:$0xff] %v7785_v5 }
 0x867   : > { %9650 = vst [vmem:[#allocation15_spill] sm:$0xff] %v7725_v19 }
 0x868   : > { %2714 = vmatpush1.bf16.msra.mxu0 %v7341_v14  ;;  %v7731_v14 = vld [vmem:[%s9172_s2 + $0x8c] ss:$16 sps:$4 sm:$0xff]  }
 0x869   : > { %2755 = vmatpush1.bf16.msra.mxu1 %v7347_v22  ;;  %2878 = vmatprep.subr.bf16.mxu0 %v7627_v18  ;;  %9651 = vst [vmem:[#allocation16_spill] sm:$0xff] %v7731_v14  ;;  %v7737_v22 = vld [vmem:[%s9172_s2 + $0x80] ss:$16 sps:$4 sm:$0xff]  }
 0x86a   : > { %2919 = vmatprep.subr.bf16.mxu1 %v7633_v24  ;;  %9652 = vst [vmem:[#allocation17_spill] sm:$0xff] %v7737_v22 }
 0x86b   : > { %2732 = vmatmul.mubr.bf16.vlgmr.msra.gmra.mrb[60].mxu0 %v5370_v28 }
 0x86c   : > { %2773 = vmatmul.mubr.bf16.vlgmr.msra.gmra.mrb[60].mxu1 %v5370_v28  ;;  %2879 = vmatpush1.bf16.msra.mxu0 %v7639_v16 }
 0x86d   : > { %2920 = vmatpush1.bf16.msra.mxu1 %v7645_v26  ;;  %2880 = vmatprep.subr.bf16.mxu0 %v7651_v10 }
 0x86e   : > { %2921 = vmatprep.subr.bf16.mxu1 %v7657_v39  ;;  %2910 = vmatprep.mubr.bf16.mxu0 %v9483_v35 }
 0x86f   : > { %2951 = vmatprep.mubr.bf16.mxu1 %v9483_v35 }
 0x870   : > { %2881 = vmatpush1.bf16.msra.mxu0 %v7665_v40 }
 0x871   : > { %2922 = vmatpush1.bf16.msra.mxu1 %v7671_v30  ;;  %2882 = vmatprep.subr.bf16.mxu0 %v7677_v36 }
 0x872   : > { %2923 = vmatprep.subr.bf16.mxu1 %v7683_v41 }
 0x874   : > { %2883 = vmatpush1.bf16.msra.mxu0 %v7689_v11 }
 0x875   : > { %2924 = vmatpush1.bf16.msra.mxu1 %v7695_v20  ;;  %2884 = vmatprep.subr.bf16.mxu0 %v7701_v13 }
 0x876   : > { %2925 = vmatprep.subr.bf16.mxu1 %v7707_v29 }
 0x878   : > { %2885 = vmatpush1.bf16.msra.mxu0 %v7713_v37 }
 0x879   : > { %2926 = vmatpush1.bf16.msra.mxu1 %v7719_v12  ;;  %2886 = vmatprep.subr.bf16.mxu0 %v7725_v19 }
 0x87a   : > { %2927 = vmatprep.subr.bf16.mxu1 %v7731_v14 }
 0x87c   : > { %2887 = vmatpush1.bf16.msra.mxu0 %v7737_v22 }
 0x87d   : > { %2928 = vmatpush1.bf16.msra.mxu1 %v7743_v58  ;;  %2888 = vmatprep.subr.bf16.mxu0 %v7749_v1 }
 0x87e   : > { %2929 = vmatprep.subr.bf16.mxu1 %v7755_v54 }
 0x880   : > { %2889 = vmatpush1.bf16.msra.mxu0 %v7761_v63 }
 0x881   : > { %2930 = vmatpush1.bf16.msra.mxu1 %v7767_v17  ;;  %2890 = vmatprep.subr.bf16.mxu0 %v7773_v3 }
 0x882   : > { %2931 = vmatprep.subr.bf16.mxu1 %v7779_v31 }
 0x884   : > { %2891 = vmatpush1.bf16.msra.mxu0 %v7785_v5 }
 0x885   : > { %2932 = vmatpush1.bf16.msra.mxu1 %v7791_v46  ;;  %2892 = vmatprep.subr.bf16.mxu0 %v7797_v38 }
 0x886   : > { %2933 = vmatprep.subr.bf16.mxu1 %v7803_v42 }
 0x888   : > { %2893 = vmatpush1.bf16.msra.mxu0 %v7809_v43 }
 0x889   : > { %2934 = vmatpush1.bf16.msra.mxu1 %v7815_v9  ;;  %2960 = vmatprep.subr.bf16.mxu0 %v7821_v4 }
 0x88a   : > { %3001 = vmatprep.subr.bf16.mxu1 %v7827_v44 }
 0x91e   : > { %v2651_v45 = vpop.f32.mrb[56].mxu0 }
 0x91f   : > { %v2692_v8 = vpop.f32.mrb[56].mxu1  ;;  %v2653_v57 = vpop.f32.mrb[57].mxu0 }
 0x920   : > { %v2694_v60 = vpop.f32.mrb[57].mxu1  ;;  %v2655_v55 = vpop.f32.mrb[58].mxu0 }
 0x921   : > { %v2696_v0 = vpop.f32.mrb[58].mxu1  ;;  %v2656_v6 = vpop.f32.mrb[59].mxu0 }
 0x922   : > { %v2697_v15 = vpop.f32.mrb[59].mxu1 }
 0x93e   : > { %v2733_v53 = vpop.f32.mrb[60].mxu0 }
 0x93f   : > { %v2774_v2 = vpop.f32.mrb[60].mxu1  ;;  %v2734_v62 = vadd.f32 %v2733_v53, %v2651_v45  ;;  %v2735_v51 = vpop.f32.mrb[61].mxu0 }
 0x940   : > { %v2775_v61 = vadd.f32 %v2774_v2, %v2692_v8  ;;  %v2776_v49 = vpop.f32.mrb[61].mxu1  ;;  %v2736_v59 = vadd.f32 %v2735_v51, %v2653_v57  ;;  %v2737_v47 = vpop.f32.mrb[62].mxu0 }
 0x941   : > { %v2777_v52 = vadd.f32 %v2776_v49, %v2694_v60  ;;  %v2778_v48 = vpop.f32.mrb[62].mxu1  ;;  %v2781_v33 = vadd.f32 %v2734_v62, %v6694_v32  ;;  %v2738_v7 = vpop.f32.mrb[63].mxu0 }
 0x942   : > { %v2779_v50 = vpop.f32.mrb[63].mxu1  ;;  %v2782_v25 = vadd.f32 %v2736_v59, %v6696_v21  ;;  %v2783_v0 = vadd.f32 %v2775_v61, %v6700_v34 }
 0x943   : > { %v5371_v28 = vmul.f32 -1.442695, %v2781_v33  ;;  %v2784_v45 = vadd.f32 %v2777_v52, %v6702_v27 }
 0x944   : > { %v5372_v55 = vmul.f32 -1.442695, %v2782_v25  ;;  %v5373_v8 = vmul.f32 -1.442695, %v2783_v0  ;;  %v7852_v0 = vld [vmem:[%s9171_s1] ss:$16 sps:$4 sm:$0xff]  }
 0x945   : > { %5716 = vpow2.f32 %v5371_v28 }
 0x946   : > { %5718 = vpow2.f32 %v5372_v55 }
 0x947   : > { %5720 = vtanh.f32 %v2784_v45  ;;  %v7858_v45 = vld [vmem:[%s9171_s1 + $0x8] ss:$16 sps:$4 sm:$0xff]  }
 0x948   : > { %5722 = vpow2.f32 %v5373_v8 }
 0x94f   : > { %v5717_v6 = vpop.eup %5716 }
 0x950   : > { %v2794_v57 = vadd.f32 1.0, %v5717_v6  ;;  %v5719_v60 = vpop.eup %5718 }
 0x951   : > { %v2795_v15 = vadd.f32 1.0, %v5719_v60  ;;  %v5721_v53 = vpop.eup %5720 }
 0x952   : > { %5724 = vrcp.f32 %v2794_v57  ;;  %v5723_v2 = vpop.eup %5722 }
 0x953   : > { %5726 = vrcp.f32 %v2795_v15  ;;  %v2796_v59 = vadd.f32 1.0, %v5723_v2  ;;  %v7868_v15 = vld [vmem:[%s9171_s1 + $0x24] ss:$16 sps:$4 sm:$0xff]  }
 0x955   : > { %5728 = vrcp.f32 %v2796_v59  ;;  %v7891_v59 = vld [vmem:[%s9171_s1 + $0x28] ss:$16 sps:$4 sm:$0xff]  }
 0x95c   : > { %v5725_v62 = vpop.eup %5724 }
 0x95d   : > { %v2805_v51 = vmul.f32 %v5725_v62, %v5721_v53  ;;  %v5727_v49 = vpop.eup %5726  ;;  %v7874_v53 = vld [vmem:[%s9171_s1 + $0x2c] ss:$16 sps:$4 sm:$0xff]  }
 0x95e   : > { %v2804_v61 = vmul.f32 %v5727_v49, %v7574_v56  ;;  %v7885_v49 = vld [vmem:[%s9171_s1 + $0x20] ss:$16 sps:$4 sm:$0xff]  }
 0x95f   : > { %v5729_v52 = vpop.eup %5728 }
 0x960   : > { %v7835_v47 = vadd.f32 %v2805_v51, %v2804_v61 }
 0x962   : > { %5730 = vtanh.f32 %v7835_v47 }
 0x96c   : > { %v5731_v48 = vpop.eup %5730 }
 0x96d   : > { %v7838_v33 = vmul.f32 %v5731_v48, %v5729_v52  ;;  %v7899_v52 = vld [vmem:[%s9171_s1 + $0x44] ss:$16 sps:$4 sm:$0xff]   ;;  %v7905_v48 = vld [vmem:[%s9171_s1 + $0x4c] ss:$16 sps:$4 sm:$0xff]  }
 0x96f   : > { %v2810_v7 = vcombine.high %v7838_v33, %v7838_v33  ;;  %v2817_v50 = vrot.slane %v7838_v33, %v6709_v23  ;;  %v2877_v25 = vpack.c.bf16 %v7838_v33, %v7838_v33 }
 0x971   : > { %v2824_v56 = vrot.slane %v2810_v7, %v6709_v23  ;;  %v2825_v28 = vcombine.high %v2817_v50, %v2817_v50  ;;  %v2833_v55 = vrot.slane %v2817_v50, %v6709_v23  ;;  %5374 = vst.sshfl [vmem:[%s6257_s25 + $0x7] sm:$0x1 pattern:$0x73625140] %v2817_v50  ;;  %2911 = vmatmul.mubr.bf16.vlgmr.msra.gmra.mrb[64].mxu0 %v2877_v25  ;;  %v7912_v7 = vld [vmem:[%s9171_s1 + $0x40] ss:$16 sps:$4 sm:$0xff]  }
 0x972   : > { %2952 = vmatmul.mubr.bf16.vlgmr.msra.gmra.mrb[64].mxu1 %v2877_v25  ;;  %2961 = vmatpush1.bf16.msra.mxu0 %v7852_v0  ;;  %v7918_v50 = vld [vmem:[%s9171_s1 + $0x48] ss:$16 sps:$4 sm:$0xff]   ;;  %v7924_v25 = vld [vmem:[%s9171_s1 + $0x64] ss:$16 sps:$4 sm:$0xff]  }
 0x973   : > { %3002 = vmatpush1.bf16.msra.mxu1 %v7858_v45  ;;  %v2826_v8 = vcombine.high %v2824_v56, %v2824_v56  ;;  %v2840_v6 = vrot.slane %v2824_v56, %v6709_v23  ;;  %v2847_v57 = vrot.slane %v2825_v28, %v6709_v23  ;;  %v2855_v60 = vcombine.high %v2833_v55, %v2833_v55  ;;  %v7942_v55 = vld [vmem:[%s9171_s1 + $0x68] ss:$16 sps:$4 sm:$0xff]  }
 0x974   : > { %5375 = vst.sshfl [vmem:[%s6257_s25 + $0x17] sm:$0x1 pattern:$0x73625140] %v2825_v28  ;;  %2962 = vmatprep.subr.bf16.mxu0 %v7868_v15  ;;  %3003 = vmatprep.subr.bf16.mxu1 %v7874_v53  ;;  %v7936_v28 = vld [vmem:[%s9171_s1 + $0x60] ss:$16 sps:$4 sm:$0xff]  }
 0x975   : > { %5376 = vst.sshfl [vmem:[%s6257_s25 + $0x47] sm:$0x1 pattern:$0x73625140] %v2824_v56  ;;  %2992 = vmatprep.mubr.bf16.mxu0 %v9483_v35  ;;  %v2854_v2 = vrot.slane %v2826_v8, %v6709_v23  ;;  %v2856_v62 = vcombine.high %v2840_v6, %v2840_v6  ;;  %v2857_v51 = vcombine.high %v2847_v57, %v2847_v57  ;;  %2869 = vst [vmem:[%s6257_s25 + $0x27] sm:$0x1] %v2855_v60 }
 0x976   : > { %5377 = vst.sshfl [vmem:[%s6257_s25 + $0x57] sm:$0x1 pattern:$0x73625140] %v2826_v8  ;;  %3033 = vmatprep.mubr.bf16.mxu1 %v9483_v35  ;;  %2963 = vmatpush1.bf16.msra.mxu0 %v7885_v49  ;;  %v7930_v56 = vld [vmem:[%s9171_s1 + $0x6c] ss:$16 sps:$4 sm:$0xff]  }
 0x977   : > { %3004 = vmatpush1.bf16.msra.mxu1 %v7891_v59  ;;  %v2858_v61 = vcombine.high %v2854_v2, %v2854_v2  ;;  %2870 = vst [vmem:[%s6257_s25 + $0x37] sm:$0x1] %v2857_v51  ;;  %2873 = vst [vmem:[%s6257_s25 + $0x67] sm:$0x1] %v2856_v62  ;;  %2964 = vmatprep.subr.bf16.mxu0 %v7899_v52  ;;  %v7948_v8 = vld [vmem:[%s9171_s1 + $0x84] ss:$16 sps:$4 sm:$0xff]  }
 0x978   : > { %3005 = vmatprep.subr.bf16.mxu1 %v7905_v48  ;;  %v7954_v6 = vld [vmem:[%s9171_s1 + $0x8c] ss:$16 sps:$4 sm:$0xff]   ;;  %v7960_v57 = vld [vmem:[%s9171_s1 + $0x80] ss:$16 sps:$4 sm:$0xff]   ;;  %v7966_v60 = vld [vmem:[%s9171_s1 + $0x88] ss:$16 sps:$4 sm:$0xff]  }
 0x979   : > { %2874 = vst [vmem:[%s6257_s25 + $0x77] sm:$0x1] %v2858_v61  ;;  %v7972_v2 = vld [vmem:[%s9171_s1 + $0xa4] ss:$16 sps:$4 sm:$0xff]   ;;  %v7978_v62 = vld [vmem:[%s9171_s1 + $0xac] ss:$16 sps:$4 sm:$0xff]  }
 0x97a   : > { %2965 = vmatpush1.bf16.msra.mxu0 %v7912_v7  ;;  %9668 = vst [vmem:[#allocation33_spill] sm:$0xff] %v7972_v2  ;;  %9669 = vst [vmem:[#allocation34_spill] sm:$0xff] %v7978_v62  ;;  %v7984_v51 = vld [vmem:[%s9171_s1 + $0xa0] ss:$16 sps:$4 sm:$0xff]   ;;  %v7990_v61 = vld [vmem:[%s9171_s1 + $0xa8] ss:$16 sps:$4 sm:$0xff]  }
 0x97b   : > { %3006 = vmatpush1.bf16.msra.mxu1 %v7918_v50  ;;  %2966 = vmatprep.subr.bf16.mxu0 %v7924_v25  ;;  %9670 = vst [vmem:[#allocation35_spill] sm:$0xff] %v7984_v51  ;;  %9671 = vst [vmem:[#allocation36_spill] sm:$0xff] %v7990_v61 }
 0x97c   : > { %3007 = vmatprep.subr.bf16.mxu1 %v7930_v56 }
 0x97e   : > { %2967 = vmatpush1.bf16.msra.mxu0 %v7936_v28 }
 0x97f   : > { %3008 = vmatpush1.bf16.msra.mxu1 %v7942_v55  ;;  %2968 = vmatprep.subr.bf16.mxu0 %v7948_v8 }
 0x980   : > { %3009 = vmatprep.subr.bf16.mxu1 %v7954_v6 }
 0x982   : > { %2969 = vmatpush1.bf16.msra.mxu0 %v7960_v57 }
 0x983   : > { %3010 = vmatpush1.bf16.msra.mxu1 %v7966_v60  ;;  %2970 = vmatprep.subr.bf16.mxu0 %v7972_v2  ;;  %v7996_v2 = vld [vmem:[%s9171_s1 + $0xc4] ss:$16 sps:$4 sm:$0xff]  }
 0x984   : > { %3011 = vmatprep.subr.bf16.mxu1 %v7978_v62  ;;  %9672 = vst [vmem:[#allocation37_spill] sm:$0xff] %v7996_v2  ;;  %v8002_v62 = vld [vmem:[%s9171_s1 + $0xcc] ss:$16 sps:$4 sm:$0xff]  }
 0x985   : > { %9673 = vst [vmem:[#allocation48_spill] sm:$0xff] %v8002_v62 }
 0x986   : > { %2971 = vmatpush1.bf16.msra.mxu0 %v7984_v51  ;;  %v8008_v51 = vld [vmem:[%s9171_s1 + $0xc0] ss:$16 sps:$4 sm:$0xff]  }
 0x987   : > { %3012 = vmatpush1.bf16.msra.mxu1 %v7990_v61  ;;  %2972 = vmatprep.subr.bf16.mxu0 %v7996_v2  ;;  %9674 = vst [vmem:[#allocation49_spill] sm:$0xff] %v8008_v51  ;;  %v8014_v61 = vld [vmem:[%s9171_s1 + $0xc8] ss:$16 sps:$4 sm:$0xff]   ;;  %v8020_v2 = vld [vmem:[%s9171_s1 + $0xe4] ss:$16 sps:$4 sm:$0xff]  }
 0x988   : > { %3013 = vmatprep.subr.bf16.mxu1 %v8002_v62  ;;  %9675 = vst [vmem:[#allocation50_spill] sm:$0xff] %v8014_v61  ;;  %9676 = vst [vmem:[#allocation51_spill] sm:$0xff] %v8020_v2  ;;  %v8026_v62 = vld [vmem:[%s9171_s1 + $0xec] ss:$16 sps:$4 sm:$0xff]  }
 0x98a   : > { %2973 = vmatpush1.bf16.msra.mxu0 %v8008_v51  ;;  %v8032_v51 = vld [vmem:[%s9171_s1 + $0xe0] ss:$16 sps:$4 sm:$0xff]  }
 0x98b   : > { %3014 = vmatpush1.bf16.msra.mxu1 %v8014_v61  ;;  %2974 = vmatprep.subr.bf16.mxu0 %v8020_v2  ;;  %v8038_v61 = vld [vmem:[%s9171_s1 + $0xe8] ss:$16 sps:$4 sm:$0xff]   ;;  %v5378_v2 = vld [vmem:[%s6255_s24 + $0x20] sm:$0xf] }
 0x98c   : > { %3015 = vmatprep.subr.bf16.mxu1 %v8026_v62 }
 0x98e   : > { %2975 = vmatpush1.bf16.msra.mxu0 %v8032_v51 }
 0x98f   : > { %3016 = vmatpush1.bf16.msra.mxu1 %v8038_v61  ;;  %3144 = vmatprep.subr.bf16.mxu0 %v7627_v18 }
 0x990   : > { %3185 = vmatprep.subr.bf16.mxu1 %v7633_v24 }
 0x991   : > { %2993 = vmatmul.mubr.bf16.vlgmr.msra.gmra.mrb[68].mxu0 %v5378_v2 }
 0x992   : > { %3034 = vmatmul.mubr.bf16.vlgmr.msra.gmra.mrb[68].mxu1 %v5378_v2  ;;  %3145 = vmatpush1.bf16.msra.mxu0 %v7639_v16 }
 0x993   : > { %3186 = vmatpush1.bf16.msra.mxu1 %v7645_v26  ;;  %3146 = vmatprep.subr.bf16.mxu0 %v7651_v10 }
 0x994   : > { %3187 = vmatprep.subr.bf16.mxu1 %v7657_v39  ;;  %3176 = vmatprep.mubr.bf16.mxu0 %v9483_v35 }
 0x995   : > { %3217 = vmatprep.mubr.bf16.mxu1 %v9483_v35 }
 0x996   : > { %3147 = vmatpush1.bf16.msra.mxu0 %v7665_v40 }
 0x997   : > { %3188 = vmatpush1.bf16.msra.mxu1 %v7671_v30  ;;  %3148 = vmatprep.subr.bf16.mxu0 %v7677_v36 }
 0x998   : > { %3189 = vmatprep.subr.bf16.mxu1 %v7683_v41 }
 0x99a   : > { %3149 = vmatpush1.bf16.msra.mxu0 %v7689_v11 }
 0x99b   : > { %3190 = vmatpush1.bf16.msra.mxu1 %v7695_v20  ;;  %3150 = vmatprep.subr.bf16.mxu0 %v7701_v13 }
 0x99c   : > { %3191 = vmatprep.subr.bf16.mxu1 %v7707_v29 }
 0x99e   : > { %3151 = vmatpush1.bf16.msra.mxu0 %v7713_v37 }
 0x99f   : > { %3192 = vmatpush1.bf16.msra.mxu1 %v7719_v12  ;;  %3152 = vmatprep.subr.bf16.mxu0 %v7725_v19 }
 0x9a0   : > { %3193 = vmatprep.subr.bf16.mxu1 %v7731_v14 }
 0x9a2   : > { %3153 = vmatpush1.bf16.msra.mxu0 %v7737_v22 }
 0x9a3   : > { %3194 = vmatpush1.bf16.msra.mxu1 %v7743_v58  ;;  %3154 = vmatprep.subr.bf16.mxu0 %v7749_v1 }
 0x9a4   : > { %3195 = vmatprep.subr.bf16.mxu1 %v7755_v54 }
 0x9a6   : > { %3155 = vmatpush1.bf16.msra.mxu0 %v7761_v63 }
 0x9a7   : > { %3196 = vmatpush1.bf16.msra.mxu1 %v7767_v17  ;;  %3156 = vmatprep.subr.bf16.mxu0 %v7773_v3 }
 0x9a8   : > { %3197 = vmatprep.subr.bf16.mxu1 %v7779_v31 }
 0x9aa   : > { %3157 = vmatpush1.bf16.msra.mxu0 %v7785_v5 }
 0x9ab   : > { %3198 = vmatpush1.bf16.msra.mxu1 %v7791_v46  ;;  %3158 = vmatprep.subr.bf16.mxu0 %v7797_v38 }
 0x9ac   : > { %3199 = vmatprep.subr.bf16.mxu1 %v7803_v42 }
 0x9ae   : > { %3159 = vmatpush1.bf16.msra.mxu0 %v7809_v43 }
 0x9af   : > { %3200 = vmatpush1.bf16.msra.mxu1 %v7815_v9  ;;  %3226 = vmatprep.subr.bf16.mxu0 %v7821_v4 }
 0x9b0   : > { %3267 = vmatprep.subr.bf16.mxu1 %v7827_v44 }
 0xa44   : > { %v2912_v2 = vpop.f32.mrb[64].mxu0 }
 0xa45   : > { %v2953_v3 = vpop.f32.mrb[64].mxu1  ;;  %v2914_v17 = vpop.f32.mrb[65].mxu0 }
 0xa46   : > { %v2955_v31 = vpop.f32.mrb[65].mxu1  ;;  %v2916_v63 = vpop.f32.mrb[66].mxu0 }
 0xa47   : > { %v2957_v5 = vpop.f32.mrb[66].mxu1  ;;  %v2917_v54 = vpop.f32.mrb[67].mxu0 }
 0xa48   : > { %v2958_v46 = vpop.f32.mrb[67].mxu1 }
 0xa64   : > { %v2994_v1 = vpop.f32.mrb[68].mxu0 }
 0xa65   : > { %v3035_v38 = vpop.f32.mrb[68].mxu1  ;;  %v2995_v58 = vadd.f32 %v2994_v1, %v2912_v2  ;;  %v2996_v22 = vpop.f32.mrb[69].mxu0 }
 0xa66   : > { %v3036_v42 = vadd.f32 %v3035_v38, %v2953_v3  ;;  %v3037_v43 = vpop.f32.mrb[69].mxu1  ;;  %v2997_v14 = vadd.f32 %v2996_v22, %v2914_v17  ;;  %v2998_v19 = vpop.f32.mrb[70].mxu0 }
 0xa67   : > { %v3038_v9 = vadd.f32 %v3037_v43, %v2955_v31  ;;  %v3039_v4 = vpop.f32.mrb[70].mxu1  ;;  %v3042_v44 = vadd.f32 %v2995_v58, %v6694_v32  ;;  %v2999_v12 = vpop.f32.mrb[71].mxu0 }
 0xa68   : > { %v3040_v37 = vpop.f32.mrb[71].mxu1  ;;  %v3043_v29 = vadd.f32 %v2997_v14, %v6696_v21  ;;  %v3044_v54 = vadd.f32 %v3036_v42, %v6700_v34 }
 0xa69   : > { %v5379_v63 = vmul.f32 -1.442695, %v3042_v44  ;;  %v3045_v1 = vadd.f32 %v3038_v9, %v6702_v27  ;;  %v3071_v9 = vstv %s3070_s17 }
 0xa6a   : > { %v5380_v5 = vmul.f32 -1.442695, %v3043_v29  ;;  %v5381_v3 = vmul.f32 -1.442695, %v3044_v54  ;;  %vm8087_vm0 = vcmp.eq.s32.totalorder %v3071_v9, 1  ;;  %v9681_v9 = vld [vmem:[#allocation35_spill] sm:$0xff] }
 0xa6b   : > { %5732 = vpow2.f32 %v5379_v63 }
 0xa6c   : > { %5734 = vpow2.f32 %v5380_v5 }
 0xa6d   : > { %5736 = vtanh.f32 %v3045_v1 }
 0xa6e   : > { %5738 = vpow2.f32 %v5381_v3 }
 0xa75   : > { %v5733_v46 = vpop.eup %5732 }
 0xa76   : > { %v3055_v22 = vadd.f32 1.0, %v5733_v46  ;;  %v5735_v19 = vpop.eup %5734 }
 0xa77   : > { %v3056_v12 = vadd.f32 1.0, %v5735_v19  ;;  %v5737_v37 = vpop.eup %5736 }
 0xa78   : > { %5740 = vrcp.f32 %v3055_v22  ;;  %v5739_v14 = vpop.eup %5738 }
 0xa79   : > { %5742 = vrcp.f32 %v3056_v12  ;;  %v3057_v31 = vadd.f32 1.0, %v5739_v14 }
 0xa7b   : > { %5744 = vrcp.f32 %v3057_v31 }
 0xa82   : > { %v5741_v58 = vpop.eup %5740 }
 0xa83   : > { %v3066_v29 = vmul.f32 %v5741_v58, %v5737_v37  ;;  %v5743_v17 = vpop.eup %5742 }
 0xa84   : > { %v3065_v38 = vmul.f32 %v5743_v17, %v7835_v47 }
 0xa85   : > { %v5745_v43 = vpop.eup %5744 }
 0xa86   : > { %v8083_v42 = vadd.f32 %v3066_v29, %v3065_v38  ;;  %v9679_v38 = vld [vmem:[#allocation33_spill] sm:$0xff] }
 0xa88   : > { %5746 = vtanh.f32 %v8083_v42 }
 0xa92   : > { %v5747_v4 = vpop.eup %5746 }
 0xa93   : > { %v3069_v44 = vmul.f32 %v5747_v4, %v5745_v43  ;;  %v9680_v43 = vld [vmem:[#allocation34_spill] sm:$0xff]  ;;  %v9682_v4 = vld [vmem:[#allocation36_spill] sm:$0xff] }
 0xa95   : > { %v3073_v63 = vsel %vm8087_vm0, %v3069_v44, %v7838_v33  ;;  %v9683_v44 = vld [vmem:[#allocation37_spill] sm:$0xff] }
 0xa96   : > { %v3076_v5 = vcombine.high %v3073_v63, %v3073_v63  ;;  %v3083_v54 = vrot.slane %v3073_v63, %v6709_v23  ;;  %v3143_v1 = vpack.c.bf16 %v3073_v63, %v3073_v63  ;;  %v9684_v63 = vld [vmem:[#allocation48_spill] sm:$0xff] }
 0xa98   : > { %v3090_v3 = vrot.slane %v3076_v5, %v6709_v23  ;;  %v3091_v46 = vcombine.high %v3083_v54, %v3083_v54  ;;  %v3099_v22 = vrot.slane %v3083_v54, %v6709_v23  ;;  %5382 = vst.sshfl [vmem:[%s6257_s25 + $0x8] sm:$0x1 pattern:$0x73625140] %v3083_v54  ;;  %3177 = vmatmul.mubr.bf16.vlgmr.msra.gmra.mrb[72].mxu0 %v3143_v1  ;;  %v9685_v5 = vld [vmem:[#allocation49_spill] sm:$0xff]  ;;  %v9686_v54 = vld [vmem:[#allocation50_spill] sm:$0xff] }
 0xa99   : > { %3218 = vmatmul.mubr.bf16.vlgmr.msra.gmra.mrb[72].mxu1 %v3143_v1  ;;  %3227 = vmatpush1.bf16.msra.mxu0 %v7852_v0  ;;  %v9687_v1 = vld [vmem:[#allocation51_spill] sm:$0xff] }
 0xa9a   : > { %3268 = vmatpush1.bf16.msra.mxu1 %v7858_v45  ;;  %v3092_v19 = vcombine.high %v3090_v3, %v3090_v3  ;;  %v3106_v12 = vrot.slane %v3090_v3, %v6709_v23  ;;  %v3113_v37 = vrot.slane %v3091_v46, %v6709_v23  ;;  %v3121_v14 = vcombine.high %v3099_v22, %v3099_v22  ;;  %v9689_v22 = vld [vmem:[#allocation13_spill] sm:$0xff] }
 0xa9b   : > { %5383 = vst.sshfl [vmem:[%s6257_s25 + $0x18] sm:$0x1 pattern:$0x73625140] %v3091_v46  ;;  %3228 = vmatprep.subr.bf16.mxu0 %v7868_v15  ;;  %3269 = vmatprep.subr.bf16.mxu1 %v7874_v53  ;;  %v9688_v46 = vld [vmem:[#allocation12_spill] sm:$0xff] }
 0xa9c   : > { %5384 = vst.sshfl [vmem:[%s6257_s25 + $0x48] sm:$0x1 pattern:$0x73625140] %v3090_v3  ;;  %3258 = vmatprep.mubr.bf16.mxu0 %v9483_v35  ;;  %v3120_v58 = vrot.slane %v3092_v19, %v6709_v23  ;;  %v3122_v29 = vcombine.high %v3106_v12, %v3106_v12  ;;  %v3123_v17 = vcombine.high %v3113_v37, %v3113_v37  ;;  %3135 = vst [vmem:[%s6257_s25 + $0x28] sm:$0x1] %v3121_v14 }
 0xa9d   : > { %5385 = vst.sshfl [vmem:[%s6257_s25 + $0x58] sm:$0x1 pattern:$0x73625140] %v3092_v19  ;;  %3299 = vmatprep.mubr.bf16.mxu1 %v9483_v35  ;;  %3229 = vmatpush1.bf16.msra.mxu0 %v7885_v49  ;;  %v5386_v3 = vld [vmem:[%s6255_s24 + $0x24] sm:$0xf] }
 0xa9e   : > { %3270 = vmatpush1.bf16.msra.mxu1 %v7891_v59  ;;  %v3124_v31 = vcombine.high %v3120_v58, %v3120_v58  ;;  %3136 = vst [vmem:[%s6257_s25 + $0x38] sm:$0x1] %v3123_v17  ;;  %3139 = vst [vmem:[%s6257_s25 + $0x68] sm:$0x1] %v3122_v29  ;;  %3230 = vmatprep.subr.bf16.mxu0 %v7899_v52  ;;  %v9690_v19 = vld [vmem:[#allocation14_spill] sm:$0xff]  ;;  %v9691_v12 = vld [vmem:[#allocation15_spill] sm:$0xff] }
 0xa9f   : > { %3271 = vmatprep.subr.bf16.mxu1 %v7905_v48  ;;  %v9692_v37 = vld [vmem:[#allocation16_spill] sm:$0xff]  ;;  %v9693_v14 = vld [vmem:[#allocation17_spill] sm:$0xff]  ;;  %v9694_v58 = vld [vmem:[#allocation18_spill] sm:$0xff] }
 0xaa0   : > { %3140 = vst [vmem:[%s6257_s25 + $0x78] sm:$0x1] %v3124_v31  ;;  %v9695_v29 = vld [vmem:[#allocation19_spill] sm:$0xff]  ;;  %v9696_v17 = vld [vmem:[#allocation20_spill] sm:$0xff]  ;;  %v9697_v31 = vld [vmem:[#allocation21_spill] sm:$0xff] }
 0xaa1   : > { %3231 = vmatpush1.bf16.msra.mxu0 %v7912_v7 }
 0xaa2   : > { %3272 = vmatpush1.bf16.msra.mxu1 %v7918_v50  ;;  %3232 = vmatprep.subr.bf16.mxu0 %v7924_v25 }
 0xaa3   : > { %3273 = vmatprep.subr.bf16.mxu1 %v7930_v56 }
 0xaa5   : > { %3233 = vmatpush1.bf16.msra.mxu0 %v7936_v28 }
 0xaa6   : > { %3274 = vmatpush1.bf16.msra.mxu1 %v7942_v55  ;;  %3234 = vmatprep.subr.bf16.mxu0 %v7948_v8 }
 0xaa7   : > { %3275 = vmatprep.subr.bf16.mxu1 %v7954_v6 }
 0xaa9   : > { %3235 = vmatpush1.bf16.msra.mxu0 %v7960_v57 }
 0xaaa   : > { %3276 = vmatpush1.bf16.msra.mxu1 %v7966_v60  ;;  %3236 = vmatprep.subr.bf16.mxu0 %v9679_v38 }
 0xaab   : > { %3277 = vmatprep.subr.bf16.mxu1 %v9680_v43 }
 0xaad   : > { %3237 = vmatpush1.bf16.msra.mxu0 %v9681_v9 }
 0xaae   : > { %3278 = vmatpush1.bf16.msra.mxu1 %v9682_v4  ;;  %3238 = vmatprep.subr.bf16.mxu0 %v9683_v44 }
 0xaaf   : > { %3279 = vmatprep.subr.bf16.mxu1 %v9684_v63 }
 0xab1   : > { %3239 = vmatpush1.bf16.msra.mxu0 %v9685_v5 }
 0xab2   : > { %3280 = vmatpush1.bf16.msra.mxu1 %v9686_v54  ;;  %3240 = vmatprep.subr.bf16.mxu0 %v9687_v1 }
 0xab3   : > { %3281 = vmatprep.subr.bf16.mxu1 %v8026_v62 }
 0xab5   : > { %3241 = vmatpush1.bf16.msra.mxu0 %v8032_v51 }
 0xab6   : > { %3282 = vmatpush1.bf16.msra.mxu1 %v8038_v61  ;;  %3407 = vmatprep.subr.bf16.mxu0 %v7627_v18 }
 0xab7   : > { %3448 = vmatprep.subr.bf16.mxu1 %v7633_v24 }
 0xab8   : > { %3259 = vmatmul.mubr.bf16.vlgmr.msra.gmra.mrb[76].mxu0 %v5386_v3 }
 0xab9   : > { %3300 = vmatmul.mubr.bf16.vlgmr.msra.gmra.mrb[76].mxu1 %v5386_v3  ;;  %3408 = vmatpush1.bf16.msra.mxu0 %v7639_v16  ;;  %v9698_v3 = vld [vmem:[#allocation22_spill] sm:$0xff] }
 0xaba   : > { %3449 = vmatpush1.bf16.msra.mxu1 %v7645_v26  ;;  %3409 = vmatprep.subr.bf16.mxu0 %v7651_v10 }
 0xabb   : > { %3450 = vmatprep.subr.bf16.mxu1 %v7657_v39  ;;  %3439 = vmatprep.mubr.bf16.mxu0 %v9483_v35 }
 0xabc   : > { %3480 = vmatprep.mubr.bf16.mxu1 %v9483_v35 }
 0xabd   : > { %3410 = vmatpush1.bf16.msra.mxu0 %v7665_v40 }
 0xabe   : > { %3451 = vmatpush1.bf16.msra.mxu1 %v7671_v30  ;;  %3411 = vmatprep.subr.bf16.mxu0 %v7677_v36 }
 0xabf   : > { %3452 = vmatprep.subr.bf16.mxu1 %v7683_v41 }
 0xac1   : > { %3412 = vmatpush1.bf16.msra.mxu0 %v7689_v11 }
 0xac2   : > { %3453 = vmatpush1.bf16.msra.mxu1 %v7695_v20  ;;  %3413 = vmatprep.subr.bf16.mxu0 %v7701_v13 }
 0xac3   : > { %3454 = vmatprep.subr.bf16.mxu1 %v9688_v46  ;;  %v9699_v46 = vld [vmem:[#allocation23_spill] sm:$0xff] }
 0xac5   : > { %3414 = vmatpush1.bf16.msra.mxu0 %v9689_v22  ;;  %v9700_v22 = vld [vmem:[#allocation24_spill] sm:$0xff] }
 0xac6   : > { %3455 = vmatpush1.bf16.msra.mxu1 %v9690_v19  ;;  %3415 = vmatprep.subr.bf16.mxu0 %v9691_v12  ;;  %v9701_v19 = vld [vmem:[#allocation25_spill] sm:$0xff]  ;;  %v9702_v12 = vld [vmem:[#allocation26_spill] sm:$0xff] }
 0xac7   : > { %3456 = vmatprep.subr.bf16.mxu1 %v9692_v37  ;;  %v9703_v37 = vld [vmem:[#allocation27_spill] sm:$0xff] }
 0xac9   : > { %3416 = vmatpush1.bf16.msra.mxu0 %v9693_v14  ;;  %v9704_v14 = vld [vmem:[#allocation28_spill] sm:$0xff] }
 0xaca   : > { %3457 = vmatpush1.bf16.msra.mxu1 %v9694_v58  ;;  %3417 = vmatprep.subr.bf16.mxu0 %v9695_v29  ;;  %v9705_v58 = vld [vmem:[#allocation29_spill] sm:$0xff]  ;;  %v9706_v29 = vld [vmem:[#allocation30_spill] sm:$0xff] }
 0xacb   : > { %3458 = vmatprep.subr.bf16.mxu1 %v9696_v17  ;;  %v9707_v17 = vld [vmem:[#allocation31_spill] sm:$0xff] }
 0xacd   : > { %3418 = vmatpush1.bf16.msra.mxu0 %v9697_v31  ;;  %v9708_v31 = vld [vmem:[#allocation32_spill] sm:$0xff] }
 0xace   : > { %3459 = vmatpush1.bf16.msra.mxu1 %v9698_v3  ;;  %3419 = vmatprep.subr.bf16.mxu0 %v9699_v46 }
 0xacf   : > { %3460 = vmatprep.subr.bf16.mxu1 %v9700_v22 }
 0xad1   : > { %3420 = vmatpush1.bf16.msra.mxu0 %v9701_v19 }
 0xad2   : > { %3461 = vmatpush1.bf16.msra.mxu1 %v9702_v12  ;;  %3421 = vmatprep.subr.bf16.mxu0 %v9703_v37 }
 0xad3   : > { %3462 = vmatprep.subr.bf16.mxu1 %v9704_v14 }
 0xad5   : > { %3422 = vmatpush1.bf16.msra.mxu0 %v9705_v58 }
 0xad6   : > { %3463 = vmatpush1.bf16.msra.mxu1 %v9706_v29  ;;  %3489 = vmatprep.subr.bf16.mxu0 %v9707_v17 }
 0xad7   : > { %3530 = vmatprep.subr.bf16.mxu1 %v9708_v31 }
 0xb6b   : > { %v3178_v3 = vpop.f32.mrb[72].mxu0 }
 0xb6c   : > { %v3219_v46 = vpop.f32.mrb[72].mxu1  ;;  %v3180_v13 = vpop.f32.mrb[73].mxu0 }
 0xb6d   : > { %v3221_v22 = vpop.f32.mrb[73].mxu1  ;;  %v3182_v20 = vpop.f32.mrb[74].mxu0 }
 0xb6e   : > { %v3223_v19 = vpop.f32.mrb[74].mxu1  ;;  %v3183_v11 = vpop.f32.mrb[75].mxu0 }
 0xb6f   : > { %v3224_v12 = vpop.f32.mrb[75].mxu1 }
 0xb8b   : > { %v3260_v41 = vpop.f32.mrb[76].mxu0 }
 0xb8c   : > { %v3301_v37 = vpop.f32.mrb[76].mxu1  ;;  %v3261_v36 = vadd.f32 %v3260_v41, %v3178_v3  ;;  %v3262_v30 = vpop.f32.mrb[77].mxu0 }
 0xb8d   : > { %v3302_v14 = vadd.f32 %v3301_v37, %v3219_v46  ;;  %v3303_v58 = vpop.f32.mrb[77].mxu1  ;;  %v3263_v40 = vadd.f32 %v3262_v30, %v3180_v13  ;;  %v3264_v39 = vpop.f32.mrb[78].mxu0  ;;  %v3074_v37 = vsel %vm8087_vm0, %v8083_v42, %v7835_v47 }
 0xb8e   : > { %v3304_v29 = vadd.f32 %v3303_v58, %v3221_v22  ;;  %v3305_v17 = vpop.f32.mrb[78].mxu1  ;;  %v3308_v31 = vadd.f32 %v3261_v36, %v6694_v32  ;;  %v3265_v10 = vpop.f32.mrb[79].mxu0 }
 0xb8f   : > { %v3306_v26 = vpop.f32.mrb[79].mxu1  ;;  %v3309_v16 = vadd.f32 %v3263_v40, %v6696_v21  ;;  %v3310_v11 = vadd.f32 %v3302_v14, %v6700_v34 }
 0xb90   : > { %v5387_v20 = vmul.f32 -1.442695, %v3308_v31  ;;  %v3311_v41 = vadd.f32 %v3304_v29, %v6702_v27 }
 0xb91   : > { %v5388_v19 = vmul.f32 -1.442695, %v3309_v16  ;;  %v5389_v46 = vmul.f32 -1.442695, %v3310_v11 }
 0xb92   : > { %5748 = vpow2.f32 %v5387_v20 }
 0xb93   : > { %5750 = vpow2.f32 %v5388_v19 }
 0xb94   : > { %5752 = vtanh.f32 %v3311_v41 }
 0xb95   : > { %5754 = vpow2.f32 %v5389_v46 }
 0xb9c   : > { %v5749_v12 = vpop.eup %5748 }
 0xb9d   : > { %v3321_v30 = vadd.f32 1.0, %v5749_v12  ;;  %v5751_v39 = vpop.eup %5750 }
 0xb9e   : > { %v3322_v36 = vadd.f32 1.0, %v5751_v39  ;;  %v5753_v26 = vpop.eup %5752 }
 0xb9f   : > { %5756 = vrcp.f32 %v3321_v30  ;;  %v5755_v10 = vpop.eup %5754 }
 0xba0   : > { %5758 = vrcp.f32 %v3322_v36  ;;  %v3323_v22 = vadd.f32 1.0, %v5755_v10 }
 0xba2   : > { %5760 = vrcp.f32 %v3323_v22  ;;  %v9709_v22 = vld [vmem:[#allocation38_spill] sm:$0xff] }
 0xba9   : > { %v5757_v40 = vpop.eup %5756 }
 0xbaa   : > { %v3332_v13 = vmul.f32 %v5757_v40, %v5753_v26  ;;  %v5759_v16 = vpop.eup %5758 }
 0xbab   : > { %v3331_v14 = vmul.f32 %v5759_v16, %v3074_v37  ;;  %v5394_v16 = vld [vmem:[%s6255_s24 + $0x28] sm:$0xf]  ;;  %v9710_v37 = vld [vmem:[#allocation39_spill] sm:$0xff] }
 0xbac   : > { %v5761_v29 = vpop.eup %5760 }
 0xbad   : > { %v8185_v58 = vadd.f32 %v3332_v13, %v3331_v14  ;;  %v9711_v14 = vld [vmem:[#allocation42_spill] sm:$0xff] }
 0xbaf   : > { %5762 = vtanh.f32 %v8185_v58 }
 0xbb9   : > { %v5763_v17 = vpop.eup %5762 }
 0xbba   : > { %v3335_v31 = vmul.f32 %v5763_v17, %v5761_v29  ;;  %v9712_v29 = vld [vmem:[#allocation43_spill] sm:$0xff]  ;;  %v9713_v17 = vld [vmem:[#allocation44_spill] sm:$0xff] }
 0xbbc   : > { %v3336_v3 = vsel %vm8087_vm0, %v3335_v31, %v7838_v33  ;;  %v9714_v31 = vld [vmem:[#allocation45_spill] sm:$0xff] }
 0xbbd   : > { %v3339_v20 = vcombine.high %v3336_v3, %v3336_v3  ;;  %v3346_v19 = vrot.slane %v3336_v3, %v6709_v23  ;;  %v3406_v11 = vpack.c.bf16 %v3336_v3, %v3336_v3  ;;  %v9717_v3 = vld [vmem:[#allocation40_spill] sm:$0xff] }
 0xbbf   : > { %v3353_v42 = vrot.slane %v3339_v20, %v6709_v23  ;;  %v3354_v41 = vcombine.high %v3346_v19, %v3346_v19  ;;  %v3362_v46 = vrot.slane %v3346_v19, %v6709_v23  ;;  %5390 = vst.sshfl [vmem:[%s6257_s25 + $0x9] sm:$0x1 pattern:$0x73625140] %v3346_v19  ;;  %3440 = vmatmul.mubr.bf16.vlgmr.msra.gmra.mrb[80].mxu0 %v3406_v11  ;;  %v9718_v20 = vld [vmem:[#allocation41_spill] sm:$0xff]  ;;  %v9719_v19 = vld [vmem:[#allocation11_spill] sm:$0xff] }
 0xbc0   : > { %3481 = vmatmul.mubr.bf16.vlgmr.msra.gmra.mrb[80].mxu1 %v3406_v11  ;;  %3490 = vmatpush1.bf16.msra.mxu0 %v7852_v0  ;;  %v9720_v11 = vld [vmem:[#allocation12_spill] sm:$0xff] }
 0xbc1   : > { %3531 = vmatpush1.bf16.msra.mxu1 %v7858_v45  ;;  %v3355_v12 = vcombine.high %v3353_v42, %v3353_v42  ;;  %v3369_v30 = vrot.slane %v3353_v42, %v6709_v23  ;;  %v3376_v39 = vrot.slane %v3354_v41, %v6709_v23  ;;  %v3384_v36 = vcombine.high %v3362_v46, %v3362_v46  ;;  %v9723_v46 = vld [vmem:[#allocation15_spill] sm:$0xff] }
 0xbc2   : > { %5391 = vst.sshfl [vmem:[%s6257_s25 + $0x19] sm:$0x1 pattern:$0x73625140] %v3354_v41  ;;  %3491 = vmatprep.subr.bf16.mxu0 %v7868_v15  ;;  %3532 = vmatprep.subr.bf16.mxu1 %v7874_v53  ;;  %v9722_v41 = vld [vmem:[#allocation14_spill] sm:$0xff] }
 0xbc3   : > { %5392 = vst.sshfl [vmem:[%s6257_s25 + $0x49] sm:$0x1 pattern:$0x73625140] %v3353_v42  ;;  %3521 = vmatprep.mubr.bf16.mxu0 %v9483_v35  ;;  %v3383_v26 = vrot.slane %v3355_v12, %v6709_v23  ;;  %v3385_v10 = vcombine.high %v3369_v30, %v3369_v30  ;;  %v3386_v40 = vcombine.high %v3376_v39, %v3376_v39  ;;  %3398 = vst [vmem:[%s6257_s25 + $0x29] sm:$0x1] %v3384_v36 }
 0xbc4   : > { %5393 = vst.sshfl [vmem:[%s6257_s25 + $0x59] sm:$0x1 pattern:$0x73625140] %v3355_v12  ;;  %3562 = vmatprep.mubr.bf16.mxu1 %v9483_v35  ;;  %3492 = vmatpush1.bf16.msra.mxu0 %v7885_v49  ;;  %v9721_v42 = vld [vmem:[#allocation13_spill] sm:$0xff]  ;;  %v9724_v12 = vld [vmem:[#allocation16_spill] sm:$0xff] }
 0xbc5   : > { %3533 = vmatpush1.bf16.msra.mxu1 %v7891_v59  ;;  %v3387_v13 = vcombine.high %v3383_v26, %v3383_v26  ;;  %3399 = vst [vmem:[%s6257_s25 + $0x39] sm:$0x1] %v3386_v40  ;;  %3402 = vst [vmem:[%s6257_s25 + $0x69] sm:$0x1] %v3385_v10  ;;  %3493 = vmatprep.subr.bf16.mxu0 %v7899_v52  ;;  %v9725_v30 = vld [vmem:[#allocation17_spill] sm:$0xff]  ;;  %v9726_v39 = vld [vmem:[#allocation18_spill] sm:$0xff] }
 0xbc6   : > { %3534 = vmatprep.subr.bf16.mxu1 %v7905_v48  ;;  %v9727_v36 = vld [vmem:[#allocation19_spill] sm:$0xff]  ;;  %v9728_v26 = vld [vmem:[#allocation20_spill] sm:$0xff]  ;;  %v9729_v10 = vld [vmem:[#allocation21_spill] sm:$0xff] }
 0xbc7   : > { %3403 = vst [vmem:[%s6257_s25 + $0x79] sm:$0x1] %v3387_v13  ;;  %v9730_v40 = vld [vmem:[#allocation22_spill] sm:$0xff]  ;;  %v9731_v13 = vld [vmem:[#allocation23_spill] sm:$0xff] }
 0xbc8   : > { %3494 = vmatpush1.bf16.msra.mxu0 %v7912_v7 }
 0xbc9   : > { %3535 = vmatpush1.bf16.msra.mxu1 %v7918_v50  ;;  %3495 = vmatprep.subr.bf16.mxu0 %v7924_v25 }
 0xbca   : > { %3536 = vmatprep.subr.bf16.mxu1 %v7930_v56 }
 0xbcc   : > { %3496 = vmatpush1.bf16.msra.mxu0 %v7936_v28 }
 0xbcd   : > { %3537 = vmatpush1.bf16.msra.mxu1 %v7942_v55  ;;  %3497 = vmatprep.subr.bf16.mxu0 %v7948_v8 }
 0xbce   : > { %3538 = vmatprep.subr.bf16.mxu1 %v7954_v6 }
 0xbd0   : > { %3498 = vmatpush1.bf16.msra.mxu0 %v7960_v57 }
 0xbd1   : > { %3539 = vmatpush1.bf16.msra.mxu1 %v7966_v60  ;;  %3499 = vmatprep.subr.bf16.mxu0 %v9679_v38 }
 0xbd2   : > { %3540 = vmatprep.subr.bf16.mxu1 %v9680_v43 }
 0xbd4   : > { %3500 = vmatpush1.bf16.msra.mxu0 %v9681_v9 }
 0xbd5   : > { %3541 = vmatpush1.bf16.msra.mxu1 %v9682_v4  ;;  %3501 = vmatprep.subr.bf16.mxu0 %v9683_v44 }
 0xbd6   : > { %3542 = vmatprep.subr.bf16.mxu1 %v9684_v63 }
 0xbd8   : > { %3502 = vmatpush1.bf16.msra.mxu0 %v9685_v5 }
 0xbd9   : > { %3543 = vmatpush1.bf16.msra.mxu1 %v9686_v54  ;;  %3503 = vmatprep.subr.bf16.mxu0 %v9687_v1 }
 0xbda   : > { %3544 = vmatprep.subr.bf16.mxu1 %v8026_v62 }
 0xbdc   : > { %3504 = vmatpush1.bf16.msra.mxu0 %v8032_v51 }
 0xbdd   : > { %3545 = vmatpush1.bf16.msra.mxu1 %v8038_v61  ;;  %3670 = vmatprep.subr.bf16.mxu0 %v7627_v18  ;;  %v9715_v18 = vld [vmem:[#allocation46_spill] sm:$0xff] }
 0xbde   : > { %3711 = vmatprep.subr.bf16.mxu1 %v7633_v24  ;;  %v9716_v24 = vld [vmem:[#allocation47_spill] sm:$0xff] }
 0xbdf   : > { %3522 = vmatmul.mubr.bf16.vlgmr.msra.gmra.mrb[84].mxu0 %v5394_v16 }
 0xbe0   : > { %3563 = vmatmul.mubr.bf16.vlgmr.msra.gmra.mrb[84].mxu1 %v5394_v16  ;;  %3671 = vmatpush1.bf16.msra.mxu0 %v9709_v22  ;;  %v9732_v16 = vld [vmem:[#allocation24_spill] sm:$0xff]  ;;  %v9733_v22 = vld [vmem:[#allocation25_spill] sm:$0xff] }
 0xbe1   : > { %3712 = vmatpush1.bf16.msra.mxu1 %v9710_v37  ;;  %3672 = vmatprep.subr.bf16.mxu0 %v9711_v14  ;;  %v9734_v37 = vld [vmem:[#allocation26_spill] sm:$0xff]  ;;  %v9735_v14 = vld [vmem:[#allocation27_spill] sm:$0xff] }
 0xbe2   : > { %3713 = vmatprep.subr.bf16.mxu1 %v9712_v29  ;;  %3702 = vmatprep.mubr.bf16.mxu0 %v9483_v35  ;;  %v9736_v29 = vld [vmem:[#allocation28_spill] sm:$0xff] }
 0xbe3   : > { %3743 = vmatprep.mubr.bf16.mxu1 %v9483_v35 }
 0xbe4   : > { %3673 = vmatpush1.bf16.msra.mxu0 %v9713_v17  ;;  %v9737_v17 = vld [vmem:[#allocation29_spill] sm:$0xff] }
 0xbe5   : > { %3714 = vmatpush1.bf16.msra.mxu1 %v9714_v31  ;;  %3674 = vmatprep.subr.bf16.mxu0 %v9715_v18  ;;  %v9738_v31 = vld [vmem:[#allocation30_spill] sm:$0xff]  ;;  %v9739_v18 = vld [vmem:[#allocation31_spill] sm:$0xff] }
 0xbe6   : > { %3715 = vmatprep.subr.bf16.mxu1 %v9716_v24  ;;  %v9740_v24 = vld [vmem:[#allocation32_spill] sm:$0xff] }
 0xbe8   : > { %3675 = vmatpush1.bf16.msra.mxu0 %v9717_v3 }
 0xbe9   : > { %3716 = vmatpush1.bf16.msra.mxu1 %v9718_v20  ;;  %3676 = vmatprep.subr.bf16.mxu0 %v9719_v19 }
 0xbea   : > { %3717 = vmatprep.subr.bf16.mxu1 %v9720_v11 }
 0xbec   : > { %3677 = vmatpush1.bf16.msra.mxu0 %v9721_v42 }
 0xbed   : > { %3718 = vmatpush1.bf16.msra.mxu1 %v9722_v41  ;;  %3678 = vmatprep.subr.bf16.mxu0 %v9723_v46 }
 0xbee   : > { %3719 = vmatprep.subr.bf16.mxu1 %v9724_v12 }
 0xbf0   : > { %3679 = vmatpush1.bf16.msra.mxu0 %v9725_v30 }
 0xbf1   : > { %3720 = vmatpush1.bf16.msra.mxu1 %v9726_v39  ;;  %3680 = vmatprep.subr.bf16.mxu0 %v9727_v36 }
 0xbf2   : > { %3721 = vmatprep.subr.bf16.mxu1 %v9728_v26 }
 0xbf4   : > { %3681 = vmatpush1.bf16.msra.mxu0 %v9729_v10 }
 0xbf5   : > { %3722 = vmatpush1.bf16.msra.mxu1 %v9730_v40  ;;  %3682 = vmatprep.subr.bf16.mxu0 %v9731_v13 }
 0xbf6   : > { %3723 = vmatprep.subr.bf16.mxu1 %v9732_v16 }
 0xbf8   : > { %3683 = vmatpush1.bf16.msra.mxu0 %v9733_v22 }
 0xbf9   : > { %3724 = vmatpush1.bf16.msra.mxu1 %v9734_v37  ;;  %3684 = vmatprep.subr.bf16.mxu0 %v9735_v14 }
 0xbfa   : > { %3725 = vmatprep.subr.bf16.mxu1 %v9736_v29 }
 0xbfc   : > { %3685 = vmatpush1.bf16.msra.mxu0 %v9737_v17 }
 0xbfd   : > { %3726 = vmatpush1.bf16.msra.mxu1 %v9738_v31  ;;  %3752 = vmatprep.subr.bf16.mxu0 %v9739_v18 }
 0xbfe   : > { %3793 = vmatprep.subr.bf16.mxu1 %v9740_v24 }
 0xc92   : > { %v3441_v3 = vpop.f32.mrb[80].mxu0 }
 0xc93   : > { %v3482_v20 = vpop.f32.mrb[80].mxu1  ;;  %v3443_v19 = vpop.f32.mrb[81].mxu0 }
 0xc94   : > { %v3484_v11 = vpop.f32.mrb[81].mxu1  ;;  %v3445_v42 = vpop.f32.mrb[82].mxu0 }
 0xc95   : > { %v3486_v41 = vpop.f32.mrb[82].mxu1  ;;  %v3446_v46 = vpop.f32.mrb[83].mxu0 }
 0xc96   : > { %v3487_v12 = vpop.f32.mrb[83].mxu1 }
 0xcb2   : > { %v3523_v30 = vpop.f32.mrb[84].mxu0 }
 0xcb3   : > { %v3564_v39 = vpop.f32.mrb[84].mxu1  ;;  %v3524_v36 = vadd.f32 %v3523_v30, %v3441_v3  ;;  %v3525_v10 = vpop.f32.mrb[85].mxu0 }
 0xcb4   : > { %v3565_v26 = vadd.f32 %v3564_v39, %v3482_v20  ;;  %v3566_v40 = vpop.f32.mrb[85].mxu1  ;;  %v3526_v13 = vadd.f32 %v3525_v10, %v3443_v19  ;;  %v3527_v22 = vpop.f32.mrb[86].mxu0 }
 0xcb5   : > { %v3567_v16 = vadd.f32 %v3566_v40, %v3484_v11  ;;  %v3568_v37 = vpop.f32.mrb[86].mxu1  ;;  %v3571_v14 = vadd.f32 %v3524_v36, %v6694_v32  ;;  %v3528_v29 = vpop.f32.mrb[87].mxu0 }
 0xcb6   : > { %v3569_v17 = vpop.f32.mrb[87].mxu1  ;;  %v3572_v31 = vadd.f32 %v3526_v13, %v6696_v21  ;;  %v3573_v42 = vadd.f32 %v3565_v26, %v6700_v34  ;;  %v3337_v26 = vsel %vm8087_vm0, %v8185_v58, %v7835_v47 }
 0xcb7   : > { %v5395_v18 = vmul.f32 -1.442695, %v3571_v14  ;;  %v3574_v3 = vadd.f32 %v3567_v16, %v6702_v27 }
 0xcb8   : > { %v5396_v24 = vmul.f32 -1.442695, %v3572_v31  ;;  %v5397_v20 = vmul.f32 -1.442695, %v3573_v42 }
 0xcb9   : > { %5764 = vpow2.f32 %v5395_v18 }
 0xcba   : > { %5766 = vpow2.f32 %v5396_v24 }
 0xcbb   : > { %5768 = vtanh.f32 %v3574_v3 }
 0xcbc   : > { %5770 = vpow2.f32 %v5397_v20 }
 0xcc3   : > { %v5765_v41 = vpop.eup %5764 }
 0xcc4   : > { %v3584_v19 = vadd.f32 1.0, %v5765_v41  ;;  %v5767_v11 = vpop.eup %5766 }
 0xcc5   : > { %v3585_v46 = vadd.f32 1.0, %v5767_v11  ;;  %v5769_v12 = vpop.eup %5768 }
 0xcc6   : > { %5772 = vrcp.f32 %v3584_v19  ;;  %v5771_v30 = vpop.eup %5770 }
 0xcc7   : > { %5774 = vrcp.f32 %v3585_v46  ;;  %v3586_v40 = vadd.f32 1.0, %v5771_v30  ;;  %v8508_v30 = vld [vmem:[%s9172_s2 + $0xe4] ss:$16 sps:$4 sm:$0xff]  }
 0xcc8   : > { %9767 = vst [vmem:[#allocation18_spill] sm:$0xff] %v8508_v30 }
 0xcc9   : > { %5776 = vrcp.f32 %v3586_v40  ;;  %v8532_v40 = vld [vmem:[%s9171_s1 + $0x4] ss:$16 sps:$4 sm:$0xff]  }
 0xcca   : > { %9771 = vst [vmem:[#allocation22_spill] sm:$0xff] %v8532_v40 }
 0xcd0   : > { %v5773_v39 = vpop.eup %5772 }
 0xcd1   : > { %v3595_v36 = vmul.f32 %v5773_v39, %v5769_v12  ;;  %v5775_v10 = vpop.eup %5774  ;;  %v8502_v12 = vld [vmem:[%s9172_s2 + $0xc8] ss:$16 sps:$4 sm:$0xff]   ;;  %v8514_v39 = vld [vmem:[%s9172_s2 + $0xec] ss:$16 sps:$4 sm:$0xff]  }
 0xcd2   : > { %v3594_v13 = vmul.f32 %v5775_v10, %v3337_v26  ;;  %9766 = vst [vmem:[#allocation17_spill] sm:$0xff] %v8502_v12  ;;  %9768 = vst [vmem:[#allocation19_spill] sm:$0xff] %v8514_v39  ;;  %v8526_v10 = vld [vmem:[%s9172_s2 + $0xe8] ss:$16 sps:$4 sm:$0xff]   ;;  %v8538_v26 = vld [vmem:[%s9171_s1 + $0xc] ss:$16 sps:$4 sm:$0xff]  }
 0xcd3   : > { %v5777_v22 = vpop.eup %5776  ;;  %9770 = vst [vmem:[#allocation21_spill] sm:$0xff] %v8526_v10  ;;  %9772 = vst [vmem:[#allocation23_spill] sm:$0xff] %v8538_v26 }
 0xcd4   : > { %v8282_v16 = vadd.f32 %v3595_v36, %v3594_v13  ;;  %v8520_v36 = vld [vmem:[%s9172_s2 + $0xe0] ss:$16 sps:$4 sm:$0xff]  }
 0xcd5   : > { %9769 = vst [vmem:[#allocation20_spill] sm:$0xff] %v8520_v36 }
 0xcd6   : > { %5778 = vtanh.f32 %v8282_v16 }
 0xce0   : > { %v5779_v37 = vpop.eup %5778 }
 0xce1   : > { %v3598_v14 = vmul.f32 %v5779_v37, %v5777_v22 }
 0xce3   : > { %v3599_v29 = vsel %vm8087_vm0, %v3598_v14, %v7838_v33 }
 0xce4   : > { %v3602_v17 = vcombine.high %v3599_v29, %v3599_v29  ;;  %v3609_v31 = vrot.slane %v3599_v29, %v6709_v23  ;;  %v3669_v18 = vpack.c.bf16 %v3599_v29, %v3599_v29 }
 0xce6   : > { %v3616_v58 = vrot.slane %v3602_v17, %v6709_v23  ;;  %v3617_v24 = vcombine.high %v3609_v31, %v3609_v31  ;;  %v3625_v42 = vrot.slane %v3609_v31, %v6709_v23  ;;  %5398 = vst.sshfl [vmem:[%s6257_s25 + $0xa] sm:$0x1 pattern:$0x73625140] %v3609_v31  ;;  %3703 = vmatmul.mubr.bf16.vlgmr.msra.gmra.mrb[88].mxu0 %v3669_v18 }
 0xce7   : > { %3744 = vmatmul.mubr.bf16.vlgmr.msra.gmra.mrb[88].mxu1 %v3669_v18  ;;  %3753 = vmatpush1.bf16.msra.mxu0 %v7852_v0 }
 0xce8   : > { %3794 = vmatpush1.bf16.msra.mxu1 %v7858_v45  ;;  %v3618_v3 = vcombine.high %v3616_v58, %v3616_v58  ;;  %v3632_v20 = vrot.slane %v3616_v58, %v6709_v23  ;;  %v3639_v41 = vrot.slane %v3617_v24, %v6709_v23  ;;  %v3647_v19 = vcombine.high %v3625_v42, %v3625_v42 }
 0xce9   : > { %5399 = vst.sshfl [vmem:[%s6257_s25 + $0x1a] sm:$0x1 pattern:$0x73625140] %v3617_v24  ;;  %3754 = vmatprep.subr.bf16.mxu0 %v7868_v15  ;;  %3795 = vmatprep.subr.bf16.mxu1 %v7874_v53  ;;  %v5402_v15 = vld [vmem:[%s6255_s24 + $0x2c] sm:$0xf] }
 0xcea   : > { %5400 = vst.sshfl [vmem:[%s6257_s25 + $0x4a] sm:$0x1 pattern:$0x73625140] %v3616_v58  ;;  %3784 = vmatprep.mubr.bf16.mxu0 %v9483_v35  ;;  %v3646_v0 = vrot.slane %v3618_v3, %v6709_v23  ;;  %v3648_v45 = vcombine.high %v3632_v20, %v3632_v20  ;;  %v3649_v11 = vcombine.high %v3639_v41, %v3639_v41  ;;  %3661 = vst [vmem:[%s6257_s25 + $0x2a] sm:$0x1] %v3647_v19 }
 0xceb   : > { %5401 = vst.sshfl [vmem:[%s6257_s25 + $0x5a] sm:$0x1 pattern:$0x73625140] %v3618_v3  ;;  %3825 = vmatprep.mubr.bf16.mxu1 %v9483_v35  ;;  %3755 = vmatpush1.bf16.msra.mxu0 %v7885_v49  ;;  %v8338_v53 = vld [vmem:[%s9172_s2 + $0x4] ss:$16 sps:$4 sm:$0xff]  }
 0xcec   : > { %3796 = vmatpush1.bf16.msra.mxu1 %v7891_v59  ;;  %v3650_v46 = vcombine.high %v3646_v0, %v3646_v0  ;;  %3662 = vst [vmem:[%s6257_s25 + $0x3a] sm:$0x1] %v3649_v11  ;;  %3665 = vst [vmem:[%s6257_s25 + $0x6a] sm:$0x1] %v3648_v45  ;;  %3756 = vmatprep.subr.bf16.mxu0 %v7899_v52  ;;  %v8344_v49 = vld [vmem:[%s9172_s2 + $0xc] ss:$16 sps:$4 sm:$0xff]  }
 0xced   : > { %3797 = vmatprep.subr.bf16.mxu1 %v7905_v48  ;;  %v8350_v59 = vld [vmem:[%s9172_s2] ss:$16 sps:$4 sm:$0xff]   ;;  %v8356_v52 = vld [vmem:[%s9172_s2 + $0x8] ss:$16 sps:$4 sm:$0xff]   ;;  %v8362_v48 = vld [vmem:[%s9172_s2 + $0x24] ss:$16 sps:$4 sm:$0xff]  }
 0xcee   : > { %3666 = vst [vmem:[%s6257_s25 + $0x7a] sm:$0x1] %v3650_v46  ;;  %9741 = vst [vmem:[#allocation33_spill] sm:$0xff] %v8350_v59 }
 0xcef   : > { %3757 = vmatpush1.bf16.msra.mxu0 %v7912_v7  ;;  %9742 = vst [vmem:[#allocation34_spill] sm:$0xff] %v8356_v52  ;;  %9743 = vst [vmem:[#allocation35_spill] sm:$0xff] %v8362_v48  ;;  %v8368_v7 = vld [vmem:[%s9172_s2 + $0x2c] ss:$16 sps:$4 sm:$0xff]  }
 0xcf0   : > { %3798 = vmatpush1.bf16.msra.mxu1 %v7918_v50  ;;  %3758 = vmatprep.subr.bf16.mxu0 %v7924_v25  ;;  %9744 = vst [vmem:[#allocation36_spill] sm:$0xff] %v8368_v7  ;;  %v8376_v50 = vld [vmem:[%s9172_s2 + $0x20] ss:$16 sps:$4 sm:$0xff]   ;;  %v8382_v25 = vld [vmem:[%s9172_s2 + $0x28] ss:$16 sps:$4 sm:$0xff]  }
 0xcf1   : > { %3799 = vmatprep.subr.bf16.mxu1 %v7930_v56  ;;  %9745 = vst [vmem:[#allocation37_spill] sm:$0xff] %v8376_v50  ;;  %9746 = vst [vmem:[#allocation48_spill] sm:$0xff] %v8382_v25  ;;  %v8388_v56 = vld [vmem:[%s9172_s2 + $0x44] ss:$16 sps:$4 sm:$0xff]  }
 0xcf2   : > { %9747 = vst [vmem:[#allocation49_spill] sm:$0xff] %v8388_v56 }
 0xcf3   : > { %3759 = vmatpush1.bf16.msra.mxu0 %v7936_v28  ;;  %v8394_v28 = vld [vmem:[%s9172_s2 + $0x4c] ss:$16 sps:$4 sm:$0xff]  }
 0xcf4   : > { %3800 = vmatpush1.bf16.msra.mxu1 %v7942_v55  ;;  %3760 = vmatprep.subr.bf16.mxu0 %v7948_v8  ;;  %9748 = vst [vmem:[#allocation50_spill] sm:$0xff] %v8394_v28  ;;  %v8400_v55 = vld [vmem:[%s9172_s2 + $0x40] ss:$16 sps:$4 sm:$0xff]   ;;  %v8406_v8 = vld [vmem:[%s9172_s2 + $0x48] ss:$16 sps:$4 sm:$0xff]  }
 0xcf5   : > { %3801 = vmatprep.subr.bf16.mxu1 %v7954_v6  ;;  %9749 = vst [vmem:[#allocation51_spill] sm:$0xff] %v8400_v55  ;;  %9750 = vst [vmem:[#allocation38_spill] sm:$0xff] %v8406_v8  ;;  %v8412_v6 = vld [vmem:[%s9172_s2 + $0x64] ss:$16 sps:$4 sm:$0xff]  }
 0xcf6   : > { %9751 = vst [vmem:[#allocation39_spill] sm:$0xff] %v8412_v6 }
 0xcf7   : > { %3761 = vmatpush1.bf16.msra.mxu0 %v7960_v57  ;;  %v8418_v57 = vld [vmem:[%s9172_s2 + $0x6c] ss:$16 sps:$4 sm:$0xff]  }
 0xcf8   : > { %3802 = vmatpush1.bf16.msra.mxu1 %v7966_v60  ;;  %3762 = vmatprep.subr.bf16.mxu0 %v9679_v38  ;;  %9752 = vst [vmem:[#allocation42_spill] sm:$0xff] %v8418_v57  ;;  %v8424_v60 = vld [vmem:[%s9172_s2 + $0x60] ss:$16 sps:$4 sm:$0xff]  }
 0xcf9   : > { %3803 = vmatprep.subr.bf16.mxu1 %v9680_v43  ;;  %9753 = vst [vmem:[#allocation43_spill] sm:$0xff] %v8424_v60  ;;  %v8448_v38 = vld [vmem:[%s9172_s2 + $0x80] ss:$16 sps:$4 sm:$0xff]   ;;  %v8454_v43 = vld [vmem:[%s9172_s2 + $0x88] ss:$16 sps:$4 sm:$0xff]  }
 0xcfa   : > { %9757 = vst [vmem:[#allocation47_spill] sm:$0xff] %v8448_v38  ;;  %9758 = vst [vmem:[#allocation40_spill] sm:$0xff] %v8454_v43 }
 0xcfb   : > { %3763 = vmatpush1.bf16.msra.mxu0 %v9681_v9  ;;  %v8460_v9 = vld [vmem:[%s9172_s2 + $0xa4] ss:$16 sps:$4 sm:$0xff]  }
 0xcfc   : > { %3804 = vmatpush1.bf16.msra.mxu1 %v9682_v4  ;;  %3764 = vmatprep.subr.bf16.mxu0 %v9683_v44  ;;  %9759 = vst [vmem:[#allocation41_spill] sm:$0xff] %v8460_v9  ;;  %v8466_v4 = vld [vmem:[%s9172_s2 + $0xac] ss:$16 sps:$4 sm:$0xff]   ;;  %v8472_v44 = vld [vmem:[%s9172_s2 + $0xa0] ss:$16 sps:$4 sm:$0xff]  }
 0xcfd   : > { %3805 = vmatprep.subr.bf16.mxu1 %v9684_v63  ;;  %9760 = vst [vmem:[#allocation11_spill] sm:$0xff] %v8466_v4  ;;  %9761 = vst [vmem:[#allocation12_spill] sm:$0xff] %v8472_v44  ;;  %v8478_v63 = vld [vmem:[%s9172_s2 + $0xa8] ss:$16 sps:$4 sm:$0xff]  }
 0xcfe   : > { %9762 = vst [vmem:[#allocation13_spill] sm:$0xff] %v8478_v63 }
 0xcff   : > { %3765 = vmatpush1.bf16.msra.mxu0 %v9685_v5  ;;  %v8484_v5 = vld [vmem:[%s9172_s2 + $0xc4] ss:$16 sps:$4 sm:$0xff]  }
 0xd00   : > { %3806 = vmatpush1.bf16.msra.mxu1 %v9686_v54  ;;  %3766 = vmatprep.subr.bf16.mxu0 %v9687_v1  ;;  %9763 = vst [vmem:[#allocation14_spill] sm:$0xff] %v8484_v5  ;;  %v8490_v54 = vld [vmem:[%s9172_s2 + $0xcc] ss:$16 sps:$4 sm:$0xff]   ;;  %v8496_v1 = vld [vmem:[%s9172_s2 + $0xc0] ss:$16 sps:$4 sm:$0xff]  }
 0xd01   : > { %3807 = vmatprep.subr.bf16.mxu1 %v8026_v62  ;;  %v8430_v62 = vld [vmem:[%s9172_s2 + $0x68] ss:$16 sps:$4 sm:$0xff]   ;;  %9764 = vst [vmem:[#allocation15_spill] sm:$0xff] %v8490_v54  ;;  %9765 = vst [vmem:[#allocation16_spill] sm:$0xff] %v8496_v1 }
 0xd02   : > { %9754 = vst [vmem:[#allocation44_spill] sm:$0xff] %v8430_v62 }
 0xd03   : > { %3767 = vmatpush1.bf16.msra.mxu0 %v8032_v51  ;;  %v8436_v51 = vld [vmem:[%s9172_s2 + $0x84] ss:$16 sps:$4 sm:$0xff]  }
 0xd04   : > { %3808 = vmatpush1.bf16.msra.mxu1 %v8038_v61  ;;  %3933 = vmatprep.subr.bf16.mxu0 %v8338_v53  ;;  %9755 = vst [vmem:[#allocation45_spill] sm:$0xff] %v8436_v51  ;;  %v8442_v61 = vld [vmem:[%s9172_s2 + $0x8c] ss:$16 sps:$4 sm:$0xff]  }
 0xd05   : > { %3974 = vmatprep.subr.bf16.mxu1 %v8344_v49  ;;  %9756 = vst [vmem:[#allocation46_spill] sm:$0xff] %v8442_v61 }
 0xd06   : > { %3785 = vmatmul.mubr.bf16.vlgmr.msra.gmra.mrb[92].mxu0 %v5402_v15 }
 0xd07   : > { %3826 = vmatmul.mubr.bf16.vlgmr.msra.gmra.mrb[92].mxu1 %v5402_v15  ;;  %3934 = vmatpush1.bf16.msra.mxu0 %v8350_v59 }
 0xd08   : > { %3975 = vmatpush1.bf16.msra.mxu1 %v8356_v52  ;;  %3935 = vmatprep.subr.bf16.mxu0 %v8362_v48 }
 0xd09   : > { %3976 = vmatprep.subr.bf16.mxu1 %v8368_v7  ;;  %3965 = vmatprep.mubr.bf16.mxu0 %v9483_v35 }
 0xd0a   : > { %4006 = vmatprep.mubr.bf16.mxu1 %v9483_v35 }
 0xd0b   : > { %3936 = vmatpush1.bf16.msra.mxu0 %v8376_v50 }
 0xd0c   : > { %3977 = vmatpush1.bf16.msra.mxu1 %v8382_v25  ;;  %3937 = vmatprep.subr.bf16.mxu0 %v8388_v56 }
 0xd0d   : > { %3978 = vmatprep.subr.bf16.mxu1 %v8394_v28 }
 0xd0f   : > { %3938 = vmatpush1.bf16.msra.mxu0 %v8400_v55 }
 0xd10   : > { %3979 = vmatpush1.bf16.msra.mxu1 %v8406_v8  ;;  %3939 = vmatprep.subr.bf16.mxu0 %v8412_v6 }
 0xd11   : > { %3980 = vmatprep.subr.bf16.mxu1 %v8418_v57 }
 0xd13   : > { %3940 = vmatpush1.bf16.msra.mxu0 %v8424_v60 }
 0xd14   : > { %3981 = vmatpush1.bf16.msra.mxu1 %v8430_v62  ;;  %3941 = vmatprep.subr.bf16.mxu0 %v8436_v51 }
 0xd15   : > { %3982 = vmatprep.subr.bf16.mxu1 %v8442_v61 }
 0xd17   : > { %3942 = vmatpush1.bf16.msra.mxu0 %v8448_v38 }
 0xd18   : > { %3983 = vmatpush1.bf16.msra.mxu1 %v8454_v43  ;;  %3943 = vmatprep.subr.bf16.mxu0 %v8460_v9 }
 0xd19   : > { %3984 = vmatprep.subr.bf16.mxu1 %v8466_v4 }
 0xd1b   : > { %3944 = vmatpush1.bf16.msra.mxu0 %v8472_v44 }
 0xd1c   : > { %3985 = vmatpush1.bf16.msra.mxu1 %v8478_v63  ;;  %3945 = vmatprep.subr.bf16.mxu0 %v8484_v5 }
 0xd1d   : > { %3986 = vmatprep.subr.bf16.mxu1 %v8490_v54 }
 0xd1f   : > { %3946 = vmatpush1.bf16.msra.mxu0 %v8496_v1 }
 0xd20   : > { %3987 = vmatpush1.bf16.msra.mxu1 %v8502_v12  ;;  %3947 = vmatprep.subr.bf16.mxu0 %v8508_v30 }
 0xd21   : > { %3988 = vmatprep.subr.bf16.mxu1 %v8514_v39 }
 0xd23   : > { %3948 = vmatpush1.bf16.msra.mxu0 %v8520_v36 }
 0xd24   : > { %3989 = vmatpush1.bf16.msra.mxu1 %v8526_v10  ;;  %4015 = vmatprep.subr.bf16.mxu0 %v8532_v40 }
 0xd25   : > { %4056 = vmatprep.subr.bf16.mxu1 %v8538_v26 }
 0xdb9   : > { %v3704_v13 = vpop.f32.mrb[88].mxu0 }
 0xdba   : > { %v3745_v22 = vpop.f32.mrb[88].mxu1  ;;  %v3706_v37 = vpop.f32.mrb[89].mxu0 }
 0xdbb   : > { %v3747_v14 = vpop.f32.mrb[89].mxu1  ;;  %v3708_v29 = vpop.f32.mrb[90].mxu0 }
 0xdbc   : > { %v3749_v17 = vpop.f32.mrb[90].mxu1  ;;  %v3709_v31 = vpop.f32.mrb[91].mxu0 }
 0xdbd   : > { %v3750_v18 = vpop.f32.mrb[91].mxu1 }
 0xdd9   : > { %v3786_v58 = vpop.f32.mrb[92].mxu0 }
 0xdda   : > { %v3827_v24 = vpop.f32.mrb[92].mxu1  ;;  %v3787_v42 = vadd.f32 %v3786_v58, %v3704_v13  ;;  %v3788_v20 = vpop.f32.mrb[93].mxu0 }
 0xddb   : > { %v3828_v3 = vadd.f32 %v3827_v24, %v3745_v22  ;;  %v3829_v41 = vpop.f32.mrb[93].mxu1  ;;  %v3789_v19 = vadd.f32 %v3788_v20, %v3706_v37  ;;  %v3790_v45 = vpop.f32.mrb[94].mxu0 }
 0xddc   : > { %v3830_v0 = vadd.f32 %v3829_v41, %v3747_v14  ;;  %v3831_v11 = vpop.f32.mrb[94].mxu1  ;;  %v3834_v46 = vadd.f32 %v3787_v42, %v6694_v32  ;;  %v3791_v15 = vpop.f32.mrb[95].mxu0 }
 0xddd   : > { %v3832_v26 = vpop.f32.mrb[95].mxu1  ;;  %v3835_v40 = vadd.f32 %v3789_v19, %v6696_v21  ;;  %v3836_v31 = vadd.f32 %v3828_v3, %v6700_v34  ;;  %v3600_v3 = vsel %vm8087_vm0, %v8282_v16, %v7835_v47 }
 0xdde   : > { %v5403_v29 = vmul.f32 -1.442695, %v3834_v46  ;;  %v3837_v13 = vadd.f32 %v3830_v0, %v6702_v27 }
 0xddf   : > { %v5404_v17 = vmul.f32 -1.442695, %v3835_v40  ;;  %v5405_v22 = vmul.f32 -1.442695, %v3836_v31 }
 0xde0   : > { %5780 = vpow2.f32 %v5403_v29 }
 0xde1   : > { %5782 = vpow2.f32 %v5404_v17 }
 0xde2   : > { %5784 = vtanh.f32 %v3837_v13 }
 0xde3   : > { %5786 = vpow2.f32 %v5405_v22 }
 0xdea   : > { %v5781_v18 = vpop.eup %5780 }
 0xdeb   : > { %v3847_v37 = vadd.f32 1.0, %v5781_v18  ;;  %v5783_v14 = vpop.eup %5782  ;;  %v8562_v18 = vld [vmem:[%s9171_s1] ss:$16 sps:$4 sm:$0xff]  }
 0xdec   : > { %v3848_v58 = vadd.f32 1.0, %v5783_v14  ;;  %v5785_v26 = vpop.eup %5784 }
 0xded   : > { %5788 = vrcp.f32 %v3847_v37  ;;  %v5787_v24 = vpop.eup %5786  ;;  %v8568_v37 = vld [vmem:[%s9171_s1 + $0x8] ss:$16 sps:$4 sm:$0xff]  }
 0xdee   : > { %5790 = vrcp.f32 %v3848_v58  ;;  %v3849_v41 = vadd.f32 1.0, %v5787_v24 }
 0xdf0   : > { %5792 = vrcp.f32 %v3849_v41 }
 0xdf7   : > { %v5789_v42 = vpop.eup %5788 }
 0xdf8   : > { %v3858_v20 = vmul.f32 %v5789_v42, %v5785_v26  ;;  %v5791_v40 = vpop.eup %5790  ;;  %v8578_v42 = vld [vmem:[%s9171_s1 + $0x24] ss:$16 sps:$4 sm:$0xff]  }
 0xdf9   : > { %v3857_v19 = vmul.f32 %v5791_v40, %v3600_v3 }
 0xdfa   : > { %v5793_v45 = vpop.eup %5792 }
 0xdfb   : > { %v8549_v0 = vadd.f32 %v3858_v20, %v3857_v19  ;;  %v8584_v20 = vld [vmem:[%s9171_s1 + $0x2c] ss:$16 sps:$4 sm:$0xff]   ;;  %v8595_v19 = vld [vmem:[%s9171_s1 + $0x20] ss:$16 sps:$4 sm:$0xff]  }
 0xdfd   : > { %5794 = vtanh.f32 %v8549_v0 }
 0xe07   : > { %v5795_v11 = vpop.eup %5794 }
 0xe08   : > { %v3861_v46 = vmul.f32 %v5795_v11, %v5793_v45  ;;  %v8601_v45 = vld [vmem:[%s9171_s1 + $0x28] ss:$16 sps:$4 sm:$0xff]  }
 0xe0a   : > { %v3862_v15 = vsel %vm8087_vm0, %v3861_v46, %v7838_v33  ;;  %v8609_v46 = vld [vmem:[%s9171_s1 + $0x44] ss:$16 sps:$4 sm:$0xff]  }
 0xe0b   : > { %v3865_v29 = vcombine.high %v3862_v15, %v3862_v15  ;;  %v3872_v17 = vrot.slane %v3862_v15, %v6709_v23  ;;  %v3932_v31 = vpack.c.bf16 %v3862_v15, %v3862_v15  ;;  %v8615_v15 = vld [vmem:[%s9171_s1 + $0x4c] ss:$16 sps:$4 sm:$0xff]  }
 0xe0d   : > { %v3879_v16 = vrot.slane %v3865_v29, %v6709_v23  ;;  %v3880_v13 = vcombine.high %v3872_v17, %v3872_v17  ;;  %v3888_v22 = vrot.slane %v3872_v17, %v6709_v23  ;;  %5406 = vst.sshfl [vmem:[%s6257_s25 + $0xb] sm:$0x1 pattern:$0x73625140] %v3872_v17  ;;  %3966 = vmatmul.mubr.bf16.vlgmr.msra.gmra.mrb[96].mxu0 %v3932_v31  ;;  %v8622_v29 = vld [vmem:[%s9171_s1 + $0x40] ss:$16 sps:$4 sm:$0xff]  }
 0xe0e   : > { %4007 = vmatmul.mubr.bf16.vlgmr.msra.gmra.mrb[96].mxu1 %v3932_v31  ;;  %4016 = vmatpush1.bf16.msra.mxu0 %v8562_v18  ;;  %v8628_v17 = vld [vmem:[%s9171_s1 + $0x48] ss:$16 sps:$4 sm:$0xff]   ;;  %v8634_v31 = vld [vmem:[%s9171_s1 + $0x64] ss:$16 sps:$4 sm:$0xff]  }
 0xe0f   : > { %4057 = vmatpush1.bf16.msra.mxu1 %v8568_v37  ;;  %v3881_v14 = vcombine.high %v3879_v16, %v3879_v16  ;;  %v3895_v58 = vrot.slane %v3879_v16, %v6709_v23  ;;  %v3902_v26 = vrot.slane %v3880_v13, %v6709_v23  ;;  %v3910_v24 = vcombine.high %v3888_v22, %v3888_v22  ;;  %v8652_v22 = vld [vmem:[%s9171_s1 + $0x68] ss:$16 sps:$4 sm:$0xff]  }
 0xe10   : > { %5407 = vst.sshfl [vmem:[%s6257_s25 + $0x1b] sm:$0x1 pattern:$0x73625140] %v3880_v13  ;;  %4017 = vmatprep.subr.bf16.mxu0 %v8578_v42  ;;  %4058 = vmatprep.subr.bf16.mxu1 %v8584_v20  ;;  %v8646_v13 = vld [vmem:[%s9171_s1 + $0x60] ss:$16 sps:$4 sm:$0xff]  }
 0xe11   : > { %5408 = vst.sshfl [vmem:[%s6257_s25 + $0x4b] sm:$0x1 pattern:$0x73625140] %v3879_v16  ;;  %4047 = vmatprep.mubr.bf16.mxu0 %v9483_v35  ;;  %v3909_v40 = vrot.slane %v3881_v14, %v6709_v23  ;;  %v3911_v41 = vcombine.high %v3895_v58, %v3895_v58  ;;  %v3912_v3 = vcombine.high %v3902_v26, %v3902_v26  ;;  %3924 = vst [vmem:[%s6257_s25 + $0x2b] sm:$0x1] %v3910_v24 }
 0xe12   : > { %5409 = vst.sshfl [vmem:[%s6257_s25 + $0x5b] sm:$0x1 pattern:$0x73625140] %v3881_v14  ;;  %4088 = vmatprep.mubr.bf16.mxu1 %v9483_v35  ;;  %4018 = vmatpush1.bf16.msra.mxu0 %v8595_v19  ;;  %v8640_v16 = vld [vmem:[%s9171_s1 + $0x6c] ss:$16 sps:$4 sm:$0xff]  }
 0xe13   : > { %4059 = vmatpush1.bf16.msra.mxu1 %v8601_v45  ;;  %v3913_v11 = vcombine.high %v3909_v40, %v3909_v40  ;;  %3925 = vst [vmem:[%s6257_s25 + $0x3b] sm:$0x1] %v3912_v3  ;;  %3928 = vst [vmem:[%s6257_s25 + $0x6b] sm:$0x1] %v3911_v41  ;;  %4019 = vmatprep.subr.bf16.mxu0 %v8609_v46  ;;  %v8658_v14 = vld [vmem:[%s9171_s1 + $0x84] ss:$16 sps:$4 sm:$0xff]  }
 0xe14   : > { %4060 = vmatprep.subr.bf16.mxu1 %v8615_v15  ;;  %v8664_v58 = vld [vmem:[%s9171_s1 + $0x8c] ss:$16 sps:$4 sm:$0xff]   ;;  %v8670_v26 = vld [vmem:[%s9171_s1 + $0x80] ss:$16 sps:$4 sm:$0xff]   ;;  %v8676_v24 = vld [vmem:[%s9171_s1 + $0x88] ss:$16 sps:$4 sm:$0xff]  }
 0xe15   : > { %3929 = vst [vmem:[%s6257_s25 + $0x7b] sm:$0x1] %v3913_v11  ;;  %v8682_v40 = vld [vmem:[%s9171_s1 + $0xa4] ss:$16 sps:$4 sm:$0xff]   ;;  %v8688_v41 = vld [vmem:[%s9171_s1 + $0xac] ss:$16 sps:$4 sm:$0xff]  }
 0xe16   : > { %4020 = vmatpush1.bf16.msra.mxu0 %v8622_v29  ;;  %9773 = vst [vmem:[#allocation24_spill] sm:$0xff] %v8682_v40  ;;  %9774 = vst [vmem:[#allocation25_spill] sm:$0xff] %v8688_v41  ;;  %v8694_v3 = vld [vmem:[%s9171_s1 + $0xa0] ss:$16 sps:$4 sm:$0xff]   ;;  %v8700_v11 = vld [vmem:[%s9171_s1 + $0xa8] ss:$16 sps:$4 sm:$0xff]  }
 0xe17   : > { %4061 = vmatpush1.bf16.msra.mxu1 %v8628_v17  ;;  %4021 = vmatprep.subr.bf16.mxu0 %v8634_v31  ;;  %9775 = vst [vmem:[#allocation26_spill] sm:$0xff] %v8694_v3  ;;  %9776 = vst [vmem:[#allocation27_spill] sm:$0xff] %v8700_v11 }
 0xe18   : > { %4062 = vmatprep.subr.bf16.mxu1 %v8640_v16 }
 0xe1a   : > { %4022 = vmatpush1.bf16.msra.mxu0 %v8646_v13 }
 0xe1b   : > { %4063 = vmatpush1.bf16.msra.mxu1 %v8652_v22  ;;  %4023 = vmatprep.subr.bf16.mxu0 %v8658_v14 }
 0xe1c   : > { %4064 = vmatprep.subr.bf16.mxu1 %v8664_v58 }
 0xe1e   : > { %4024 = vmatpush1.bf16.msra.mxu0 %v8670_v26 }
 0xe1f   : > { %4065 = vmatpush1.bf16.msra.mxu1 %v8676_v24  ;;  %4025 = vmatprep.subr.bf16.mxu0 %v8682_v40  ;;  %v8706_v40 = vld [vmem:[%s9171_s1 + $0xc4] ss:$16 sps:$4 sm:$0xff]  }
 0xe20   : > { %4066 = vmatprep.subr.bf16.mxu1 %v8688_v41  ;;  %9777 = vst [vmem:[#allocation28_spill] sm:$0xff] %v8706_v40  ;;  %v8712_v41 = vld [vmem:[%s9171_s1 + $0xcc] ss:$16 sps:$4 sm:$0xff]  }
 0xe21   : > { %9778 = vst [vmem:[#allocation29_spill] sm:$0xff] %v8712_v41 }
 0xe22   : > { %4026 = vmatpush1.bf16.msra.mxu0 %v8694_v3  ;;  %v8718_v3 = vld [vmem:[%s9171_s1 + $0xc0] ss:$16 sps:$4 sm:$0xff]  }
 0xe23   : > { %4067 = vmatpush1.bf16.msra.mxu1 %v8700_v11  ;;  %4027 = vmatprep.subr.bf16.mxu0 %v8706_v40  ;;  %9779 = vst [vmem:[#allocation30_spill] sm:$0xff] %v8718_v3  ;;  %v8724_v11 = vld [vmem:[%s9171_s1 + $0xc8] ss:$16 sps:$4 sm:$0xff]   ;;  %v8730_v40 = vld [vmem:[%s9171_s1 + $0xe4] ss:$16 sps:$4 sm:$0xff]  }
 0xe24   : > { %4068 = vmatprep.subr.bf16.mxu1 %v8712_v41  ;;  %9780 = vst [vmem:[#allocation31_spill] sm:$0xff] %v8724_v11  ;;  %9781 = vst [vmem:[#allocation32_spill] sm:$0xff] %v8730_v40  ;;  %v8736_v41 = vld [vmem:[%s9171_s1 + $0xec] ss:$16 sps:$4 sm:$0xff]  }
 0xe26   : > { %4028 = vmatpush1.bf16.msra.mxu0 %v8718_v3  ;;  %v8742_v3 = vld [vmem:[%s9171_s1 + $0xe0] ss:$16 sps:$4 sm:$0xff]  }
 0xe27   : > { %4069 = vmatpush1.bf16.msra.mxu1 %v8724_v11  ;;  %4029 = vmatprep.subr.bf16.mxu0 %v8730_v40  ;;  %v8748_v11 = vld [vmem:[%s9171_s1 + $0xe8] ss:$16 sps:$4 sm:$0xff]   ;;  %v5410_v40 = vld [vmem:[%s6255_s24 + $0x30] sm:$0xf] }
 0xe28   : > { %4070 = vmatprep.subr.bf16.mxu1 %v8736_v41 }
 0xe2a   : > { %4030 = vmatpush1.bf16.msra.mxu0 %v8742_v3 }
 0xe2b   : > { %4071 = vmatpush1.bf16.msra.mxu1 %v8748_v11  ;;  %4196 = vmatprep.subr.bf16.mxu0 %v8338_v53 }
 0xe2c   : > { %4237 = vmatprep.subr.bf16.mxu1 %v8344_v49 }
 0xe2d   : > { %4048 = vmatmul.mubr.bf16.vlgmr.msra.gmra.mrb[100].mxu0 %v5410_v40 }
 0xe2e   : > { %4089 = vmatmul.mubr.bf16.vlgmr.msra.gmra.mrb[100].mxu1 %v5410_v40  ;;  %4197 = vmatpush1.bf16.msra.mxu0 %v8350_v59  ;;  %v9782_v40 = vld [vmem:[#allocation22_spill] sm:$0xff] }
 0xe2f   : > { %4238 = vmatpush1.bf16.msra.mxu1 %v8356_v52  ;;  %4198 = vmatprep.subr.bf16.mxu0 %v8362_v48 }
 0xe30   : > { %4239 = vmatprep.subr.bf16.mxu1 %v8368_v7  ;;  %4228 = vmatprep.mubr.bf16.mxu0 %v9483_v35 }
 0xe31   : > { %4269 = vmatprep.mubr.bf16.mxu1 %v9483_v35 }
 0xe32   : > { %4199 = vmatpush1.bf16.msra.mxu0 %v8376_v50 }
 0xe33   : > { %4240 = vmatpush1.bf16.msra.mxu1 %v8382_v25  ;;  %4200 = vmatprep.subr.bf16.mxu0 %v8388_v56 }
 0xe34   : > { %4241 = vmatprep.subr.bf16.mxu1 %v8394_v28 }
 0xe36   : > { %4201 = vmatpush1.bf16.msra.mxu0 %v8400_v55 }
 0xe37   : > { %4242 = vmatpush1.bf16.msra.mxu1 %v8406_v8  ;;  %4202 = vmatprep.subr.bf16.mxu0 %v8412_v6 }
 0xe38   : > { %4243 = vmatprep.subr.bf16.mxu1 %v8418_v57 }
 0xe3a   : > { %4203 = vmatpush1.bf16.msra.mxu0 %v8424_v60 }
 0xe3b   : > { %4244 = vmatpush1.bf16.msra.mxu1 %v8430_v62  ;;  %4204 = vmatprep.subr.bf16.mxu0 %v8436_v51 }
 0xe3c   : > { %4245 = vmatprep.subr.bf16.mxu1 %v8442_v61 }
 0xe3e   : > { %4205 = vmatpush1.bf16.msra.mxu0 %v8448_v38 }
 0xe3f   : > { %4246 = vmatpush1.bf16.msra.mxu1 %v8454_v43  ;;  %4206 = vmatprep.subr.bf16.mxu0 %v8460_v9 }
 0xe40   : > { %4247 = vmatprep.subr.bf16.mxu1 %v8466_v4 }
 0xe42   : > { %4207 = vmatpush1.bf16.msra.mxu0 %v8472_v44  ;;  %v9783_v44 = vld [vmem:[#allocation23_spill] sm:$0xff] }
 0xe43   : > { %4248 = vmatpush1.bf16.msra.mxu1 %v8478_v63  ;;  %4208 = vmatprep.subr.bf16.mxu0 %v8484_v5 }
 0xe44   : > { %4249 = vmatprep.subr.bf16.mxu1 %v8490_v54 }
 0xe46   : > { %4209 = vmatpush1.bf16.msra.mxu0 %v8496_v1 }
 0xe47   : > { %4250 = vmatpush1.bf16.msra.mxu1 %v8502_v12  ;;  %4210 = vmatprep.subr.bf16.mxu0 %v8508_v30 }
 0xe48   : > { %4251 = vmatprep.subr.bf16.mxu1 %v8514_v39 }
 0xe4a   : > { %4211 = vmatpush1.bf16.msra.mxu0 %v8520_v36 }
 0xe4b   : > { %4252 = vmatpush1.bf16.msra.mxu1 %v8526_v10  ;;  %4278 = vmatprep.subr.bf16.mxu0 %v9782_v40 }
 0xe4c   : > { %4319 = vmatprep.subr.bf16.mxu1 %v9783_v44 }
 0xee0   : > { %v3967_v63 = vpop.f32.mrb[96].mxu0 }
 0xee1   : > { %v4008_v5 = vpop.f32.mrb[96].mxu1  ;;  %v3969_v4 = vpop.f32.mrb[97].mxu0 }
 0xee2   : > { %v4010_v54 = vpop.f32.mrb[97].mxu1  ;;  %v3971_v9 = vpop.f32.mrb[98].mxu0 }
 0xee3   : > { %v4012_v1 = vpop.f32.mrb[98].mxu1  ;;  %v3972_v43 = vpop.f32.mrb[99].mxu0 }
 0xee4   : > { %v4013_v12 = vpop.f32.mrb[99].mxu1 }
 0xf00   : > { %v4049_v38 = vpop.f32.mrb[100].mxu0 }
 0xf01   : > { %v4090_v30 = vpop.f32.mrb[100].mxu1  ;;  %v4050_v61 = vadd.f32 %v4049_v38, %v3967_v63  ;;  %v4051_v51 = vpop.f32.mrb[101].mxu0 }
 0xf02   : > { %v4091_v39 = vadd.f32 %v4090_v30, %v4008_v5  ;;  %v4092_v36 = vpop.f32.mrb[101].mxu1  ;;  %v4052_v62 = vadd.f32 %v4051_v51, %v3969_v4  ;;  %v4053_v60 = vpop.f32.mrb[102].mxu0 }
 0xf03   : > { %v4093_v10 = vadd.f32 %v4092_v36, %v4010_v54  ;;  %v4094_v40 = vpop.f32.mrb[102].mxu1  ;;  %v4097_v44 = vadd.f32 %v4050_v61, %v6694_v32  ;;  %v4054_v57 = vpop.f32.mrb[103].mxu0  ;;  %v3863_v54 = vsel %vm8087_vm0, %v8549_v0, %v7835_v47 }
 0xf04   : > { %v4095_v6 = vpop.f32.mrb[103].mxu1  ;;  %v4098_v8 = vadd.f32 %v4052_v62, %v6696_v21  ;;  %v4099_v43 = vadd.f32 %v4091_v39, %v6700_v34 }
 0xf05   : > { %v5411_v9 = vmul.f32 -1.442695, %v4097_v44  ;;  %v4100_v38 = vadd.f32 %v4093_v10, %v6702_v27 }
 0xf06   : > { %v5412_v1 = vmul.f32 -1.442695, %v4098_v8  ;;  %v5413_v63 = vmul.f32 -1.442695, %v4099_v43 }
 0xf07   : > { %5796 = vpow2.f32 %v5411_v9 }
 0xf08   : > { %5798 = vpow2.f32 %v5412_v1 }
 0xf09   : > { %5800 = vtanh.f32 %v4100_v38 }
 0xf0a   : > { %5802 = vpow2.f32 %v5413_v63 }
 0xf11   : > { %v5797_v5 = vpop.eup %5796 }
 0xf12   : > { %v4110_v51 = vadd.f32 1.0, %v5797_v5  ;;  %v5799_v60 = vpop.eup %5798 }
 0xf13   : > { %v4111_v61 = vadd.f32 1.0, %v5799_v60  ;;  %v5801_v6 = vpop.eup %5800 }
 0xf14   : > { %5804 = vrcp.f32 %v4110_v51  ;;  %v5803_v57 = vpop.eup %5802 }
 0xf15   : > { %5806 = vrcp.f32 %v4111_v61  ;;  %v4112_v44 = vadd.f32 1.0, %v5803_v57 }
 0xf17   : > { %5808 = vrcp.f32 %v4112_v44  ;;  %v9785_v44 = vld [vmem:[#allocation25_spill] sm:$0xff] }
 0xf1e   : > { %v5805_v62 = vpop.eup %5804 }
 0xf1f   : > { %v4121_v4 = vmul.f32 %v5805_v62, %v5801_v6  ;;  %v5807_v8 = vpop.eup %5806 }
 0xf20   : > { %v4120_v12 = vmul.f32 %v5807_v8, %v3863_v54  ;;  %v9784_v8 = vld [vmem:[#allocation24_spill] sm:$0xff]  ;;  %v9786_v54 = vld [vmem:[#allocation26_spill] sm:$0xff] }
 0xf21   : > { %v5809_v39 = vpop.eup %5808 }
 0xf22   : > { %v8796_v30 = vadd.f32 %v4121_v4, %v4120_v12  ;;  %v9787_v12 = vld [vmem:[#allocation27_spill] sm:$0xff] }
 0xf24   : > { %5810 = vtanh.f32 %v8796_v30 }
 0xf2e   : > { %v5811_v36 = vpop.eup %5810 }
 0xf2f   : > { %v4124_v10 = vmul.f32 %v5811_v36, %v5809_v39  ;;  %v9788_v39 = vld [vmem:[#allocation28_spill] sm:$0xff]  ;;  %v9789_v36 = vld [vmem:[#allocation29_spill] sm:$0xff] }
 0xf31   : > { %v4125_v40 = vsel %vm8087_vm0, %v4124_v10, %v7838_v33  ;;  %v9790_v10 = vld [vmem:[#allocation30_spill] sm:$0xff] }
 0xf32   : > { %v4128_v9 = vcombine.high %v4125_v40, %v4125_v40  ;;  %v4135_v1 = vrot.slane %v4125_v40, %v6709_v23  ;;  %v4195_v43 = vpack.c.bf16 %v4125_v40, %v4125_v40  ;;  %v9791_v40 = vld [vmem:[#allocation31_spill] sm:$0xff] }
 0xf34   : > { %v4142_v0 = vrot.slane %v4128_v9, %v6709_v23  ;;  %v4143_v38 = vcombine.high %v4135_v1, %v4135_v1  ;;  %v4151_v63 = vrot.slane %v4135_v1, %v6709_v23  ;;  %5414 = vst.sshfl [vmem:[%s6257_s25 + $0xc] sm:$0x1 pattern:$0x73625140] %v4135_v1  ;;  %4229 = vmatmul.mubr.bf16.vlgmr.msra.gmra.mrb[104].mxu0 %v4195_v43  ;;  %v9792_v9 = vld [vmem:[#allocation32_spill] sm:$0xff] }
 0xf35   : > { %4270 = vmatmul.mubr.bf16.vlgmr.msra.gmra.mrb[104].mxu1 %v4195_v43  ;;  %4279 = vmatpush1.bf16.msra.mxu0 %v8562_v18  ;;  %v5418_v1 = vld [vmem:[%s6255_s24 + $0x34] sm:$0xf]  ;;  %v9793_v43 = vld [vmem:[#allocation38_spill] sm:$0xff] }
 0xf36   : > { %4320 = vmatpush1.bf16.msra.mxu1 %v8568_v37  ;;  %v4144_v5 = vcombine.high %v4142_v0, %v4142_v0  ;;  %v4158_v51 = vrot.slane %v4142_v0, %v6709_v23  ;;  %v4165_v60 = vrot.slane %v4143_v38, %v6709_v23  ;;  %v4173_v61 = vcombine.high %v4151_v63, %v4151_v63  ;;  %v9796_v63 = vld [vmem:[#allocation43_spill] sm:$0xff] }
 0xf37   : > { %5415 = vst.sshfl [vmem:[%s6257_s25 + $0x1c] sm:$0x1 pattern:$0x73625140] %v4143_v38  ;;  %4280 = vmatprep.subr.bf16.mxu0 %v8578_v42  ;;  %4321 = vmatprep.subr.bf16.mxu1 %v8584_v20  ;;  %v9795_v38 = vld [vmem:[#allocation42_spill] sm:$0xff] }
 0xf38   : > { %5416 = vst.sshfl [vmem:[%s6257_s25 + $0x4c] sm:$0x1 pattern:$0x73625140] %v4142_v0  ;;  %4310 = vmatprep.mubr.bf16.mxu0 %v9483_v35  ;;  %v4172_v6 = vrot.slane %v4144_v5, %v6709_v23  ;;  %v4174_v57 = vcombine.high %v4158_v51, %v4158_v51  ;;  %v4175_v62 = vcombine.high %v4165_v60, %v4165_v60  ;;  %4187 = vst [vmem:[%s6257_s25 + $0x2c] sm:$0x1] %v4173_v61 }
 0xf39   : > { %5417 = vst.sshfl [vmem:[%s6257_s25 + $0x5c] sm:$0x1 pattern:$0x73625140] %v4144_v5  ;;  %4351 = vmatprep.mubr.bf16.mxu1 %v9483_v35  ;;  %4281 = vmatpush1.bf16.msra.mxu0 %v8595_v19  ;;  %v9794_v0 = vld [vmem:[#allocation39_spill] sm:$0xff]  ;;  %v9797_v5 = vld [vmem:[#allocation44_spill] sm:$0xff] }
 0xf3a   : > { %4322 = vmatpush1.bf16.msra.mxu1 %v8601_v45  ;;  %v4176_v4 = vcombine.high %v4172_v6, %v4172_v6  ;;  %4188 = vst [vmem:[%s6257_s25 + $0x3c] sm:$0x1] %v4175_v62  ;;  %4191 = vst [vmem:[%s6257_s25 + $0x6c] sm:$0x1] %v4174_v57  ;;  %4282 = vmatprep.subr.bf16.mxu0 %v8609_v46  ;;  %v9798_v51 = vld [vmem:[#allocation45_spill] sm:$0xff]  ;;  %v9799_v60 = vld [vmem:[#allocation46_spill] sm:$0xff] }
 0xf3b   : > { %4323 = vmatprep.subr.bf16.mxu1 %v8615_v15  ;;  %v9800_v61 = vld [vmem:[#allocation47_spill] sm:$0xff]  ;;  %v9801_v6 = vld [vmem:[#allocation40_spill] sm:$0xff]  ;;  %v9802_v57 = vld [vmem:[#allocation41_spill] sm:$0xff] }
 0xf3c   : > { %4192 = vst [vmem:[%s6257_s25 + $0x7c] sm:$0x1] %v4176_v4  ;;  %v9803_v62 = vld [vmem:[#allocation11_spill] sm:$0xff]  ;;  %v9804_v4 = vld [vmem:[#allocation12_spill] sm:$0xff] }
 0xf3d   : > { %4283 = vmatpush1.bf16.msra.mxu0 %v8622_v29 }
 0xf3e   : > { %4324 = vmatpush1.bf16.msra.mxu1 %v8628_v17  ;;  %4284 = vmatprep.subr.bf16.mxu0 %v8634_v31 }
 0xf3f   : > { %4325 = vmatprep.subr.bf16.mxu1 %v8640_v16 }
 0xf41   : > { %4285 = vmatpush1.bf16.msra.mxu0 %v8646_v13 }
 0xf42   : > { %4326 = vmatpush1.bf16.msra.mxu1 %v8652_v22  ;;  %4286 = vmatprep.subr.bf16.mxu0 %v8658_v14 }
 0xf43   : > { %4327 = vmatprep.subr.bf16.mxu1 %v8664_v58 }
 0xf45   : > { %4287 = vmatpush1.bf16.msra.mxu0 %v8670_v26 }
 0xf46   : > { %4328 = vmatpush1.bf16.msra.mxu1 %v8676_v24  ;;  %4288 = vmatprep.subr.bf16.mxu0 %v9784_v8 }
 0xf47   : > { %4329 = vmatprep.subr.bf16.mxu1 %v9785_v44 }
 0xf49   : > { %4289 = vmatpush1.bf16.msra.mxu0 %v9786_v54 }
 0xf4a   : > { %4330 = vmatpush1.bf16.msra.mxu1 %v9787_v12  ;;  %4290 = vmatprep.subr.bf16.mxu0 %v9788_v39 }
 0xf4b   : > { %4331 = vmatprep.subr.bf16.mxu1 %v9789_v36 }
 0xf4d   : > { %4291 = vmatpush1.bf16.msra.mxu0 %v9790_v10 }
 0xf4e   : > { %4332 = vmatpush1.bf16.msra.mxu1 %v9791_v40  ;;  %4292 = vmatprep.subr.bf16.mxu0 %v9792_v9 }
 0xf4f   : > { %4333 = vmatprep.subr.bf16.mxu1 %v8736_v41 }
 0xf51   : > { %4293 = vmatpush1.bf16.msra.mxu0 %v8742_v3 }
 0xf52   : > { %4334 = vmatpush1.bf16.msra.mxu1 %v8748_v11  ;;  %4459 = vmatprep.subr.bf16.mxu0 %v8338_v53 }
 0xf53   : > { %4500 = vmatprep.subr.bf16.mxu1 %v8344_v49 }
 0xf54   : > { %4311 = vmatmul.mubr.bf16.vlgmr.msra.gmra.mrb[108].mxu0 %v5418_v1 }
 0xf55   : > { %4352 = vmatmul.mubr.bf16.vlgmr.msra.gmra.mrb[108].mxu1 %v5418_v1  ;;  %4460 = vmatpush1.bf16.msra.mxu0 %v8350_v59  ;;  %v9805_v1 = vld [vmem:[#allocation13_spill] sm:$0xff] }
 0xf56   : > { %4501 = vmatpush1.bf16.msra.mxu1 %v8356_v52  ;;  %4461 = vmatprep.subr.bf16.mxu0 %v8362_v48 }
 0xf57   : > { %4502 = vmatprep.subr.bf16.mxu1 %v8368_v7  ;;  %4491 = vmatprep.mubr.bf16.mxu0 %v9483_v35 }
 0xf58   : > { %4532 = vmatprep.mubr.bf16.mxu1 %v9483_v35 }
 0xf59   : > { %4462 = vmatpush1.bf16.msra.mxu0 %v8376_v50 }
 0xf5a   : > { %4503 = vmatpush1.bf16.msra.mxu1 %v8382_v25  ;;  %4463 = vmatprep.subr.bf16.mxu0 %v8388_v56 }
 0xf5b   : > { %4504 = vmatprep.subr.bf16.mxu1 %v8394_v28 }
 0xf5d   : > { %4464 = vmatpush1.bf16.msra.mxu0 %v8400_v55 }
 0xf5e   : > { %4505 = vmatpush1.bf16.msra.mxu1 %v9793_v43  ;;  %4465 = vmatprep.subr.bf16.mxu0 %v9794_v0 }
 0xf5f   : > { %4506 = vmatprep.subr.bf16.mxu1 %v9795_v38  ;;  %v9806_v38 = vld [vmem:[#allocation14_spill] sm:$0xff] }
 0xf61   : > { %4466 = vmatpush1.bf16.msra.mxu0 %v9796_v63  ;;  %v9807_v63 = vld [vmem:[#allocation15_spill] sm:$0xff] }
 0xf62   : > { %4507 = vmatpush1.bf16.msra.mxu1 %v9797_v5  ;;  %4467 = vmatprep.subr.bf16.mxu0 %v9798_v51  ;;  %v9808_v5 = vld [vmem:[#allocation16_spill] sm:$0xff]  ;;  %v9809_v51 = vld [vmem:[#allocation17_spill] sm:$0xff] }
 0xf63   : > { %4508 = vmatprep.subr.bf16.mxu1 %v9799_v60  ;;  %v9810_v60 = vld [vmem:[#allocation18_spill] sm:$0xff] }
 0xf65   : > { %4468 = vmatpush1.bf16.msra.mxu0 %v9800_v61  ;;  %v9811_v61 = vld [vmem:[#allocation19_spill] sm:$0xff] }
 0xf66   : > { %4509 = vmatpush1.bf16.msra.mxu1 %v9801_v6  ;;  %4469 = vmatprep.subr.bf16.mxu0 %v9802_v57  ;;  %v9812_v6 = vld [vmem:[#allocation20_spill] sm:$0xff]  ;;  %v9813_v57 = vld [vmem:[#allocation21_spill] sm:$0xff] }
 0xf67   : > { %4510 = vmatprep.subr.bf16.mxu1 %v9803_v62  ;;  %v9814_v62 = vld [vmem:[#allocation22_spill] sm:$0xff] }
 0xf69   : > { %4470 = vmatpush1.bf16.msra.mxu0 %v9804_v4  ;;  %v9815_v4 = vld [vmem:[#allocation23_spill] sm:$0xff] }
 0xf6a   : > { %4511 = vmatpush1.bf16.msra.mxu1 %v9805_v1  ;;  %4471 = vmatprep.subr.bf16.mxu0 %v9806_v38 }
 0xf6b   : > { %4512 = vmatprep.subr.bf16.mxu1 %v9807_v63 }
 0xf6d   : > { %4472 = vmatpush1.bf16.msra.mxu0 %v9808_v5 }
 0xf6e   : > { %4513 = vmatpush1.bf16.msra.mxu1 %v9809_v51  ;;  %4473 = vmatprep.subr.bf16.mxu0 %v9810_v60 }
 0xf6f   : > { %4514 = vmatprep.subr.bf16.mxu1 %v9811_v61 }
 0xf71   : > { %4474 = vmatpush1.bf16.msra.mxu0 %v9812_v6 }
 0xf72   : > { %4515 = vmatpush1.bf16.msra.mxu1 %v9813_v57  ;;  %4541 = vmatprep.subr.bf16.mxu0 %v9814_v62 }
 0xf73   : > { %4582 = vmatprep.subr.bf16.mxu1 %v9815_v4 }
0x1007   : > { %v4230_v1 = vpop.f32.mrb[104].mxu0 }
0x1008   : > { %v4271_v38 = vpop.f32.mrb[104].mxu1  ;;  %v4232_v0 = vpop.f32.mrb[105].mxu0 }
0x1009   : > { %v4273_v63 = vpop.f32.mrb[105].mxu1  ;;  %v4234_v43 = vpop.f32.mrb[106].mxu0 }
0x100a   : > { %v4275_v5 = vpop.f32.mrb[106].mxu1  ;;  %v4235_v55 = vpop.f32.mrb[107].mxu0 }
0x100b   : > { %v4276_v51 = vpop.f32.mrb[107].mxu1 }
0x1027   : > { %v4312_v28 = vpop.f32.mrb[108].mxu0 }
0x1028   : > { %v4353_v60 = vpop.f32.mrb[108].mxu1  ;;  %v4313_v56 = vadd.f32 %v4312_v28, %v4230_v1  ;;  %v4314_v25 = vpop.f32.mrb[109].mxu0 }
0x1029   : > { %v4354_v61 = vadd.f32 %v4353_v60, %v4271_v38  ;;  %v4355_v6 = vpop.f32.mrb[109].mxu1  ;;  %v4315_v50 = vadd.f32 %v4314_v25, %v4232_v0  ;;  %v4316_v7 = vpop.f32.mrb[110].mxu0  ;;  %v4126_v60 = vsel %vm8087_vm0, %v8796_v30, %v7835_v47 }
0x102a   : > { %v4356_v57 = vadd.f32 %v4355_v6, %v4273_v63  ;;  %v4357_v62 = vpop.f32.mrb[110].mxu1  ;;  %v4360_v4 = vadd.f32 %v4313_v56, %v6694_v32  ;;  %v4317_v48 = vpop.f32.mrb[111].mxu0 }
0x102b   : > { %v4358_v52 = vpop.f32.mrb[111].mxu1  ;;  %v4361_v59 = vadd.f32 %v4315_v50, %v6696_v21  ;;  %v4362_v55 = vadd.f32 %v4354_v61, %v6700_v34 }
0x102c   : > { %v5419_v43 = vmul.f32 -1.442695, %v4360_v4  ;;  %v4363_v28 = vadd.f32 %v4356_v57, %v6702_v27 }
0x102d   : > { %v5420_v5 = vmul.f32 -1.442695, %v4361_v59  ;;  %v5421_v38 = vmul.f32 -1.442695, %v4362_v55 }
0x102e   : > { %5812 = vpow2.f32 %v5419_v43 }
0x102f   : > { %5814 = vpow2.f32 %v5420_v5 }
0x1030   : > { %5816 = vtanh.f32 %v4363_v28 }
0x1031   : > { %5818 = vpow2.f32 %v5421_v38 }
0x1038   : > { %v5813_v51 = vpop.eup %5812 }
0x1039   : > { %v4373_v25 = vadd.f32 1.0, %v5813_v51  ;;  %v5815_v7 = vpop.eup %5814 }
0x103a   : > { %v4374_v56 = vadd.f32 1.0, %v5815_v7  ;;  %v5817_v52 = vpop.eup %5816 }
0x103b   : > { %5820 = vrcp.f32 %v4373_v25  ;;  %v5819_v48 = vpop.eup %5818 }
0x103c   : > { %5822 = vrcp.f32 %v4374_v56  ;;  %v4375_v63 = vadd.f32 1.0, %v5819_v48 }
0x103e   : > { %5824 = vrcp.f32 %v4375_v63  ;;  %v9816_v63 = vld [vmem:[#allocation33_spill] sm:$0xff] }
0x1045   : > { %v5821_v50 = vpop.eup %5820 }
0x1046   : > { %v4384_v0 = vmul.f32 %v5821_v50, %v5817_v52  ;;  %v5823_v59 = vpop.eup %5822 }
0x1047   : > { %v4383_v61 = vmul.f32 %v5823_v59, %v4126_v60  ;;  %v5426_v59 = vld [vmem:[%s6255_s24 + $0x38] sm:$0xf] }
0x1048   : > { %v5825_v57 = vpop.eup %5824  ;;  %v9817_v60 = vld [vmem:[#allocation34_spill] sm:$0xff] }
0x1049   : > { %v8893_v6 = vadd.f32 %v4384_v0, %v4383_v61  ;;  %v9818_v61 = vld [vmem:[#allocation35_spill] sm:$0xff] }
0x104b   : > { %5826 = vtanh.f32 %v8893_v6 }
0x1055   : > { %v5827_v62 = vpop.eup %5826 }
0x1056   : > { %v4387_v4 = vmul.f32 %v5827_v62, %v5825_v57  ;;  %v9819_v57 = vld [vmem:[#allocation36_spill] sm:$0xff]  ;;  %v9820_v62 = vld [vmem:[#allocation37_spill] sm:$0xff] }
0x1058   : > { %v4388_v1 = vsel %vm8087_vm0, %v4387_v4, %v7838_v33  ;;  %v9821_v4 = vld [vmem:[#allocation48_spill] sm:$0xff] }
0x1059   : > { %v4391_v43 = vcombine.high %v4388_v1, %v4388_v1  ;;  %v4398_v5 = vrot.slane %v4388_v1, %v6709_v23  ;;  %v4458_v55 = vpack.c.bf16 %v4388_v1, %v4388_v1  ;;  %v9824_v1 = vld [vmem:[#allocation51_spill] sm:$0xff] }
0x105b   : > { %v4405_v30 = vrot.slane %v4391_v43, %v6709_v23  ;;  %v4406_v28 = vcombine.high %v4398_v5, %v4398_v5  ;;  %v4414_v38 = vrot.slane %v4398_v5, %v6709_v23  ;;  %5422 = vst.sshfl [vmem:[%s6257_s25 + $0xd] sm:$0x1 pattern:$0x73625140] %v4398_v5  ;;  %4492 = vmatmul.mubr.bf16.vlgmr.msra.gmra.mrb[112].mxu0 %v4458_v55  ;;  %v9825_v43 = vld [vmem:[#allocation38_spill] sm:$0xff]  ;;  %v9826_v5 = vld [vmem:[#allocation39_spill] sm:$0xff] }
0x105c   : > { %4533 = vmatmul.mubr.bf16.vlgmr.msra.gmra.mrb[112].mxu1 %v4458_v55  ;;  %4542 = vmatpush1.bf16.msra.mxu0 %v8562_v18  ;;  %v9827_v55 = vld [vmem:[#allocation42_spill] sm:$0xff] }
0x105d   : > { %4583 = vmatpush1.bf16.msra.mxu1 %v8568_v37  ;;  %v4407_v51 = vcombine.high %v4405_v30, %v4405_v30  ;;  %v4421_v25 = vrot.slane %v4405_v30, %v6709_v23  ;;  %v4428_v7 = vrot.slane %v4406_v28, %v6709_v23  ;;  %v4436_v56 = vcombine.high %v4414_v38, %v4414_v38  ;;  %v9830_v38 = vld [vmem:[#allocation45_spill] sm:$0xff] }
0x105e   : > { %5423 = vst.sshfl [vmem:[%s6257_s25 + $0x1d] sm:$0x1 pattern:$0x73625140] %v4406_v28  ;;  %4543 = vmatprep.subr.bf16.mxu0 %v8578_v42  ;;  %4584 = vmatprep.subr.bf16.mxu1 %v8584_v20  ;;  %v9829_v28 = vld [vmem:[#allocation44_spill] sm:$0xff] }
0x105f   : > { %5424 = vst.sshfl [vmem:[%s6257_s25 + $0x4d] sm:$0x1 pattern:$0x73625140] %v4405_v30  ;;  %4573 = vmatprep.mubr.bf16.mxu0 %v9483_v35  ;;  %v4435_v52 = vrot.slane %v4407_v51, %v6709_v23  ;;  %v4437_v48 = vcombine.high %v4421_v25, %v4421_v25  ;;  %v4438_v50 = vcombine.high %v4428_v7, %v4428_v7  ;;  %4450 = vst [vmem:[%s6257_s25 + $0x2d] sm:$0x1] %v4436_v56 }
0x1060   : > { %5425 = vst.sshfl [vmem:[%s6257_s25 + $0x5d] sm:$0x1 pattern:$0x73625140] %v4407_v51  ;;  %4614 = vmatprep.mubr.bf16.mxu1 %v9483_v35  ;;  %4544 = vmatpush1.bf16.msra.mxu0 %v8595_v19  ;;  %v9828_v30 = vld [vmem:[#allocation43_spill] sm:$0xff]  ;;  %v9831_v51 = vld [vmem:[#allocation46_spill] sm:$0xff] }
0x1061   : > { %4585 = vmatpush1.bf16.msra.mxu1 %v8601_v45  ;;  %v4439_v0 = vcombine.high %v4435_v52, %v4435_v52  ;;  %4451 = vst [vmem:[%s6257_s25 + $0x3d] sm:$0x1] %v4438_v50  ;;  %4454 = vst [vmem:[%s6257_s25 + $0x6d] sm:$0x1] %v4437_v48  ;;  %4545 = vmatprep.subr.bf16.mxu0 %v8609_v46  ;;  %v9832_v25 = vld [vmem:[#allocation47_spill] sm:$0xff]  ;;  %v9833_v7 = vld [vmem:[#allocation40_spill] sm:$0xff] }
0x1062   : > { %4586 = vmatprep.subr.bf16.mxu1 %v8615_v15  ;;  %v9834_v56 = vld [vmem:[#allocation41_spill] sm:$0xff]  ;;  %v9835_v52 = vld [vmem:[#allocation11_spill] sm:$0xff]  ;;  %v9836_v48 = vld [vmem:[#allocation12_spill] sm:$0xff] }
0x1063   : > { %4455 = vst [vmem:[%s6257_s25 + $0x7d] sm:$0x1] %v4439_v0  ;;  %v9837_v50 = vld [vmem:[#allocation13_spill] sm:$0xff]  ;;  %v9838_v0 = vld [vmem:[#allocation14_spill] sm:$0xff] }
0x1064   : > { %4546 = vmatpush1.bf16.msra.mxu0 %v8622_v29 }
0x1065   : > { %4587 = vmatpush1.bf16.msra.mxu1 %v8628_v17  ;;  %4547 = vmatprep.subr.bf16.mxu0 %v8634_v31 }
0x1066   : > { %4588 = vmatprep.subr.bf16.mxu1 %v8640_v16 }
0x1068   : > { %4548 = vmatpush1.bf16.msra.mxu0 %v8646_v13 }
0x1069   : > { %4589 = vmatpush1.bf16.msra.mxu1 %v8652_v22  ;;  %4549 = vmatprep.subr.bf16.mxu0 %v8658_v14 }
0x106a   : > { %4590 = vmatprep.subr.bf16.mxu1 %v8664_v58 }
0x106c   : > { %4550 = vmatpush1.bf16.msra.mxu0 %v8670_v26 }
0x106d   : > { %4591 = vmatpush1.bf16.msra.mxu1 %v8676_v24  ;;  %4551 = vmatprep.subr.bf16.mxu0 %v9784_v8 }
0x106e   : > { %4592 = vmatprep.subr.bf16.mxu1 %v9785_v44 }
0x1070   : > { %4552 = vmatpush1.bf16.msra.mxu0 %v9786_v54 }
0x1071   : > { %4593 = vmatpush1.bf16.msra.mxu1 %v9787_v12  ;;  %4553 = vmatprep.subr.bf16.mxu0 %v9788_v39 }
0x1072   : > { %4594 = vmatprep.subr.bf16.mxu1 %v9789_v36 }
0x1074   : > { %4554 = vmatpush1.bf16.msra.mxu0 %v9790_v10 }
0x1075   : > { %4595 = vmatpush1.bf16.msra.mxu1 %v9791_v40  ;;  %4555 = vmatprep.subr.bf16.mxu0 %v9792_v9 }
0x1076   : > { %4596 = vmatprep.subr.bf16.mxu1 %v8736_v41 }
0x1078   : > { %4556 = vmatpush1.bf16.msra.mxu0 %v8742_v3 }
0x1079   : > { %4597 = vmatpush1.bf16.msra.mxu1 %v8748_v11  ;;  %4722 = vmatprep.subr.bf16.mxu0 %v8338_v53  ;;  %v9822_v53 = vld [vmem:[#allocation49_spill] sm:$0xff] }
0x107a   : > { %4763 = vmatprep.subr.bf16.mxu1 %v8344_v49  ;;  %v9823_v49 = vld [vmem:[#allocation50_spill] sm:$0xff] }
0x107b   : > { %4574 = vmatmul.mubr.bf16.vlgmr.msra.gmra.mrb[116].mxu0 %v5426_v59 }
0x107c   : > { %4615 = vmatmul.mubr.bf16.vlgmr.msra.gmra.mrb[116].mxu1 %v5426_v59  ;;  %4723 = vmatpush1.bf16.msra.mxu0 %v9816_v63  ;;  %v9839_v59 = vld [vmem:[#allocation15_spill] sm:$0xff]  ;;  %v9840_v63 = vld [vmem:[#allocation16_spill] sm:$0xff] }
0x107d   : > { %4764 = vmatpush1.bf16.msra.mxu1 %v9817_v60  ;;  %4724 = vmatprep.subr.bf16.mxu0 %v9818_v61  ;;  %v9841_v60 = vld [vmem:[#allocation17_spill] sm:$0xff]  ;;  %v9842_v61 = vld [vmem:[#allocation18_spill] sm:$0xff] }
0x107e   : > { %4765 = vmatprep.subr.bf16.mxu1 %v9819_v57  ;;  %4754 = vmatprep.mubr.bf16.mxu0 %v9483_v35  ;;  %v9843_v57 = vld [vmem:[#allocation19_spill] sm:$0xff] }
0x107f   : > { %4795 = vmatprep.mubr.bf16.mxu1 %v9483_v35 }
0x1080   : > { %4725 = vmatpush1.bf16.msra.mxu0 %v9820_v62  ;;  %v9844_v62 = vld [vmem:[#allocation20_spill] sm:$0xff] }
0x1081   : > { %4766 = vmatpush1.bf16.msra.mxu1 %v9821_v4  ;;  %4726 = vmatprep.subr.bf16.mxu0 %v9822_v53  ;;  %v9845_v4 = vld [vmem:[#allocation21_spill] sm:$0xff]  ;;  %v9846_v53 = vld [vmem:[#allocation22_spill] sm:$0xff] }
0x1082   : > { %4767 = vmatprep.subr.bf16.mxu1 %v9823_v49  ;;  %v9847_v49 = vld [vmem:[#allocation23_spill] sm:$0xff] }
0x1084   : > { %4727 = vmatpush1.bf16.msra.mxu0 %v9824_v1 }
0x1085   : > { %4768 = vmatpush1.bf16.msra.mxu1 %v9825_v43  ;;  %4728 = vmatprep.subr.bf16.mxu0 %v9826_v5 }
0x1086   : > { %4769 = vmatprep.subr.bf16.mxu1 %v9827_v55 }
0x1088   : > { %4729 = vmatpush1.bf16.msra.mxu0 %v9828_v30 }
0x1089   : > { %4770 = vmatpush1.bf16.msra.mxu1 %v9829_v28  ;;  %4730 = vmatprep.subr.bf16.mxu0 %v9830_v38 }
0x108a   : > { %4771 = vmatprep.subr.bf16.mxu1 %v9831_v51 }
0x108c   : > { %4731 = vmatpush1.bf16.msra.mxu0 %v9832_v25 }
0x108d   : > { %4772 = vmatpush1.bf16.msra.mxu1 %v9833_v7  ;;  %4732 = vmatprep.subr.bf16.mxu0 %v9834_v56 }
0x108e   : > { %4773 = vmatprep.subr.bf16.mxu1 %v9835_v52 }
0x1090   : > { %4733 = vmatpush1.bf16.msra.mxu0 %v9836_v48 }
0x1091   : > { %4774 = vmatpush1.bf16.msra.mxu1 %v9837_v50  ;;  %4734 = vmatprep.subr.bf16.mxu0 %v9838_v0 }
0x1092   : > { %4775 = vmatprep.subr.bf16.mxu1 %v9839_v59 }
0x1094   : > { %4735 = vmatpush1.bf16.msra.mxu0 %v9840_v63 }
0x1095   : > { %4776 = vmatpush1.bf16.msra.mxu1 %v9841_v60  ;;  %4736 = vmatprep.subr.bf16.mxu0 %v9842_v61 }
0x1096   : > { %4777 = vmatprep.subr.bf16.mxu1 %v9843_v57 }
0x1098   : > { %4737 = vmatpush1.bf16.msra.mxu0 %v9844_v62 }
0x1099   : > { %4778 = vmatpush1.bf16.msra.mxu1 %v9845_v4  ;;  %4804 = vmatprep.subr.bf16.mxu0 %v9846_v53 }
0x109a   : > { %4845 = vmatprep.subr.bf16.mxu1 %v9847_v49 }
0x112e   : > { %v4493_v1 = vpop.f32.mrb[112].mxu0 }
0x112f   : > { %v4534_v43 = vpop.f32.mrb[112].mxu1  ;;  %v4495_v5 = vpop.f32.mrb[113].mxu0 }
0x1130   : > { %v4536_v55 = vpop.f32.mrb[113].mxu1  ;;  %v4497_v30 = vpop.f32.mrb[114].mxu0 }
0x1131   : > { %v4538_v28 = vpop.f32.mrb[114].mxu1  ;;  %v4498_v38 = vpop.f32.mrb[115].mxu0 }
0x1132   : > { %v4539_v51 = vpop.f32.mrb[115].mxu1 }
0x114e   : > { %v4575_v25 = vpop.f32.mrb[116].mxu0 }
0x114f   : > { %v4616_v7 = vpop.f32.mrb[116].mxu1  ;;  %v4576_v56 = vadd.f32 %v4575_v25, %v4493_v1  ;;  %v4577_v48 = vpop.f32.mrb[117].mxu0 }
0x1150   : > { %v4617_v52 = vadd.f32 %v4616_v7, %v4534_v43  ;;  %v4618_v50 = vpop.f32.mrb[117].mxu1  ;;  %v4578_v0 = vadd.f32 %v4577_v48, %v4495_v5  ;;  %v4579_v63 = vpop.f32.mrb[118].mxu0 }
0x1151   : > { %v4619_v59 = vadd.f32 %v4618_v50, %v4536_v55  ;;  %v4620_v60 = vpop.f32.mrb[118].mxu1  ;;  %v4623_v61 = vadd.f32 %v4576_v56, %v6694_v32  ;;  %v4580_v57 = vpop.f32.mrb[119].mxu0 }
0x1152   : > { %v4621_v62 = vpop.f32.mrb[119].mxu1  ;;  %v4624_v4 = vadd.f32 %v4578_v0, %v6696_v21  ;;  %v4625_v30 = vadd.f32 %v4617_v52, %v6700_v34  ;;  %v4389_v52 = vsel %vm8087_vm0, %v8893_v6, %v7835_v47 }
0x1153   : > { %v5427_v53 = vmul.f32 -1.442695, %v4623_v61  ;;  %v4626_v1 = vadd.f32 %v4619_v59, %v6702_v27 }
0x1154   : > { %v5428_v49 = vmul.f32 -1.442695, %v4624_v4  ;;  %v5429_v43 = vmul.f32 -1.442695, %v4625_v30 }
0x1155   : > { %5828 = vpow2.f32 %v5427_v53 }
0x1156   : > { %5830 = vpow2.f32 %v5428_v49 }
0x1157   : > { %5832 = vtanh.f32 %v4626_v1 }
0x1158   : > { %5834 = vpow2.f32 %v5429_v43 }
0x115f   : > { %v5829_v28 = vpop.eup %5828 }
0x1160   : > { %v4636_v5 = vadd.f32 1.0, %v5829_v28  ;;  %v5831_v55 = vpop.eup %5830 }
0x1161   : > { %v4637_v38 = vadd.f32 1.0, %v5831_v55  ;;  %v5833_v51 = vpop.eup %5832 }
0x1162   : > { %5836 = vrcp.f32 %v4636_v5  ;;  %v5835_v25 = vpop.eup %5834 }
0x1163   : > { %5838 = vrcp.f32 %v4637_v38  ;;  %v4638_v50 = vadd.f32 1.0, %v5835_v25 }
0x1165   : > { %5840 = vrcp.f32 %v4638_v50 }
0x116c   : > { %v5837_v7 = vpop.eup %5836 }
0x116d   : > { %v4647_v56 = vmul.f32 %v5837_v7, %v5833_v51  ;;  %v5839_v48 = vpop.eup %5838 }
0x116e   : > { %v4646_v0 = vmul.f32 %v5839_v48, %v4389_v52 }
0x116f   : > { %v5841_v63 = vpop.eup %5840 }
0x1170   : > { %v8990_v59 = vadd.f32 %v4647_v56, %v4646_v0 }
0x1172   : > { %5842 = vtanh.f32 %v8990_v59 }
0x117c   : > { %v5843_v60 = vpop.eup %5842 }
0x117d   : > { %v4650_v61 = vmul.f32 %v5843_v60, %v5841_v63 }
0x117f   : > { %v4651_v57 = vsel %vm8087_vm0, %v4650_v61, %v7838_v33 }
0x1180   : > { %v4654_v62 = vcombine.high %v4651_v57, %v4651_v57  ;;  %v4661_v4 = vrot.slane %v4651_v57, %v6709_v23  ;;  %v4721_v53 = vpack.c.bf16 %v4651_v57, %v4651_v57 }
0x1182   : > { %v4668_v6 = vrot.slane %v4654_v62, %v6709_v23  ;;  %v4669_v49 = vcombine.high %v4661_v4, %v4661_v4  ;;  %v4677_v30 = vrot.slane %v4661_v4, %v6709_v23  ;;  %5430 = vst.sshfl [vmem:[%s6257_s25 + $0xe] sm:$0x1 pattern:$0x73625140] %v4661_v4  ;;  %4755 = vmatmul.mubr.bf16.vlgmr.msra.gmra.mrb[120].mxu0 %v4721_v53 }
0x1183   : > { %4796 = vmatmul.mubr.bf16.vlgmr.msra.gmra.mrb[120].mxu1 %v4721_v53  ;;  %4805 = vmatpush1.bf16.msra.mxu0 %v8562_v18 }
0x1184   : > { %4846 = vmatpush1.bf16.msra.mxu1 %v8568_v37  ;;  %v4670_v1 = vcombine.high %v4668_v6, %v4668_v6  ;;  %v4684_v43 = vrot.slane %v4668_v6, %v6709_v23  ;;  %v4691_v28 = vrot.slane %v4669_v49, %v6709_v23  ;;  %v4699_v5 = vcombine.high %v4677_v30, %v4677_v30 }
0x1185   : > { %5431 = vst.sshfl [vmem:[%s6257_s25 + $0x1e] sm:$0x1 pattern:$0x73625140] %v4669_v49  ;;  %4806 = vmatprep.subr.bf16.mxu0 %v8578_v42  ;;  %4847 = vmatprep.subr.bf16.mxu1 %v8584_v20 }
0x1186   : > { %5432 = vst.sshfl [vmem:[%s6257_s25 + $0x4e] sm:$0x1 pattern:$0x73625140] %v4668_v6  ;;  %4836 = vmatprep.mubr.bf16.mxu0 %v9483_v35  ;;  %v4698_v18 = vrot.slane %v4670_v1, %v6709_v23  ;;  %v4700_v37 = vcombine.high %v4684_v43, %v4684_v43  ;;  %v4701_v55 = vcombine.high %v4691_v28, %v4691_v28  ;;  %4713 = vst [vmem:[%s6257_s25 + $0x2e] sm:$0x1] %v4699_v5 }
0x1187   : > { %5433 = vst.sshfl [vmem:[%s6257_s25 + $0x5e] sm:$0x1 pattern:$0x73625140] %v4670_v1  ;;  %4877 = vmatprep.mubr.bf16.mxu1 %v9483_v35  ;;  %4807 = vmatpush1.bf16.msra.mxu0 %v8595_v19  ;;  %v5434_v35 = vld [vmem:[%s6255_s24 + $0x3c] sm:$0xf] }
0x1188   : > { %4848 = vmatpush1.bf16.msra.mxu1 %v8601_v45  ;;  %v4702_v38 = vcombine.high %v4698_v18, %v4698_v18  ;;  %4714 = vst [vmem:[%s6257_s25 + $0x3e] sm:$0x1] %v4701_v55  ;;  %4717 = vst [vmem:[%s6257_s25 + $0x6e] sm:$0x1] %v4700_v37  ;;  %4808 = vmatprep.subr.bf16.mxu0 %v8609_v46  ;;  %v5060_v37 = vld [vmem:[%s6257_s25 + $0x10] sm:$0xff] (%p6236_p3) }
0x1189   : > { %4849 = vmatprep.subr.bf16.mxu1 %v8615_v15  ;;  %5061 = vst [vmem:[%s9077_s12 + $0x20] sm:$0xff] (%p6236_p3), %v5060_v37 }
0x118a   : > { %4718 = vst [vmem:[%s6257_s25 + $0x7e] sm:$0x1] %v4702_v38  ;;  %v5064_v38 = vld [vmem:[%s6257_s25 + $0x20] sm:$0xff] (%p6236_p3) }
0x118b   : > { %4809 = vmatpush1.bf16.msra.mxu0 %v8622_v29  ;;  %5065 = vst [vmem:[%s9077_s12 + $0x40] sm:$0xff] (%p6236_p3), %v5064_v38 }
0x118c   : > { %4850 = vmatpush1.bf16.msra.mxu1 %v8628_v17  ;;  %4810 = vmatprep.subr.bf16.mxu0 %v8634_v31 }
0x118d   : > { %4851 = vmatprep.subr.bf16.mxu1 %v8640_v16 }
0x118f   : > { %4811 = vmatpush1.bf16.msra.mxu0 %v8646_v13 }
0x1190   : > { %4852 = vmatpush1.bf16.msra.mxu1 %v8652_v22  ;;  %4812 = vmatprep.subr.bf16.mxu0 %v8658_v14 }
0x1191   : > { %4853 = vmatprep.subr.bf16.mxu1 %v8664_v58 }
0x1193   : > { %4813 = vmatpush1.bf16.msra.mxu0 %v8670_v26 }
0x1194   : > { %4854 = vmatpush1.bf16.msra.mxu1 %v8676_v24  ;;  %4814 = vmatprep.subr.bf16.mxu0 %v9784_v8 }
0x1195   : > { %4855 = vmatprep.subr.bf16.mxu1 %v9785_v44 }
0x1197   : > { %4815 = vmatpush1.bf16.msra.mxu0 %v9786_v54 }
0x1198   : > { %4856 = vmatpush1.bf16.msra.mxu1 %v9787_v12  ;;  %4816 = vmatprep.subr.bf16.mxu0 %v9788_v39 }
0x1199   : > { %4857 = vmatprep.subr.bf16.mxu1 %v9789_v36 }
0x119b   : > { %4817 = vmatpush1.bf16.msra.mxu0 %v9790_v10 }
0x119c   : > { %4858 = vmatpush1.bf16.msra.mxu1 %v9791_v40  ;;  %4818 = vmatprep.subr.bf16.mxu0 %v9792_v9 }
0x119d   : > { %4859 = vmatprep.subr.bf16.mxu1 %v8736_v41 }
0x119f   : > { %4819 = vmatpush1.bf16.msra.mxu0 %v8742_v3 }
0x11a0   : > { %4860 = vmatpush1.bf16.msra.mxu1 %v8748_v11 }
0x11a2   : > { %4837 = vmatmul.mubr.bf16.vlgmr.msra.gmra.mrb[124].mxu0 %v5434_v35 }
0x11a3   : > { %4878 = vmatmul.mubr.bf16.vlgmr.msra.gmra.mrb[124].mxu1 %v5434_v35 }
0x1255   : > { %v4756_v42 = vpop.f32.mrb[120].mxu0 }
0x1256   : > { %v4797_v20 = vpop.f32.mrb[120].mxu1  ;;  %v4758_v19 = vpop.f32.mrb[121].mxu0 }
0x1257   : > { %v4799_v45 = vpop.f32.mrb[121].mxu1  ;;  %v4760_v46 = vpop.f32.mrb[122].mxu0 }
0x1258   : > { %v4801_v15 = vpop.f32.mrb[122].mxu1  ;;  %v4761_v29 = vpop.f32.mrb[123].mxu0  ;;  %v5076_v46 = vld [vmem:[%s6257_s25 + $0x50] sm:$0xff] (%p6236_p3) }
0x1259   : > { %v4802_v17 = vpop.f32.mrb[123].mxu1  ;;  %5077 = vst [vmem:[%s9077_s12 + $0xa0] sm:$0xff] (%p6236_p3), %v5076_v46  ;;  %v5080_v29 = vld [vmem:[%s6257_s25 + $0x60] sm:$0xff] (%p6236_p3) }
0x125a   : > { %5081 = vst [vmem:[%s9077_s12 + $0xc0] sm:$0xff] (%p6236_p3), %v5080_v29 }
0x1275   : > { %v4838_v31 = vpop.f32.mrb[124].mxu0 }
0x1276   : > { %v4879_v16 = vpop.f32.mrb[124].mxu1  ;;  %v4839_v13 = vadd.f32 %v4838_v31, %v4756_v42  ;;  %v4840_v14 = vpop.f32.mrb[125].mxu0  ;;  %v5068_v42 = vld [vmem:[%s6257_s25 + $0x30] sm:$0xff] (%p6236_p3) }
0x1277   : > { %v4880_v22 = vadd.f32 %v4879_v16, %v4797_v20  ;;  %v4881_v58 = vpop.f32.mrb[125].mxu1  ;;  %v4841_v26 = vadd.f32 %v4840_v14, %v4758_v19  ;;  %v4842_v41 = vpop.f32.mrb[126].mxu0  ;;  %v5072_v19 = vld [vmem:[%s6257_s25 + $0x40] sm:$0xff] (%p6236_p3)  ;;  %5069 = vst [vmem:[%s9077_s12 + $0x60] sm:$0xff] (%p6236_p3), %v5068_v42  ;;  %v5084_v31 = vld [vmem:[%s6257_s25 + $0x70] sm:$0xff] (%p6236_p3) }
0x1278   : > { %v4882_v24 = vadd.f32 %v4881_v58, %v4799_v45  ;;  %v4883_v3 = vpop.f32.mrb[126].mxu1  ;;  %v4886_v11 = vadd.f32 %v4839_v13, %v6694_v32  ;;  %v4843_v8 = vpop.f32.mrb[127].mxu0  ;;  %5073 = vst [vmem:[%s9077_s12 + $0x80] sm:$0xff] (%p6236_p3), %v5072_v19  ;;  %5085 = vst [vmem:[%s9077_s12 + $0xe0] sm:$0xff] (%p6236_p3), %v5084_v31 }
0x1279   : > { %v4884_v44 = vpop.f32.mrb[127].mxu1  ;;  %v4887_v54 = vadd.f32 %v4841_v26, %v6696_v21  ;;  %v4888_v36 = vadd.f32 %v4880_v22, %v6700_v34  ;;  %v4652_v34 = vsel %vm8087_vm0, %v8990_v59, %v7835_v47 }
0x127a   : > { %v5435_v12 = vmul.f32 -1.442695, %v4886_v11  ;;  %v4889_v10 = vadd.f32 %v4882_v24, %v6702_v27 }
0x127b   : > { %v5436_v39 = vmul.f32 -1.442695, %v4887_v54  ;;  %v5437_v40 = vmul.f32 -1.442695, %v4888_v36 }
0x127c   : > { %5844 = vpow2.f32 %v5435_v12 }
0x127d   : > { %5846 = vpow2.f32 %v5436_v39 }
0x127e   : > { %5848 = vtanh.f32 %v4889_v10 }
0x127f   : > { %5850 = vpow2.f32 %v5437_v40 }
0x1286   : > { %v5845_v9 = vpop.eup %5844 }
0x1287   : > { %v4899_v51 = vadd.f32 1.0, %v5845_v9  ;;  %v5847_v25 = vpop.eup %5846 }
0x1288   : > { %v4900_v32 = vadd.f32 1.0, %v5847_v25  ;;  %v5849_v7 = vpop.eup %5848 }
0x1289   : > { %5852 = vrcp.f32 %v4899_v51  ;;  %v5851_v56 = vpop.eup %5850 }
0x128a   : > { %5854 = vrcp.f32 %v4900_v32  ;;  %v4901_v52 = vadd.f32 1.0, %v5851_v56 }
0x128c   : > { %5856 = vrcp.f32 %v4901_v52 }
0x1293   : > { %v5853_v21 = vpop.eup %5852 }
0x1294   : > { %v4910_v48 = vmul.f32 %v5853_v21, %v5849_v7  ;;  %v5855_v50 = vpop.eup %5854 }
0x1295   : > { %v4909_v27 = vmul.f32 %v5855_v50, %v4652_v34 }
0x1296   : > { %v5857_v60 = vpop.eup %5856 }
0x1297   : > { %v4911_v0 = vadd.f32 %v4910_v48, %v4909_v27 }
0x1299   : > { %5858 = vtanh.f32 %v4911_v0  ;;  %v4915_v63 = vsel %vm8087_vm0, %v4911_v0, %v7835_v47 }
0x129a   : > { %4983 = vst [vmem:[#allocation3] sm:$0xff] %v4915_v63  ;;  %4985 = vst [vmem:[#allocation7] sm:$0xff] %v4915_v63 }
0x12a3   : > { %v5859_v61 = vpop.eup %5858 }
0x12a4   : > { %v4913_v57 = vmul.f32 %v5859_v61, %v5857_v60 }
0x12a6   : > { %v4914_v59 = vsel %vm8087_vm0, %v4913_v57, %v7838_v33 }
0x12a7   : > { %v4917_v62 = vcombine.high %v4914_v59, %v4914_v59  ;;  %v4924_v4 = vrot.slane %v4914_v59, %v6709_v23  ;;  %4982 = vst [vmem:[#allocation2] sm:$0xff] %v4914_v59  ;;  %4984 = vst [vmem:[#allocation5] sm:$0xff] %v4914_v59 }
0x12a9   : > { %v4931_v47 = vrot.slane %v4917_v62, %v6709_v23  ;;  %v4932_v53 = vcombine.high %v4924_v4, %v4924_v4  ;;  %v4940_v6 = vrot.slane %v4924_v4, %v6709_v23  ;;  %5438 = vst.sshfl [vmem:[%s6257_s25 + $0xf] sm:$0x1 pattern:$0x73625140] %v4924_v4 }
0x12ab   : > { %v4933_v49 = vcombine.high %v4931_v47, %v4931_v47  ;;  %v4947_v2 = vrot.slane %v4931_v47, %v6709_v23  ;;  %v4954_v33 = vrot.slane %v4932_v53, %v6709_v23  ;;  %v4962_v30 = vcombine.high %v4940_v6, %v4940_v6  ;;  %5439 = vst.sshfl [vmem:[%s6257_s25 + $0x1f] sm:$0x1 pattern:$0x73625140] %v4932_v53  ;;  %4992 = sbr.rel (!%p6236_p3) target bundleno = 4794 (0x12ba), region = 52 }
0x12ac   : > { %5440 = vst.sshfl [vmem:[%s6257_s25 + $0x4f] sm:$0x1 pattern:$0x73625140] %v4931_v47 }
0x12ad   : > { %v4961_v1 = vrot.slane %v4933_v49, %v6709_v23  ;;  %v4963_v43 = vcombine.high %v4947_v2, %v4947_v2  ;;  %v4964_v28 = vcombine.high %v4954_v33, %v4954_v33  ;;  %4976 = vst [vmem:[%s6257_s25 + $0x2f] sm:$0x1] %v4962_v30  ;;  %5441 = vst.sshfl [vmem:[%s6257_s25 + $0x5f] sm:$0x1 pattern:$0x73625140] %v4933_v49 }
0x12ae   : > { %v5056_v23 = vld [vmem:[%s6257_s25] sm:$0xff] (%p6236_p3) }
0x12af   : > { %v4965_v5 = vcombine.high %v4961_v1, %v4961_v1  ;;  %4977 = vst [vmem:[%s6257_s25 + $0x3f] sm:$0x1] %v4964_v28  ;;  %4980 = vst [vmem:[%s6257_s25 + $0x6f] sm:$0x1] %v4963_v43 }
0x12b0   : > { %v5058_v18 = vld [vmem:[%s6257_s25 + $0x8] sm:$0xff] (%p6236_p3)  ;;  %5057 = vst [vmem:[%s9077_s12] sm:$0xff] (%p6236_p3), %v5056_v23 }
0x12b1   : > { %4981 = vst [vmem:[%s6257_s25 + $0x7f] sm:$0x1] %v4965_v5  ;;  %5059 = vst [vmem:[%s9077_s12 + $0x8] sm:$0xff] (%p6236_p3), %v5058_v18 }
0x12b2   : > { %v5062_v55 = vld [vmem:[%s6257_s25 + $0x18] sm:$0xff] }
0x12b3   : > { %5063 = vst [vmem:[%s9077_s12 + $0x28] sm:$0xff] %v5062_v55  ;;  %v5074_v45 = vld [vmem:[%s6257_s25 + $0x48] sm:$0xff] }
0x12b4   : > { %v5066_v35 = vld [vmem:[%s6257_s25 + $0x28] sm:$0xff]  ;;  %v5078_v15 = vld [vmem:[%s6257_s25 + $0x58] sm:$0xff]  ;;  %5075 = vst [vmem:[%s9077_s12 + $0x88] sm:$0xff] %v5074_v45 }
0x12b5   : > { %5067 = vst [vmem:[%s9077_s12 + $0x48] sm:$0xff] %v5066_v35  ;;  %5079 = vst [vmem:[%s9077_s12 + $0xa8] sm:$0xff] %v5078_v15 }
0x12b6   : > { %v5070_v20 = vld [vmem:[%s6257_s25 + $0x38] sm:$0xff]  ;;  %v5082_v17 = vld [vmem:[%s6257_s25 + $0x68] sm:$0xff] }
0x12b7   : > { %5071 = vst [vmem:[%s9077_s12 + $0x68] sm:$0xff] %v5070_v20  ;;  %5083 = vst [vmem:[%s9077_s12 + $0xc8] sm:$0xff] %v5082_v17 }
0x12b8   : > { %v5086_v16 = vld [vmem:[%s6257_s25 + $0x78] sm:$0xff] }
0x12b9   : > { %5087 = vst [vmem:[%s9077_s12 + $0xe8] sm:$0xff] %v5086_v16 }
0x12ba PF: > { %s6154_s14 = smov [#allocation5]   ;;  %s6155_s15 = smov [#allocation7]  }
0x12bb   : > { %s5100_s18 = sshll.u32 %s6154_s14, 4  ;;  %s5113_s17 = sshll.u32 %s6155_s15, 4  ;;  %s5101_s18 = int_to_ptr.vmem [resolvable:$true] %s5100_s18  ;;  %s5114_s17 = int_to_ptr.vmem [resolvable:$true] %s5113_s17 }
0x12bc   : > { %s6052_s29 = scalar_lea.vmem %s5101_s18, 128  ;;  %p6059_p0 = scmp.lt.s32.totalorder %s5101_s18, %s5101_s18 }
0x12bd   : > { %p6053_p11 = scmp.ne.s32.totalorder %s5101_s18, %s6052_s29  ;;  %p6060_p1 = scmp.lt.s32.totalorder %s6052_s29, %s6052_s29 }
0x12bf   : > { %p6054_p12 = pnand %p6053_p11, %p6228_p2  ;;  %p6061_p3 = por %p6060_p1, %p6059_p0 }
0x12c1   : > { %p6055_p13 = pneg %p6054_p12 }
0x12c3   : > { %p6062_p4 = pnand %p6061_p3, %p6055_p13 }
0x12c5   : > { %6065 = shalt.err (!%p6062_p4)
}
0x12c6   : > { %s6066_s20 = scalar_lea.hbm %s9177_s7, 128 }
0x12c7   : > { %p6067_p5 = scmp.ne.s32.totalorder %s9177_s7, %s6066_s20  ;;  %p6072_p8 = scmp.lt.u32.totalorder %s6066_s20, %s9177_s7 }
0x12c9   : > { %p6068_p6 = pnand %p6067_p5, %p6228_p2 }
0x12cb   : > { %p6069_p7 = pneg %p6068_p6 }
0x12cd   : > { %p6074_p9 = pnand %p6072_p8, %p6069_p7 }
0x12cf   : > { %6077 = shalt.err (!%p6074_p9)
}
0x12d0   : > { %5453 = dma.vmem_to_hbm [thread:$0]  (%p6228_p2), %s5101_s18, 128, %s9177_s7, [#allocation6]  }
0x12d1   : > { %s6078_s10 = scalar_lea.vmem %s5114_s17, 128  ;;  %p6085_p13 = scmp.lt.s32.totalorder %s5114_s17, %s5114_s17 }
0x12d2   : > { %p6079_p10 = scmp.ne.s32.totalorder %s5114_s17, %s6078_s10  ;;  %p6086_p0 = scmp.lt.s32.totalorder %s6078_s10, %s6078_s10 }
0x12d4   : > { %p6080_p11 = pnand %p6079_p10, %p6228_p2  ;;  %p6087_p1 = por %p6086_p0, %p6085_p13 }
0x12d6   : > { %p6081_p12 = pneg %p6080_p11 }
0x12d8   : > { %p6088_p3 = pnand %p6087_p1, %p6081_p12 }
0x12da   : > { %6091 = shalt.err (!%p6088_p3)
}
0x12db   : > { %s6092_s15 = scalar_lea.hbm %s9178_s8, 128 }
0x12dc   : > { %p6093_p4 = scmp.ne.s32.totalorder %s9178_s8, %s6092_s15  ;;  %p6098_p7 = scmp.lt.u32.totalorder %s6092_s15, %s9178_s8 }
0x12de   : > { %p6094_p5 = pnand %p6093_p4, %p6228_p2 }
0x12e0   : > { %p6095_p6 = pneg %p6094_p5 }
0x12e2   : > { %p6100_p8 = pnand %p6098_p7, %p6095_p6 }
0x12e4   : > { %6103 = shalt.err (!%p6100_p8)
}
0x12e5   : > { %5455 = dma.vmem_to_hbm [thread:$0]  (%p6228_p2), %s5114_s17, 128, %s9178_s8, [#allocation8]  }
0x12e6   : > { %6125 = dma.done.wait (%p6228_p2), [#allocation6], 128  }
0x12e7   : > { %6127 = vsyncadd (%p6228_p2), [#allocation6], 4294967168 }
0x12e8   : > { %6129 = dma.done.wait (%p6228_p2), [#allocation8], 128  }
0x12e9   : > { %6131 = vsyncadd (%p6228_p2), [#allocation8], 4294967168 }
0x12ea PF: > { %s21_s9 = sadd.s32 1, %s6150_s9   ;;  %s9848_s27 = smov %s6138_s28 }
0x12eb   : > { %p18_p9 = scmp.ge.s32.totalorder %s21_s9, 4   ;;  %s9849_s28 = smov %s6245_s16 }
0x12ec   : > { %s9850_s29 = smov %s6146_s30  ;;  %s9851_s30 = smov %s9853_s11 }
0x12ed   :  { %20 = sbr.rel (!%p18_p9) target bundleno = 4 (0x4), region = 156 }
0x12f4   :  { %5137 = vsyncpa [#allocation6], 1 }
0x12f5   :  { %5139 = vsyncpa [#allocation6 + $0x1], 1 }
0x12f6   :  { %5140 = vsyncpa [#allocation8], 1 }

</bundles_post_ra>
